<compile_context>
chip_gen: v5e
topology: v5e:2x2
jax: 0.10.0
libtpu: 0.0.40
codegen_flags: <defaults>
</compile_context>

<pallas_src>
import jax
import jax.numpy as jnp
import numpy as np
from jax import lax
from jax.experimental import pallas as pl
from jax.experimental.pallas import tpu as pltpu

LEAKY_SLOPE = 0.01          # torch.nn.LeakyReLU default
H, W = 150, 142             # (H/2)*(W/2) = 75*71 = 5325 = Linear input size
HO, WO = H // 2, W // 2     # pooled spatial map
VMEM_LIMIT = 32 * 1024 * 1024


def _leaky(x):
    return jnp.where(x > 0, x, LEAKY_SLOPE * x)


def _fused_kernel(x_ref, w1_ref, b1_ref, w2_ref, b2_ref, w3_ref, b3_ref,
                  wexp_ref, bfc_ref, o_ref,
                  xpad, y1pad, y2pad, fc_acc):
    # ---- zero-init padded scratch (borders must be zero) and the fc accumulator ----
    xpad[...] = jnp.zeros(xpad.shape, xpad.dtype)
    y1pad[...] = jnp.zeros(y1pad.shape, y1pad.dtype)
    y2pad[...] = jnp.zeros(y2pad.shape, y2pad.dtype)
    fc_acc[...] = jnp.zeros(fc_acc.shape, fc_acc.dtype)

    # place this image into the padded scratch (pad=3 for the 7x7 conv)
    xpad[pl.ds(3, H), pl.ds(3, W)] = x_ref[0]

    # ---- conv1: 7x7, 1 -> 16. Full im2col matmul (16,49) @ (49,W) per output row ----
    def c1_body(h, carry):
        parts = []
        for kh in range(7):
            r = xpad[pl.ds(h + kh, 1), :]                 # (1, W+6)
            for kw in range(7):
                parts.append(r[:, kw:kw + W])             # (1, W)
        col = jnp.concatenate(parts, axis=0)              # (49, W)
        acc = jnp.dot(w1_ref[...], col,
                      preferred_element_type=jnp.float32)  # (16, W)
        y = _leaky(acc + b1_ref[...])
        y1pad[h + 2, :, pl.ds(2, W)] = y                  # interior of (H+4, 16, W+4)
        return carry

    lax.fori_loop(0, H, c1_body, 0)

    # ---- conv2: 5x5, 16 -> 32. kw and Cin folded into the contraction (K=80) ----
    def c2_body(h, carry):
        acc = jnp.zeros((32, W), jnp.float32)
        for kh in range(5):
            row = y1pad[h + kh]                           # (16, W+4)
            slab = jnp.concatenate([row[:, kw:kw + W] for kw in range(5)],
                                   axis=0)                # (80, W), index = kw*16+ci
            acc = acc + jnp.dot(w2_ref[kh], slab,
                                preferred_element_type=jnp.float32)
        y = _leaky(acc + b2_ref[...])
        y2pad[h + 1, :, pl.ds(1, W)] = y                  # interior of (H+2, 32, W+2)
        return carry

    lax.fori_loop(0, H, c2_body, 0)

    # ---- conv3 (3x3, 32->64) fused with 2x2 maxpool and Linear(5325,1) ----
    def c3_body(i, carry):
        z = []
        for r in range(2):                                # the two rows of this pool pair
            h = 2 * i + r
            acc = jnp.zeros((64, W), jnp.float32)
            for kh in range(3):
                row = y2pad[h + kh]                       # (32, W+2)
                slab = jnp.concatenate([row[:, kw:kw + W] for kw in range(3)],
                                       axis=0)            # (96, W), index = kw*32+ci
                acc = acc + jnp.dot(w3_ref[kh], slab,
                                    preferred_element_type=jnp.float32)
            z.append(_leaky(acc + b3_ref[...]))           # (64, W)
        m = jnp.maximum(z[0], z[1])                       # row-pair max       (64, W)
        cm = jnp.maximum(m[:, :W - 1], m[:, 1:])          # col-pair max       (64, W-1)
        # wexp row i carries wfc[i, j] at even column 2j and zeros at odd columns, so
        # the weighted sum over cm equals the sum over the 2x2-pooled map * wfc.
        wrow = wexp_ref[pl.ds(i, 1), :]                   # (1, W-1)
        fc_acc[...] += jnp.sum(cm * wrow, axis=1, keepdims=True)   # (64, 1)
        return carry

    lax.fori_loop(0, HO, c3_body, 0)

    o_ref[0] = _leaky(fc_acc[...] + bfc_ref[...])         # (64, 1)


@jax.jit
def fourier_conv_forward(x_nchw, params):
    B = x_nchw.shape[0]
    x2d = x_nchw.astype(jnp.float32).reshape(B, H, W)     # (B,1,H,W) -> (B,H,W)

    w1 = params["w1"].astype(jnp.float32)                 # (7,7,1,16)  HWIO
    w2 = params["w2"].astype(jnp.float32)                 # (5,5,16,32)
    w3 = params["w3"].astype(jnp.float32)                 # (3,3,32,64)

    # reshape weights for in-kernel matmuls: (Cout, kh*kw) / (kh, Cout, kw*Cin)
    w1r = jnp.transpose(w1[:, :, 0, :], (2, 0, 1)).reshape(16, 49)
    w2r = jnp.transpose(w2, (0, 3, 1, 2)).reshape(5, 32, 5 * 16)
    w3r = jnp.transpose(w3, (0, 3, 1, 2)).reshape(3, 64, 3 * 32)
    b1 = params["b1"].astype(jnp.float32).reshape(16, 1)
    b2 = params["b2"].astype(jnp.float32).reshape(32, 1)
    b3 = params["b3"].astype(jnp.float32).reshape(64, 1)
    bfc = params["bfc"].astype(jnp.float32).reshape(1, 1)

    # expanded fc weights: wfc[i, j] at even column 2j of a width-(W-1) row, zeros at odd
    wfc = params["wfc"].astype(jnp.float32)                # (75, 71)
    wexp = jnp.zeros((HO, W), jnp.float32).at[:, 0::2].set(wfc)[:, :W - 1]   # (75, 141)

    out = pl.pallas_call(
        _fused_kernel,
        out_shape=jax.ShapeDtypeStruct((B, 64, 1), jnp.float32),
        grid=(B,),
        in_specs=[
            pl.BlockSpec((1, H, W), lambda b: (b, 0, 0)),
            pl.BlockSpec((16, 49), lambda b: (0, 0)),
            pl.BlockSpec((16, 1), lambda b: (0, 0)),
            pl.BlockSpec((5, 32, 80), lambda b: (0, 0, 0)),
            pl.BlockSpec((32, 1), lambda b: (0, 0)),
            pl.BlockSpec((3, 64, 96), lambda b: (0, 0, 0)),
            pl.BlockSpec((64, 1), lambda b: (0, 0)),
            pl.BlockSpec((HO, W - 1), lambda b: (0, 0)),
            pl.BlockSpec((1, 1), lambda b: (0, 0)),
        ],
        out_specs=pl.BlockSpec((1, 64, 1), lambda b: (b, 0, 0)),
        scratch_shapes=[
            pltpu.VMEM((H + 6, W + 6), jnp.float32),        # padded input
            pltpu.VMEM((H + 4, 16, W + 4), jnp.float32),    # conv1 out (padded for conv2)
            pltpu.VMEM((H + 2, 32, W + 2), jnp.float32),    # conv2 out (padded for conv3)
            pltpu.VMEM((64, 1), jnp.float32),               # fc accumulator
        ],
        compiler_params=pltpu.CompilerParams(
            dimension_semantics=("parallel",),              # B>=2 uses both v7x TCs
            vmem_limit_bytes=VMEM_LIMIT),
    )(x2d, w1r, b1, w2r, b2, w3r, b3, wexp, bfc)
    return out.reshape(B, 64)


def reference_forward(x_nchw, params):
    """Pure-JAX reference mirroring the PyTorch forward (validation only)."""
    x = jnp.transpose(x_nchw, (0, 2, 3, 1)).astype(jnp.float32)

    def conv(x, w, b, pad):
        y = lax.conv_general_dilated(
            x, w, window_strides=(1, 1), padding=[(pad, pad), (pad, pad)],
            dimension_numbers=("NHWC", "HWIO", "NHWC"))
        return _leaky(y + b.reshape(1, 1, 1, -1))

    x = conv(x, params["w1"], params["b1"], 3)
    x = conv(x, params["w2"], params["b2"], 2)
    x = conv(x, params["w3"], params["b3"], 1)
    x = lax.reduce_window(x, -jnp.inf, lax.max, (1, 2, 2, 1), (1, 2, 2, 1), "VALID")
    s = jnp.einsum("bhwc,hw->bc", x, params["wfc"]) + params["bfc"]
    return _leaky(s)


if __name__ == "__main__":
    key = jax.random.PRNGKey(0)
    k = jax.random.split(key, 10)
    B = 2
    x = jax.random.normal(k[0], (B, 1, H, W), jnp.float32)
    params = {
        "w1": jax.random.normal(k[1], (7, 7, 1, 16), jnp.float32) * 0.14,
        "b1": jax.random.normal(k[2], (16,), jnp.float32) * 0.05,
        "w2": jax.random.normal(k[3], (5, 5, 16, 32), jnp.float32) * 0.05,
        "b2": jax.random.normal(k[4], (32,), jnp.float32) * 0.05,
        "w3": jax.random.normal(k[5], (3, 3, 32, 64), jnp.float32) * 0.06,
        "b3": jax.random.normal(k[6], (64,), jnp.float32) * 0.05,
        "wfc": jax.random.normal(k[7], (75, 71), jnp.float32) * 0.0137,
        "bfc": jax.random.normal(k[8], (), jnp.float32) * 0.05,
    }

    out = jax.block_until_ready(fourier_conv_forward(x, params))
    assert out.shape == (B, 64), out.shape

    ref = jax.block_until_ready(reference_forward(x, params))
    err = float(np.max(np.abs(np.asarray(out) - np.asarray(ref))))
    assert np.allclose(np.asarray(out), np.asarray(ref), rtol=2e-3, atol=2e-3), err

    print("KERNEL_OK")
</pallas_src>

<mosaic_0001>
module attributes {stable_mosaic.version = 11 : i64} {
  func.func @_fused_kernel(%arg0: i32, %arg1: memref<1x150x142xf32, #tpu.memory_space<vmem>>, %arg2: memref<16x49xf32, #tpu.memory_space<vmem>>, %arg3: memref<16x1xf32, #tpu.memory_space<vmem>>, %arg4: memref<5x32x80xf32, #tpu.memory_space<vmem>>, %arg5: memref<32x1xf32, #tpu.memory_space<vmem>>, %arg6: memref<3x64x96xf32, #tpu.memory_space<vmem>>, %arg7: memref<64x1xf32, #tpu.memory_space<vmem>>, %arg8: memref<75x141xf32, #tpu.memory_space<vmem>>, %arg9: memref<1x1xf32, #tpu.memory_space<vmem>>, %arg10: memref<1x64x1xf32, #tpu.memory_space<vmem>>, %arg11: memref<156x148xf32, #tpu.memory_space<vmem>>, %arg12: memref<154x16x146xf32, #tpu.memory_space<vmem>>, %arg13: memref<152x32x144xf32, #tpu.memory_space<vmem>>, %arg14: memref<64x1xf32, #tpu.memory_space<vmem>>) attributes {dimension_semantics = [#tpu.dimension_semantics<parallel>], iteration_bounds = array<i64: 2>, scalar_prefetch = 0 : i64, scratch_operands = 4 : i64, tpu.core_type = #tpu.core_type<tc>, window_params = [{transform_indices = @transform_0, window_bounds = array<i64: 1, 150, 142>}, {pipeline_mode = #tpu.pipeline_mode<synchronous>, transform_indices = @transform_1, window_bounds = array<i64: 16, 49>}, {pipeline_mode = #tpu.pipeline_mode<synchronous>, transform_indices = @transform_2, window_bounds = array<i64: 16, 1>}, {pipeline_mode = #tpu.pipeline_mode<synchronous>, transform_indices = @transform_3, window_bounds = array<i64: 5, 32, 80>}, {pipeline_mode = #tpu.pipeline_mode<synchronous>, transform_indices = @transform_4, window_bounds = array<i64: 32, 1>}, {pipeline_mode = #tpu.pipeline_mode<synchronous>, transform_indices = @transform_5, window_bounds = array<i64: 3, 64, 96>}, {pipeline_mode = #tpu.pipeline_mode<synchronous>, transform_indices = @transform_6, window_bounds = array<i64: 64, 1>}, {pipeline_mode = #tpu.pipeline_mode<synchronous>, transform_indices = @transform_7, window_bounds = array<i64: 75, 141>}, {pipeline_mode = #tpu.pipeline_mode<synchronous>, transform_indices = @transform_8, window_bounds = array<i64: 1, 1>}, {transform_indices = @transform_9, window_bounds = array<i64: 1, 64, 1>}]} {
    %cst = arith.constant 0.000000e+00 : f32
    %0 = vector.broadcast %cst : f32 to vector<156x148xf32>
    %c0 = arith.constant 0 : index
    %c0_0 = arith.constant 0 : index
    %1 = vector.load %arg11[%c0, %c0_0] : memref<156x148xf32, #tpu.memory_space<vmem>>, vector<156x148xf32>
    tpu.vector_store %arg11[%c0, %c0_0], %0 {strides = array<i32>} : memref<156x148xf32, #tpu.memory_space<vmem>>, vector<156x148xf32>,
    %cst_1 = arith.constant 0.000000e+00 : f32
    %2 = vector.broadcast %cst_1 : f32 to vector<154x16x146xf32>
    %c0_2 = arith.constant 0 : index
    %c0_3 = arith.constant 0 : index
    %c0_4 = arith.constant 0 : index
    %3 = vector.load %arg12[%c0_2, %c0_3, %c0_4] : memref<154x16x146xf32, #tpu.memory_space<vmem>>, vector<154x16x146xf32>
    tpu.vector_store %arg12[%c0_2, %c0_3, %c0_4], %2 {strides = array<i32>} : memref<154x16x146xf32, #tpu.memory_space<vmem>>, vector<154x16x146xf32>,
    %cst_5 = arith.constant 0.000000e+00 : f32
    %4 = vector.broadcast %cst_5 : f32 to vector<152x32x144xf32>
    %c0_6 = arith.constant 0 : index
    %c0_7 = arith.constant 0 : index
    %c0_8 = arith.constant 0 : index
    %5 = vector.load %arg13[%c0_6, %c0_7, %c0_8] : memref<152x32x144xf32, #tpu.memory_space<vmem>>, vector<152x32x144xf32>
    tpu.vector_store %arg13[%c0_6, %c0_7, %c0_8], %4 {strides = array<i32>} : memref<152x32x144xf32, #tpu.memory_space<vmem>>, vector<152x32x144xf32>,
    %cst_9 = arith.constant 0.000000e+00 : f32
    %6 = vector.broadcast %cst_9 : f32 to vector<64x1xf32>
    %c0_10 = arith.constant 0 : index
    %c0_11 = arith.constant 0 : index
    %7 = vector.load %arg14[%c0_10, %c0_11] : memref<64x1xf32, #tpu.memory_space<vmem>>, vector<64x1xf32>
    tpu.vector_store %arg14[%c0_10, %c0_11], %6 {strides = array<i32>} : memref<64x1xf32, #tpu.memory_space<vmem>>, vector<64x1xf32>,
    %c0_12 = arith.constant 0 : index
    %c0_13 = arith.constant 0 : index
    %c0_14 = arith.constant 0 : index
    %8 = vector.load %arg1[%c0_12, %c0_13, %c0_14] : memref<1x150x142xf32, #tpu.memory_space<vmem>>, vector<1x150x142xf32>
    %9 = vector.shape_cast %8 : vector<1x150x142xf32> to vector<150x142xf32>
    %c3 = arith.constant 3 : index
    %c3_15 = arith.constant 3 : index
    %10 = vector.load %arg11[%c3, %c3_15] : memref<156x148xf32, #tpu.memory_space<vmem>>, vector<150x142xf32>
    tpu.vector_store %arg11[%c3, %c3_15], %9 {strides = array<i32>} : memref<156x148xf32, #tpu.memory_space<vmem>>, vector<150x142xf32>,
    %c0_i32 = arith.constant 0 : i32
    %c150_i32 = arith.constant 150 : i32
    %11 = arith.addi %c0_i32, %c150_i32 : i32
    %c1_i32 = arith.constant 1 : i32
    scf.for %arg15 = %c0_i32 to %11 step %c1_i32  : i32 {
      %c0_i32_33 = arith.constant 0 : i32
      %26 = arith.addi %arg15, %c0_i32_33 : i32
      %27 = arith.index_cast %26 : i32 to index
      %c0_34 = arith.constant 0 : index
      %28 = vector.load %arg11[%27, %c0_34] : memref<156x148xf32, #tpu.memory_space<vmem>>, vector<1x148xf32>
      %29 = vector.extract_strided_slice %28 {offsets = [0, 0], sizes = [1, 142], strides = [1, 1]} : vector<1x148xf32> to vector<1x142xf32>
      %30 = vector.extract_strided_slice %28 {offsets = [0, 1], sizes = [1, 142], strides = [1, 1]} : vector<1x148xf32> to vector<1x142xf32>
      %31 = vector.extract_strided_slice %28 {offsets = [0, 2], sizes = [1, 142], strides = [1, 1]} : vector<1x148xf32> to vector<1x142xf32>
      %32 = vector.extract_strided_slice %28 {offsets = [0, 3], sizes = [1, 142], strides = [1, 1]} : vector<1x148xf32> to vector<1x142xf32>
      %33 = vector.extract_strided_slice %28 {offsets = [0, 4], sizes = [1, 142], strides = [1, 1]} : vector<1x148xf32> to vector<1x142xf32>
      %34 = vector.extract_strided_slice %28 {offsets = [0, 5], sizes = [1, 142], strides = [1, 1]} : vector<1x148xf32> to vector<1x142xf32>
      %35 = vector.extract_strided_slice %28 {offsets = [0, 6], sizes = [1, 142], strides = [1, 1]} : vector<1x148xf32> to vector<1x142xf32>
      %c1_i32_35 = arith.constant 1 : i32
      %36 = arith.addi %arg15, %c1_i32_35 : i32
      %37 = arith.index_cast %36 : i32 to index
      %c0_36 = arith.constant 0 : index
      %38 = vector.load %arg11[%37, %c0_36] : memref<156x148xf32, #tpu.memory_space<vmem>>, vector<1x148xf32>
      %39 = vector.extract_strided_slice %38 {offsets = [0, 0], sizes = [1, 142], strides = [1, 1]} : vector<1x148xf32> to vector<1x142xf32>
      %40 = vector.extract_strided_slice %38 {offsets = [0, 1], sizes = [1, 142], strides = [1, 1]} : vector<1x148xf32> to vector<1x142xf32>
      %41 = vector.extract_strided_slice %38 {offsets = [0, 2], sizes = [1, 142], strides = [1, 1]} : vector<1x148xf32> to vector<1x142xf32>
      %42 = vector.extract_strided_slice %38 {offsets = [0, 3], sizes = [1, 142], strides = [1, 1]} : vector<1x148xf32> to vector<1x142xf32>
      %43 = vector.extract_strided_slice %38 {offsets = [0, 4], sizes = [1, 142], strides = [1, 1]} : vector<1x148xf32> to vector<1x142xf32>
      %44 = vector.extract_strided_slice %38 {offsets = [0, 5], sizes = [1, 142], strides = [1, 1]} : vector<1x148xf32> to vector<1x142xf32>
      %45 = vector.extract_strided_slice %38 {offsets = [0, 6], sizes = [1, 142], strides = [1, 1]} : vector<1x148xf32> to vector<1x142xf32>
      %c2_i32 = arith.constant 2 : i32
      %46 = arith.addi %arg15, %c2_i32 : i32
      %47 = arith.index_cast %46 : i32 to index
      %c0_37 = arith.constant 0 : index
      %48 = vector.load %arg11[%47, %c0_37] : memref<156x148xf32, #tpu.memory_space<vmem>>, vector<1x148xf32>
      %49 = vector.extract_strided_slice %48 {offsets = [0, 0], sizes = [1, 142], strides = [1, 1]} : vector<1x148xf32> to vector<1x142xf32>
      %50 = vector.extract_strided_slice %48 {offsets = [0, 1], sizes = [1, 142], strides = [1, 1]} : vector<1x148xf32> to vector<1x142xf32>
      %51 = vector.extract_strided_slice %48 {offsets = [0, 2], sizes = [1, 142], strides = [1, 1]} : vector<1x148xf32> to vector<1x142xf32>
      %52 = vector.extract_strided_slice %48 {offsets = [0, 3], sizes = [1, 142], strides = [1, 1]} : vector<1x148xf32> to vector<1x142xf32>
      %53 = vector.extract_strided_slice %48 {offsets = [0, 4], sizes = [1, 142], strides = [1, 1]} : vector<1x148xf32> to vector<1x142xf32>
      %54 = vector.extract_strided_slice %48 {offsets = [0, 5], sizes = [1, 142], strides = [1, 1]} : vector<1x148xf32> to vector<1x142xf32>
      %55 = vector.extract_strided_slice %48 {offsets = [0, 6], sizes = [1, 142], strides = [1, 1]} : vector<1x148xf32> to vector<1x142xf32>
      %c3_i32 = arith.constant 3 : i32
      %56 = arith.addi %arg15, %c3_i32 : i32
      %57 = arith.index_cast %56 : i32 to index
      %c0_38 = arith.constant 0 : index
      %58 = vector.load %arg11[%57, %c0_38] : memref<156x148xf32, #tpu.memory_space<vmem>>, vector<1x148xf32>
      %59 = vector.extract_strided_slice %58 {offsets = [0, 0], sizes = [1, 142], strides = [1, 1]} : vector<1x148xf32> to vector<1x142xf32>
      %60 = vector.extract_strided_slice %58 {offsets = [0, 1], sizes = [1, 142], strides = [1, 1]} : vector<1x148xf32> to vector<1x142xf32>
      %61 = vector.extract_strided_slice %58 {offsets = [0, 2], sizes = [1, 142], strides = [1, 1]} : vector<1x148xf32> to vector<1x142xf32>
      %62 = vector.extract_strided_slice %58 {offsets = [0, 3], sizes = [1, 142], strides = [1, 1]} : vector<1x148xf32> to vector<1x142xf32>
      %63 = vector.extract_strided_slice %58 {offsets = [0, 4], sizes = [1, 142], strides = [1, 1]} : vector<1x148xf32> to vector<1x142xf32>
      %64 = vector.extract_strided_slice %58 {offsets = [0, 5], sizes = [1, 142], strides = [1, 1]} : vector<1x148xf32> to vector<1x142xf32>
      %65 = vector.extract_strided_slice %58 {offsets = [0, 6], sizes = [1, 142], strides = [1, 1]} : vector<1x148xf32> to vector<1x142xf32>
      %c4_i32 = arith.constant 4 : i32
      %66 = arith.addi %arg15, %c4_i32 : i32
      %67 = arith.index_cast %66 : i32 to index
      %c0_39 = arith.constant 0 : index
      %68 = vector.load %arg11[%67, %c0_39] : memref<156x148xf32, #tpu.memory_space<vmem>>, vector<1x148xf32>
      %69 = vector.extract_strided_slice %68 {offsets = [0, 0], sizes = [1, 142], strides = [1, 1]} : vector<1x148xf32> to vector<1x142xf32>
      %70 = vector.extract_strided_slice %68 {offsets = [0, 1], sizes = [1, 142], strides = [1, 1]} : vector<1x148xf32> to vector<1x142xf32>
      %71 = vector.extract_strided_slice %68 {offsets = [0, 2], sizes = [1, 142], strides = [1, 1]} : vector<1x148xf32> to vector<1x142xf32>
      %72 = vector.extract_strided_slice %68 {offsets = [0, 3], sizes = [1, 142], strides = [1, 1]} : vector<1x148xf32> to vector<1x142xf32>
      %73 = vector.extract_strided_slice %68 {offsets = [0, 4], sizes = [1, 142], strides = [1, 1]} : vector<1x148xf32> to vector<1x142xf32>
      %74 = vector.extract_strided_slice %68 {offsets = [0, 5], sizes = [1, 142], strides = [1, 1]} : vector<1x148xf32> to vector<1x142xf32>
      %75 = vector.extract_strided_slice %68 {offsets = [0, 6], sizes = [1, 142], strides = [1, 1]} : vector<1x148xf32> to vector<1x142xf32>
      %c5_i32 = arith.constant 5 : i32
      %76 = arith.addi %arg15, %c5_i32 : i32
      %77 = arith.index_cast %76 : i32 to index
      %c0_40 = arith.constant 0 : index
      %78 = vector.load %arg11[%77, %c0_40] : memref<156x148xf32, #tpu.memory_space<vmem>>, vector<1x148xf32>
      %79 = vector.extract_strided_slice %78 {offsets = [0, 0], sizes = [1, 142], strides = [1, 1]} : vector<1x148xf32> to vector<1x142xf32>
      %80 = vector.extract_strided_slice %78 {offsets = [0, 1], sizes = [1, 142], strides = [1, 1]} : vector<1x148xf32> to vector<1x142xf32>
      %81 = vector.extract_strided_slice %78 {offsets = [0, 2], sizes = [1, 142], strides = [1, 1]} : vector<1x148xf32> to vector<1x142xf32>
      %82 = vector.extract_strided_slice %78 {offsets = [0, 3], sizes = [1, 142], strides = [1, 1]} : vector<1x148xf32> to vector<1x142xf32>
      %83 = vector.extract_strided_slice %78 {offsets = [0, 4], sizes = [1, 142], strides = [1, 1]} : vector<1x148xf32> to vector<1x142xf32>
      %84 = vector.extract_strided_slice %78 {offsets = [0, 5], sizes = [1, 142], strides = [1, 1]} : vector<1x148xf32> to vector<1x142xf32>
      %85 = vector.extract_strided_slice %78 {offsets = [0, 6], sizes = [1, 142], strides = [1, 1]} : vector<1x148xf32> to vector<1x142xf32>
      %c6_i32 = arith.constant 6 : i32
      %86 = arith.addi %arg15, %c6_i32 : i32
      %87 = arith.index_cast %86 : i32 to index
      %c0_41 = arith.constant 0 : index
      %88 = vector.load %arg11[%87, %c0_41] : memref<156x148xf32, #tpu.memory_space<vmem>>, vector<1x148xf32>
      %89 = vector.extract_strided_slice %88 {offsets = [0, 0], sizes = [1, 142], strides = [1, 1]} : vector<1x148xf32> to vector<1x142xf32>
      %90 = vector.extract_strided_slice %88 {offsets = [0, 1], sizes = [1, 142], strides = [1, 1]} : vector<1x148xf32> to vector<1x142xf32>
      %91 = vector.extract_strided_slice %88 {offsets = [0, 2], sizes = [1, 142], strides = [1, 1]} : vector<1x148xf32> to vector<1x142xf32>
      %92 = vector.extract_strided_slice %88 {offsets = [0, 3], sizes = [1, 142], strides = [1, 1]} : vector<1x148xf32> to vector<1x142xf32>
      %93 = vector.extract_strided_slice %88 {offsets = [0, 4], sizes = [1, 142], strides = [1, 1]} : vector<1x148xf32> to vector<1x142xf32>
      %94 = vector.extract_strided_slice %88 {offsets = [0, 5], sizes = [1, 142], strides = [1, 1]} : vector<1x148xf32> to vector<1x142xf32>
      %95 = vector.extract_strided_slice %88 {offsets = [0, 6], sizes = [1, 142], strides = [1, 1]} : vector<1x148xf32> to vector<1x142xf32>
      %96 = tpu.concatenate %29, %30, %31, %32, %33, %34, %35, %39, %40, %41, %42, %43, %44, %45, %49, %50 in 0 : vector<1x142xf32>, vector<1x142xf32>, vector<1x142xf32>, vector<1x142xf32>, vector<1x142xf32>, vector<1x142xf32>, vector<1x142xf32>, vector<1x142xf32>, vector<1x142xf32>, vector<1x142xf32>, vector<1x142xf32>, vector<1x142xf32>, vector<1x142xf32>, vector<1x142xf32>, vector<1x142xf32>, vector<1x142xf32> -> vector<16x142xf32>
      %97 = tpu.concatenate %51, %52, %53, %54, %55, %59, %60, %61, %62, %63, %64, %65, %69, %70, %71, %72 in 0 : vector<1x142xf32>, vector<1x142xf32>, vector<1x142xf32>, vector<1x142xf32>, vector<1x142xf32>, vector<1x142xf32>, vector<1x142xf32>, vector<1x142xf32>, vector<1x142xf32>, vector<1x142xf32>, vector<1x142xf32>, vector<1x142xf32>, vector<1x142xf32>, vector<1x142xf32>, vector<1x142xf32>, vector<1x142xf32> -> vector<16x142xf32>
      %98 = tpu.concatenate %73, %74, %75, %79, %80, %81, %82, %83, %84, %85, %89, %90, %91, %92, %93, %94 in 0 : vector<1x142xf32>, vector<1x142xf32>, vector<1x142xf32>, vector<1x142xf32>, vector<1x142xf32>, vector<1x142xf32>, vector<1x142xf32>, vector<1x142xf32>, vector<1x142xf32>, vector<1x142xf32>, vector<1x142xf32>, vector<1x142xf32>, vector<1x142xf32>, vector<1x142xf32>, vector<1x142xf32>, vector<1x142xf32> -> vector<16x142xf32>
      %99 = tpu.concatenate %96, %97, %98, %95 in 0 : vector<16x142xf32>, vector<16x142xf32>, vector<16x142xf32>, vector<1x142xf32> -> vector<49x142xf32>
      %c0_42 = arith.constant 0 : index
      %c0_43 = arith.constant 0 : index
      %100 = vector.load %arg2[%c0_42, %c0_43] : memref<16x49xf32, #tpu.memory_space<vmem>>, vector<16x49xf32>
      %cst_44 = arith.constant dense<0.000000e+00> : vector<16x142xf32>
      %101 = tpu.matmul %100, %99, %cst_44 {dimension_numbers = #tpu.dot_dimension_numbers<[1], [0], [0], [1], [0, 0, 1, 1], [], []>} : vector<16x49xf32>, vector<49x142xf32>, vector<16x142xf32> -> vector<16x142xf32>
      %c0_45 = arith.constant 0 : index
      %c0_46 = arith.constant 0 : index
      %102 = vector.load %arg3[%c0_45, %c0_46] : memref<16x1xf32, #tpu.memory_space<vmem>>, vector<16x1xf32>
      %103 = vector.broadcast %102 : vector<16x1xf32> to vector<16x142xf32>
      %104 = arith.addf %101, %103 : vector<16x142xf32>
      %cst_47 = arith.constant 0.000000e+00 : f32
      %105 = vector.broadcast %cst_47 : f32 to vector<16x142xf32>
      %106 = arith.cmpf ogt, %104, %105 : vector<16x142xf32>
      %cst_48 = arith.constant 0.00999999977 : f32
      %107 = vector.broadcast %cst_48 : f32 to vector<16x142xf32>
      %108 = arith.mulf %107, %104 : vector<16x142xf32>
      %109 = arith.select %106, %104, %108 : vector<16x142xi1>, vector<16x142xf32>
      %c2_i32_49 = arith.constant 2 : i32
      %110 = arith.addi %arg15, %c2_i32_49 : i32
      %111 = arith.index_cast %110 : i32 to index
      %c0_50 = arith.constant 0 : index
      %c2 = arith.constant 2 : index
      %112 = vector.load %arg12[%111, %c0_50, %c2] : memref<154x16x146xf32, #tpu.memory_space<vmem>>, vector<1x16x142xf32>
      %113 = vector.shape_cast %112 : vector<1x16x142xf32> to vector<16x142xf32>
      %114 = vector.shape_cast %109 : vector<16x142xf32> to vector<1x16x142xf32>
      tpu.vector_store %arg12[%111, %c0_50, %c2], %114 {strides = array<i32>} : memref<154x16x146xf32, #tpu.memory_space<vmem>>, vector<1x16x142xf32>,
    }
    %c150_i32_16 = arith.constant 150 : i32
    %c0_i32_17 = arith.constant 0 : i32
    %c150_i32_18 = arith.constant 150 : i32
    %12 = arith.addi %c0_i32_17, %c150_i32_18 : i32
    %c1_i32_19 = arith.constant 1 : i32
    scf.for %arg15 = %c0_i32_17 to %12 step %c1_i32_19  : i32 {
      %cst_33 = arith.constant 0.000000e+00 : f32
      %26 = vector.broadcast %cst_33 : f32 to vector<32x142xf32>
      %c0_i32_34 = arith.constant 0 : i32
      %27 = arith.addi %arg15, %c0_i32_34 : i32
      %28 = arith.index_cast %27 : i32 to index
      %c0_35 = arith.constant 0 : index
      %c0_36 = arith.constant 0 : index
      %29 = vector.load %arg12[%28, %c0_35, %c0_36] : memref<154x16x146xf32, #tpu.memory_space<vmem>>, vector<1x16x146xf32>
      %30 = vector.shape_cast %29 : vector<1x16x146xf32> to vector<16x146xf32>
      %31 = vector.extract_strided_slice %30 {offsets = [0, 0], sizes = [16, 142], strides = [1, 1]} : vector<16x146xf32> to vector<16x142xf32>
      %32 = vector.extract_strided_slice %30 {offsets = [0, 1], sizes = [16, 142], strides = [1, 1]} : vector<16x146xf32> to vector<16x142xf32>
      %33 = vector.extract_strided_slice %30 {offsets = [0, 2], sizes = [16, 142], strides = [1, 1]} : vector<16x146xf32> to vector<16x142xf32>
      %34 = vector.extract_strided_slice %30 {offsets = [0, 3], sizes = [16, 142], strides = [1, 1]} : vector<16x146xf32> to vector<16x142xf32>
      %35 = vector.extract_strided_slice %30 {offsets = [0, 4], sizes = [16, 142], strides = [1, 1]} : vector<16x146xf32> to vector<16x142xf32>
      %36 = tpu.concatenate %31, %32, %33, %34, %35 in 0 : vector<16x142xf32>, vector<16x142xf32>, vector<16x142xf32>, vector<16x142xf32>, vector<16x142xf32> -> vector<80x142xf32>
      %c0_37 = arith.constant 0 : index
      %c0_38 = arith.constant 0 : index
      %c0_39 = arith.constant 0 : index
      %37 = vector.load %arg4[%c0_37, %c0_38, %c0_39] : memref<5x32x80xf32, #tpu.memory_space<vmem>>, vector<1x32x80xf32>
      %38 = vector.shape_cast %37 : vector<1x32x80xf32> to vector<32x80xf32>
      %cst_40 = arith.constant dense<0.000000e+00> : vector<32x142xf32>
      %39 = tpu.matmul %38, %36, %cst_40 {dimension_numbers = #tpu.dot_dimension_numbers<[1], [0], [0], [1], [0, 0, 1, 1], [], []>} : vector<32x80xf32>, vector<80x142xf32>, vector<32x142xf32> -> vector<32x142xf32>
      %40 = arith.addf %26, %39 : vector<32x142xf32>
      %c1_i32_41 = arith.constant 1 : i32
      %41 = arith.addi %arg15, %c1_i32_41 : i32
      %42 = arith.index_cast %41 : i32 to index
      %c0_42 = arith.constant 0 : index
      %c0_43 = arith.constant 0 : index
      %43 = vector.load %arg12[%42, %c0_42, %c0_43] : memref<154x16x146xf32, #tpu.memory_space<vmem>>, vector<1x16x146xf32>
      %44 = vector.shape_cast %43 : vector<1x16x146xf32> to vector<16x146xf32>
      %45 = vector.extract_strided_slice %44 {offsets = [0, 0], sizes = [16, 142], strides = [1, 1]} : vector<16x146xf32> to vector<16x142xf32>
      %46 = vector.extract_strided_slice %44 {offsets = [0, 1], sizes = [16, 142], strides = [1, 1]} : vector<16x146xf32> to vector<16x142xf32>
      %47 = vector.extract_strided_slice %44 {offsets = [0, 2], sizes = [16, 142], strides = [1, 1]} : vector<16x146xf32> to vector<16x142xf32>
      %48 = vector.extract_strided_slice %44 {offsets = [0, 3], sizes = [16, 142], strides = [1, 1]} : vector<16x146xf32> to vector<16x142xf32>
      %49 = vector.extract_strided_slice %44 {offsets = [0, 4], sizes = [16, 142], strides = [1, 1]} : vector<16x146xf32> to vector<16x142xf32>
      %50 = tpu.concatenate %45, %46, %47, %48, %49 in 0 : vector<16x142xf32>, vector<16x142xf32>, vector<16x142xf32>, vector<16x142xf32>, vector<16x142xf32> -> vector<80x142xf32>
      %c1 = arith.constant 1 : index
      %c0_44 = arith.constant 0 : index
      %c0_45 = arith.constant 0 : index
      %51 = vector.load %arg4[%c1, %c0_44, %c0_45] : memref<5x32x80xf32, #tpu.memory_space<vmem>>, vector<1x32x80xf32>
      %52 = vector.shape_cast %51 : vector<1x32x80xf32> to vector<32x80xf32>
      %cst_46 = arith.constant dense<0.000000e+00> : vector<32x142xf32>
      %53 = tpu.matmul %52, %50, %cst_46 {dimension_numbers = #tpu.dot_dimension_numbers<[1], [0], [0], [1], [0, 0, 1, 1], [], []>} : vector<32x80xf32>, vector<80x142xf32>, vector<32x142xf32> -> vector<32x142xf32>
      %54 = arith.addf %40, %53 : vector<32x142xf32>
      %c2_i32 = arith.constant 2 : i32
      %55 = arith.addi %arg15, %c2_i32 : i32
      %56 = arith.index_cast %55 : i32 to index
      %c0_47 = arith.constant 0 : index
      %c0_48 = arith.constant 0 : index
      %57 = vector.load %arg12[%56, %c0_47, %c0_48] : memref<154x16x146xf32, #tpu.memory_space<vmem>>, vector<1x16x146xf32>
      %58 = vector.shape_cast %57 : vector<1x16x146xf32> to vector<16x146xf32>
      %59 = vector.extract_strided_slice %58 {offsets = [0, 0], sizes = [16, 142], strides = [1, 1]} : vector<16x146xf32> to vector<16x142xf32>
      %60 = vector.extract_strided_slice %58 {offsets = [0, 1], sizes = [16, 142], strides = [1, 1]} : vector<16x146xf32> to vector<16x142xf32>
      %61 = vector.extract_strided_slice %58 {offsets = [0, 2], sizes = [16, 142], strides = [1, 1]} : vector<16x146xf32> to vector<16x142xf32>
      %62 = vector.extract_strided_slice %58 {offsets = [0, 3], sizes = [16, 142], strides = [1, 1]} : vector<16x146xf32> to vector<16x142xf32>
      %63 = vector.extract_strided_slice %58 {offsets = [0, 4], sizes = [16, 142], strides = [1, 1]} : vector<16x146xf32> to vector<16x142xf32>
      %64 = tpu.concatenate %59, %60, %61, %62, %63 in 0 : vector<16x142xf32>, vector<16x142xf32>, vector<16x142xf32>, vector<16x142xf32>, vector<16x142xf32> -> vector<80x142xf32>
      %c2 = arith.constant 2 : index
      %c0_49 = arith.constant 0 : index
      %c0_50 = arith.constant 0 : index
      %65 = vector.load %arg4[%c2, %c0_49, %c0_50] : memref<5x32x80xf32, #tpu.memory_space<vmem>>, vector<1x32x80xf32>
      %66 = vector.shape_cast %65 : vector<1x32x80xf32> to vector<32x80xf32>
      %cst_51 = arith.constant dense<0.000000e+00> : vector<32x142xf32>
      %67 = tpu.matmul %66, %64, %cst_51 {dimension_numbers = #tpu.dot_dimension_numbers<[1], [0], [0], [1], [0, 0, 1, 1], [], []>} : vector<32x80xf32>, vector<80x142xf32>, vector<32x142xf32> -> vector<32x142xf32>
      %68 = arith.addf %54, %67 : vector<32x142xf32>
      %c3_i32 = arith.constant 3 : i32
      %69 = arith.addi %arg15, %c3_i32 : i32
      %70 = arith.index_cast %69 : i32 to index
      %c0_52 = arith.constant 0 : index
      %c0_53 = arith.constant 0 : index
      %71 = vector.load %arg12[%70, %c0_52, %c0_53] : memref<154x16x146xf32, #tpu.memory_space<vmem>>, vector<1x16x146xf32>
      %72 = vector.shape_cast %71 : vector<1x16x146xf32> to vector<16x146xf32>
      %73 = vector.extract_strided_slice %72 {offsets = [0, 0], sizes = [16, 142], strides = [1, 1]} : vector<16x146xf32> to vector<16x142xf32>
      %74 = vector.extract_strided_slice %72 {offsets = [0, 1], sizes = [16, 142], strides = [1, 1]} : vector<16x146xf32> to vector<16x142xf32>
      %75 = vector.extract_strided_slice %72 {offsets = [0, 2], sizes = [16, 142], strides = [1, 1]} : vector<16x146xf32> to vector<16x142xf32>
      %76 = vector.extract_strided_slice %72 {offsets = [0, 3], sizes = [16, 142], strides = [1, 1]} : vector<16x146xf32> to vector<16x142xf32>
      %77 = vector.extract_strided_slice %72 {offsets = [0, 4], sizes = [16, 142], strides = [1, 1]} : vector<16x146xf32> to vector<16x142xf32>
      %78 = tpu.concatenate %73, %74, %75, %76, %77 in 0 : vector<16x142xf32>, vector<16x142xf32>, vector<16x142xf32>, vector<16x142xf32>, vector<16x142xf32> -> vector<80x142xf32>
      %c3_54 = arith.constant 3 : index
      %c0_55 = arith.constant 0 : index
      %c0_56 = arith.constant 0 : index
      %79 = vector.load %arg4[%c3_54, %c0_55, %c0_56] : memref<5x32x80xf32, #tpu.memory_space<vmem>>, vector<1x32x80xf32>
      %80 = vector.shape_cast %79 : vector<1x32x80xf32> to vector<32x80xf32>
      %cst_57 = arith.constant dense<0.000000e+00> : vector<32x142xf32>
      %81 = tpu.matmul %80, %78, %cst_57 {dimension_numbers = #tpu.dot_dimension_numbers<[1], [0], [0], [1], [0, 0, 1, 1], [], []>} : vector<32x80xf32>, vector<80x142xf32>, vector<32x142xf32> -> vector<32x142xf32>
      %82 = arith.addf %68, %81 : vector<32x142xf32>
      %c4_i32 = arith.constant 4 : i32
      %83 = arith.addi %arg15, %c4_i32 : i32
      %84 = arith.index_cast %83 : i32 to index
      %c0_58 = arith.constant 0 : index
      %c0_59 = arith.constant 0 : index
      %85 = vector.load %arg12[%84, %c0_58, %c0_59] : memref<154x16x146xf32, #tpu.memory_space<vmem>>, vector<1x16x146xf32>
      %86 = vector.shape_cast %85 : vector<1x16x146xf32> to vector<16x146xf32>
      %87 = vector.extract_strided_slice %86 {offsets = [0, 0], sizes = [16, 142], strides = [1, 1]} : vector<16x146xf32> to vector<16x142xf32>
      %88 = vector.extract_strided_slice %86 {offsets = [0, 1], sizes = [16, 142], strides = [1, 1]} : vector<16x146xf32> to vector<16x142xf32>
      %89 = vector.extract_strided_slice %86 {offsets = [0, 2], sizes = [16, 142], strides = [1, 1]} : vector<16x146xf32> to vector<16x142xf32>
      %90 = vector.extract_strided_slice %86 {offsets = [0, 3], sizes = [16, 142], strides = [1, 1]} : vector<16x146xf32> to vector<16x142xf32>
      %91 = vector.extract_strided_slice %86 {offsets = [0, 4], sizes = [16, 142], strides = [1, 1]} : vector<16x146xf32> to vector<16x142xf32>
      %92 = tpu.concatenate %87, %88, %89, %90, %91 in 0 : vector<16x142xf32>, vector<16x142xf32>, vector<16x142xf32>, vector<16x142xf32>, vector<16x142xf32> -> vector<80x142xf32>
      %c4 = arith.constant 4 : index
      %c0_60 = arith.constant 0 : index
      %c0_61 = arith.constant 0 : index
      %93 = vector.load %arg4[%c4, %c0_60, %c0_61] : memref<5x32x80xf32, #tpu.memory_space<vmem>>, vector<1x32x80xf32>
      %94 = vector.shape_cast %93 : vector<1x32x80xf32> to vector<32x80xf32>
      %cst_62 = arith.constant dense<0.000000e+00> : vector<32x142xf32>
      %95 = tpu.matmul %94, %92, %cst_62 {dimension_numbers = #tpu.dot_dimension_numbers<[1], [0], [0], [1], [0, 0, 1, 1], [], []>} : vector<32x80xf32>, vector<80x142xf32>, vector<32x142xf32> -> vector<32x142xf32>
      %96 = arith.addf %82, %95 : vector<32x142xf32>
      %c0_63 = arith.constant 0 : index
      %c0_64 = arith.constant 0 : index
      %97 = vector.load %arg5[%c0_63, %c0_64] : memref<32x1xf32, #tpu.memory_space<vmem>>, vector<32x1xf32>
      %98 = vector.broadcast %97 : vector<32x1xf32> to vector<32x142xf32>
      %99 = arith.addf %96, %98 : vector<32x142xf32>
      %cst_65 = arith.constant 0.000000e+00 : f32
      %100 = vector.broadcast %cst_65 : f32 to vector<32x142xf32>
      %101 = arith.cmpf ogt, %99, %100 : vector<32x142xf32>
      %cst_66 = arith.constant 0.00999999977 : f32
      %102 = vector.broadcast %cst_66 : f32 to vector<32x142xf32>
      %103 = arith.mulf %102, %99 : vector<32x142xf32>
      %104 = arith.select %101, %99, %103 : vector<32x142xi1>, vector<32x142xf32>
      %c1_i32_67 = arith.constant 1 : i32
      %105 = arith.addi %arg15, %c1_i32_67 : i32
      %106 = arith.index_cast %105 : i32 to index
      %c0_68 = arith.constant 0 : index
      %c1_69 = arith.constant 1 : index
      %107 = vector.load %arg13[%106, %c0_68, %c1_69] : memref<152x32x144xf32, #tpu.memory_space<vmem>>, vector<1x32x142xf32>
      %108 = vector.shape_cast %107 : vector<1x32x142xf32> to vector<32x142xf32>
      %109 = vector.shape_cast %104 : vector<32x142xf32> to vector<1x32x142xf32>
      tpu.vector_store %arg13[%106, %c0_68, %c1_69], %109 {strides = array<i32>} : memref<152x32x144xf32, #tpu.memory_space<vmem>>, vector<1x32x142xf32>,
    }
    %c150_i32_20 = arith.constant 150 : i32
    %c0_i32_21 = arith.constant 0 : i32
    %c75_i32 = arith.constant 75 : i32
    %13 = arith.addi %c0_i32_21, %c75_i32 : i32
    %c1_i32_22 = arith.constant 1 : i32
    scf.for %arg15 = %c0_i32_21 to %13 step %c1_i32_22  : i32 {
      %c2_i32 = arith.constant 2 : i32
      %26 = arith.muli %c2_i32, %arg15 : i32
      %c0_i32_33 = arith.constant 0 : i32
      %27 = arith.addi %26, %c0_i32_33 : i32
      %cst_34 = arith.constant 0.000000e+00 : f32
      %28 = vector.broadcast %cst_34 : f32 to vector<64x142xf32>
      %c0_i32_35 = arith.constant 0 : i32
      %29 = arith.addi %27, %c0_i32_35 : i32
      %30 = arith.index_cast %29 : i32 to index
      %c0_36 = arith.constant 0 : index
      %c0_37 = arith.constant 0 : index
      %31 = vector.load %arg13[%30, %c0_36, %c0_37] : memref<152x32x144xf32, #tpu.memory_space<vmem>>, vector<1x32x144xf32>
      %32 = vector.shape_cast %31 : vector<1x32x144xf32> to vector<32x144xf32>
      %33 = vector.extract_strided_slice %32 {offsets = [0, 0], sizes = [32, 142], strides = [1, 1]} : vector<32x144xf32> to vector<32x142xf32>
      %34 = vector.extract_strided_slice %32 {offsets = [0, 1], sizes = [32, 142], strides = [1, 1]} : vector<32x144xf32> to vector<32x142xf32>
      %35 = vector.extract_strided_slice %32 {offsets = [0, 2], sizes = [32, 142], strides = [1, 1]} : vector<32x144xf32> to vector<32x142xf32>
      %36 = tpu.concatenate %33, %34, %35 in 0 : vector<32x142xf32>, vector<32x142xf32>, vector<32x142xf32> -> vector<96x142xf32>
      %c0_38 = arith.constant 0 : index
      %c0_39 = arith.constant 0 : index
      %c0_40 = arith.constant 0 : index
      %37 = vector.load %arg6[%c0_38, %c0_39, %c0_40] : memref<3x64x96xf32, #tpu.memory_space<vmem>>, vector<1x64x96xf32>
      %38 = vector.shape_cast %37 : vector<1x64x96xf32> to vector<64x96xf32>
      %cst_41 = arith.constant dense<0.000000e+00> : vector<64x142xf32>
      %39 = tpu.matmul %38, %36, %cst_41 {dimension_numbers = #tpu.dot_dimension_numbers<[1], [0], [0], [1], [0, 0, 1, 1], [], []>} : vector<64x96xf32>, vector<96x142xf32>, vector<64x142xf32> -> vector<64x142xf32>
      %40 = arith.addf %28, %39 : vector<64x142xf32>
      %c1_i32_42 = arith.constant 1 : i32
      %41 = arith.addi %27, %c1_i32_42 : i32
      %42 = arith.index_cast %41 : i32 to index
      %c0_43 = arith.constant 0 : index
      %c0_44 = arith.constant 0 : index
      %43 = vector.load %arg13[%42, %c0_43, %c0_44] : memref<152x32x144xf32, #tpu.memory_space<vmem>>, vector<1x32x144xf32>
      %44 = vector.shape_cast %43 : vector<1x32x144xf32> to vector<32x144xf32>
      %45 = vector.extract_strided_slice %44 {offsets = [0, 0], sizes = [32, 142], strides = [1, 1]} : vector<32x144xf32> to vector<32x142xf32>
      %46 = vector.extract_strided_slice %44 {offsets = [0, 1], sizes = [32, 142], strides = [1, 1]} : vector<32x144xf32> to vector<32x142xf32>
      %47 = vector.extract_strided_slice %44 {offsets = [0, 2], sizes = [32, 142], strides = [1, 1]} : vector<32x144xf32> to vector<32x142xf32>
      %48 = tpu.concatenate %45, %46, %47 in 0 : vector<32x142xf32>, vector<32x142xf32>, vector<32x142xf32> -> vector<96x142xf32>
      %c1 = arith.constant 1 : index
      %c0_45 = arith.constant 0 : index
      %c0_46 = arith.constant 0 : index
      %49 = vector.load %arg6[%c1, %c0_45, %c0_46] : memref<3x64x96xf32, #tpu.memory_space<vmem>>, vector<1x64x96xf32>
      %50 = vector.shape_cast %49 : vector<1x64x96xf32> to vector<64x96xf32>
      %cst_47 = arith.constant dense<0.000000e+00> : vector<64x142xf32>
      %51 = tpu.matmul %50, %48, %cst_47 {dimension_numbers = #tpu.dot_dimension_numbers<[1], [0], [0], [1], [0, 0, 1, 1], [], []>} : vector<64x96xf32>, vector<96x142xf32>, vector<64x142xf32> -> vector<64x142xf32>
      %52 = arith.addf %40, %51 : vector<64x142xf32>
      %c2_i32_48 = arith.constant 2 : i32
      %53 = arith.addi %27, %c2_i32_48 : i32
      %54 = arith.index_cast %53 : i32 to index
      %c0_49 = arith.constant 0 : index
      %c0_50 = arith.constant 0 : index
      %55 = vector.load %arg13[%54, %c0_49, %c0_50] : memref<152x32x144xf32, #tpu.memory_space<vmem>>, vector<1x32x144xf32>
      %56 = vector.shape_cast %55 : vector<1x32x144xf32> to vector<32x144xf32>
      %57 = vector.extract_strided_slice %56 {offsets = [0, 0], sizes = [32, 142], strides = [1, 1]} : vector<32x144xf32> to vector<32x142xf32>
      %58 = vector.extract_strided_slice %56 {offsets = [0, 1], sizes = [32, 142], strides = [1, 1]} : vector<32x144xf32> to vector<32x142xf32>
      %59 = vector.extract_strided_slice %56 {offsets = [0, 2], sizes = [32, 142], strides = [1, 1]} : vector<32x144xf32> to vector<32x142xf32>
      %60 = tpu.concatenate %57, %58, %59 in 0 : vector<32x142xf32>, vector<32x142xf32>, vector<32x142xf32> -> vector<96x142xf32>
      %c2 = arith.constant 2 : index
      %c0_51 = arith.constant 0 : index
      %c0_52 = arith.constant 0 : index
      %61 = vector.load %arg6[%c2, %c0_51, %c0_52] : memref<3x64x96xf32, #tpu.memory_space<vmem>>, vector<1x64x96xf32>
      %62 = vector.shape_cast %61 : vector<1x64x96xf32> to vector<64x96xf32>
      %cst_53 = arith.constant dense<0.000000e+00> : vector<64x142xf32>
      %63 = tpu.matmul %62, %60, %cst_53 {dimension_numbers = #tpu.dot_dimension_numbers<[1], [0], [0], [1], [0, 0, 1, 1], [], []>} : vector<64x96xf32>, vector<96x142xf32>, vector<64x142xf32> -> vector<64x142xf32>
      %64 = arith.addf %52, %63 : vector<64x142xf32>
      %c0_54 = arith.constant 0 : index
      %c0_55 = arith.constant 0 : index
      %65 = vector.load %arg7[%c0_54, %c0_55] : memref<64x1xf32, #tpu.memory_space<vmem>>, vector<64x1xf32>
      %66 = vector.broadcast %65 : vector<64x1xf32> to vector<64x142xf32>
      %67 = arith.addf %64, %66 : vector<64x142xf32>
      %cst_56 = arith.constant 0.000000e+00 : f32
      %68 = vector.broadcast %cst_56 : f32 to vector<64x142xf32>
      %69 = arith.cmpf ogt, %67, %68 : vector<64x142xf32>
      %cst_57 = arith.constant 0.00999999977 : f32
      %70 = vector.broadcast %cst_57 : f32 to vector<64x142xf32>
      %71 = arith.mulf %70, %67 : vector<64x142xf32>
      %72 = arith.select %69, %67, %71 : vector<64x142xi1>, vector<64x142xf32>
      %c2_i32_58 = arith.constant 2 : i32
      %73 = arith.muli %c2_i32_58, %arg15 : i32
      %c1_i32_59 = arith.constant 1 : i32
      %74 = arith.addi %73, %c1_i32_59 : i32
      %cst_60 = arith.constant 0.000000e+00 : f32
      %75 = vector.broadcast %cst_60 : f32 to vector<64x142xf32>
      %c0_i32_61 = arith.constant 0 : i32
      %76 = arith.addi %74, %c0_i32_61 : i32
      %77 = arith.index_cast %76 : i32 to index
      %c0_62 = arith.constant 0 : index
      %c0_63 = arith.constant 0 : index
      %78 = vector.load %arg13[%77, %c0_62, %c0_63] : memref<152x32x144xf32, #tpu.memory_space<vmem>>, vector<1x32x144xf32>
      %79 = vector.shape_cast %78 : vector<1x32x144xf32> to vector<32x144xf32>
      %80 = vector.extract_strided_slice %79 {offsets = [0, 0], sizes = [32, 142], strides = [1, 1]} : vector<32x144xf32> to vector<32x142xf32>
      %81 = vector.extract_strided_slice %79 {offsets = [0, 1], sizes = [32, 142], strides = [1, 1]} : vector<32x144xf32> to vector<32x142xf32>
      %82 = vector.extract_strided_slice %79 {offsets = [0, 2], sizes = [32, 142], strides = [1, 1]} : vector<32x144xf32> to vector<32x142xf32>
      %83 = tpu.concatenate %80, %81, %82 in 0 : vector<32x142xf32>, vector<32x142xf32>, vector<32x142xf32> -> vector<96x142xf32>
      %c0_64 = arith.constant 0 : index
      %c0_65 = arith.constant 0 : index
      %c0_66 = arith.constant 0 : index
      %84 = vector.load %arg6[%c0_64, %c0_65, %c0_66] : memref<3x64x96xf32, #tpu.memory_space<vmem>>, vector<1x64x96xf32>
      %85 = vector.shape_cast %84 : vector<1x64x96xf32> to vector<64x96xf32>
      %cst_67 = arith.constant dense<0.000000e+00> : vector<64x142xf32>
      %86 = tpu.matmul %85, %83, %cst_67 {dimension_numbers = #tpu.dot_dimension_numbers<[1], [0], [0], [1], [0, 0, 1, 1], [], []>} : vector<64x96xf32>, vector<96x142xf32>, vector<64x142xf32> -> vector<64x142xf32>
      %87 = arith.addf %75, %86 : vector<64x142xf32>
      %c1_i32_68 = arith.constant 1 : i32
      %88 = arith.addi %74, %c1_i32_68 : i32
      %89 = arith.index_cast %88 : i32 to index
      %c0_69 = arith.constant 0 : index
      %c0_70 = arith.constant 0 : index
      %90 = vector.load %arg13[%89, %c0_69, %c0_70] : memref<152x32x144xf32, #tpu.memory_space<vmem>>, vector<1x32x144xf32>
      %91 = vector.shape_cast %90 : vector<1x32x144xf32> to vector<32x144xf32>
      %92 = vector.extract_strided_slice %91 {offsets = [0, 0], sizes = [32, 142], strides = [1, 1]} : vector<32x144xf32> to vector<32x142xf32>
      %93 = vector.extract_strided_slice %91 {offsets = [0, 1], sizes = [32, 142], strides = [1, 1]} : vector<32x144xf32> to vector<32x142xf32>
      %94 = vector.extract_strided_slice %91 {offsets = [0, 2], sizes = [32, 142], strides = [1, 1]} : vector<32x144xf32> to vector<32x142xf32>
      %95 = tpu.concatenate %92, %93, %94 in 0 : vector<32x142xf32>, vector<32x142xf32>, vector<32x142xf32> -> vector<96x142xf32>
      %c1_71 = arith.constant 1 : index
      %c0_72 = arith.constant 0 : index
      %c0_73 = arith.constant 0 : index
      %96 = vector.load %arg6[%c1_71, %c0_72, %c0_73] : memref<3x64x96xf32, #tpu.memory_space<vmem>>, vector<1x64x96xf32>
      %97 = vector.shape_cast %96 : vector<1x64x96xf32> to vector<64x96xf32>
      %cst_74 = arith.constant dense<0.000000e+00> : vector<64x142xf32>
      %98 = tpu.matmul %97, %95, %cst_74 {dimension_numbers = #tpu.dot_dimension_numbers<[1], [0], [0], [1], [0, 0, 1, 1], [], []>} : vector<64x96xf32>, vector<96x142xf32>, vector<64x142xf32> -> vector<64x142xf32>
      %99 = arith.addf %87, %98 : vector<64x142xf32>
      %c2_i32_75 = arith.constant 2 : i32
      %100 = arith.addi %74, %c2_i32_75 : i32
      %101 = arith.index_cast %100 : i32 to index
      %c0_76 = arith.constant 0 : index
      %c0_77 = arith.constant 0 : index
      %102 = vector.load %arg13[%101, %c0_76, %c0_77] : memref<152x32x144xf32, #tpu.memory_space<vmem>>, vector<1x32x144xf32>
      %103 = vector.shape_cast %102 : vector<1x32x144xf32> to vector<32x144xf32>
      %104 = vector.extract_strided_slice %103 {offsets = [0, 0], sizes = [32, 142], strides = [1, 1]} : vector<32x144xf32> to vector<32x142xf32>
      %105 = vector.extract_strided_slice %103 {offsets = [0, 1], sizes = [32, 142], strides = [1, 1]} : vector<32x144xf32> to vector<32x142xf32>
      %106 = vector.extract_strided_slice %103 {offsets = [0, 2], sizes = [32, 142], strides = [1, 1]} : vector<32x144xf32> to vector<32x142xf32>
      %107 = tpu.concatenate %104, %105, %106 in 0 : vector<32x142xf32>, vector<32x142xf32>, vector<32x142xf32> -> vector<96x142xf32>
      %c2_78 = arith.constant 2 : index
      %c0_79 = arith.constant 0 : index
      %c0_80 = arith.constant 0 : index
      %108 = vector.load %arg6[%c2_78, %c0_79, %c0_80] : memref<3x64x96xf32, #tpu.memory_space<vmem>>, vector<1x64x96xf32>
      %109 = vector.shape_cast %108 : vector<1x64x96xf32> to vector<64x96xf32>
      %cst_81 = arith.constant dense<0.000000e+00> : vector<64x142xf32>
      %110 = tpu.matmul %109, %107, %cst_81 {dimension_numbers = #tpu.dot_dimension_numbers<[1], [0], [0], [1], [0, 0, 1, 1], [], []>} : vector<64x96xf32>, vector<96x142xf32>, vector<64x142xf32> -> vector<64x142xf32>
      %111 = arith.addf %99, %110 : vector<64x142xf32>
      %c0_82 = arith.constant 0 : index
      %c0_83 = arith.constant 0 : index
      %112 = vector.load %arg7[%c0_82, %c0_83] : memref<64x1xf32, #tpu.memory_space<vmem>>, vector<64x1xf32>
      %113 = vector.broadcast %112 : vector<64x1xf32> to vector<64x142xf32>
      %114 = arith.addf %111, %113 : vector<64x142xf32>
      %cst_84 = arith.constant 0.000000e+00 : f32
      %115 = vector.broadcast %cst_84 : f32 to vector<64x142xf32>
      %116 = arith.cmpf ogt, %114, %115 : vector<64x142xf32>
      %cst_85 = arith.constant 0.00999999977 : f32
      %117 = vector.broadcast %cst_85 : f32 to vector<64x142xf32>
      %118 = arith.mulf %117, %114 : vector<64x142xf32>
      %119 = arith.select %116, %114, %118 : vector<64x142xi1>, vector<64x142xf32>
      %120 = arith.maximumf %72, %119 : vector<64x142xf32>
      %121 = vector.extract_strided_slice %120 {offsets = [0, 0], sizes = [64, 141], strides = [1, 1]} : vector<64x142xf32> to vector<64x141xf32>
      %122 = vector.extract_strided_slice %120 {offsets = [0, 1], sizes = [64, 141], strides = [1, 1]} : vector<64x142xf32> to vector<64x141xf32>
      %123 = arith.maximumf %121, %122 : vector<64x141xf32>
      %124 = arith.index_cast %arg15 : i32 to index
      %c0_86 = arith.constant 0 : index
      %125 = vector.load %arg8[%124, %c0_86] : memref<75x141xf32, #tpu.memory_space<vmem>>, vector<1x141xf32>
      %c0_87 = arith.constant 0 : index
      %c0_88 = arith.constant 0 : index
      %126 = vector.load %arg14[%c0_87, %c0_88] : memref<64x1xf32, #tpu.memory_space<vmem>>, vector<64x1xf32>
      %127 = vector.broadcast %125 : vector<1x141xf32> to vector<64x141xf32>
      %128 = arith.mulf %123, %127 : vector<64x141xf32>
      %cst_89 = arith.constant dense<0.000000e+00> : vector<64xf32>
      %129 = vector.multi_reduction <add>, %128, %cst_89 [1] : vector<64x141xf32> to vector<64xf32>
      %130 = vector.shape_cast %129 : vector<64xf32> to vector<64x1xf32>
      %131 = arith.addf %126, %130 : vector<64x1xf32>
      %c0_90 = arith.constant 0 : index
      %c0_91 = arith.constant 0 : index
      %132 = vector.load %arg14[%c0_90, %c0_91] : memref<64x1xf32, #tpu.memory_space<vmem>>, vector<64x1xf32>
      tpu.vector_store %arg14[%c0_90, %c0_91], %131 {strides = array<i32>} : memref<64x1xf32, #tpu.memory_space<vmem>>, vector<64x1xf32>,
    }
    %c75_i32_23 = arith.constant 75 : i32
    %c0_24 = arith.constant 0 : index
    %c0_25 = arith.constant 0 : index
    %14 = vector.load %arg14[%c0_24, %c0_25] : memref<64x1xf32, #tpu.memory_space<vmem>>, vector<64x1xf32>
    %c0_26 = arith.constant 0 : index
    %c0_27 = arith.constant 0 : index
    %15 = vector.load %arg9[%c0_26, %c0_27] : memref<1x1xf32, #tpu.memory_space<vmem>>, vector<1x1xf32>
    %16 = vector.broadcast %15 : vector<1x1xf32> to vector<64x1xf32>
    %17 = arith.addf %14, %16 : vector<64x1xf32>
    %cst_28 = arith.constant 0.000000e+00 : f32
    %18 = vector.broadcast %cst_28 : f32 to vector<64x1xf32>
    %19 = arith.cmpf ogt, %17, %18 : vector<64x1xf32>
    %cst_29 = arith.constant 0.00999999977 : f32
    %20 = vector.broadcast %cst_29 : f32 to vector<64x1xf32>
    %21 = arith.mulf %20, %17 : vector<64x1xf32>
    %22 = arith.select %19, %17, %21 : vector<64x1xi1>, vector<64x1xf32>
    %c0_30 = arith.constant 0 : index
    %c0_31 = arith.constant 0 : index
    %c0_32 = arith.constant 0 : index
    %23 = vector.load %arg10[%c0_30, %c0_31, %c0_32] : memref<1x64x1xf32, #tpu.memory_space<vmem>>, vector<1x64x1xf32>
    %24 = vector.shape_cast %23 : vector<1x64x1xf32> to vector<64x1xf32>
    %25 = vector.shape_cast %22 : vector<64x1xf32> to vector<1x64x1xf32>
    tpu.vector_store %arg10[%c0_30, %c0_31, %c0_32], %25 {strides = array<i32>} : memref<1x64x1xf32, #tpu.memory_space<vmem>>, vector<1x64x1xf32>,
    return
  }
  func.func @transform_0(%arg0: i32) -> (i32, i32, i32) {
    %c0_i32 = arith.constant 0 : i32
    %c0_i32_0 = arith.constant 0 : i32
    %c0_i32_1 = arith.constant 0 : i32
    return %arg0, %c0_i32, %c0_i32_0 : i32, i32, i32
  }
  func.func @transform_1(%arg0: i32) -> (i32, i32) {
    %c0_i32 = arith.constant 0 : i32
    %c0_i32_0 = arith.constant 0 : i32
    %c0_i32_1 = arith.constant 0 : i32
    return %c0_i32, %c0_i32_0 : i32, i32
  }
  func.func @transform_2(%arg0: i32) -> (i32, i32) {
    %c0_i32 = arith.constant 0 : i32
    %c0_i32_0 = arith.constant 0 : i32
    %c0_i32_1 = arith.constant 0 : i32
    return %c0_i32, %c0_i32_0 : i32, i32
  }
  func.func @transform_3(%arg0: i32) -> (i32, i32, i32) {
    %c0_i32 = arith.constant 0 : i32
    %c0_i32_0 = arith.constant 0 : i32
    %c0_i32_1 = arith.constant 0 : i32
    %c0_i32_2 = arith.constant 0 : i32
    return %c0_i32, %c0_i32_0, %c0_i32_1 : i32, i32, i32
  }
  func.func @transform_4(%arg0: i32) -> (i32, i32) {
    %c0_i32 = arith.constant 0 : i32
    %c0_i32_0 = arith.constant 0 : i32
    %c0_i32_1 = arith.constant 0 : i32
    return %c0_i32, %c0_i32_0 : i32, i32
  }
  func.func @transform_5(%arg0: i32) -> (i32, i32, i32) {
    %c0_i32 = arith.constant 0 : i32
    %c0_i32_0 = arith.constant 0 : i32
    %c0_i32_1 = arith.constant 0 : i32
    %c0_i32_2 = arith.constant 0 : i32
    return %c0_i32, %c0_i32_0, %c0_i32_1 : i32, i32, i32
  }
  func.func @transform_6(%arg0: i32) -> (i32, i32) {
    %c0_i32 = arith.constant 0 : i32
    %c0_i32_0 = arith.constant 0 : i32
    %c0_i32_1 = arith.constant 0 : i32
    return %c0_i32, %c0_i32_0 : i32, i32
  }
  func.func @transform_7(%arg0: i32) -> (i32, i32) {
    %c0_i32 = arith.constant 0 : i32
    %c0_i32_0 = arith.constant 0 : i32
    %c0_i32_1 = arith.constant 0 : i32
    return %c0_i32, %c0_i32_0 : i32, i32
  }
  func.func @transform_8(%arg0: i32) -> (i32, i32) {
    %c0_i32 = arith.constant 0 : i32
    %c0_i32_0 = arith.constant 0 : i32
    %c0_i32_1 = arith.constant 0 : i32
    return %c0_i32, %c0_i32_0 : i32, i32
  }
  func.func @transform_9(%arg0: i32) -> (i32, i32, i32) {
    %c0_i32 = arith.constant 0 : i32
    %c0_i32_0 = arith.constant 0 : i32
    %c0_i32_1 = arith.constant 0 : i32
    return %arg0, %c0_i32, %c0_i32_0 : i32, i32, i32
  }
}

</mosaic_0001>

<bundles_post_ra>
// kernel: fourier_conv_forward.1
= control target key start
LH: loop header
LB: loop body
LE: loop exit
PB: predicated region body
PF: predicated region fallthrough
CT: control target
= control target key end

     0   :  { %s6568_s11 = smov 0   ;;  %s11232_s0 = inlined_call_operand.vmem [shape: f32[2,150,142], index: 0, kind: input, shape index: {}]   ;;  %s11233_s1 = inlined_call_operand.vmem [shape: f32[16,49], index: 1, kind: input, shape index: {}]   ;;  %s11234_s2 = inlined_call_operand.vmem [shape: f32[16,1], index: 2, kind: input, shape index: {}]   ;;  %s11235_s3 = inlined_call_operand.vmem [shape: f32[5,32,80], index: 3, kind: input, shape index: {}]   ;;  %s11236_s4 = inlined_call_operand.vmem [shape: f32[32,1], index: 4, kind: input, shape index: {}]   ;;  %s11237_s5 = inlined_call_operand.vmem [shape: f32[3,64,96], index: 5, kind: input, shape index: {}]   ;;  %s11238_s6 = inlined_call_operand.vmem [shape: f32[64,1], index: 6, kind: input, shape index: {}]   ;;  %s11239_s7 = inlined_call_operand.vmem [shape: f32[75,141], index: 7, kind: input, shape index: {}]   ;;  %s11240_s8 = inlined_call_operand.<no memory space> [shape: f32[1,1], index: 8, kind: input, shape index: {}]   ;;  %s11241_s9 = inlined_call_operand.vmem [shape: f32[2,64,1], index: 9, kind: output, shape index: {}]  }
   0x1   :  { %v14_v0 = vstv %s11240_s8 }
   0x2   :  { %15 = vst [vmem:[#allocation6] sm:$0x1] %v14_v0 }
   0x3 LB: > { %s5510_s12 = sadd.s32 4294967295, %s6479_s11   ;;  %p5514_p0 = scmp.ge.s32.totalorder %s6479_s11, 1  ;;  %s6479_s11 = sphi %s6568_s11, %s21_s11  }
   0x4   : > { %p289_p1 = scmp.lt.s32.totalorder %s6479_s11, 3 }
   0x6   : > { %p290_p2 = pnand %p5514_p0, %p289_p1 }
   0x7   : > { %p325_p3 = scmp.lt.s32.totalorder (!%p290_p2), %s5510_s12, 1  ;;  %s6493_s20 = smov (!%p290_p2), 3  }
   0x8   : > { %293 = sbr.rel (%p290_p2) target bundleno = 3792 (0xed0), region = 56  ;;  %s9618_s21 = smov (!%p290_p2), 0  }
   0xd   : > { %s11246_s12 = smov (!%p325_p3, %s5510_s12), 1  ;;  %vm2296_vm0 = vcmask 1042432   ;;  %vm2516_vm1 = vcmask 1047576   ;;  %vm2512_vm2 = vcmask 1047579   ;;  %vm11242_vm3 = vcmask 23552  }
   0xe   : > { %s5828_s13 = smul.u32 304, %s11246_s12  ;;  %s5779_s8 = sshll.u32 %s11246_s12, 6  ;;  %vm336_vm4 = vcmask 162816   ;;  %vm2518_vm5 = vcmask 138240   ;;  %vm2514_vm6 = vcmask 138243   ;;  %vm375_vm7 = vcmask 158720  }
   0xf   : > { %s6579_s16 = scalar_lea.vmem %s11241_s9, %s5779_s8  ;;  %vm378_vm8 = vcmask 146432   ;;  %vm2554_vm9 = vcmask 1040408   ;;  %vm2556_vm10 = vcmask 131072   ;;  %vm995_vm11 = vcmask 130048  }
  0x10   : > { %s6584_s19 = scalar_lea.vmem %s11232_s0, %s5828_s13  ;;  %vm2211_vm12 = vcmask 7168  }
  0x11   : > { %v2220_v1 = vld [vmem:[%s6584_s19] sm:$0xff]  ;;  %v2222_v2 = vld [vmem:[%s6584_s19 + $0x10] sm:$0xff]  ;;  %v2221_v6 = vld [vmem:[%s6584_s19 + $0x8] sm:$0xff] }
  0x12   : > { %v2297_v3 = vrot.slane %v2220_v1, 5  ;;  %v2299_v4 = vrot.slane %v2222_v2, 5  ;;  %v2224_v5 = vld [vmem:[%s6584_s19 + $0x20] sm:$0xff]  ;;  %v2223_v7 = vld [vmem:[%s6584_s19 + $0x18] sm:$0xff]  ;;  %v2298_v11 = vrot.slane %v2221_v6, 5  ;;  %v2225_v13 = vld [vmem:[%s6584_s19 + $0x28] sm:$0xff] }
  0x13   : > { %v2303_v8 = vrot.slane %v2224_v5, 5  ;;  %v2301_v12 = vrot.slane %v2223_v7, 5  ;;  %v2305_v14 = vrot.slane %v2225_v13, 5  ;;  %v2226_v16 = vld [vmem:[%s6584_s19 + $0x30] sm:$0xff]  ;;  %v2227_v17 = vld [vmem:[%s6584_s19 + $0x38] sm:$0xff]  ;;  %v2228_v21 = vld [vmem:[%s6584_s19 + $0x40] sm:$0xff] }
  0x14   : > { %2371 = vrot.lane.b32.xlu0 %v2297_v3, %s6493_s20  ;;  %v2300_v9 = vsel %vm2296_vm0, %v2297_v3, %v2299_v4  ;;  %v2307_v19 = vrot.slane %v2226_v16, 5  ;;  %v2309_v20 = vrot.slane %v2227_v17, 5  ;;  %v2311_v23 = vrot.slane %v2228_v21, 5  ;;  %v2229_v25 = vld [vmem:[%s6584_s19 + $0x48] sm:$0xff]  ;;  %v2230_v26 = vld [vmem:[%s6584_s19 + $0x50] sm:$0xff]  ;;  %v2231_v30 = vld [vmem:[%s6584_s19 + $0x58] sm:$0xff] }
  0x15   : > { %2375 = vrot.lane.b32.xlu1 %v2300_v9, %s6493_s20  ;;  %v2304_v10 = vsel %vm2296_vm0, %v2299_v4, %v2303_v8  ;;  %v2302_v15 = vsel %vm2296_vm0, %v2298_v11, %v2301_v12  ;;  %v2306_v18 = vsel %vm2296_vm0, %v2301_v12, %v2305_v14  ;;  %v2313_v28 = vrot.slane %v2229_v25, 5  ;;  %v2232_v34 = vld [vmem:[%s6584_s19 + $0x60] sm:$0xff]  ;;  %v2233_v35 = vld [vmem:[%s6584_s19 + $0x68] sm:$0xff]  ;;  %v2234_v39 = vld [vmem:[%s6584_s19 + $0x70] sm:$0xff] }
  0x16   : > { %2379 = vrot.lane.b32.xlu2 %v2304_v10, %s6493_s20  ;;  %v2308_v22 = vsel %vm2296_vm0, %v2303_v8, %v2307_v19  ;;  %v2310_v24 = vsel %vm2296_vm0, %v2305_v14, %v2309_v20  ;;  %v2312_v27 = vsel %vm2296_vm0, %v2307_v19, %v2311_v23  ;;  %v2315_v29 = vrot.slane %v2230_v26, 5  ;;  %v2235_v43 = vld [vmem:[%s6584_s19 + $0x78] sm:$0xff]  ;;  %v2236_v44 = vld [vmem:[%s6584_s19 + $0x80] sm:$0xff]  ;;  %v2237_v48 = vld [vmem:[%s6584_s19 + $0x88] sm:$0xff] }
  0x17   : > { %v2314_v31 = vsel %vm2296_vm0, %v2309_v20, %v2313_v28  ;;  %v2317_v32 = vrot.slane %v2231_v30, 5  ;;  %v2319_v37 = vrot.slane %v2232_v34, 5  ;;  %v2321_v38 = vrot.slane %v2233_v35, 5  ;;  %v2238_v52 = vld [vmem:[%s6584_s19 + $0x90] sm:$0xff]  ;;  %v2239_v53 = vld [vmem:[%s6584_s19 + $0x98] sm:$0xff]  ;;  %v2240_v57 = vld [vmem:[%s6584_s19 + $0xa0] sm:$0xff] }
  0x18   : > { %v2316_v33 = vsel %vm2296_vm0, %v2311_v23, %v2315_v29  ;;  %v2323_v41 = vrot.slane %v2234_v39, 5  ;;  %v2325_v46 = vrot.slane %v2235_v43, 5  ;;  %v2327_v47 = vrot.slane %v2236_v44, 5  ;;  %v2241_v61 = vld [vmem:[%s6584_s19 + $0xa8] sm:$0xff]  ;;  %v2242_v62 = vld [vmem:[%s6584_s19 + $0xb0] sm:$0xff]  ;;  %v2243_v2 = vld [vmem:[%s6584_s19 + $0xb8] sm:$0xff] }
  0x19   : > { %v2318_v36 = vsel %vm2296_vm0, %v2313_v28, %v2317_v32  ;;  %v2320_v40 = vsel %vm2296_vm0, %v2315_v29, %v2319_v37  ;;  %v2322_v42 = vsel %vm2296_vm0, %v2317_v32, %v2321_v38  ;;  %v2329_v50 = vrot.slane %v2237_v48, 5  ;;  %v2244_v6 = vld [vmem:[%s6584_s19 + $0xc0] sm:$0xff]  ;;  %v2245_v7 = vld [vmem:[%s6584_s19 + $0xc8] sm:$0xff]  ;;  %v2251_v25 = vld [vmem:[%s6584_s19 + $0xf8] sm:$0xff] }
  0x1a   : > { %v2324_v45 = vsel %vm2296_vm0, %v2319_v37, %v2323_v41  ;;  %v2326_v49 = vsel %vm2296_vm0, %v2321_v38, %v2325_v46  ;;  %v2328_v51 = vsel %vm2296_vm0, %v2323_v41, %v2327_v47  ;;  %v2331_v55 = vrot.slane %v2238_v52, 5  ;;  %v2248_v16 = vld [vmem:[%s6584_s19 + $0xe0] sm:$0xff]  ;;  %v2249_v20 = vld [vmem:[%s6584_s19 + $0xe8] sm:$0xff]  ;;  %v2254_v35 = vld [vmem:[%s6584_s19 + $0x110] sm:$0xff] }
  0x1b   : > { %v2330_v54 = vsel %vm2296_vm0, %v2325_v46, %v2329_v50  ;;  %v2333_v56 = vrot.slane %v2239_v53, 5  ;;  %v2335_v59 = vrot.slane %v2240_v57, 5  ;;  %v2337_v0 = vrot.slane %v2241_v61, 5  ;;  %v2252_v30 = vld [vmem:[%s6584_s19 + $0x100] sm:$0xff]  ;;  %v6685_v34 = vld [vmem:[%s6584_s19 + $0x108] sm:$0xff] }
  0x1c   : > { %2373 = vrot.lane.b32.xlu0 %v2298_v11, %s6493_s20  ;;  %v2332_v58 = vsel %vm2296_vm0, %v2327_v47, %v2331_v55  ;;  %v2339_v1 = vrot.slane %v2242_v62, 5  ;;  %v2341_v4 = vrot.slane %v2243_v2, 5  ;;  %v2343_v9 = vrot.slane %v2244_v6, 5  ;;  %v2246_v11 = vld [vmem:[%s6584_s19 + $0xd0] sm:$0xff]  ;;  %v6706_v41 = vld [vmem:[%s6584_s19 + $0x120] sm:$0x3f] }
  0x1d   : > { %2377 = vrot.lane.b32.xlu1 %v2302_v15, %s6493_s20  ;;  %v2334_v60 = vsel %vm2296_vm0, %v2329_v50, %v2333_v56  ;;  %v2336_v63 = vsel %vm2296_vm0, %v2331_v55, %v2335_v59  ;;  %v2338_v3 = vsel %vm2296_vm0, %v2333_v56, %v2337_v0  ;;  %v2345_v10 = vrot.slane %v2245_v7, 5  ;;  %v2247_v15 = vld [vmem:[%s6584_s19 + $0xd8] sm:$0xff]  ;;  %v2257_v43 = vld [vmem:[%s6584_s19 + $0x128] sm:$0x3f] }
  0x1e   : > { %2381 = vrot.lane.b32.xlu2 %v2306_v18, %s6493_s20  ;;  %v2340_v5 = vsel %vm2296_vm0, %v2335_v59, %v2339_v1  ;;  %v2342_v8 = vsel %vm2296_vm0, %v2337_v0, %v2341_v4  ;;  %v2344_v12 = vsel %vm2296_vm0, %v2339_v1, %v2343_v9  ;;  %v2347_v13 = vrot.slane %v2246_v11, 5 }
  0x1f   : > { %v2346_v14 = vsel %vm2296_vm0, %v2341_v4, %v2345_v10  ;;  %v2349_v18 = vrot.slane %v2247_v15, 5  ;;  %v2351_v19 = vrot.slane %v2248_v16, 5  ;;  %v6494_v28 = vmov 0.0  }
  0x20   : > { %v2348_v17 = vsel %vm2296_vm0, %v2343_v9, %v2347_v13  ;;  %340 = vst [vmem:[#allocation2 + $0x20] sm:$0xff] %v6494_v28  ;;  %v2357_v29 = vrot.slane %v2251_v25, 5  ;;  %v2359_v32 = vrot.slane %v2252_v30, 5  ;;  %v2361_v37 = vrot.slane %v6685_v34, 5 }
  0x21   : > { %v2350_v21 = vsel %vm2296_vm0, %v2345_v10, %v2349_v18  ;;  %v2352_v23 = vsel %vm2296_vm0, %v2347_v13, %v2351_v19  ;;  %335 = vst [vmem:[#allocation2] sm:$0xff] %v6494_v28  ;;  %v2363_v38 = vrot.slane %v2254_v35, 5  ;;  %v2367_v44 = vrot.slane %v6706_v41, 5 }
  0x22   : > { %338 = vst [vmem:[#allocation2 + $0x10] sm:$0xff] %v6494_v28  ;;  %v2362_v39 = vsel %vm2296_vm0, %v2357_v29, %v2361_v37  ;;  %v2369_v46 = vrot.slane %v2257_v43, 5 }
  0x23   : > { %342 = vst [vmem:[#allocation2 + $0x30] sm:$0xff] %v6494_v28  ;;  %v2368_v48 = vsel %vm2296_vm0, %v2363_v38, %v2367_v44 }
  0x24   : > { %2383 = vrot.lane.b32.xlu0 %v2308_v22, %s6493_s20  ;;  %v2353_v22 = vrot.slane %v2249_v20, 5  ;;  %344 = vst [vmem:[#allocation2 + $0x40] sm:$0xff] %v6494_v28 }
  0x25   : > { %2385 = vrot.lane.b32.xlu1 %v2310_v24, %s6493_s20  ;;  %v2250_v24 = vld [vmem:[%s6584_s19 + $0xf0] sm:$0xff]  ;;  %346 = vst [vmem:[#allocation2 + $0x50] sm:$0xff] %v6494_v28 }
  0x26   : > { %2387 = vrot.lane.b32.xlu2 %v2312_v27, %s6493_s20  ;;  %v2354_v26 = vsel %vm2296_vm0, %v2349_v18, %v2353_v22  ;;  %v2355_v27 = vrot.slane %v2250_v24, 5  ;;  %348 = vst [vmem:[#allocation2 + $0x60] sm:$0xff] %v6494_v28 }
  0x27   : > { %350 = vst [vmem:[#allocation2 + $0x70] sm:$0xff] %v6494_v28 }
  0x28   : > { %352 = vst [vmem:[#allocation2 + $0x80] sm:$0xff] %v6494_v28  ;;  %v7200_v50 = vld [vmem:[#allocation2] sm:$0xff] }
  0x29   : > { %354 = vst [vmem:[#allocation2 + $0x90] sm:$0xff] %v6494_v28 }
  0x2a   : > { %356 = vst [vmem:[#allocation2 + $0xa0] sm:$0xff] %v6494_v28 }
  0x2b   : > { %358 = vst [vmem:[#allocation2 + $0xb0] sm:$0xff] %v6494_v28 }
  0x2c   : > { %2389 = vrot.lane.b32.xlu0 %v2314_v31, %s6493_s20  ;;  %v2356_v31 = vsel %vm2296_vm0, %v2351_v19, %v2355_v27  ;;  %360 = vst [vmem:[#allocation2 + $0xc0] sm:$0xff] %v6494_v28 }
  0x2d   : > { %2391 = vrot.lane.b32.xlu1 %v2316_v33, %s6493_s20  ;;  %v2358_v33 = vsel %vm2296_vm0, %v2353_v22, %v2357_v29  ;;  %362 = vst [vmem:[#allocation2 + $0xd0] sm:$0xff] %v6494_v28 }
  0x2e   : > { %2393 = vrot.lane.b32.xlu2 %v2318_v36, %s6493_s20  ;;  %v2360_v36 = vsel %vm2296_vm0, %v2355_v27, %v2359_v32  ;;  %364 = vst [vmem:[#allocation2 + $0xe0] sm:$0xff] %v6494_v28 }
  0x2f   : > { %366 = vst [vmem:[#allocation2 + $0xf0] sm:$0xff] %v6494_v28 }
  0x30   : > { %368 = vst [vmem:[#allocation2 + $0x100] sm:$0xff] %v6494_v28 }
  0x31   : > { %370 = vst [vmem:[#allocation2 + $0x110] sm:$0xff] %v6494_v28 }
  0x32   : > { %372 = vst [vmem:[#allocation2 + $0x120] sm:$0xff] %v6494_v28 }
  0x33   : > { %374 = vst [vmem:[#allocation2 + $0x130] sm:$0xf] %v6494_v28 }
  0x34   : > { %2395 = vrot.lane.b32.xlu0 %v2320_v40, %s6493_s20  ;;  %v2364_v40 = vsel %vm2296_vm0, %v2359_v32, %v2363_v38  ;;  %377 = vst [vmem:[#allocation3] sm:$0xff] %v6494_v28 }
  0x35   : > { %2397 = vrot.lane.b32.xlu1 %v2322_v42, %s6493_s20  ;;  %v6710_v42 = vld [vmem:[%s6584_s19 + $0x118] sm:$0xff]  ;;  %380 = vst [vmem:[#allocation3 + $0x10] sm:$0xff] %v6494_v28  ;;  %v7748_v29 = vld [vmem:[#allocation2 + $0xe0] sm:$0xff] }
  0x36   : > { %2399 = vrot.lane.b32.xlu2 %v2324_v45, %s6493_s20  ;;  %v2365_v45 = vrot.slane %v6710_v42, 5  ;;  %382 = vst [vmem:[#allocation3 + $0x20] sm:$0xff] %v6494_v28 }
  0x37   : > { %384 = vst [vmem:[#allocation3 + $0x30] sm:$0xff] %v6494_v28 }
  0x38   : > { %386 = vst [vmem:[#allocation3 + $0x40] sm:$0xff] %v6494_v28 }
  0x39   : > { %388 = vst [vmem:[#allocation3 + $0x50] sm:$0xff] %v6494_v28 }
  0x3a   : > { %390 = vst [vmem:[#allocation3 + $0x60] sm:$0xff] %v6494_v28 }
  0x3b   : > { %392 = vst [vmem:[#allocation3 + $0x70] sm:$0xff] %v6494_v28 }
  0x3c   : > { %2401 = vrot.lane.b32.xlu0 %v2326_v49, %s6493_s20  ;;  %v2370_v49 = vsel %vm2296_vm0, %v2365_v45, %v2369_v46  ;;  %394 = vst [vmem:[#allocation3 + $0x80] sm:$0xff] %v6494_v28 }
  0x3d   : > { %2403 = vrot.lane.b32.xlu1 %v2328_v51, %s6493_s20  ;;  %396 = vst [vmem:[#allocation3 + $0x90] sm:$0xff] %v6494_v28  ;;  %v2366_v51 = vsel %vm2296_vm0, %v2361_v37, %v2365_v45 }
  0x3e   : > { %2405 = vrot.lane.b32.xlu2 %v2330_v54, %s6493_s20  ;;  %398 = vst [vmem:[#allocation3 + $0xa0] sm:$0xff] %v6494_v28 }
  0x3f   : > { %400 = vst [vmem:[#allocation3 + $0xb0] sm:$0xff] %v6494_v28 }
  0x40   : > { %402 = vst [vmem:[#allocation3 + $0xc0] sm:$0xff] %v6494_v28 }
  0x41   : > { %404 = vst [vmem:[#allocation3 + $0xd0] sm:$0xff] %v6494_v28 }
  0x42   : > { %406 = vst [vmem:[#allocation3 + $0xe0] sm:$0xff] %v6494_v28 }
  0x43   : > { %408 = vst [vmem:[#allocation3 + $0xf0] sm:$0xff] %v6494_v28 }
  0x44   : > { %2407 = vrot.lane.b32.xlu0 %v2332_v58, %s6493_s20  ;;  %410 = vst [vmem:[#allocation3 + $0x100] sm:$0xff] %v6494_v28 }
  0x45   : > { %2409 = vrot.lane.b32.xlu1 %v2334_v60, %s6493_s20  ;;  %412 = vst [vmem:[#allocation3 + $0x110] sm:$0xff] %v6494_v28 }
  0x46   : > { %2411 = vrot.lane.b32.xlu2 %v2336_v63, %s6493_s20  ;;  %414 = vst [vmem:[#allocation3 + $0x120] sm:$0xff] %v6494_v28 }
  0x47   : > { %416 = vst [vmem:[#allocation3 + $0x130] sm:$0xff] %v6494_v28 }
  0x48   : > { %418 = vst [vmem:[#allocation3 + $0x140] sm:$0xff] %v6494_v28 }
  0x49   : > { %420 = vst [vmem:[#allocation3 + $0x150] sm:$0xff] %v6494_v28 }
  0x4a   : > { %422 = vst [vmem:[#allocation3 + $0x160] sm:$0xff] %v6494_v28 }
  0x4b   : > { %424 = vst [vmem:[#allocation3 + $0x170] sm:$0xff] %v6494_v28 }
  0x4c   : > { %2413 = vrot.lane.b32.xlu0 %v2338_v3, %s6493_s20  ;;  %426 = vst [vmem:[#allocation3 + $0x180] sm:$0xff] %v6494_v28 }
  0x4d   : > { %2415 = vrot.lane.b32.xlu1 %v2340_v5, %s6493_s20  ;;  %428 = vst [vmem:[#allocation3 + $0x190] sm:$0xff] %v6494_v28 }
  0x4e   : > { %2417 = vrot.lane.b32.xlu2 %v2342_v8, %s6493_s20  ;;  %430 = vst [vmem:[#allocation3 + $0x1a0] sm:$0xff] %v6494_v28 }
  0x4f   : > { %432 = vst [vmem:[#allocation3 + $0x1b0] sm:$0xff] %v6494_v28 }
  0x50   : > { %434 = vst [vmem:[#allocation3 + $0x1c0] sm:$0xff] %v6494_v28 }
  0x51   : > { %436 = vst [vmem:[#allocation3 + $0x1d0] sm:$0xff] %v6494_v28 }
  0x52   : > { %438 = vst [vmem:[#allocation3 + $0x1e0] sm:$0xff] %v6494_v28 }
  0x53   : > { %440 = vst [vmem:[#allocation3 + $0x1f0] sm:$0xff] %v6494_v28 }
  0x54   : > { %2419 = vrot.lane.b32.xlu0 %v2344_v12, %s6493_s20  ;;  %442 = vst [vmem:[#allocation3 + $0x200] sm:$0xff] %v6494_v28 }
  0x55   : > { %2421 = vrot.lane.b32.xlu1 %v2346_v14, %s6493_s20  ;;  %444 = vst [vmem:[#allocation3 + $0x210] sm:$0xff] %v6494_v28 }
  0x56   : > { %2423 = vrot.lane.b32.xlu2 %v2348_v17, %s6493_s20  ;;  %446 = vst [vmem:[#allocation3 + $0x220] sm:$0xff] %v6494_v28 }
  0x57   : > { %448 = vst [vmem:[#allocation3 + $0x230] sm:$0xff] %v6494_v28 }
  0x58   : > { %450 = vst [vmem:[#allocation3 + $0x240] sm:$0xff] %v6494_v28 }
  0x59   : > { %452 = vst [vmem:[#allocation3 + $0x250] sm:$0xff] %v6494_v28 }
  0x5a   : > { %454 = vst [vmem:[#allocation3 + $0x260] sm:$0xff] %v6494_v28 }
  0x5b   : > { %456 = vst [vmem:[#allocation3 + $0x270] sm:$0xff] %v6494_v28 }
  0x5c   : > { %2425 = vrot.lane.b32.xlu0 %v2350_v21, %s6493_s20  ;;  %458 = vst [vmem:[#allocation3 + $0x280] sm:$0xff] %v6494_v28 }
  0x5d   : > { %2427 = vrot.lane.b32.xlu1 %v2352_v23, %s6493_s20  ;;  %460 = vst [vmem:[#allocation3 + $0x290] sm:$0xff] %v6494_v28 }
  0x5e   : > { %2429 = vrot.lane.b32.xlu2 %v2354_v26, %s6493_s20  ;;  %462 = vst [vmem:[#allocation3 + $0x2a0] sm:$0xff] %v6494_v28 }
  0x5f   : > { %464 = vst [vmem:[#allocation3 + $0x2b0] sm:$0xff] %v6494_v28 }
  0x60   : > { %466 = vst [vmem:[#allocation3 + $0x2c0] sm:$0xff] %v6494_v28 }
  0x61   : > { %468 = vst [vmem:[#allocation3 + $0x2d0] sm:$0xff] %v6494_v28 }
  0x62   : > { %470 = vst [vmem:[#allocation3 + $0x2e0] sm:$0xff] %v6494_v28 }
  0x63   : > { %472 = vst [vmem:[#allocation3 + $0x2f0] sm:$0xff] %v6494_v28 }
  0x64   : > { %2431 = vrot.lane.b32.xlu0 %v2356_v31, %s6493_s20  ;;  %474 = vst [vmem:[#allocation3 + $0x300] sm:$0xff] %v6494_v28 }
  0x65   : > { %2433 = vrot.lane.b32.xlu1 %v2358_v33, %s6493_s20  ;;  %476 = vst [vmem:[#allocation3 + $0x310] sm:$0xff] %v6494_v28 }
  0x66   : > { %2435 = vrot.lane.b32.xlu2 %v2360_v36, %s6493_s20  ;;  %478 = vst [vmem:[#allocation3 + $0x320] sm:$0xff] %v6494_v28 }
  0x67   : > { %480 = vst [vmem:[#allocation3 + $0x330] sm:$0xff] %v6494_v28 }
  0x68   : > { %482 = vst [vmem:[#allocation3 + $0x340] sm:$0xff] %v6494_v28 }
  0x69   : > { %484 = vst [vmem:[#allocation3 + $0x350] sm:$0xff] %v6494_v28 }
  0x6a   : > { %486 = vst [vmem:[#allocation3 + $0x360] sm:$0xff] %v6494_v28 }
  0x6b   : > { %488 = vst [vmem:[#allocation3 + $0x370] sm:$0xff] %v6494_v28 }
  0x6c   : > { %2437 = vrot.lane.b32.xlu0 %v2362_v39, %s6493_s20  ;;  %490 = vst [vmem:[#allocation3 + $0x380] sm:$0xff] %v6494_v28 }
  0x6d   : > { %2439 = vrot.lane.b32.xlu1 %v2364_v40, %s6493_s20  ;;  %492 = vst [vmem:[#allocation3 + $0x390] sm:$0xff] %v6494_v28 }
  0x6e   : > { %494 = vst [vmem:[#allocation3 + $0x3a0] sm:$0xff] %v6494_v28  ;;  %2441 = vrot.lane.b32.xlu2 %v2366_v51, %s6493_s20 }
  0x6f   : > { %496 = vst [vmem:[#allocation3 + $0x3b0] sm:$0xff] %v6494_v28 }
  0x70   : > { %v6722_v47 = vpop.permute.xlu2 %2379  ;;  %498 = vst [vmem:[#allocation3 + $0x3c0] sm:$0xff] %v6494_v28 }
  0x71   : > { %2520 = vst.msk [vmem:[#allocation2 + $0x20] sm:$0xff] %vm2516_vm1, %v6722_v47 }
  0x72   : > { %500 = vst [vmem:[#allocation3 + $0x3d0] sm:$0xff] %v6494_v28 }
  0x73   : > { %502 = vst [vmem:[#allocation3 + $0x3e0] sm:$0xff] %v6494_v28 }
  0x74   : > { %2443 = vrot.lane.b32.xlu0 %v2368_v48, %s6493_s20  ;;  %504 = vst [vmem:[#allocation3 + $0x3f0] sm:$0xff] %v6494_v28  ;;  %v8720_v48 = vld [vmem:[#allocation3] sm:$0xff] }
  0x75   : > { %2445 = vrot.lane.b32.xlu1 %v2370_v49, %s6493_s20  ;;  %506 = vst [vmem:[#allocation3 + $0x400] sm:$0xff] %v6494_v28 }
  0x76   : > { %508 = vst [vmem:[#allocation3 + $0x410] sm:$0xff] %v6494_v28  ;;  %2447 = vrot.lane.b32.xlu2 %v2367_v44, %s6493_s20 }
  0x77   : > { %510 = vst [vmem:[#allocation3 + $0x420] sm:$0xff] %v6494_v28 }
  0x78   : > { %512 = vst [vmem:[#allocation3 + $0x430] sm:$0xff] %v6494_v28  ;;  %v2382_v55 = vpop.permute.xlu2 %2381 }
  0x79   : > { %514 = vst [vmem:[#allocation3 + $0x440] sm:$0xff] %v6494_v28  ;;  %v2454_v61 = vsel %vm11242_vm3, %v6722_v47, %v2382_v55 }
  0x7a   : > { %516 = vst [vmem:[#allocation3 + $0x450] sm:$0xff] %v6494_v28 }
  0x7b   : > { %518 = vst [vmem:[#allocation3 + $0x460] sm:$0xff] %v6494_v28 }
  0x7c   : > { %2449 = vrot.lane.b32.xlu0 %v2369_v46, %s6493_s20  ;;  %520 = vst [vmem:[#allocation3 + $0x470] sm:$0xff] %v6494_v28 }
  0x7d   : > { %522 = vst [vmem:[#allocation3 + $0x480] sm:$0xff] %v6494_v28 }
  0x7e   : > { %524 = vst [vmem:[#allocation3 + $0x490] sm:$0xff] %v6494_v28 }
  0x7f   : > { %526 = vst [vmem:[#allocation3 + $0x4a0] sm:$0xff] %v6494_v28 }
  0x80   : > { %528 = vst [vmem:[#allocation3 + $0x4b0] sm:$0xff] %v6494_v28  ;;  %v2388_v58 = vpop.permute.xlu2 %2387 }
  0x81   : > { %530 = vst [vmem:[#allocation3 + $0x4c0] sm:$0xff] %v6494_v28 }
  0x82   : > { %532 = vst [vmem:[#allocation3 + $0x4d0] sm:$0xff] %v6494_v28 }
  0x83   : > { %534 = vst [vmem:[#allocation3 + $0x4e0] sm:$0xff] %v6494_v28 }
  0x84   : > { %536 = vst [vmem:[#allocation3 + $0x4f0] sm:$0xff] %v6494_v28 }
  0x85   : > { %538 = vst [vmem:[#allocation3 + $0x500] sm:$0xff] %v6494_v28 }
  0x86   : > { %540 = vst [vmem:[#allocation3 + $0x510] sm:$0xff] %v6494_v28  ;;  %v7632_v52 = vpop.permute.xlu0 %2371 }
  0x87   : > { %542 = vst [vmem:[#allocation3 + $0x520] sm:$0xff] %v6494_v28  ;;  %v7645_v53 = vpop.permute.xlu1 %2375 }
  0x88   : > { %544 = vst [vmem:[#allocation3 + $0x530] sm:$0xff] %v6494_v28  ;;  %v2394_v62 = vpop.permute.xlu2 %2393 }
  0x89   : > { %546 = vst [vmem:[#allocation3 + $0x540] sm:$0xff] %v6494_v28 }
  0x8a   : > { %548 = vst [vmem:[#allocation3 + $0x550] sm:$0xff] %v6494_v28 }
  0x8b   : > { %550 = vst [vmem:[#allocation3 + $0x560] sm:$0xff] %v6494_v28 }
  0x8c   : > { %552 = vst [vmem:[#allocation3 + $0x570] sm:$0xff] %v6494_v28 }
  0x8d   : > { %554 = vst [vmem:[#allocation3 + $0x580] sm:$0xff] %v6494_v28 }
  0x8e   : > { %556 = vst [vmem:[#allocation3 + $0x590] sm:$0xff] %v6494_v28  ;;  %v2374_v54 = vpop.permute.xlu0 %2373 }
  0x8f   : > { %558 = vst [vmem:[#allocation3 + $0x5a0] sm:$0xff] %v6494_v28  ;;  %v2378_v56 = vpop.permute.xlu1 %2377  ;;  %v2452_v5 = vsel %vm11242_vm3, %v7632_v52, %v2374_v54 }
  0x90   : > { %560 = vst [vmem:[#allocation3 + $0x5b0] sm:$0xff] %v6494_v28  ;;  %v2400_v1 = vpop.permute.xlu2 %2399  ;;  %v2453_v6 = vsel %vm11242_vm3, %v7645_v53, %v2378_v56 }
  0x91   : > { %562 = vst [vmem:[#allocation3 + $0x5c0] sm:$0xff] %v6494_v28 }
  0x92   : > { %564 = vst [vmem:[#allocation3 + $0x5d0] sm:$0xff] %v6494_v28 }
  0x93   : > { %566 = vst [vmem:[#allocation3 + $0x5e0] sm:$0xff] %v6494_v28 }
  0x94   : > { %568 = vst [vmem:[#allocation3 + $0x5f0] sm:$0xff] %v6494_v28 }
  0x95   : > { %570 = vst [vmem:[#allocation3 + $0x600] sm:$0xff] %v6494_v28 }
  0x96   : > { %572 = vst [vmem:[#allocation3 + $0x610] sm:$0xff] %v6494_v28  ;;  %v2384_v57 = vpop.permute.xlu0 %2383 }
  0x97   : > { %574 = vst [vmem:[#allocation3 + $0x620] sm:$0xff] %v6494_v28  ;;  %v2386_v59 = vpop.permute.xlu1 %2385 }
  0x98   : > { %576 = vst [vmem:[#allocation3 + $0x630] sm:$0xff] %v6494_v28  ;;  %v2406_v4 = vpop.permute.xlu2 %2405  ;;  %v2455_v8 = vsel %vm11242_vm3, %v2384_v57, %v2386_v59 }
  0x99   : > { %578 = vst [vmem:[#allocation3 + $0x640] sm:$0xff] %v6494_v28 }
  0x9a   : > { %580 = vst [vmem:[#allocation3 + $0x650] sm:$0xff] %v6494_v28 }
  0x9b   : > { %582 = vst [vmem:[#allocation3 + $0x660] sm:$0xff] %v6494_v28 }
  0x9c   : > { %584 = vst [vmem:[#allocation3 + $0x670] sm:$0xff] %v6494_v28 }
  0x9d   : > { %586 = vst [vmem:[#allocation3 + $0x680] sm:$0xff] %v6494_v28 }
  0x9e   : > { %588 = vst [vmem:[#allocation3 + $0x690] sm:$0xff] %v6494_v28  ;;  %v2390_v60 = vpop.permute.xlu0 %2389 }
  0x9f   : > { %590 = vst [vmem:[#allocation3 + $0x6a0] sm:$0xff] %v6494_v28  ;;  %v2392_v63 = vpop.permute.xlu1 %2391  ;;  %v2456_v10 = vsel %vm11242_vm3, %v2388_v58, %v2390_v60 }
  0xa0   : > { %592 = vst [vmem:[#allocation3 + $0x6b0] sm:$0xff] %v6494_v28  ;;  %v2412_v11 = vpop.permute.xlu2 %2411  ;;  %v2457_v12 = vsel %vm11242_vm3, %v2392_v63, %v2394_v62 }
  0xa1   : > { %594 = vst [vmem:[#allocation3 + $0x6c0] sm:$0xff] %v6494_v28 }
  0xa2   : > { %596 = vst [vmem:[#allocation3 + $0x6d0] sm:$0xff] %v6494_v28 }
  0xa3   : > { %598 = vst [vmem:[#allocation3 + $0x6e0] sm:$0xff] %v6494_v28 }
  0xa4   : > { %600 = vst [vmem:[#allocation3 + $0x6f0] sm:$0xff] %v6494_v28 }
  0xa5   : > { %602 = vst [vmem:[#allocation3 + $0x700] sm:$0xff] %v6494_v28 }
  0xa6   : > { %604 = vst [vmem:[#allocation3 + $0x710] sm:$0xff] %v6494_v28  ;;  %v2396_v0 = vpop.permute.xlu0 %2395 }
  0xa7   : > { %606 = vst [vmem:[#allocation3 + $0x720] sm:$0xff] %v6494_v28  ;;  %v2398_v2 = vpop.permute.xlu1 %2397 }
  0xa8   : > { %608 = vst [vmem:[#allocation3 + $0x730] sm:$0xff] %v6494_v28  ;;  %v2458_v13 = vsel %vm11242_vm3, %v2396_v0, %v2398_v2  ;;  %v2418_v18 = vpop.permute.xlu2 %2417 }
  0xa9   : > { %610 = vst [vmem:[#allocation3 + $0x740] sm:$0xff] %v6494_v28 }
  0xaa   : > { %612 = vst [vmem:[#allocation3 + $0x750] sm:$0xff] %v6494_v28 }
  0xab   : > { %614 = vst [vmem:[#allocation3 + $0x760] sm:$0xff] %v6494_v28 }
  0xac   : > { %616 = vst [vmem:[#allocation3 + $0x770] sm:$0xff] %v6494_v28 }
  0xad   : > { %618 = vst [vmem:[#allocation3 + $0x780] sm:$0xff] %v6494_v28 }
  0xae   : > { %620 = vst [vmem:[#allocation3 + $0x790] sm:$0xff] %v6494_v28  ;;  %v2402_v3 = vpop.permute.xlu0 %2401 }
  0xaf   : > { %622 = vst [vmem:[#allocation3 + $0x7a0] sm:$0xff] %v6494_v28  ;;  %v2404_v7 = vpop.permute.xlu1 %2403  ;;  %v2459_v15 = vsel %vm11242_vm3, %v2400_v1, %v2402_v3 }
  0xb0   : > { %624 = vst [vmem:[#allocation3 + $0x7b0] sm:$0xff] %v6494_v28  ;;  %v2460_v17 = vsel %vm11242_vm3, %v2404_v7, %v2406_v4  ;;  %v2424_v24 = vpop.permute.xlu2 %2423 }
  0xb1   : > { %626 = vst [vmem:[#allocation3 + $0x7c0] sm:$0xff] %v6494_v28 }
  0xb2   : > { %628 = vst [vmem:[#allocation3 + $0x7d0] sm:$0xff] %v6494_v28 }
  0xb3   : > { %630 = vst [vmem:[#allocation3 + $0x7e0] sm:$0xff] %v6494_v28 }
  0xb4   : > { %632 = vst [vmem:[#allocation3 + $0x7f0] sm:$0xff] %v6494_v28 }
  0xb5   : > { %634 = vst [vmem:[#allocation3 + $0x800] sm:$0xff] %v6494_v28 }
  0xb6   : > { %636 = vst [vmem:[#allocation3 + $0x810] sm:$0xff] %v6494_v28  ;;  %v2408_v9 = vpop.permute.xlu0 %2407 }
  0xb7   : > { %638 = vst [vmem:[#allocation3 + $0x820] sm:$0xff] %v6494_v28  ;;  %v2410_v14 = vpop.permute.xlu1 %2409 }
  0xb8   : > { %640 = vst [vmem:[#allocation3 + $0x830] sm:$0xff] %v6494_v28  ;;  %v2461_v19 = vsel %vm11242_vm3, %v2408_v9, %v2410_v14  ;;  %v2430_v30 = vpop.permute.xlu2 %2429 }
  0xb9   : > { %642 = vst [vmem:[#allocation3 + $0x840] sm:$0xff] %v6494_v28 }
  0xba   : > { %644 = vst [vmem:[#allocation3 + $0x850] sm:$0xff] %v6494_v28 }
  0xbb   : > { %646 = vst [vmem:[#allocation3 + $0x860] sm:$0xff] %v6494_v28 }
  0xbc   : > { %648 = vst [vmem:[#allocation3 + $0x870] sm:$0xff] %v6494_v28 }
  0xbd   : > { %650 = vst [vmem:[#allocation3 + $0x880] sm:$0xff] %v6494_v28 }
  0xbe   : > { %652 = vst [vmem:[#allocation3 + $0x890] sm:$0xff] %v6494_v28  ;;  %v2414_v16 = vpop.permute.xlu0 %2413 }
  0xbf   : > { %654 = vst [vmem:[#allocation3 + $0x8a0] sm:$0xff] %v6494_v28  ;;  %v2462_v20 = vsel %vm11242_vm3, %v2412_v11, %v2414_v16  ;;  %v2416_v21 = vpop.permute.xlu1 %2415 }
  0xc0   : > { %656 = vst [vmem:[#allocation3 + $0x8b0] sm:$0xff] %v6494_v28  ;;  %v2463_v22 = vsel %vm11242_vm3, %v2416_v21, %v2418_v18  ;;  %v2436_v34 = vpop.permute.xlu2 %2435 }
  0xc1   : > { %658 = vst [vmem:[#allocation3 + $0x8c0] sm:$0xff] %v6494_v28 }
  0xc2   : > { %660 = vst [vmem:[#allocation3 + $0x8d0] sm:$0xff] %v6494_v28 }
  0xc3   : > { %662 = vst [vmem:[#allocation3 + $0x8e0] sm:$0xff] %v6494_v28 }
  0xc4   : > { %664 = vst [vmem:[#allocation3 + $0x8f0] sm:$0xff] %v6494_v28 }
  0xc5   : > { %666 = vst [vmem:[#allocation3 + $0x900] sm:$0xff] %v6494_v28 }
  0xc6   : > { %668 = vst [vmem:[#allocation3 + $0x910] sm:$0xff] %v6494_v28  ;;  %v2420_v23 = vpop.permute.xlu0 %2419 }
  0xc7   : > { %670 = vst [vmem:[#allocation3 + $0x920] sm:$0xff] %v6494_v28  ;;  %v2422_v25 = vpop.permute.xlu1 %2421 }
  0xc8   : > { %672 = vst [vmem:[#allocation3 + $0x930] sm:$0xff] %v6494_v28  ;;  %v2464_v26 = vsel %vm11242_vm3, %v2420_v23, %v2422_v25  ;;  %v2442_v39 = vpop.permute.xlu2 %2441 }
  0xc9   : > { %674 = vst [vmem:[#allocation3 + $0x940] sm:$0xff] %v6494_v28 }
  0xca   : > { %676 = vst [vmem:[#allocation3 + $0x950] sm:$0xff] %v6494_v28 }
  0xcb   : > { %678 = vst [vmem:[#allocation3 + $0x960] sm:$0xff] %v6494_v28 }
  0xcc   : > { %680 = vst [vmem:[#allocation3 + $0x970] sm:$0xff] %v6494_v28 }
  0xcd   : > { %682 = vst [vmem:[#allocation3 + $0x980] sm:$0xff] %v6494_v28 }
  0xce   : > { %684 = vst [vmem:[#allocation3 + $0x990] sm:$0xff] %v6494_v28  ;;  %v2426_v27 = vpop.permute.xlu0 %2425 }
  0xcf   : > { %686 = vst [vmem:[#allocation3 + $0x9a0] sm:$0xff] %v6494_v28  ;;  %v2428_v31 = vpop.permute.xlu1 %2427 }
  0xd0   : > { %688 = vst [vmem:[#allocation3 + $0x9b0] sm:$0xff] %v6494_v28  ;;  %v2466_v32 = vsel %vm11242_vm3, %v2428_v31, %v2430_v30  ;;  %v2448_v43 = vpop.permute.xlu2 %2447 }
  0xd1   : > { %690 = vst [vmem:[#allocation3 + $0x9c0] sm:$0xff] %v6494_v28 }
  0xd2   : > { %692 = vst [vmem:[#allocation3 + $0x9d0] sm:$0xff] %v6494_v28 }
  0xd3   : > { %694 = vst [vmem:[#allocation3 + $0x9e0] sm:$0xff] %v6494_v28 }
  0xd4   : > { %696 = vst [vmem:[#allocation3 + $0x9f0] sm:$0xff] %v6494_v28 }
  0xd5   : > { %698 = vst [vmem:[#allocation3 + $0xa00] sm:$0xff] %v6494_v28 }
  0xd6   : > { %700 = vst [vmem:[#allocation3 + $0xa10] sm:$0xff] %v6494_v28  ;;  %v2432_v33 = vpop.permute.xlu0 %2431 }
  0xd7   : > { %702 = vst [vmem:[#allocation3 + $0xa20] sm:$0xff] %v6494_v28  ;;  %v2434_v35 = vpop.permute.xlu1 %2433 }
  0xd8   : > { %704 = vst [vmem:[#allocation3 + $0xa30] sm:$0xff] %v6494_v28  ;;  %v2467_v36 = vsel %vm11242_vm3, %v2432_v33, %v2434_v35 }
  0xd9   : > { %706 = vst [vmem:[#allocation3 + $0xa40] sm:$0xff] %v6494_v28 }
  0xda   : > { %708 = vst [vmem:[#allocation3 + $0xa50] sm:$0xff] %v6494_v28 }
  0xdb   : > { %710 = vst [vmem:[#allocation3 + $0xa60] sm:$0xff] %v6494_v28 }
  0xdc   : > { %712 = vst [vmem:[#allocation3 + $0xa70] sm:$0xff] %v6494_v28 }
  0xdd   : > { %714 = vst [vmem:[#allocation3 + $0xa80] sm:$0xff] %v6494_v28 }
  0xde   : > { %716 = vst [vmem:[#allocation3 + $0xa90] sm:$0xff] %v6494_v28  ;;  %v2438_v37 = vpop.permute.xlu0 %2437 }
  0xdf   : > { %718 = vst [vmem:[#allocation3 + $0xaa0] sm:$0xff] %v6494_v28  ;;  %v2468_v38 = vsel %vm11242_vm3, %v2436_v34, %v2438_v37  ;;  %v2440_v40 = vpop.permute.xlu1 %2439 }
  0xe0   : > { %720 = vst [vmem:[#allocation3 + $0xab0] sm:$0xff] %v6494_v28  ;;  %v2469_v41 = vsel %vm11242_vm3, %v2440_v40, %v2442_v39 }
  0xe1   : > { %722 = vst [vmem:[#allocation3 + $0xac0] sm:$0xff] %v6494_v28 }
  0xe2   : > { %724 = vst [vmem:[#allocation3 + $0xad0] sm:$0xff] %v6494_v28 }
  0xe3   : > { %726 = vst [vmem:[#allocation3 + $0xae0] sm:$0xff] %v6494_v28 }
  0xe4   : > { %728 = vst [vmem:[#allocation3 + $0xaf0] sm:$0xff] %v6494_v28 }
  0xe5   : > { %730 = vst [vmem:[#allocation3 + $0xb00] sm:$0xff] %v6494_v28 }
  0xe6   : > { %732 = vst [vmem:[#allocation3 + $0xb10] sm:$0xff] %v6494_v28  ;;  %v2444_v42 = vpop.permute.xlu0 %2443 }
  0xe7   : > { %734 = vst [vmem:[#allocation3 + $0xb20] sm:$0xff] %v6494_v28  ;;  %v2446_v44 = vpop.permute.xlu1 %2445 }
  0xe8   : > { %736 = vst [vmem:[#allocation3 + $0xb30] sm:$0xff] %v6494_v28  ;;  %v2470_v45 = vsel %vm11242_vm3, %v2444_v42, %v2446_v44 }
  0xe9   : > { %738 = vst [vmem:[#allocation3 + $0xb40] sm:$0xff] %v6494_v28 }
  0xea   : > { %740 = vst [vmem:[#allocation3 + $0xb50] sm:$0xff] %v6494_v28 }
  0xeb   : > { %742 = vst [vmem:[#allocation3 + $0xb60] sm:$0xff] %v6494_v28 }
  0xec   : > { %744 = vst [vmem:[#allocation3 + $0xb70] sm:$0xff] %v6494_v28 }
  0xed   : > { %746 = vst [vmem:[#allocation3 + $0xb80] sm:$0xff] %v6494_v28 }
  0xee   : > { %748 = vst [vmem:[#allocation3 + $0xb90] sm:$0xff] %v6494_v28  ;;  %v2450_v46 = vpop.permute.xlu0 %2449 }
  0xef   : > { %750 = vst [vmem:[#allocation3 + $0xba0] sm:$0xff] %v6494_v28  ;;  %v2471_v47 = vsel %vm11242_vm3, %v2448_v43, %v2450_v46 }
  0xf0   : > { %752 = vst [vmem:[#allocation3 + $0xbb0] sm:$0xff] %v6494_v28 }
  0xf1   : > { %754 = vst [vmem:[#allocation3 + $0xbc0] sm:$0xff] %v6494_v28 }
  0xf2   : > { %756 = vst [vmem:[#allocation3 + $0xbd0] sm:$0xff] %v6494_v28 }
  0xf3   : > { %758 = vst [vmem:[#allocation3 + $0xbe0] sm:$0xff] %v6494_v28 }
  0xf4   : > { %760 = vst [vmem:[#allocation3 + $0xbf0] sm:$0xff] %v6494_v28 }
  0xf5   : > { %762 = vst [vmem:[#allocation3 + $0xc00] sm:$0xff] %v6494_v28 }
  0xf6   : > { %764 = vst [vmem:[#allocation3 + $0xc10] sm:$0xff] %v6494_v28 }
  0xf7   : > { %766 = vst [vmem:[#allocation3 + $0xc20] sm:$0xff] %v6494_v28 }
  0xf8   : > { %768 = vst [vmem:[#allocation3 + $0xc30] sm:$0xff] %v6494_v28 }
  0xf9   : > { %770 = vst [vmem:[#allocation3 + $0xc40] sm:$0xff] %v6494_v28 }
  0xfa   : > { %772 = vst [vmem:[#allocation3 + $0xc50] sm:$0xff] %v6494_v28 }
  0xfb   : > { %774 = vst [vmem:[#allocation3 + $0xc60] sm:$0xff] %v6494_v28 }
  0xfc   : > { %776 = vst [vmem:[#allocation3 + $0xc70] sm:$0xff] %v6494_v28 }
  0xfd   : > { %778 = vst [vmem:[#allocation3 + $0xc80] sm:$0xff] %v6494_v28 }
  0xfe   : > { %780 = vst [vmem:[#allocation3 + $0xc90] sm:$0xff] %v6494_v28 }
  0xff   : > { %782 = vst [vmem:[#allocation3 + $0xca0] sm:$0xff] %v6494_v28 }
 0x100   : > { %784 = vst [vmem:[#allocation3 + $0xcb0] sm:$0xff] %v6494_v28 }
 0x101   : > { %786 = vst [vmem:[#allocation3 + $0xcc0] sm:$0xff] %v6494_v28 }
 0x102   : > { %788 = vst [vmem:[#allocation3 + $0xcd0] sm:$0xff] %v6494_v28 }
 0x103   : > { %790 = vst [vmem:[#allocation3 + $0xce0] sm:$0xff] %v6494_v28 }
 0x104   : > { %792 = vst [vmem:[#allocation3 + $0xcf0] sm:$0xff] %v6494_v28 }
 0x105   : > { %794 = vst [vmem:[#allocation3 + $0xd00] sm:$0xff] %v6494_v28 }
 0x106   : > { %796 = vst [vmem:[#allocation3 + $0xd10] sm:$0xff] %v6494_v28 }
 0x107   : > { %798 = vst [vmem:[#allocation3 + $0xd20] sm:$0xff] %v6494_v28 }
 0x108   : > { %800 = vst [vmem:[#allocation3 + $0xd30] sm:$0xff] %v6494_v28 }
 0x109   : > { %802 = vst [vmem:[#allocation3 + $0xd40] sm:$0xff] %v6494_v28 }
 0x10a   : > { %804 = vst [vmem:[#allocation3 + $0xd50] sm:$0xff] %v6494_v28 }
 0x10b   : > { %806 = vst [vmem:[#allocation3 + $0xd60] sm:$0xff] %v6494_v28 }
 0x10c   : > { %808 = vst [vmem:[#allocation3 + $0xd70] sm:$0xff] %v6494_v28 }
 0x10d   : > { %810 = vst [vmem:[#allocation3 + $0xd80] sm:$0xff] %v6494_v28 }
 0x10e   : > { %812 = vst [vmem:[#allocation3 + $0xd90] sm:$0xff] %v6494_v28 }
 0x10f   : > { %814 = vst [vmem:[#allocation3 + $0xda0] sm:$0xff] %v6494_v28 }
 0x110   : > { %816 = vst [vmem:[#allocation3 + $0xdb0] sm:$0xff] %v6494_v28 }
 0x111   : > { %818 = vst [vmem:[#allocation3 + $0xdc0] sm:$0xff] %v6494_v28 }
 0x112   : > { %820 = vst [vmem:[#allocation3 + $0xdd0] sm:$0xff] %v6494_v28 }
 0x113   : > { %822 = vst [vmem:[#allocation3 + $0xde0] sm:$0xff] %v6494_v28 }
 0x114   : > { %824 = vst [vmem:[#allocation3 + $0xdf0] sm:$0xff] %v6494_v28 }
 0x115   : > { %826 = vst [vmem:[#allocation3 + $0xe00] sm:$0xff] %v6494_v28 }
 0x116   : > { %828 = vst [vmem:[#allocation3 + $0xe10] sm:$0xff] %v6494_v28 }
 0x117   : > { %830 = vst [vmem:[#allocation3 + $0xe20] sm:$0xff] %v6494_v28 }
 0x118   : > { %832 = vst [vmem:[#allocation3 + $0xe30] sm:$0xff] %v6494_v28 }
 0x119   : > { %834 = vst [vmem:[#allocation3 + $0xe40] sm:$0xff] %v6494_v28 }
 0x11a   : > { %836 = vst [vmem:[#allocation3 + $0xe50] sm:$0xff] %v6494_v28 }
 0x11b   : > { %838 = vst [vmem:[#allocation3 + $0xe60] sm:$0xff] %v6494_v28 }
 0x11c   : > { %840 = vst [vmem:[#allocation3 + $0xe70] sm:$0xff] %v6494_v28 }
 0x11d   : > { %842 = vst [vmem:[#allocation3 + $0xe80] sm:$0xff] %v6494_v28 }
 0x11e   : > { %844 = vst [vmem:[#allocation3 + $0xe90] sm:$0xff] %v6494_v28 }
 0x11f   : > { %846 = vst [vmem:[#allocation3 + $0xea0] sm:$0xff] %v6494_v28 }
 0x120   : > { %848 = vst [vmem:[#allocation3 + $0xeb0] sm:$0xff] %v6494_v28 }
 0x121   : > { %850 = vst [vmem:[#allocation3 + $0xec0] sm:$0xff] %v6494_v28 }
 0x122   : > { %852 = vst [vmem:[#allocation3 + $0xed0] sm:$0xff] %v6494_v28 }
 0x123   : > { %854 = vst [vmem:[#allocation3 + $0xee0] sm:$0xff] %v6494_v28 }
 0x124   : > { %856 = vst [vmem:[#allocation3 + $0xef0] sm:$0xff] %v6494_v28 }
 0x125   : > { %858 = vst [vmem:[#allocation3 + $0xf00] sm:$0xff] %v6494_v28 }
 0x126   : > { %860 = vst [vmem:[#allocation3 + $0xf10] sm:$0xff] %v6494_v28 }
 0x127   : > { %862 = vst [vmem:[#allocation3 + $0xf20] sm:$0xff] %v6494_v28 }
 0x128   : > { %864 = vst [vmem:[#allocation3 + $0xf30] sm:$0xff] %v6494_v28 }
 0x129   : > { %866 = vst [vmem:[#allocation3 + $0xf40] sm:$0xff] %v6494_v28 }
 0x12a   : > { %868 = vst [vmem:[#allocation3 + $0xf50] sm:$0xff] %v6494_v28 }
 0x12b   : > { %870 = vst [vmem:[#allocation3 + $0xf60] sm:$0xff] %v6494_v28 }
 0x12c   : > { %872 = vst [vmem:[#allocation3 + $0xf70] sm:$0xff] %v6494_v28 }
 0x12d   : > { %874 = vst [vmem:[#allocation3 + $0xf80] sm:$0xff] %v6494_v28 }
 0x12e   : > { %876 = vst [vmem:[#allocation3 + $0xf90] sm:$0xff] %v6494_v28 }
 0x12f   : > { %878 = vst [vmem:[#allocation3 + $0xfa0] sm:$0xff] %v6494_v28 }
 0x130   : > { %880 = vst [vmem:[#allocation3 + $0xfb0] sm:$0xff] %v6494_v28 }
 0x131   : > { %882 = vst [vmem:[#allocation3 + $0xfc0] sm:$0xff] %v6494_v28 }
 0x132   : > { %884 = vst [vmem:[#allocation3 + $0xfd0] sm:$0xff] %v6494_v28 }
 0x133   : > { %886 = vst [vmem:[#allocation3 + $0xfe0] sm:$0xff] %v6494_v28 }
 0x134   : > { %888 = vst [vmem:[#allocation3 + $0xff0] sm:$0xff] %v6494_v28 }
 0x135   : > { %890 = vst [vmem:[#allocation3 + $0x1000] sm:$0xff] %v6494_v28 }
 0x136   : > { %892 = vst [vmem:[#allocation3 + $0x1010] sm:$0xff] %v6494_v28 }
 0x137   : > { %894 = vst [vmem:[#allocation3 + $0x1020] sm:$0xff] %v6494_v28 }
 0x138   : > { %896 = vst [vmem:[#allocation3 + $0x1030] sm:$0xff] %v6494_v28 }
 0x139   : > { %898 = vst [vmem:[#allocation3 + $0x1040] sm:$0xff] %v6494_v28 }
 0x13a   : > { %900 = vst [vmem:[#allocation3 + $0x1050] sm:$0xff] %v6494_v28 }
 0x13b   : > { %902 = vst [vmem:[#allocation3 + $0x1060] sm:$0xff] %v6494_v28 }
 0x13c   : > { %904 = vst [vmem:[#allocation3 + $0x1070] sm:$0xff] %v6494_v28 }
 0x13d   : > { %906 = vst [vmem:[#allocation3 + $0x1080] sm:$0xff] %v6494_v28 }
 0x13e   : > { %908 = vst [vmem:[#allocation3 + $0x1090] sm:$0xff] %v6494_v28 }
 0x13f   : > { %910 = vst [vmem:[#allocation3 + $0x10a0] sm:$0xff] %v6494_v28 }
 0x140   : > { %912 = vst [vmem:[#allocation3 + $0x10b0] sm:$0xff] %v6494_v28 }
 0x141   : > { %914 = vst [vmem:[#allocation3 + $0x10c0] sm:$0xff] %v6494_v28 }
 0x142   : > { %916 = vst [vmem:[#allocation3 + $0x10d0] sm:$0xff] %v6494_v28 }
 0x143   : > { %918 = vst [vmem:[#allocation3 + $0x10e0] sm:$0xff] %v6494_v28 }
 0x144   : > { %920 = vst [vmem:[#allocation3 + $0x10f0] sm:$0xff] %v6494_v28 }
 0x145   : > { %922 = vst [vmem:[#allocation3 + $0x1100] sm:$0xff] %v6494_v28 }
 0x146   : > { %924 = vst [vmem:[#allocation3 + $0x1110] sm:$0xff] %v6494_v28 }
 0x147   : > { %926 = vst [vmem:[#allocation3 + $0x1120] sm:$0xff] %v6494_v28 }
 0x148   : > { %928 = vst [vmem:[#allocation3 + $0x1130] sm:$0xff] %v6494_v28 }
 0x149   : > { %930 = vst [vmem:[#allocation3 + $0x1140] sm:$0xff] %v6494_v28 }
 0x14a   : > { %932 = vst [vmem:[#allocation3 + $0x1150] sm:$0xff] %v6494_v28 }
 0x14b   : > { %934 = vst [vmem:[#allocation3 + $0x1160] sm:$0xff] %v6494_v28 }
 0x14c   : > { %936 = vst [vmem:[#allocation3 + $0x1170] sm:$0xff] %v6494_v28 }
 0x14d   : > { %938 = vst [vmem:[#allocation3 + $0x1180] sm:$0xff] %v6494_v28 }
 0x14e   : > { %940 = vst [vmem:[#allocation3 + $0x1190] sm:$0xff] %v6494_v28 }
 0x14f   : > { %942 = vst [vmem:[#allocation3 + $0x11a0] sm:$0xff] %v6494_v28 }
 0x150   : > { %944 = vst [vmem:[#allocation3 + $0x11b0] sm:$0xff] %v6494_v28 }
 0x151   : > { %946 = vst [vmem:[#allocation3 + $0x11c0] sm:$0xff] %v6494_v28 }
 0x152   : > { %948 = vst [vmem:[#allocation3 + $0x11d0] sm:$0xff] %v6494_v28 }
 0x153   : > { %950 = vst [vmem:[#allocation3 + $0x11e0] sm:$0xff] %v6494_v28 }
 0x154   : > { %952 = vst [vmem:[#allocation3 + $0x11f0] sm:$0xff] %v6494_v28 }
 0x155   : > { %954 = vst [vmem:[#allocation3 + $0x1200] sm:$0xff] %v6494_v28 }
 0x156   : > { %956 = vst [vmem:[#allocation3 + $0x1210] sm:$0xff] %v6494_v28 }
 0x157   : > { %958 = vst [vmem:[#allocation3 + $0x1220] sm:$0xff] %v6494_v28 }
 0x158   : > { %960 = vst [vmem:[#allocation3 + $0x1230] sm:$0xff] %v6494_v28 }
 0x159   : > { %962 = vst [vmem:[#allocation3 + $0x1240] sm:$0xff] %v6494_v28 }
 0x15a   : > { %964 = vst [vmem:[#allocation3 + $0x1250] sm:$0xff] %v6494_v28 }
 0x15b   : > { %966 = vst [vmem:[#allocation3 + $0x1260] sm:$0xff] %v6494_v28 }
 0x15c   : > { %968 = vst [vmem:[#allocation3 + $0x1270] sm:$0xff] %v6494_v28 }
 0x15d   : > { %970 = vst [vmem:[#allocation3 + $0x1280] sm:$0xff] %v6494_v28 }
 0x15e   : > { %972 = vst [vmem:[#allocation3 + $0x1290] sm:$0xff] %v6494_v28 }
 0x15f   : > { %974 = vst [vmem:[#allocation3 + $0x12a0] sm:$0xff] %v6494_v28 }
 0x160   : > { %976 = vst [vmem:[#allocation3 + $0x12b0] sm:$0xff] %v6494_v28 }
 0x161   : > { %978 = vst [vmem:[#allocation3 + $0x12c0] sm:$0xff] %v6494_v28 }
 0x162   : > { %980 = vst [vmem:[#allocation3 + $0x12d0] sm:$0xff] %v6494_v28 }
 0x163   : > { %982 = vst [vmem:[#allocation3 + $0x12e0] sm:$0xff] %v6494_v28 }
 0x164   : > { %984 = vst [vmem:[#allocation3 + $0x12f0] sm:$0xff] %v6494_v28 }
 0x165   : > { %986 = vst [vmem:[#allocation3 + $0x1300] sm:$0xff] %v6494_v28 }
 0x166   : > { %988 = vst [vmem:[#allocation3 + $0x1310] sm:$0xff] %v6494_v28 }
 0x167   : > { %990 = vst [vmem:[#allocation3 + $0x1320] sm:$0xff] %v6494_v28 }
 0x168   : > { %992 = vst [vmem:[#allocation3 + $0x1330] sm:$0xff] %v6494_v28 }
 0x169   : > { %994 = vst [vmem:[#allocation4] sm:$0xff] %v6494_v28 }
 0x16a   : > { %997 = vst [vmem:[#allocation4 + $0x10] sm:$0xff] %v6494_v28 }
 0x16b   : > { %999 = vst [vmem:[#allocation4 + $0x20] sm:$0xff] %v6494_v28 }
 0x16c   : > { %1001 = vst [vmem:[#allocation4 + $0x30] sm:$0xff] %v6494_v28 }
 0x16d   : > { %1003 = vst [vmem:[#allocation4 + $0x40] sm:$0xff] %v6494_v28 }
 0x16e   : > { %1005 = vst [vmem:[#allocation4 + $0x50] sm:$0xff] %v6494_v28 }
 0x16f   : > { %1007 = vst [vmem:[#allocation4 + $0x60] sm:$0xff] %v6494_v28 }
 0x170   : > { %1009 = vst [vmem:[#allocation4 + $0x70] sm:$0xff] %v6494_v28 }
 0x171   : > { %1011 = vst [vmem:[#allocation4 + $0x80] sm:$0xff] %v6494_v28 }
 0x172   : > { %1013 = vst [vmem:[#allocation4 + $0x90] sm:$0xff] %v6494_v28 }
 0x173   : > { %1015 = vst [vmem:[#allocation4 + $0xa0] sm:$0xff] %v6494_v28 }
 0x174   : > { %1017 = vst [vmem:[#allocation4 + $0xb0] sm:$0xff] %v6494_v28 }
 0x175   : > { %1019 = vst [vmem:[#allocation4 + $0xc0] sm:$0xff] %v6494_v28 }
 0x176   : > { %1021 = vst [vmem:[#allocation4 + $0xd0] sm:$0xff] %v6494_v28 }
 0x177   : > { %1023 = vst [vmem:[#allocation4 + $0xe0] sm:$0xff] %v6494_v28 }
 0x178   : > { %1025 = vst [vmem:[#allocation4 + $0xf0] sm:$0xff] %v6494_v28 }
 0x179   : > { %1027 = vst [vmem:[#allocation4 + $0x100] sm:$0xff] %v6494_v28 }
 0x17a   : > { %1029 = vst [vmem:[#allocation4 + $0x110] sm:$0xff] %v6494_v28 }
 0x17b   : > { %1031 = vst [vmem:[#allocation4 + $0x120] sm:$0xff] %v6494_v28 }
 0x17c   : > { %1033 = vst [vmem:[#allocation4 + $0x130] sm:$0xff] %v6494_v28 }
 0x17d   : > { %1035 = vst [vmem:[#allocation4 + $0x140] sm:$0xff] %v6494_v28 }
 0x17e   : > { %1037 = vst [vmem:[#allocation4 + $0x150] sm:$0xff] %v6494_v28 }
 0x17f   : > { %1039 = vst [vmem:[#allocation4 + $0x160] sm:$0xff] %v6494_v28 }
 0x180   : > { %1041 = vst [vmem:[#allocation4 + $0x170] sm:$0xff] %v6494_v28 }
 0x181   : > { %1043 = vst [vmem:[#allocation4 + $0x180] sm:$0xff] %v6494_v28 }
 0x182   : > { %1045 = vst [vmem:[#allocation4 + $0x190] sm:$0xff] %v6494_v28 }
 0x183   : > { %1047 = vst [vmem:[#allocation4 + $0x1a0] sm:$0xff] %v6494_v28 }
 0x184   : > { %1049 = vst [vmem:[#allocation4 + $0x1b0] sm:$0xff] %v6494_v28 }
 0x185   : > { %1051 = vst [vmem:[#allocation4 + $0x1c0] sm:$0xff] %v6494_v28 }
 0x186   : > { %1053 = vst [vmem:[#allocation4 + $0x1d0] sm:$0xff] %v6494_v28 }
 0x187   : > { %1055 = vst [vmem:[#allocation4 + $0x1e0] sm:$0xff] %v6494_v28 }
 0x188   : > { %1057 = vst [vmem:[#allocation4 + $0x1f0] sm:$0xff] %v6494_v28 }
 0x189   : > { %1059 = vst [vmem:[#allocation4 + $0x200] sm:$0xff] %v6494_v28 }
 0x18a   : > { %1061 = vst [vmem:[#allocation4 + $0x210] sm:$0xff] %v6494_v28 }
 0x18b   : > { %1063 = vst [vmem:[#allocation4 + $0x220] sm:$0xff] %v6494_v28 }
 0x18c   : > { %1065 = vst [vmem:[#allocation4 + $0x230] sm:$0xff] %v6494_v28 }
 0x18d   : > { %1067 = vst [vmem:[#allocation4 + $0x240] sm:$0xff] %v6494_v28 }
 0x18e   : > { %1069 = vst [vmem:[#allocation4 + $0x250] sm:$0xff] %v6494_v28 }
 0x18f   : > { %1071 = vst [vmem:[#allocation4 + $0x260] sm:$0xff] %v6494_v28 }
 0x190   : > { %1073 = vst [vmem:[#allocation4 + $0x270] sm:$0xff] %v6494_v28 }
 0x191   : > { %1075 = vst [vmem:[#allocation4 + $0x280] sm:$0xff] %v6494_v28 }
 0x192   : > { %1077 = vst [vmem:[#allocation4 + $0x290] sm:$0xff] %v6494_v28 }
 0x193   : > { %1079 = vst [vmem:[#allocation4 + $0x2a0] sm:$0xff] %v6494_v28 }
 0x194   : > { %1081 = vst [vmem:[#allocation4 + $0x2b0] sm:$0xff] %v6494_v28 }
 0x195   : > { %1083 = vst [vmem:[#allocation4 + $0x2c0] sm:$0xff] %v6494_v28 }
 0x196   : > { %1085 = vst [vmem:[#allocation4 + $0x2d0] sm:$0xff] %v6494_v28 }
 0x197   : > { %1087 = vst [vmem:[#allocation4 + $0x2e0] sm:$0xff] %v6494_v28 }
 0x198   : > { %1089 = vst [vmem:[#allocation4 + $0x2f0] sm:$0xff] %v6494_v28 }
 0x199   : > { %1091 = vst [vmem:[#allocation4 + $0x300] sm:$0xff] %v6494_v28 }
 0x19a   : > { %1093 = vst [vmem:[#allocation4 + $0x310] sm:$0xff] %v6494_v28 }
 0x19b   : > { %1095 = vst [vmem:[#allocation4 + $0x320] sm:$0xff] %v6494_v28 }
 0x19c   : > { %1097 = vst [vmem:[#allocation4 + $0x330] sm:$0xff] %v6494_v28 }
 0x19d   : > { %1099 = vst [vmem:[#allocation4 + $0x340] sm:$0xff] %v6494_v28 }
 0x19e   : > { %1101 = vst [vmem:[#allocation4 + $0x350] sm:$0xff] %v6494_v28 }
 0x19f   : > { %1103 = vst [vmem:[#allocation4 + $0x360] sm:$0xff] %v6494_v28 }
 0x1a0   : > { %1105 = vst [vmem:[#allocation4 + $0x370] sm:$0xff] %v6494_v28 }
 0x1a1   : > { %1107 = vst [vmem:[#allocation4 + $0x380] sm:$0xff] %v6494_v28 }
 0x1a2   : > { %1109 = vst [vmem:[#allocation4 + $0x390] sm:$0xff] %v6494_v28 }
 0x1a3   : > { %1111 = vst [vmem:[#allocation4 + $0x3a0] sm:$0xff] %v6494_v28 }
 0x1a4   : > { %1113 = vst [vmem:[#allocation4 + $0x3b0] sm:$0xff] %v6494_v28 }
 0x1a5   : > { %1115 = vst [vmem:[#allocation4 + $0x3c0] sm:$0xff] %v6494_v28 }
 0x1a6   : > { %1117 = vst [vmem:[#allocation4 + $0x3d0] sm:$0xff] %v6494_v28 }
 0x1a7   : > { %1119 = vst [vmem:[#allocation4 + $0x3e0] sm:$0xff] %v6494_v28 }
 0x1a8   : > { %1121 = vst [vmem:[#allocation4 + $0x3f0] sm:$0xff] %v6494_v28 }
 0x1a9   : > { %1123 = vst [vmem:[#allocation4 + $0x400] sm:$0xff] %v6494_v28 }
 0x1aa   : > { %1125 = vst [vmem:[#allocation4 + $0x410] sm:$0xff] %v6494_v28 }
 0x1ab   : > { %1127 = vst [vmem:[#allocation4 + $0x420] sm:$0xff] %v6494_v28 }
 0x1ac   : > { %1129 = vst [vmem:[#allocation4 + $0x430] sm:$0xff] %v6494_v28 }
 0x1ad   : > { %1131 = vst [vmem:[#allocation4 + $0x440] sm:$0xff] %v6494_v28 }
 0x1ae   : > { %1133 = vst [vmem:[#allocation4 + $0x450] sm:$0xff] %v6494_v28 }
 0x1af   : > { %1135 = vst [vmem:[#allocation4 + $0x460] sm:$0xff] %v6494_v28 }
 0x1b0   : > { %1137 = vst [vmem:[#allocation4 + $0x470] sm:$0xff] %v6494_v28 }
 0x1b1   : > { %1139 = vst [vmem:[#allocation4 + $0x480] sm:$0xff] %v6494_v28 }
 0x1b2   : > { %1141 = vst [vmem:[#allocation4 + $0x490] sm:$0xff] %v6494_v28 }
 0x1b3   : > { %1143 = vst [vmem:[#allocation4 + $0x4a0] sm:$0xff] %v6494_v28 }
 0x1b4   : > { %1145 = vst [vmem:[#allocation4 + $0x4b0] sm:$0xff] %v6494_v28 }
 0x1b5   : > { %1147 = vst [vmem:[#allocation4 + $0x4c0] sm:$0xff] %v6494_v28 }
 0x1b6   : > { %1149 = vst [vmem:[#allocation4 + $0x4d0] sm:$0xff] %v6494_v28 }
 0x1b7   : > { %1151 = vst [vmem:[#allocation4 + $0x4e0] sm:$0xff] %v6494_v28 }
 0x1b8   : > { %1153 = vst [vmem:[#allocation4 + $0x4f0] sm:$0xff] %v6494_v28 }
 0x1b9   : > { %1155 = vst [vmem:[#allocation4 + $0x500] sm:$0xff] %v6494_v28 }
 0x1ba   : > { %1157 = vst [vmem:[#allocation4 + $0x510] sm:$0xff] %v6494_v28 }
 0x1bb   : > { %1159 = vst [vmem:[#allocation4 + $0x520] sm:$0xff] %v6494_v28 }
 0x1bc   : > { %1161 = vst [vmem:[#allocation4 + $0x530] sm:$0xff] %v6494_v28 }
 0x1bd   : > { %1163 = vst [vmem:[#allocation4 + $0x540] sm:$0xff] %v6494_v28 }
 0x1be   : > { %1165 = vst [vmem:[#allocation4 + $0x550] sm:$0xff] %v6494_v28 }
 0x1bf   : > { %1167 = vst [vmem:[#allocation4 + $0x560] sm:$0xff] %v6494_v28 }
 0x1c0   : > { %1169 = vst [vmem:[#allocation4 + $0x570] sm:$0xff] %v6494_v28 }
 0x1c1   : > { %1171 = vst [vmem:[#allocation4 + $0x580] sm:$0xff] %v6494_v28 }
 0x1c2   : > { %1173 = vst [vmem:[#allocation4 + $0x590] sm:$0xff] %v6494_v28 }
 0x1c3   : > { %1175 = vst [vmem:[#allocation4 + $0x5a0] sm:$0xff] %v6494_v28 }
 0x1c4   : > { %1177 = vst [vmem:[#allocation4 + $0x5b0] sm:$0xff] %v6494_v28 }
 0x1c5   : > { %1179 = vst [vmem:[#allocation4 + $0x5c0] sm:$0xff] %v6494_v28 }
 0x1c6   : > { %1181 = vst [vmem:[#allocation4 + $0x5d0] sm:$0xff] %v6494_v28 }
 0x1c7   : > { %1183 = vst [vmem:[#allocation4 + $0x5e0] sm:$0xff] %v6494_v28 }
 0x1c8   : > { %1185 = vst [vmem:[#allocation4 + $0x5f0] sm:$0xff] %v6494_v28 }
 0x1c9   : > { %1187 = vst [vmem:[#allocation4 + $0x600] sm:$0xff] %v6494_v28 }
 0x1ca   : > { %1189 = vst [vmem:[#allocation4 + $0x610] sm:$0xff] %v6494_v28 }
 0x1cb   : > { %1191 = vst [vmem:[#allocation4 + $0x620] sm:$0xff] %v6494_v28 }
 0x1cc   : > { %1193 = vst [vmem:[#allocation4 + $0x630] sm:$0xff] %v6494_v28 }
 0x1cd   : > { %1195 = vst [vmem:[#allocation4 + $0x640] sm:$0xff] %v6494_v28 }
 0x1ce   : > { %1197 = vst [vmem:[#allocation4 + $0x650] sm:$0xff] %v6494_v28 }
 0x1cf   : > { %1199 = vst [vmem:[#allocation4 + $0x660] sm:$0xff] %v6494_v28 }
 0x1d0   : > { %1201 = vst [vmem:[#allocation4 + $0x670] sm:$0xff] %v6494_v28 }
 0x1d1   : > { %1203 = vst [vmem:[#allocation4 + $0x680] sm:$0xff] %v6494_v28 }
 0x1d2   : > { %1205 = vst [vmem:[#allocation4 + $0x690] sm:$0xff] %v6494_v28 }
 0x1d3   : > { %1207 = vst [vmem:[#allocation4 + $0x6a0] sm:$0xff] %v6494_v28 }
 0x1d4   : > { %1209 = vst [vmem:[#allocation4 + $0x6b0] sm:$0xff] %v6494_v28 }
 0x1d5   : > { %1211 = vst [vmem:[#allocation4 + $0x6c0] sm:$0xff] %v6494_v28 }
 0x1d6   : > { %1213 = vst [vmem:[#allocation4 + $0x6d0] sm:$0xff] %v6494_v28 }
 0x1d7   : > { %1215 = vst [vmem:[#allocation4 + $0x6e0] sm:$0xff] %v6494_v28 }
 0x1d8   : > { %1217 = vst [vmem:[#allocation4 + $0x6f0] sm:$0xff] %v6494_v28 }
 0x1d9   : > { %1219 = vst [vmem:[#allocation4 + $0x700] sm:$0xff] %v6494_v28 }
 0x1da   : > { %1221 = vst [vmem:[#allocation4 + $0x710] sm:$0xff] %v6494_v28 }
 0x1db   : > { %1223 = vst [vmem:[#allocation4 + $0x720] sm:$0xff] %v6494_v28 }
 0x1dc   : > { %1225 = vst [vmem:[#allocation4 + $0x730] sm:$0xff] %v6494_v28 }
 0x1dd   : > { %1227 = vst [vmem:[#allocation4 + $0x740] sm:$0xff] %v6494_v28 }
 0x1de   : > { %1229 = vst [vmem:[#allocation4 + $0x750] sm:$0xff] %v6494_v28 }
 0x1df   : > { %1231 = vst [vmem:[#allocation4 + $0x760] sm:$0xff] %v6494_v28 }
 0x1e0   : > { %1233 = vst [vmem:[#allocation4 + $0x770] sm:$0xff] %v6494_v28 }
 0x1e1   : > { %1235 = vst [vmem:[#allocation4 + $0x780] sm:$0xff] %v6494_v28 }
 0x1e2   : > { %1237 = vst [vmem:[#allocation4 + $0x790] sm:$0xff] %v6494_v28 }
 0x1e3   : > { %1239 = vst [vmem:[#allocation4 + $0x7a0] sm:$0xff] %v6494_v28 }
 0x1e4   : > { %1241 = vst [vmem:[#allocation4 + $0x7b0] sm:$0xff] %v6494_v28 }
 0x1e5   : > { %1243 = vst [vmem:[#allocation4 + $0x7c0] sm:$0xff] %v6494_v28 }
 0x1e6   : > { %1245 = vst [vmem:[#allocation4 + $0x7d0] sm:$0xff] %v6494_v28 }
 0x1e7   : > { %1247 = vst [vmem:[#allocation4 + $0x7e0] sm:$0xff] %v6494_v28 }
 0x1e8   : > { %1249 = vst [vmem:[#allocation4 + $0x7f0] sm:$0xff] %v6494_v28 }
 0x1e9   : > { %1251 = vst [vmem:[#allocation4 + $0x800] sm:$0xff] %v6494_v28 }
 0x1ea   : > { %1253 = vst [vmem:[#allocation4 + $0x810] sm:$0xff] %v6494_v28 }
 0x1eb   : > { %1255 = vst [vmem:[#allocation4 + $0x820] sm:$0xff] %v6494_v28 }
 0x1ec   : > { %1257 = vst [vmem:[#allocation4 + $0x830] sm:$0xff] %v6494_v28 }
 0x1ed   : > { %1259 = vst [vmem:[#allocation4 + $0x840] sm:$0xff] %v6494_v28 }
 0x1ee   : > { %1261 = vst [vmem:[#allocation4 + $0x850] sm:$0xff] %v6494_v28 }
 0x1ef   : > { %1263 = vst [vmem:[#allocation4 + $0x860] sm:$0xff] %v6494_v28 }
 0x1f0   : > { %1265 = vst [vmem:[#allocation4 + $0x870] sm:$0xff] %v6494_v28 }
 0x1f1   : > { %1267 = vst [vmem:[#allocation4 + $0x880] sm:$0xff] %v6494_v28 }
 0x1f2   : > { %1269 = vst [vmem:[#allocation4 + $0x890] sm:$0xff] %v6494_v28 }
 0x1f3   : > { %1271 = vst [vmem:[#allocation4 + $0x8a0] sm:$0xff] %v6494_v28 }
 0x1f4   : > { %1273 = vst [vmem:[#allocation4 + $0x8b0] sm:$0xff] %v6494_v28 }
 0x1f5   : > { %1275 = vst [vmem:[#allocation4 + $0x8c0] sm:$0xff] %v6494_v28 }
 0x1f6   : > { %1277 = vst [vmem:[#allocation4 + $0x8d0] sm:$0xff] %v6494_v28 }
 0x1f7   : > { %1279 = vst [vmem:[#allocation4 + $0x8e0] sm:$0xff] %v6494_v28 }
 0x1f8   : > { %1281 = vst [vmem:[#allocation4 + $0x8f0] sm:$0xff] %v6494_v28 }
 0x1f9   : > { %1283 = vst [vmem:[#allocation4 + $0x900] sm:$0xff] %v6494_v28 }
 0x1fa   : > { %1285 = vst [vmem:[#allocation4 + $0x910] sm:$0xff] %v6494_v28 }
 0x1fb   : > { %1287 = vst [vmem:[#allocation4 + $0x920] sm:$0xff] %v6494_v28 }
 0x1fc   : > { %1289 = vst [vmem:[#allocation4 + $0x930] sm:$0xff] %v6494_v28 }
 0x1fd   : > { %1291 = vst [vmem:[#allocation4 + $0x940] sm:$0xff] %v6494_v28 }
 0x1fe   : > { %1293 = vst [vmem:[#allocation4 + $0x950] sm:$0xff] %v6494_v28 }
 0x1ff   : > { %1295 = vst [vmem:[#allocation4 + $0x960] sm:$0xff] %v6494_v28 }
 0x200   : > { %1297 = vst [vmem:[#allocation4 + $0x970] sm:$0xff] %v6494_v28 }
 0x201   : > { %1299 = vst [vmem:[#allocation4 + $0x980] sm:$0xff] %v6494_v28 }
 0x202   : > { %1301 = vst [vmem:[#allocation4 + $0x990] sm:$0xff] %v6494_v28 }
 0x203   : > { %1303 = vst [vmem:[#allocation4 + $0x9a0] sm:$0xff] %v6494_v28 }
 0x204   : > { %1305 = vst [vmem:[#allocation4 + $0x9b0] sm:$0xff] %v6494_v28  ;;  %v2465_v28 = vsel %vm11242_vm3, %v2424_v24, %v2426_v27 }
 0x205   : > { %1307 = vst [vmem:[#allocation4 + $0x9c0] sm:$0xff] %v7200_v50 }
 0x206   : > { %1309 = vst [vmem:[#allocation4 + $0x9d0] sm:$0xff] %v7200_v50 }
 0x207   : > { %1311 = vst [vmem:[#allocation4 + $0x9e0] sm:$0xff] %v7200_v50 }
 0x208   : > { %1313 = vst [vmem:[#allocation4 + $0x9f0] sm:$0xff] %v7200_v50 }
 0x209   : > { %1315 = vst [vmem:[#allocation4 + $0xa00] sm:$0xff] %v7200_v50 }
 0x20a   : > { %1317 = vst [vmem:[#allocation4 + $0xa10] sm:$0xff] %v7200_v50 }
 0x20b   : > { %1319 = vst [vmem:[#allocation4 + $0xa20] sm:$0xff] %v7200_v50 }
 0x20c   : > { %1321 = vst [vmem:[#allocation4 + $0xa30] sm:$0xff] %v7200_v50 }
 0x20d   : > { %1323 = vst [vmem:[#allocation4 + $0xa40] sm:$0xff] %v7200_v50 }
 0x20e   : > { %1325 = vst [vmem:[#allocation4 + $0xa50] sm:$0xff] %v7200_v50 }
 0x20f   : > { %1327 = vst [vmem:[#allocation4 + $0xa60] sm:$0xff] %v7200_v50 }
 0x210   : > { %1329 = vst [vmem:[#allocation4 + $0xa70] sm:$0xff] %v7200_v50 }
 0x211   : > { %1331 = vst [vmem:[#allocation4 + $0xa80] sm:$0xff] %v7200_v50 }
 0x212   : > { %1333 = vst [vmem:[#allocation4 + $0xa90] sm:$0xff] %v7200_v50 }
 0x213   : > { %1335 = vst [vmem:[#allocation4 + $0xaa0] sm:$0xff] %v7200_v50 }
 0x214   : > { %1337 = vst [vmem:[#allocation4 + $0xab0] sm:$0xff] %v7200_v50 }
 0x215   : > { %1339 = vst [vmem:[#allocation4 + $0xac0] sm:$0xff] %v7200_v50 }
 0x216   : > { %1341 = vst [vmem:[#allocation4 + $0xad0] sm:$0xff] %v7200_v50 }
 0x217   : > { %1343 = vst [vmem:[#allocation4 + $0xae0] sm:$0xff] %v7200_v50 }
 0x218   : > { %1345 = vst [vmem:[#allocation4 + $0xaf0] sm:$0xff] %v7200_v50 }
 0x219   : > { %1347 = vst [vmem:[#allocation4 + $0xb00] sm:$0xff] %v7200_v50 }
 0x21a   : > { %1349 = vst [vmem:[#allocation4 + $0xb10] sm:$0xff] %v7200_v50 }
 0x21b   : > { %1351 = vst [vmem:[#allocation4 + $0xb20] sm:$0xff] %v7200_v50 }
 0x21c   : > { %1353 = vst [vmem:[#allocation4 + $0xb30] sm:$0xff] %v7200_v50 }
 0x21d   : > { %1355 = vst [vmem:[#allocation4 + $0xb40] sm:$0xff] %v7200_v50 }
 0x21e   : > { %1357 = vst [vmem:[#allocation4 + $0xb50] sm:$0xff] %v7200_v50 }
 0x21f   : > { %1359 = vst [vmem:[#allocation4 + $0xb60] sm:$0xff] %v7200_v50 }
 0x220   : > { %1361 = vst [vmem:[#allocation4 + $0xb70] sm:$0xff] %v7200_v50 }
 0x221   : > { %1363 = vst [vmem:[#allocation4 + $0xb80] sm:$0xff] %v7200_v50 }
 0x222   : > { %1365 = vst [vmem:[#allocation4 + $0xb90] sm:$0xff] %v7200_v50 }
 0x223   : > { %1367 = vst [vmem:[#allocation4 + $0xba0] sm:$0xff] %v7200_v50 }
 0x224   : > { %1369 = vst [vmem:[#allocation4 + $0xbb0] sm:$0xff] %v7200_v50 }
 0x225   : > { %1371 = vst [vmem:[#allocation4 + $0xbc0] sm:$0xff] %v7200_v50 }
 0x226   : > { %1373 = vst [vmem:[#allocation4 + $0xbd0] sm:$0xff] %v7200_v50 }
 0x227   : > { %1375 = vst [vmem:[#allocation4 + $0xbe0] sm:$0xff] %v7200_v50 }
 0x228   : > { %1377 = vst [vmem:[#allocation4 + $0xbf0] sm:$0xff] %v7200_v50 }
 0x229   : > { %1379 = vst [vmem:[#allocation4 + $0xc00] sm:$0xff] %v7200_v50 }
 0x22a   : > { %1381 = vst [vmem:[#allocation4 + $0xc10] sm:$0xff] %v7200_v50 }
 0x22b   : > { %1383 = vst [vmem:[#allocation4 + $0xc20] sm:$0xff] %v7200_v50 }
 0x22c   : > { %1385 = vst [vmem:[#allocation4 + $0xc30] sm:$0xff] %v7200_v50 }
 0x22d   : > { %1387 = vst [vmem:[#allocation4 + $0xc40] sm:$0xff] %v7200_v50 }
 0x22e   : > { %1389 = vst [vmem:[#allocation4 + $0xc50] sm:$0xff] %v7200_v50 }
 0x22f   : > { %1391 = vst [vmem:[#allocation4 + $0xc60] sm:$0xff] %v7200_v50 }
 0x230   : > { %1393 = vst [vmem:[#allocation4 + $0xc70] sm:$0xff] %v7200_v50 }
 0x231   : > { %1395 = vst [vmem:[#allocation4 + $0xc80] sm:$0xff] %v7200_v50 }
 0x232   : > { %1397 = vst [vmem:[#allocation4 + $0xc90] sm:$0xff] %v7200_v50 }
 0x233   : > { %1399 = vst [vmem:[#allocation4 + $0xca0] sm:$0xff] %v7200_v50 }
 0x234   : > { %1401 = vst [vmem:[#allocation4 + $0xcb0] sm:$0xff] %v7200_v50 }
 0x235   : > { %1403 = vst [vmem:[#allocation4 + $0xcc0] sm:$0xff] %v7200_v50 }
 0x236   : > { %1405 = vst [vmem:[#allocation4 + $0xcd0] sm:$0xff] %v7200_v50 }
 0x237   : > { %1407 = vst [vmem:[#allocation4 + $0xce0] sm:$0xff] %v7200_v50 }
 0x238   : > { %1409 = vst [vmem:[#allocation4 + $0xcf0] sm:$0xff] %v7200_v50 }
 0x239   : > { %1411 = vst [vmem:[#allocation4 + $0xd00] sm:$0xff] %v7200_v50 }
 0x23a   : > { %1413 = vst [vmem:[#allocation4 + $0xd10] sm:$0xff] %v7200_v50 }
 0x23b   : > { %1415 = vst [vmem:[#allocation4 + $0xd20] sm:$0xff] %v7200_v50 }
 0x23c   : > { %1417 = vst [vmem:[#allocation4 + $0xd30] sm:$0xff] %v7200_v50 }
 0x23d   : > { %1419 = vst [vmem:[#allocation4 + $0xd40] sm:$0xff] %v7200_v50 }
 0x23e   : > { %1421 = vst [vmem:[#allocation4 + $0xd50] sm:$0xff] %v7200_v50 }
 0x23f   : > { %1423 = vst [vmem:[#allocation4 + $0xd60] sm:$0xff] %v7200_v50 }
 0x240   : > { %1425 = vst [vmem:[#allocation4 + $0xd70] sm:$0xff] %v7200_v50 }
 0x241   : > { %1427 = vst [vmem:[#allocation4 + $0xd80] sm:$0xff] %v7200_v50 }
 0x242   : > { %1429 = vst [vmem:[#allocation4 + $0xd90] sm:$0xff] %v7200_v50 }
 0x243   : > { %1431 = vst [vmem:[#allocation4 + $0xda0] sm:$0xff] %v7200_v50 }
 0x244   : > { %1433 = vst [vmem:[#allocation4 + $0xdb0] sm:$0xff] %v7200_v50 }
 0x245   : > { %1435 = vst [vmem:[#allocation4 + $0xdc0] sm:$0xff] %v7200_v50 }
 0x246   : > { %1437 = vst [vmem:[#allocation4 + $0xdd0] sm:$0xff] %v7200_v50 }
 0x247   : > { %1439 = vst [vmem:[#allocation4 + $0xde0] sm:$0xff] %v7200_v50 }
 0x248   : > { %1441 = vst [vmem:[#allocation4 + $0xdf0] sm:$0xff] %v7200_v50 }
 0x249   : > { %1443 = vst [vmem:[#allocation4 + $0xe00] sm:$0xff] %v7200_v50 }
 0x24a   : > { %1445 = vst [vmem:[#allocation4 + $0xe10] sm:$0xff] %v7200_v50 }
 0x24b   : > { %1447 = vst [vmem:[#allocation4 + $0xe20] sm:$0xff] %v7200_v50 }
 0x24c   : > { %1449 = vst [vmem:[#allocation4 + $0xe30] sm:$0xff] %v7200_v50 }
 0x24d   : > { %1451 = vst [vmem:[#allocation4 + $0xe40] sm:$0xff] %v7200_v50 }
 0x24e   : > { %1453 = vst [vmem:[#allocation4 + $0xe50] sm:$0xff] %v7200_v50 }
 0x24f   : > { %1455 = vst [vmem:[#allocation4 + $0xe60] sm:$0xff] %v7200_v50 }
 0x250   : > { %1457 = vst [vmem:[#allocation4 + $0xe70] sm:$0xff] %v7200_v50 }
 0x251   : > { %1459 = vst [vmem:[#allocation4 + $0xe80] sm:$0xff] %v7200_v50 }
 0x252   : > { %1461 = vst [vmem:[#allocation4 + $0xe90] sm:$0xff] %v7200_v50 }
 0x253   : > { %1463 = vst [vmem:[#allocation4 + $0xea0] sm:$0xff] %v7200_v50 }
 0x254   : > { %1465 = vst [vmem:[#allocation4 + $0xeb0] sm:$0xff] %v7200_v50 }
 0x255   : > { %1467 = vst [vmem:[#allocation4 + $0xec0] sm:$0xff] %v7200_v50 }
 0x256   : > { %1469 = vst [vmem:[#allocation4 + $0xed0] sm:$0xff] %v7200_v50 }
 0x257   : > { %1471 = vst [vmem:[#allocation4 + $0xee0] sm:$0xff] %v7200_v50 }
 0x258   : > { %1473 = vst [vmem:[#allocation4 + $0xef0] sm:$0xff] %v7200_v50 }
 0x259   : > { %1475 = vst [vmem:[#allocation4 + $0xf00] sm:$0xff] %v7200_v50 }
 0x25a   : > { %1477 = vst [vmem:[#allocation4 + $0xf10] sm:$0xff] %v7200_v50 }
 0x25b   : > { %1479 = vst [vmem:[#allocation4 + $0xf20] sm:$0xff] %v7200_v50 }
 0x25c   : > { %1481 = vst [vmem:[#allocation4 + $0xf30] sm:$0xff] %v7200_v50 }
 0x25d   : > { %1483 = vst [vmem:[#allocation4 + $0xf40] sm:$0xff] %v7200_v50 }
 0x25e   : > { %1485 = vst [vmem:[#allocation4 + $0xf50] sm:$0xff] %v7200_v50 }
 0x25f   : > { %1487 = vst [vmem:[#allocation4 + $0xf60] sm:$0xff] %v7200_v50 }
 0x260   : > { %1489 = vst [vmem:[#allocation4 + $0xf70] sm:$0xff] %v7200_v50 }
 0x261   : > { %1491 = vst [vmem:[#allocation4 + $0xf80] sm:$0xff] %v7200_v50 }
 0x262   : > { %1493 = vst [vmem:[#allocation4 + $0xf90] sm:$0xff] %v7200_v50 }
 0x263   : > { %1495 = vst [vmem:[#allocation4 + $0xfa0] sm:$0xff] %v7200_v50 }
 0x264   : > { %1497 = vst [vmem:[#allocation4 + $0xfb0] sm:$0xff] %v7200_v50 }
 0x265   : > { %1499 = vst [vmem:[#allocation4 + $0xfc0] sm:$0xff] %v7200_v50 }
 0x266   : > { %1501 = vst [vmem:[#allocation4 + $0xfd0] sm:$0xff] %v7200_v50 }
 0x267   : > { %1503 = vst [vmem:[#allocation4 + $0xfe0] sm:$0xff] %v7200_v50 }
 0x268   : > { %1505 = vst [vmem:[#allocation4 + $0xff0] sm:$0xff] %v7200_v50 }
 0x269   : > { %1507 = vst [vmem:[#allocation4 + $0x1000] sm:$0xff] %v7200_v50 }
 0x26a   : > { %1509 = vst [vmem:[#allocation4 + $0x1010] sm:$0xff] %v7200_v50 }
 0x26b   : > { %1511 = vst [vmem:[#allocation4 + $0x1020] sm:$0xff] %v7200_v50 }
 0x26c   : > { %1513 = vst [vmem:[#allocation4 + $0x1030] sm:$0xff] %v7200_v50 }
 0x26d   : > { %1515 = vst [vmem:[#allocation4 + $0x1040] sm:$0xff] %v7200_v50 }
 0x26e   : > { %1517 = vst [vmem:[#allocation4 + $0x1050] sm:$0xff] %v7200_v50 }
 0x26f   : > { %1519 = vst [vmem:[#allocation4 + $0x1060] sm:$0xff] %v7200_v50 }
 0x270   : > { %1521 = vst [vmem:[#allocation4 + $0x1070] sm:$0xff] %v7200_v50 }
 0x271   : > { %1523 = vst [vmem:[#allocation4 + $0x1080] sm:$0xff] %v7200_v50 }
 0x272   : > { %1525 = vst [vmem:[#allocation4 + $0x1090] sm:$0xff] %v7200_v50 }
 0x273   : > { %1527 = vst [vmem:[#allocation4 + $0x10a0] sm:$0xff] %v7200_v50 }
 0x274   : > { %1529 = vst [vmem:[#allocation4 + $0x10b0] sm:$0xff] %v7200_v50 }
 0x275   : > { %1531 = vst [vmem:[#allocation4 + $0x10c0] sm:$0xff] %v7200_v50 }
 0x276   : > { %1533 = vst [vmem:[#allocation4 + $0x10d0] sm:$0xff] %v7200_v50 }
 0x277   : > { %1535 = vst [vmem:[#allocation4 + $0x10e0] sm:$0xff] %v7200_v50 }
 0x278   : > { %1537 = vst [vmem:[#allocation4 + $0x10f0] sm:$0xff] %v7200_v50 }
 0x279   : > { %1539 = vst [vmem:[#allocation4 + $0x1100] sm:$0xff] %v7200_v50 }
 0x27a   : > { %1541 = vst [vmem:[#allocation4 + $0x1110] sm:$0xff] %v7200_v50 }
 0x27b   : > { %1543 = vst [vmem:[#allocation4 + $0x1120] sm:$0xff] %v7200_v50 }
 0x27c   : > { %1545 = vst [vmem:[#allocation4 + $0x1130] sm:$0xff] %v7200_v50 }
 0x27d   : > { %1547 = vst [vmem:[#allocation4 + $0x1140] sm:$0xff] %v7200_v50 }
 0x27e   : > { %1549 = vst [vmem:[#allocation4 + $0x1150] sm:$0xff] %v7200_v50 }
 0x27f   : > { %1551 = vst [vmem:[#allocation4 + $0x1160] sm:$0xff] %v7200_v50 }
 0x280   : > { %1553 = vst [vmem:[#allocation4 + $0x1170] sm:$0xff] %v7200_v50 }
 0x281   : > { %1555 = vst [vmem:[#allocation4 + $0x1180] sm:$0xff] %v7200_v50 }
 0x282   : > { %1557 = vst [vmem:[#allocation4 + $0x1190] sm:$0xff] %v7200_v50 }
 0x283   : > { %1559 = vst [vmem:[#allocation4 + $0x11a0] sm:$0xff] %v7200_v50 }
 0x284   : > { %1561 = vst [vmem:[#allocation4 + $0x11b0] sm:$0xff] %v7200_v50 }
 0x285   : > { %1563 = vst [vmem:[#allocation4 + $0x11c0] sm:$0xff] %v7200_v50 }
 0x286   : > { %1565 = vst [vmem:[#allocation4 + $0x11d0] sm:$0xff] %v7200_v50 }
 0x287   : > { %1567 = vst [vmem:[#allocation4 + $0x11e0] sm:$0xff] %v7200_v50 }
 0x288   : > { %1569 = vst [vmem:[#allocation4 + $0x11f0] sm:$0xff] %v7200_v50 }
 0x289   : > { %1571 = vst [vmem:[#allocation4 + $0x1200] sm:$0xff] %v7200_v50 }
 0x28a   : > { %1573 = vst [vmem:[#allocation4 + $0x1210] sm:$0xff] %v7200_v50 }
 0x28b   : > { %1575 = vst [vmem:[#allocation4 + $0x1220] sm:$0xff] %v7200_v50 }
 0x28c   : > { %1577 = vst [vmem:[#allocation4 + $0x1230] sm:$0xff] %v7200_v50 }
 0x28d   : > { %1579 = vst [vmem:[#allocation4 + $0x1240] sm:$0xff] %v7200_v50 }
 0x28e   : > { %1581 = vst [vmem:[#allocation4 + $0x1250] sm:$0xff] %v7200_v50 }
 0x28f   : > { %1583 = vst [vmem:[#allocation4 + $0x1260] sm:$0xff] %v7200_v50 }
 0x290   : > { %1585 = vst [vmem:[#allocation4 + $0x1270] sm:$0xff] %v7200_v50 }
 0x291   : > { %1587 = vst [vmem:[#allocation4 + $0x1280] sm:$0xff] %v7200_v50 }
 0x292   : > { %1589 = vst [vmem:[#allocation4 + $0x1290] sm:$0xff] %v7200_v50 }
 0x293   : > { %1591 = vst [vmem:[#allocation4 + $0x12a0] sm:$0xff] %v7200_v50 }
 0x294   : > { %1593 = vst [vmem:[#allocation4 + $0x12b0] sm:$0xff] %v7200_v50 }
 0x295   : > { %1595 = vst [vmem:[#allocation4 + $0x12c0] sm:$0xff] %v7200_v50 }
 0x296   : > { %1597 = vst [vmem:[#allocation4 + $0x12d0] sm:$0xff] %v7200_v50 }
 0x297   : > { %1599 = vst [vmem:[#allocation4 + $0x12e0] sm:$0xff] %v7200_v50 }
 0x298   : > { %1601 = vst [vmem:[#allocation4 + $0x12f0] sm:$0xff] %v7200_v50 }
 0x299   : > { %1603 = vst [vmem:[#allocation4 + $0x1300] sm:$0xff] %v7200_v50 }
 0x29a   : > { %1605 = vst [vmem:[#allocation4 + $0x1310] sm:$0xff] %v7200_v50 }
 0x29b   : > { %1607 = vst [vmem:[#allocation4 + $0x1320] sm:$0xff] %v7200_v50 }
 0x29c   : > { %1609 = vst [vmem:[#allocation4 + $0x1330] sm:$0xff] %v7200_v50 }
 0x29d   : > { %1611 = vst [vmem:[#allocation4 + $0x1340] sm:$0xff] %v7200_v50 }
 0x29e   : > { %1613 = vst [vmem:[#allocation4 + $0x1350] sm:$0xff] %v7200_v50 }
 0x29f   : > { %1615 = vst [vmem:[#allocation4 + $0x1360] sm:$0xff] %v7200_v50 }
 0x2a0   : > { %1617 = vst [vmem:[#allocation4 + $0x1370] sm:$0xff] %v7200_v50 }
 0x2a1   : > { %1619 = vst [vmem:[#allocation4 + $0x1380] sm:$0xff] %v7200_v50 }
 0x2a2   : > { %1621 = vst [vmem:[#allocation4 + $0x1390] sm:$0xff] %v7200_v50 }
 0x2a3   : > { %1623 = vst [vmem:[#allocation4 + $0x13a0] sm:$0xff] %v7200_v50 }
 0x2a4   : > { %1625 = vst [vmem:[#allocation4 + $0x13b0] sm:$0xff] %v7200_v50 }
 0x2a5   : > { %1627 = vst [vmem:[#allocation4 + $0x13c0] sm:$0xff] %v7200_v50 }
 0x2a6   : > { %1629 = vst [vmem:[#allocation4 + $0x13d0] sm:$0xff] %v7200_v50 }
 0x2a7   : > { %1631 = vst [vmem:[#allocation4 + $0x13e0] sm:$0xff] %v7200_v50 }
 0x2a8   : > { %1633 = vst [vmem:[#allocation4 + $0x13f0] sm:$0xff] %v7200_v50 }
 0x2a9   : > { %1635 = vst [vmem:[#allocation4 + $0x1400] sm:$0xff] %v7200_v50 }
 0x2aa   : > { %1637 = vst [vmem:[#allocation4 + $0x1410] sm:$0xff] %v7200_v50 }
 0x2ab   : > { %1639 = vst [vmem:[#allocation4 + $0x1420] sm:$0xff] %v7200_v50 }
 0x2ac   : > { %1641 = vst [vmem:[#allocation4 + $0x1430] sm:$0xff] %v7200_v50 }
 0x2ad   : > { %1643 = vst [vmem:[#allocation4 + $0x1440] sm:$0xff] %v7200_v50 }
 0x2ae   : > { %1645 = vst [vmem:[#allocation4 + $0x1450] sm:$0xff] %v7200_v50 }
 0x2af   : > { %1647 = vst [vmem:[#allocation4 + $0x1460] sm:$0xff] %v7200_v50 }
 0x2b0   : > { %1649 = vst [vmem:[#allocation4 + $0x1470] sm:$0xff] %v7200_v50 }
 0x2b1   : > { %1651 = vst [vmem:[#allocation4 + $0x1480] sm:$0xff] %v7200_v50 }
 0x2b2   : > { %1653 = vst [vmem:[#allocation4 + $0x1490] sm:$0xff] %v7200_v50 }
 0x2b3   : > { %1655 = vst [vmem:[#allocation4 + $0x14a0] sm:$0xff] %v7200_v50 }
 0x2b4   : > { %1657 = vst [vmem:[#allocation4 + $0x14b0] sm:$0xff] %v7200_v50 }
 0x2b5   : > { %1659 = vst [vmem:[#allocation4 + $0x14c0] sm:$0xff] %v7200_v50 }
 0x2b6   : > { %1661 = vst [vmem:[#allocation4 + $0x14d0] sm:$0xff] %v7200_v50 }
 0x2b7   : > { %1663 = vst [vmem:[#allocation4 + $0x14e0] sm:$0xff] %v7200_v50 }
 0x2b8   : > { %1665 = vst [vmem:[#allocation4 + $0x14f0] sm:$0xff] %v7200_v50 }
 0x2b9   : > { %1667 = vst [vmem:[#allocation4 + $0x1500] sm:$0xff] %v7200_v50 }
 0x2ba   : > { %1669 = vst [vmem:[#allocation4 + $0x1510] sm:$0xff] %v7200_v50 }
 0x2bb   : > { %1671 = vst [vmem:[#allocation4 + $0x1520] sm:$0xff] %v7200_v50 }
 0x2bc   : > { %1673 = vst [vmem:[#allocation4 + $0x1530] sm:$0xff] %v7200_v50 }
 0x2bd   : > { %1675 = vst [vmem:[#allocation4 + $0x1540] sm:$0xff] %v7200_v50 }
 0x2be   : > { %1677 = vst [vmem:[#allocation4 + $0x1550] sm:$0xff] %v7200_v50 }
 0x2bf   : > { %1679 = vst [vmem:[#allocation4 + $0x1560] sm:$0xff] %v7200_v50 }
 0x2c0   : > { %1681 = vst [vmem:[#allocation4 + $0x1570] sm:$0xff] %v7200_v50 }
 0x2c1   : > { %1683 = vst [vmem:[#allocation4 + $0x1580] sm:$0xff] %v7200_v50 }
 0x2c2   : > { %1685 = vst [vmem:[#allocation4 + $0x1590] sm:$0xff] %v7200_v50 }
 0x2c3   : > { %1687 = vst [vmem:[#allocation4 + $0x15a0] sm:$0xff] %v7200_v50 }
 0x2c4   : > { %1689 = vst [vmem:[#allocation4 + $0x15b0] sm:$0xff] %v7200_v50 }
 0x2c5   : > { %1691 = vst [vmem:[#allocation4 + $0x15c0] sm:$0xff] %v7200_v50 }
 0x2c6   : > { %1693 = vst [vmem:[#allocation4 + $0x15d0] sm:$0xff] %v7200_v50 }
 0x2c7   : > { %1695 = vst [vmem:[#allocation4 + $0x15e0] sm:$0xff] %v7200_v50 }
 0x2c8   : > { %1697 = vst [vmem:[#allocation4 + $0x15f0] sm:$0xff] %v7200_v50 }
 0x2c9   : > { %1699 = vst [vmem:[#allocation4 + $0x1600] sm:$0xff] %v7200_v50 }
 0x2ca   : > { %1701 = vst [vmem:[#allocation4 + $0x1610] sm:$0xff] %v7200_v50 }
 0x2cb   : > { %1703 = vst [vmem:[#allocation4 + $0x1620] sm:$0xff] %v7200_v50 }
 0x2cc   : > { %1705 = vst [vmem:[#allocation4 + $0x1630] sm:$0xff] %v7200_v50 }
 0x2cd   : > { %1707 = vst [vmem:[#allocation4 + $0x1640] sm:$0xff] %v7200_v50 }
 0x2ce   : > { %1709 = vst [vmem:[#allocation4 + $0x1650] sm:$0xff] %v7200_v50 }
 0x2cf   : > { %1711 = vst [vmem:[#allocation4 + $0x1660] sm:$0xff] %v7200_v50 }
 0x2d0   : > { %1713 = vst [vmem:[#allocation4 + $0x1670] sm:$0xff] %v7200_v50 }
 0x2d1   : > { %1715 = vst [vmem:[#allocation4 + $0x1680] sm:$0xff] %v7200_v50 }
 0x2d2   : > { %1717 = vst [vmem:[#allocation4 + $0x1690] sm:$0xff] %v7200_v50 }
 0x2d3   : > { %1719 = vst [vmem:[#allocation4 + $0x16a0] sm:$0xff] %v7200_v50 }
 0x2d4   : > { %1721 = vst [vmem:[#allocation4 + $0x16b0] sm:$0xff] %v7200_v50 }
 0x2d5   : > { %1723 = vst [vmem:[#allocation4 + $0x16c0] sm:$0xff] %v7200_v50 }
 0x2d6   : > { %1725 = vst [vmem:[#allocation4 + $0x16d0] sm:$0xff] %v7200_v50 }
 0x2d7   : > { %1727 = vst [vmem:[#allocation4 + $0x16e0] sm:$0xff] %v7200_v50 }
 0x2d8   : > { %1729 = vst [vmem:[#allocation4 + $0x16f0] sm:$0xff] %v7200_v50 }
 0x2d9   : > { %1731 = vst [vmem:[#allocation4 + $0x1700] sm:$0xff] %v7200_v50 }
 0x2da   : > { %1733 = vst [vmem:[#allocation4 + $0x1710] sm:$0xff] %v7200_v50 }
 0x2db   : > { %1735 = vst [vmem:[#allocation4 + $0x1720] sm:$0xff] %v7200_v50 }
 0x2dc   : > { %1737 = vst [vmem:[#allocation4 + $0x1730] sm:$0xff] %v7200_v50 }
 0x2dd   : > { %1739 = vst [vmem:[#allocation4 + $0x1740] sm:$0xff] %v7200_v50 }
 0x2de   : > { %1741 = vst [vmem:[#allocation4 + $0x1750] sm:$0xff] %v7200_v50 }
 0x2df   : > { %1743 = vst [vmem:[#allocation4 + $0x1760] sm:$0xff] %v7200_v50 }
 0x2e0   : > { %1745 = vst [vmem:[#allocation4 + $0x1770] sm:$0xff] %v7200_v50 }
 0x2e1   : > { %1747 = vst [vmem:[#allocation4 + $0x1780] sm:$0xff] %v7200_v50 }
 0x2e2   : > { %1749 = vst [vmem:[#allocation4 + $0x1790] sm:$0xff] %v7200_v50 }
 0x2e3   : > { %1751 = vst [vmem:[#allocation4 + $0x17a0] sm:$0xff] %v7200_v50 }
 0x2e4   : > { %1753 = vst [vmem:[#allocation4 + $0x17b0] sm:$0xff] %v7200_v50 }
 0x2e5   : > { %1755 = vst [vmem:[#allocation4 + $0x17c0] sm:$0xff] %v7200_v50 }
 0x2e6   : > { %1757 = vst [vmem:[#allocation4 + $0x17d0] sm:$0xff] %v7200_v50 }
 0x2e7   : > { %1759 = vst [vmem:[#allocation4 + $0x17e0] sm:$0xff] %v7200_v50 }
 0x2e8   : > { %1761 = vst [vmem:[#allocation4 + $0x17f0] sm:$0xff] %v7200_v50 }
 0x2e9   : > { %1763 = vst [vmem:[#allocation4 + $0x1800] sm:$0xff] %v7200_v50 }
 0x2ea   : > { %1765 = vst [vmem:[#allocation4 + $0x1810] sm:$0xff] %v7200_v50 }
 0x2eb   : > { %1767 = vst [vmem:[#allocation4 + $0x1820] sm:$0xff] %v7200_v50 }
 0x2ec   : > { %1769 = vst [vmem:[#allocation4 + $0x1830] sm:$0xff] %v7200_v50 }
 0x2ed   : > { %1771 = vst [vmem:[#allocation4 + $0x1840] sm:$0xff] %v7200_v50 }
 0x2ee   : > { %1773 = vst [vmem:[#allocation4 + $0x1850] sm:$0xff] %v7200_v50 }
 0x2ef   : > { %1775 = vst [vmem:[#allocation4 + $0x1860] sm:$0xff] %v7200_v50 }
 0x2f0   : > { %1777 = vst [vmem:[#allocation4 + $0x1870] sm:$0xff] %v7200_v50 }
 0x2f1   : > { %1779 = vst [vmem:[#allocation4 + $0x1880] sm:$0xff] %v7200_v50 }
 0x2f2   : > { %1781 = vst [vmem:[#allocation4 + $0x1890] sm:$0xff] %v7200_v50 }
 0x2f3   : > { %1783 = vst [vmem:[#allocation4 + $0x18a0] sm:$0xff] %v7200_v50 }
 0x2f4   : > { %1785 = vst [vmem:[#allocation4 + $0x18b0] sm:$0xff] %v7200_v50 }
 0x2f5   : > { %1787 = vst [vmem:[#allocation4 + $0x18c0] sm:$0xff] %v7200_v50 }
 0x2f6   : > { %1789 = vst [vmem:[#allocation4 + $0x18d0] sm:$0xff] %v7200_v50 }
 0x2f7   : > { %1791 = vst [vmem:[#allocation4 + $0x18e0] sm:$0xff] %v7200_v50 }
 0x2f8   : > { %1793 = vst [vmem:[#allocation4 + $0x18f0] sm:$0xff] %v7200_v50 }
 0x2f9   : > { %1795 = vst [vmem:[#allocation4 + $0x1900] sm:$0xff] %v7200_v50 }
 0x2fa   : > { %1797 = vst [vmem:[#allocation4 + $0x1910] sm:$0xff] %v7200_v50 }
 0x2fb   : > { %1799 = vst [vmem:[#allocation4 + $0x1920] sm:$0xff] %v7200_v50 }
 0x2fc   : > { %1801 = vst [vmem:[#allocation4 + $0x1930] sm:$0xff] %v7200_v50 }
 0x2fd   : > { %1803 = vst [vmem:[#allocation4 + $0x1940] sm:$0xff] %v7200_v50 }
 0x2fe   : > { %1805 = vst [vmem:[#allocation4 + $0x1950] sm:$0xff] %v7200_v50 }
 0x2ff   : > { %1807 = vst [vmem:[#allocation4 + $0x1960] sm:$0xff] %v7200_v50 }
 0x300   : > { %1809 = vst [vmem:[#allocation4 + $0x1970] sm:$0xff] %v7200_v50 }
 0x301   : > { %1811 = vst [vmem:[#allocation4 + $0x1980] sm:$0xff] %v7200_v50 }
 0x302   : > { %1813 = vst [vmem:[#allocation4 + $0x1990] sm:$0xff] %v7200_v50 }
 0x303   : > { %1815 = vst [vmem:[#allocation4 + $0x19a0] sm:$0xff] %v7200_v50 }
 0x304   : > { %1817 = vst [vmem:[#allocation4 + $0x19b0] sm:$0xff] %v7200_v50 }
 0x305   : > { %1819 = vst [vmem:[#allocation4 + $0x19c0] sm:$0xff] %v7200_v50 }
 0x306   : > { %1821 = vst [vmem:[#allocation4 + $0x19d0] sm:$0xff] %v7200_v50 }
 0x307   : > { %1823 = vst [vmem:[#allocation4 + $0x19e0] sm:$0xff] %v7200_v50 }
 0x308   : > { %1825 = vst [vmem:[#allocation4 + $0x19f0] sm:$0xff] %v7200_v50 }
 0x309   : > { %1827 = vst [vmem:[#allocation4 + $0x1a00] sm:$0xff] %v7200_v50 }
 0x30a   : > { %1829 = vst [vmem:[#allocation4 + $0x1a10] sm:$0xff] %v7200_v50 }
 0x30b   : > { %1831 = vst [vmem:[#allocation4 + $0x1a20] sm:$0xff] %v7200_v50 }
 0x30c   : > { %1833 = vst [vmem:[#allocation4 + $0x1a30] sm:$0xff] %v7200_v50 }
 0x30d   : > { %1835 = vst [vmem:[#allocation4 + $0x1a40] sm:$0xff] %v7200_v50 }
 0x30e   : > { %1837 = vst [vmem:[#allocation4 + $0x1a50] sm:$0xff] %v7200_v50 }
 0x30f   : > { %1839 = vst [vmem:[#allocation4 + $0x1a60] sm:$0xff] %v7200_v50 }
 0x310   : > { %1841 = vst [vmem:[#allocation4 + $0x1a70] sm:$0xff] %v7200_v50 }
 0x311   : > { %1843 = vst [vmem:[#allocation4 + $0x1a80] sm:$0xff] %v7200_v50 }
 0x312   : > { %1845 = vst [vmem:[#allocation4 + $0x1a90] sm:$0xff] %v7200_v50 }
 0x313   : > { %1847 = vst [vmem:[#allocation4 + $0x1aa0] sm:$0xff] %v7200_v50 }
 0x314   : > { %1849 = vst [vmem:[#allocation4 + $0x1ab0] sm:$0xff] %v7200_v50 }
 0x315   : > { %1851 = vst [vmem:[#allocation4 + $0x1ac0] sm:$0xff] %v7200_v50 }
 0x316   : > { %1853 = vst [vmem:[#allocation4 + $0x1ad0] sm:$0xff] %v7200_v50 }
 0x317   : > { %1855 = vst [vmem:[#allocation4 + $0x1ae0] sm:$0xff] %v7200_v50 }
 0x318   : > { %1857 = vst [vmem:[#allocation4 + $0x1af0] sm:$0xff] %v7200_v50 }
 0x319   : > { %1859 = vst [vmem:[#allocation4 + $0x1b00] sm:$0xff] %v7200_v50 }
 0x31a   : > { %1861 = vst [vmem:[#allocation4 + $0x1b10] sm:$0xff] %v7200_v50 }
 0x31b   : > { %1863 = vst [vmem:[#allocation4 + $0x1b20] sm:$0xff] %v7200_v50 }
 0x31c   : > { %1865 = vst [vmem:[#allocation4 + $0x1b30] sm:$0xff] %v7200_v50 }
 0x31d   : > { %1867 = vst [vmem:[#allocation4 + $0x1b40] sm:$0xff] %v7200_v50 }
 0x31e   : > { %1869 = vst [vmem:[#allocation4 + $0x1b50] sm:$0xff] %v7200_v50 }
 0x31f   : > { %1871 = vst [vmem:[#allocation4 + $0x1b60] sm:$0xff] %v7200_v50 }
 0x320   : > { %1873 = vst [vmem:[#allocation4 + $0x1b70] sm:$0xff] %v7200_v50 }
 0x321   : > { %1875 = vst [vmem:[#allocation4 + $0x1b80] sm:$0xff] %v7200_v50 }
 0x322   : > { %1877 = vst [vmem:[#allocation4 + $0x1b90] sm:$0xff] %v7200_v50 }
 0x323   : > { %1879 = vst [vmem:[#allocation4 + $0x1ba0] sm:$0xff] %v7200_v50 }
 0x324   : > { %1881 = vst [vmem:[#allocation4 + $0x1bb0] sm:$0xff] %v7200_v50 }
 0x325   : > { %1883 = vst [vmem:[#allocation4 + $0x1bc0] sm:$0xff] %v7200_v50 }
 0x326   : > { %1885 = vst [vmem:[#allocation4 + $0x1bd0] sm:$0xff] %v7200_v50 }
 0x327   : > { %1887 = vst [vmem:[#allocation4 + $0x1be0] sm:$0xff] %v7200_v50 }
 0x328   : > { %1889 = vst [vmem:[#allocation4 + $0x1bf0] sm:$0xff] %v7200_v50 }
 0x329   : > { %1891 = vst [vmem:[#allocation4 + $0x1c00] sm:$0xff] %v7200_v50 }
 0x32a   : > { %1893 = vst [vmem:[#allocation4 + $0x1c10] sm:$0xff] %v7200_v50 }
 0x32b   : > { %1895 = vst [vmem:[#allocation4 + $0x1c20] sm:$0xff] %v7200_v50 }
 0x32c   : > { %1897 = vst [vmem:[#allocation4 + $0x1c30] sm:$0xff] %v7200_v50 }
 0x32d   : > { %1899 = vst [vmem:[#allocation4 + $0x1c40] sm:$0xff] %v7200_v50 }
 0x32e   : > { %1901 = vst [vmem:[#allocation4 + $0x1c50] sm:$0xff] %v7200_v50 }
 0x32f   : > { %1903 = vst [vmem:[#allocation4 + $0x1c60] sm:$0xff] %v7200_v50 }
 0x330   : > { %1905 = vst [vmem:[#allocation4 + $0x1c70] sm:$0xff] %v7200_v50 }
 0x331   : > { %1907 = vst [vmem:[#allocation4 + $0x1c80] sm:$0xff] %v7200_v50 }
 0x332   : > { %1909 = vst [vmem:[#allocation4 + $0x1c90] sm:$0xff] %v7200_v50 }
 0x333   : > { %1911 = vst [vmem:[#allocation4 + $0x1ca0] sm:$0xff] %v7200_v50 }
 0x334   : > { %1913 = vst [vmem:[#allocation4 + $0x1cb0] sm:$0xff] %v7200_v50 }
 0x335   : > { %1915 = vst [vmem:[#allocation4 + $0x1cc0] sm:$0xff] %v7200_v50 }
 0x336   : > { %1917 = vst [vmem:[#allocation4 + $0x1cd0] sm:$0xff] %v7200_v50 }
 0x337   : > { %1919 = vst [vmem:[#allocation4 + $0x1ce0] sm:$0xff] %v7200_v50 }
 0x338   : > { %1921 = vst [vmem:[#allocation4 + $0x1cf0] sm:$0xff] %v7200_v50 }
 0x339   : > { %1923 = vst [vmem:[#allocation4 + $0x1d00] sm:$0xff] %v7200_v50 }
 0x33a   : > { %1925 = vst [vmem:[#allocation4 + $0x1d10] sm:$0xff] %v7200_v50 }
 0x33b   : > { %1927 = vst [vmem:[#allocation4 + $0x1d20] sm:$0xff] %v7200_v50 }
 0x33c   : > { %1929 = vst [vmem:[#allocation4 + $0x1d30] sm:$0xff] %v7200_v50 }
 0x33d   : > { %1931 = vst [vmem:[#allocation4 + $0x1d40] sm:$0xff] %v7200_v50 }
 0x33e   : > { %1933 = vst [vmem:[#allocation4 + $0x1d50] sm:$0xff] %v7200_v50 }
 0x33f   : > { %1935 = vst [vmem:[#allocation4 + $0x1d60] sm:$0xff] %v7200_v50 }
 0x340   : > { %1937 = vst [vmem:[#allocation4 + $0x1d70] sm:$0xff] %v7200_v50 }
 0x341   : > { %1939 = vst [vmem:[#allocation4 + $0x1d80] sm:$0xff] %v7200_v50 }
 0x342   : > { %1941 = vst [vmem:[#allocation4 + $0x1d90] sm:$0xff] %v7200_v50 }
 0x343   : > { %1943 = vst [vmem:[#allocation4 + $0x1da0] sm:$0xff] %v7200_v50 }
 0x344   : > { %1945 = vst [vmem:[#allocation4 + $0x1db0] sm:$0xff] %v7200_v50 }
 0x345   : > { %1947 = vst [vmem:[#allocation4 + $0x1dc0] sm:$0xff] %v7200_v50 }
 0x346   : > { %1949 = vst [vmem:[#allocation4 + $0x1dd0] sm:$0xff] %v7200_v50 }
 0x347   : > { %1951 = vst [vmem:[#allocation4 + $0x1de0] sm:$0xff] %v7200_v50 }
 0x348   : > { %1953 = vst [vmem:[#allocation4 + $0x1df0] sm:$0xff] %v7200_v50 }
 0x349   : > { %1955 = vst [vmem:[#allocation4 + $0x1e00] sm:$0xff] %v7200_v50 }
 0x34a   : > { %1957 = vst [vmem:[#allocation4 + $0x1e10] sm:$0xff] %v7200_v50 }
 0x34b   : > { %1959 = vst [vmem:[#allocation4 + $0x1e20] sm:$0xff] %v7200_v50 }
 0x34c   : > { %1961 = vst [vmem:[#allocation4 + $0x1e30] sm:$0xff] %v7200_v50 }
 0x34d   : > { %1963 = vst [vmem:[#allocation4 + $0x1e40] sm:$0xff] %v7200_v50 }
 0x34e   : > { %1965 = vst [vmem:[#allocation4 + $0x1e50] sm:$0xff] %v7200_v50 }
 0x34f   : > { %1967 = vst [vmem:[#allocation4 + $0x1e60] sm:$0xff] %v7200_v50 }
 0x350   : > { %1969 = vst [vmem:[#allocation4 + $0x1e70] sm:$0xff] %v7200_v50 }
 0x351   : > { %1971 = vst [vmem:[#allocation4 + $0x1e80] sm:$0xff] %v7200_v50 }
 0x352   : > { %1973 = vst [vmem:[#allocation4 + $0x1e90] sm:$0xff] %v7200_v50 }
 0x353   : > { %1975 = vst [vmem:[#allocation4 + $0x1ea0] sm:$0xff] %v7200_v50 }
 0x354   : > { %1977 = vst [vmem:[#allocation4 + $0x1eb0] sm:$0xff] %v7200_v50 }
 0x355   : > { %1979 = vst [vmem:[#allocation4 + $0x1ec0] sm:$0xff] %v7200_v50 }
 0x356   : > { %1981 = vst [vmem:[#allocation4 + $0x1ed0] sm:$0xff] %v7200_v50 }
 0x357   : > { %1983 = vst [vmem:[#allocation4 + $0x1ee0] sm:$0xff] %v7200_v50 }
 0x358   : > { %1985 = vst [vmem:[#allocation4 + $0x1ef0] sm:$0xff] %v7200_v50 }
 0x359   : > { %1987 = vst [vmem:[#allocation4 + $0x1f00] sm:$0xff] %v7200_v50 }
 0x35a   : > { %1989 = vst [vmem:[#allocation4 + $0x1f10] sm:$0xff] %v7200_v50 }
 0x35b   : > { %1991 = vst [vmem:[#allocation4 + $0x1f20] sm:$0xff] %v7200_v50 }
 0x35c   : > { %1993 = vst [vmem:[#allocation4 + $0x1f30] sm:$0xff] %v7200_v50 }
 0x35d   : > { %1995 = vst [vmem:[#allocation4 + $0x1f40] sm:$0xff] %v7200_v50 }
 0x35e   : > { %1997 = vst [vmem:[#allocation4 + $0x1f50] sm:$0xff] %v7200_v50 }
 0x35f   : > { %1999 = vst [vmem:[#allocation4 + $0x1f60] sm:$0xff] %v7200_v50 }
 0x360   : > { %2001 = vst [vmem:[#allocation4 + $0x1f70] sm:$0xff] %v7200_v50 }
 0x361   : > { %2003 = vst [vmem:[#allocation4 + $0x1f80] sm:$0xff] %v7200_v50 }
 0x362   : > { %2005 = vst [vmem:[#allocation4 + $0x1f90] sm:$0xff] %v7200_v50 }
 0x363   : > { %2007 = vst [vmem:[#allocation4 + $0x1fa0] sm:$0xff] %v7200_v50 }
 0x364   : > { %2009 = vst [vmem:[#allocation4 + $0x1fb0] sm:$0xff] %v7200_v50 }
 0x365   : > { %2011 = vst [vmem:[#allocation4 + $0x1fc0] sm:$0xff] %v7200_v50 }
 0x366   : > { %2013 = vst [vmem:[#allocation4 + $0x1fd0] sm:$0xff] %v7200_v50 }
 0x367   : > { %2015 = vst [vmem:[#allocation4 + $0x1fe0] sm:$0xff] %v7200_v50 }
 0x368   : > { %2017 = vst [vmem:[#allocation4 + $0x1ff0] sm:$0xff] %v7200_v50 }
 0x369   : > { %2019 = vst [vmem:[#allocation4 + $0x2000] sm:$0xff] %v7200_v50 }
 0x36a   : > { %2021 = vst [vmem:[#allocation4 + $0x2010] sm:$0xff] %v7200_v50 }
 0x36b   : > { %2023 = vst [vmem:[#allocation4 + $0x2020] sm:$0xff] %v7200_v50 }
 0x36c   : > { %2025 = vst [vmem:[#allocation4 + $0x2030] sm:$0xff] %v7200_v50 }
 0x36d   : > { %2027 = vst [vmem:[#allocation4 + $0x2040] sm:$0xff] %v7200_v50 }
 0x36e   : > { %2029 = vst [vmem:[#allocation4 + $0x2050] sm:$0xff] %v7200_v50 }
 0x36f   : > { %2031 = vst [vmem:[#allocation4 + $0x2060] sm:$0xff] %v7200_v50 }
 0x370   : > { %2033 = vst [vmem:[#allocation4 + $0x2070] sm:$0xff] %v7200_v50 }
 0x371   : > { %2035 = vst [vmem:[#allocation4 + $0x2080] sm:$0xff] %v7200_v50 }
 0x372   : > { %2037 = vst [vmem:[#allocation4 + $0x2090] sm:$0xff] %v7200_v50 }
 0x373   : > { %2039 = vst [vmem:[#allocation4 + $0x20a0] sm:$0xff] %v7200_v50 }
 0x374   : > { %2041 = vst [vmem:[#allocation4 + $0x20b0] sm:$0xff] %v7200_v50 }
 0x375   : > { %2043 = vst [vmem:[#allocation4 + $0x20c0] sm:$0xff] %v7200_v50 }
 0x376   : > { %2045 = vst [vmem:[#allocation4 + $0x20d0] sm:$0xff] %v7200_v50 }
 0x377   : > { %2047 = vst [vmem:[#allocation4 + $0x20e0] sm:$0xff] %v7200_v50 }
 0x378   : > { %2049 = vst [vmem:[#allocation4 + $0x20f0] sm:$0xff] %v7200_v50 }
 0x379   : > { %2051 = vst [vmem:[#allocation4 + $0x2100] sm:$0xff] %v7200_v50 }
 0x37a   : > { %2053 = vst [vmem:[#allocation4 + $0x2110] sm:$0xff] %v7200_v50 }
 0x37b   : > { %2055 = vst [vmem:[#allocation4 + $0x2120] sm:$0xff] %v7200_v50 }
 0x37c   : > { %2057 = vst [vmem:[#allocation4 + $0x2130] sm:$0xff] %v7200_v50 }
 0x37d   : > { %2059 = vst [vmem:[#allocation4 + $0x2140] sm:$0xff] %v7200_v50 }
 0x37e   : > { %2061 = vst [vmem:[#allocation4 + $0x2150] sm:$0xff] %v7200_v50 }
 0x37f   : > { %2063 = vst [vmem:[#allocation4 + $0x2160] sm:$0xff] %v7200_v50 }
 0x380   : > { %2065 = vst [vmem:[#allocation4 + $0x2170] sm:$0xff] %v7200_v50 }
 0x381   : > { %2067 = vst [vmem:[#allocation4 + $0x2180] sm:$0xff] %v7200_v50 }
 0x382   : > { %2069 = vst [vmem:[#allocation4 + $0x2190] sm:$0xff] %v7200_v50 }
 0x383   : > { %2071 = vst [vmem:[#allocation4 + $0x21a0] sm:$0xff] %v7200_v50 }
 0x384   : > { %2073 = vst [vmem:[#allocation4 + $0x21b0] sm:$0xff] %v7200_v50 }
 0x385   : > { %2075 = vst [vmem:[#allocation4 + $0x21c0] sm:$0xff] %v7200_v50 }
 0x386   : > { %2077 = vst [vmem:[#allocation4 + $0x21d0] sm:$0xff] %v7200_v50 }
 0x387   : > { %2079 = vst [vmem:[#allocation4 + $0x21e0] sm:$0xff] %v7200_v50 }
 0x388   : > { %2081 = vst [vmem:[#allocation4 + $0x21f0] sm:$0xff] %v7200_v50 }
 0x389   : > { %2083 = vst [vmem:[#allocation4 + $0x2200] sm:$0xff] %v7200_v50 }
 0x38a   : > { %2085 = vst [vmem:[#allocation4 + $0x2210] sm:$0xff] %v7200_v50 }
 0x38b   : > { %2087 = vst [vmem:[#allocation4 + $0x2220] sm:$0xff] %v7200_v50 }
 0x38c   : > { %2089 = vst [vmem:[#allocation4 + $0x2230] sm:$0xff] %v7200_v50 }
 0x38d   : > { %2091 = vst [vmem:[#allocation4 + $0x2240] sm:$0xff] %v7200_v50 }
 0x38e   : > { %2093 = vst [vmem:[#allocation4 + $0x2250] sm:$0xff] %v7200_v50 }
 0x38f   : > { %2095 = vst [vmem:[#allocation4 + $0x2260] sm:$0xff] %v7200_v50 }
 0x390   : > { %2097 = vst [vmem:[#allocation4 + $0x2270] sm:$0xff] %v7200_v50 }
 0x391   : > { %2099 = vst [vmem:[#allocation4 + $0x2280] sm:$0xff] %v7200_v50 }
 0x392   : > { %2101 = vst [vmem:[#allocation4 + $0x2290] sm:$0xff] %v7200_v50 }
 0x393   : > { %2103 = vst [vmem:[#allocation4 + $0x22a0] sm:$0xff] %v7200_v50 }
 0x394   : > { %2105 = vst [vmem:[#allocation4 + $0x22b0] sm:$0xff] %v7200_v50 }
 0x395   : > { %2107 = vst [vmem:[#allocation4 + $0x22c0] sm:$0xff] %v7200_v50 }
 0x396   : > { %2109 = vst [vmem:[#allocation4 + $0x22d0] sm:$0xff] %v7200_v50 }
 0x397   : > { %2111 = vst [vmem:[#allocation4 + $0x22e0] sm:$0xff] %v7200_v50 }
 0x398   : > { %2113 = vst [vmem:[#allocation4 + $0x22f0] sm:$0xff] %v7200_v50 }
 0x399   : > { %2115 = vst [vmem:[#allocation4 + $0x2300] sm:$0xff] %v7200_v50 }
 0x39a   : > { %2117 = vst [vmem:[#allocation4 + $0x2310] sm:$0xff] %v7200_v50 }
 0x39b   : > { %2119 = vst [vmem:[#allocation4 + $0x2320] sm:$0xff] %v7200_v50 }
 0x39c   : > { %2121 = vst [vmem:[#allocation4 + $0x2330] sm:$0xff] %v7200_v50 }
 0x39d   : > { %2123 = vst [vmem:[#allocation4 + $0x2340] sm:$0xff] %v7200_v50 }
 0x39e   : > { %2125 = vst [vmem:[#allocation4 + $0x2350] sm:$0xff] %v7200_v50 }
 0x39f   : > { %2127 = vst [vmem:[#allocation4 + $0x2360] sm:$0xff] %v7200_v50 }
 0x3a0   : > { %2129 = vst [vmem:[#allocation4 + $0x2370] sm:$0xff] %v7200_v50 }
 0x3a1   : > { %2131 = vst [vmem:[#allocation4 + $0x2380] sm:$0xff] %v7200_v50 }
 0x3a2   : > { %2133 = vst [vmem:[#allocation4 + $0x2390] sm:$0xff] %v7200_v50 }
 0x3a3   : > { %2135 = vst [vmem:[#allocation4 + $0x23a0] sm:$0xff] %v7200_v50 }
 0x3a4   : > { %2137 = vst [vmem:[#allocation4 + $0x23b0] sm:$0xff] %v7200_v50 }
 0x3a5   : > { %2139 = vst [vmem:[#allocation4 + $0x23c0] sm:$0xff] %v7200_v50 }
 0x3a6   : > { %2141 = vst [vmem:[#allocation4 + $0x23d0] sm:$0xff] %v7200_v50 }
 0x3a7   : > { %2143 = vst [vmem:[#allocation4 + $0x23e0] sm:$0xff] %v7200_v50 }
 0x3a8   : > { %2145 = vst [vmem:[#allocation4 + $0x23f0] sm:$0xff] %v7200_v50 }
 0x3a9   : > { %2147 = vst [vmem:[#allocation4 + $0x2400] sm:$0xff] %v7200_v50 }
 0x3aa   : > { %2149 = vst [vmem:[#allocation4 + $0x2410] sm:$0xff] %v7200_v50 }
 0x3ab   : > { %2151 = vst [vmem:[#allocation4 + $0x2420] sm:$0xff] %v7200_v50 }
 0x3ac   : > { %2153 = vst [vmem:[#allocation4 + $0x2430] sm:$0xff] %v7200_v50 }
 0x3ad   : > { %2155 = vst [vmem:[#allocation4 + $0x2440] sm:$0xff] %v7200_v50 }
 0x3ae   : > { %2157 = vst [vmem:[#allocation4 + $0x2450] sm:$0xff] %v7200_v50 }
 0x3af   : > { %2159 = vst [vmem:[#allocation4 + $0x2460] sm:$0xff] %v7200_v50 }
 0x3b0   : > { %2161 = vst [vmem:[#allocation4 + $0x2470] sm:$0xff] %v7200_v50 }
 0x3b1   : > { %2163 = vst [vmem:[#allocation4 + $0x2480] sm:$0xff] %v7200_v50 }
 0x3b2   : > { %2165 = vst [vmem:[#allocation4 + $0x2490] sm:$0xff] %v7200_v50 }
 0x3b3   : > { %2167 = vst [vmem:[#allocation4 + $0x24a0] sm:$0xff] %v7200_v50 }
 0x3b4   : > { %2169 = vst [vmem:[#allocation4 + $0x24b0] sm:$0xff] %v7200_v50 }
 0x3b5   : > { %2171 = vst [vmem:[#allocation4 + $0x24c0] sm:$0xff] %v7200_v50 }
 0x3b6   : > { %2173 = vst [vmem:[#allocation4 + $0x24d0] sm:$0xff] %v7200_v50 }
 0x3b7   : > { %2175 = vst [vmem:[#allocation4 + $0x24e0] sm:$0xff] %v7200_v50 }
 0x3b8   : > { %2177 = vst [vmem:[#allocation4 + $0x24f0] sm:$0xff] %v7200_v50 }
 0x3b9   : > { %2179 = vst [vmem:[#allocation4 + $0x2500] sm:$0xff] %v7200_v50 }
 0x3ba   : > { %2181 = vst [vmem:[#allocation4 + $0x2510] sm:$0xff] %v7200_v50 }
 0x3bb   : > { %2183 = vst [vmem:[#allocation4 + $0x2520] sm:$0xff] %v7200_v50 }
 0x3bc   : > { %2185 = vst [vmem:[#allocation4 + $0x2530] sm:$0xff] %v7200_v50 }
 0x3bd   : > { %2187 = vst [vmem:[#allocation4 + $0x2540] sm:$0xff] %v7200_v50 }
 0x3be   : > { %2189 = vst [vmem:[#allocation4 + $0x2550] sm:$0xff] %v7200_v50 }
 0x3bf   : > { %2191 = vst [vmem:[#allocation4 + $0x2560] sm:$0xff] %v7200_v50 }
 0x3c0   : > { %2193 = vst [vmem:[#allocation4 + $0x2570] sm:$0xff] %v7200_v50 }
 0x3c1   : > { %2195 = vst [vmem:[#allocation4 + $0x2580] sm:$0xff] %v7200_v50 }
 0x3c2   : > { %2197 = vst [vmem:[#allocation4 + $0x2590] sm:$0xff] %v7200_v50 }
 0x3c3   : > { %2199 = vst [vmem:[#allocation4 + $0x25a0] sm:$0xff] %v7200_v50 }
 0x3c4   : > { %2201 = vst [vmem:[#allocation4 + $0x25b0] sm:$0xff] %v7200_v50 }
 0x3c5   : > { %2203 = vst [vmem:[#allocation4 + $0x25c0] sm:$0xff] %v7200_v50 }
 0x3c6   : > { %2205 = vst [vmem:[#allocation4 + $0x25d0] sm:$0xff] %v7200_v50 }
 0x3c7   : > { %2207 = vst [vmem:[#allocation4 + $0x25e0] sm:$0xff] %v7200_v50 }
 0x3c8   : > { %2209 = vst [vmem:[#allocation4 + $0x25f0] sm:$0xff] %v7200_v50 }
 0x3c9   : > { %2513 = vst.msk [vmem:[#allocation2] sm:$0xf8] %vm2512_vm2, %v7632_v52 }
 0x3ca   : > { %2517 = vst.msk [vmem:[#allocation2 + $0x10] sm:$0xff] %vm2516_vm1, %v7645_v53 }
 0x3cb   : > { %341 = vst.msk [vmem:[#allocation2 + $0x28] sm:$0xff] %vm336_vm4, %v7200_v50 }
 0x3cc   : > { %2521 = vst.msk [vmem:[#allocation2 + $0x28] sm:$0xff] %vm2518_vm5, %v2454_v61 }
 0x3cd   : > { %337 = vst.msk [vmem:[#allocation2 + $0x8] sm:$0xff] %vm336_vm4, %v7200_v50 }
 0x3ce   : > { %339 = vst.msk [vmem:[#allocation2 + $0x18] sm:$0xff] %vm336_vm4, %v7200_v50 }
 0x3cf   : > { %343 = vst.msk [vmem:[#allocation2 + $0x38] sm:$0xff] %vm336_vm4, %v7200_v50 }
 0x3d0   : > { %345 = vst.msk [vmem:[#allocation2 + $0x48] sm:$0xff] %vm336_vm4, %v7200_v50 }
 0x3d1   : > { %347 = vst.msk [vmem:[#allocation2 + $0x58] sm:$0xff] %vm336_vm4, %v7200_v50 }
 0x3d2   : > { %349 = vst.msk [vmem:[#allocation2 + $0x68] sm:$0xff] %vm336_vm4, %v7200_v50 }
 0x3d3   : > { %351 = vst.msk [vmem:[#allocation2 + $0x78] sm:$0xff] %vm336_vm4, %v7200_v50 }
 0x3d4   : > { %353 = vst.msk [vmem:[#allocation2 + $0x88] sm:$0xff] %vm336_vm4, %v7200_v50 }
 0x3d5   : > { %355 = vst.msk [vmem:[#allocation2 + $0x98] sm:$0xff] %vm336_vm4, %v7200_v50 }
 0x3d6   : > { %357 = vst.msk [vmem:[#allocation2 + $0xa8] sm:$0xff] %vm336_vm4, %v7200_v50 }
 0x3d7   : > { %359 = vst.msk [vmem:[#allocation2 + $0xb8] sm:$0xff] %vm336_vm4, %v7200_v50 }
 0x3d8   : > { %361 = vst.msk [vmem:[#allocation2 + $0xc8] sm:$0xff] %vm336_vm4, %v7200_v50 }
 0x3d9   : > { %363 = vst.msk [vmem:[#allocation2 + $0xd8] sm:$0xff] %vm336_vm4, %v7200_v50 }
 0x3da   : > { %365 = vst.msk [vmem:[#allocation2 + $0xe8] sm:$0xff] %vm336_vm4, %v7200_v50 }
 0x3db   : > { %367 = vst.msk [vmem:[#allocation2 + $0xf8] sm:$0xff] %vm336_vm4, %v7200_v50 }
 0x3dc   : > { %369 = vst.msk [vmem:[#allocation2 + $0x108] sm:$0xff] %vm336_vm4, %v7200_v50 }
 0x3dd   : > { %371 = vst.msk [vmem:[#allocation2 + $0x118] sm:$0xff] %vm336_vm4, %v7200_v50 }
 0x3de   : > { %373 = vst.msk [vmem:[#allocation2 + $0x128] sm:$0xff] %vm336_vm4, %v7200_v50 }
 0x3df   : > { %2515 = vst.msk [vmem:[#allocation2 + $0x8] sm:$0xf8] %vm2514_vm6, %v2452_v5 }
 0x3e0   : > { %2519 = vst.msk [vmem:[#allocation2 + $0x18] sm:$0xff] %vm2518_vm5, %v2453_v6 }
 0x3e1   : > { %2522 = vst.msk [vmem:[#allocation2 + $0x30] sm:$0xff] %vm2516_vm1, %v2384_v57 }
 0x3e2   : > { %2523 = vst.msk [vmem:[#allocation2 + $0x38] sm:$0xff] %vm2518_vm5, %v2455_v8 }
 0x3e3   : > { %2524 = vst.msk [vmem:[#allocation2 + $0x40] sm:$0xff] %vm2516_vm1, %v2388_v58 }
 0x3e4   : > { %2525 = vst.msk [vmem:[#allocation2 + $0x48] sm:$0xff] %vm2518_vm5, %v2456_v10 }
 0x3e5   : > { %2526 = vst.msk [vmem:[#allocation2 + $0x50] sm:$0xff] %vm2516_vm1, %v2392_v63 }
 0x3e6   : > { %2527 = vst.msk [vmem:[#allocation2 + $0x58] sm:$0xff] %vm2518_vm5, %v2457_v12 }
 0x3e7   : > { %2528 = vst.msk [vmem:[#allocation2 + $0x60] sm:$0xff] %vm2516_vm1, %v2396_v0 }
 0x3e8   : > { %2529 = vst.msk [vmem:[#allocation2 + $0x68] sm:$0xff] %vm2518_vm5, %v2458_v13 }
 0x3e9   : > { %2530 = vst.msk [vmem:[#allocation2 + $0x70] sm:$0xff] %vm2516_vm1, %v2400_v1 }
 0x3ea   : > { %2531 = vst.msk [vmem:[#allocation2 + $0x78] sm:$0xff] %vm2518_vm5, %v2459_v15 }
 0x3eb   : > { %2532 = vst.msk [vmem:[#allocation2 + $0x80] sm:$0xff] %vm2516_vm1, %v2404_v7 }
 0x3ec   : > { %2533 = vst.msk [vmem:[#allocation2 + $0x88] sm:$0xff] %vm2518_vm5, %v2460_v17 }
 0x3ed   : > { %2534 = vst.msk [vmem:[#allocation2 + $0x90] sm:$0xff] %vm2516_vm1, %v2408_v9 }
 0x3ee   : > { %2535 = vst.msk [vmem:[#allocation2 + $0x98] sm:$0xff] %vm2518_vm5, %v2461_v19 }
 0x3ef   : > { %2536 = vst.msk [vmem:[#allocation2 + $0xa0] sm:$0xff] %vm2516_vm1, %v2412_v11 }
 0x3f0   : > { %2537 = vst.msk [vmem:[#allocation2 + $0xa8] sm:$0xff] %vm2518_vm5, %v2462_v20 }
 0x3f1   : > { %2538 = vst.msk [vmem:[#allocation2 + $0xb0] sm:$0xff] %vm2516_vm1, %v2416_v21 }
 0x3f2   : > { %2539 = vst.msk [vmem:[#allocation2 + $0xb8] sm:$0xff] %vm2518_vm5, %v2463_v22 }
 0x3f3   : > { %2540 = vst.msk [vmem:[#allocation2 + $0xc0] sm:$0xff] %vm2516_vm1, %v2420_v23 }
 0x3f4   : > { %2542 = vst.msk [vmem:[#allocation2 + $0xd0] sm:$0xff] %vm2516_vm1, %v2424_v24 }
 0x3f5   : > { %2541 = vst.msk [vmem:[#allocation2 + $0xc8] sm:$0xff] %vm2518_vm5, %v2464_v26 }
 0x3f6   : > { %376 = vst.msk [vmem:[#allocation2 + $0x138] sm:$0xf] %vm375_vm7, %v7748_v29 }
 0x3f7   : > { %2543 = vst.msk [vmem:[#allocation2 + $0xd8] sm:$0xff] %vm2518_vm5, %v2465_v28 }
 0x3f8   : > { %379 = vst.msk [vmem:[#allocation3 + $0x8] sm:$0xff] %vm378_vm8, %v7748_v29 }
 0x3f9   : > { %381 = vst.msk [vmem:[#allocation3 + $0x18] sm:$0xff] %vm378_vm8, %v7748_v29 }
 0x3fa   : > { %383 = vst.msk [vmem:[#allocation3 + $0x28] sm:$0xff] %vm378_vm8, %v7748_v29 }
 0x3fb   : > { %385 = vst.msk [vmem:[#allocation3 + $0x38] sm:$0xff] %vm378_vm8, %v7748_v29 }
 0x3fc   : > { %2544 = vst.msk [vmem:[#allocation2 + $0xe0] sm:$0xff] %vm2516_vm1, %v2428_v31 }
 0x3fd   : > { %2545 = vst.msk [vmem:[#allocation2 + $0xe8] sm:$0xff] %vm2518_vm5, %v2466_v32 }
 0x3fe   : > { %2546 = vst.msk [vmem:[#allocation2 + $0xf0] sm:$0xff] %vm2516_vm1, %v2432_v33 }
 0x3ff   : > { %387 = vst.msk [vmem:[#allocation3 + $0x48] sm:$0xff] %vm378_vm8, %v7748_v29 }
 0x400   : > { %2548 = vst.msk [vmem:[#allocation2 + $0x100] sm:$0xff] %vm2516_vm1, %v2436_v34 }
 0x401   : > { %389 = vst.msk [vmem:[#allocation3 + $0x58] sm:$0xff] %vm378_vm8, %v7748_v29 }
 0x402   : > { %391 = vst.msk [vmem:[#allocation3 + $0x68] sm:$0xff] %vm378_vm8, %v7748_v29 }
 0x403   : > { %393 = vst.msk [vmem:[#allocation3 + $0x78] sm:$0xff] %vm378_vm8, %v7748_v29 }
 0x404   : > { %395 = vst.msk [vmem:[#allocation3 + $0x88] sm:$0xff] %vm378_vm8, %v7748_v29 }
 0x405   : > { %2547 = vst.msk [vmem:[#allocation2 + $0xf8] sm:$0xff] %vm2518_vm5, %v2467_v36 }
 0x406   : > { %397 = vst.msk [vmem:[#allocation3 + $0x98] sm:$0xff] %vm378_vm8, %v7748_v29 }
 0x407   : > { %2549 = vst.msk [vmem:[#allocation2 + $0x108] sm:$0xff] %vm2518_vm5, %v2468_v38 }
 0x408   : > { %399 = vst.msk [vmem:[#allocation3 + $0xa8] sm:$0xff] %vm378_vm8, %v7748_v29 }
 0x409   : > { %401 = vst.msk [vmem:[#allocation3 + $0xb8] sm:$0xff] %vm378_vm8, %v7748_v29 }
 0x40a   : > { %403 = vst.msk [vmem:[#allocation3 + $0xc8] sm:$0xff] %vm378_vm8, %v7748_v29 }
 0x40b   : > { %405 = vst.msk [vmem:[#allocation3 + $0xd8] sm:$0xff] %vm378_vm8, %v7748_v29 }
 0x40c   : > { %2550 = vst.msk [vmem:[#allocation2 + $0x110] sm:$0xff] %vm2516_vm1, %v2440_v40 }
 0x40d   : > { %2551 = vst.msk [vmem:[#allocation2 + $0x118] sm:$0xff] %vm2518_vm5, %v2469_v41 }
 0x40e   : > { %2552 = vst.msk [vmem:[#allocation2 + $0x120] sm:$0xff] %vm2516_vm1, %v2444_v42 }
 0x40f   : > { %407 = vst.msk [vmem:[#allocation3 + $0xe8] sm:$0xff] %vm378_vm8, %v7748_v29 }
 0x410   : > { %2555 = vst.msk [vmem:[#allocation2 + $0x130] sm:$0x1] %vm2554_vm9, %v2448_v43 }
 0x411   : > { %409 = vst.msk [vmem:[#allocation3 + $0xf8] sm:$0xff] %vm378_vm8, %v7748_v29 }
 0x412   : > { %411 = vst.msk [vmem:[#allocation3 + $0x108] sm:$0xff] %vm378_vm8, %v7748_v29 }
 0x413   : > { %413 = vst.msk [vmem:[#allocation3 + $0x118] sm:$0xff] %vm378_vm8, %v7748_v29 }
 0x414   : > { %415 = vst.msk [vmem:[#allocation3 + $0x128] sm:$0xff] %vm378_vm8, %v7748_v29 }
 0x415   : > { %2553 = vst.msk [vmem:[#allocation2 + $0x128] sm:$0xff] %vm2518_vm5, %v2470_v45 }
 0x416   : > { %417 = vst.msk [vmem:[#allocation3 + $0x138] sm:$0xff] %vm378_vm8, %v7748_v29 }
 0x417   : > { %2557 = vst.msk [vmem:[#allocation2 + $0x138] sm:$0x1] %vm2556_vm10, %v2471_v47 }
 0x418   : > { %419 = vst.msk [vmem:[#allocation3 + $0x148] sm:$0xff] %vm378_vm8, %v7748_v29 }
 0x419   : > { %421 = vst.msk [vmem:[#allocation3 + $0x158] sm:$0xff] %vm378_vm8, %v7748_v29 }
 0x41a   : > { %423 = vst.msk [vmem:[#allocation3 + $0x168] sm:$0xff] %vm378_vm8, %v7748_v29 }
 0x41b   : > { %425 = vst.msk [vmem:[#allocation3 + $0x178] sm:$0xff] %vm378_vm8, %v7748_v29 }
 0x41c   : > { %427 = vst.msk [vmem:[#allocation3 + $0x188] sm:$0xff] %vm378_vm8, %v7748_v29 }
 0x41d   : > { %429 = vst.msk [vmem:[#allocation3 + $0x198] sm:$0xff] %vm378_vm8, %v7748_v29 }
 0x41e   : > { %431 = vst.msk [vmem:[#allocation3 + $0x1a8] sm:$0xff] %vm378_vm8, %v7748_v29 }
 0x41f   : > { %433 = vst.msk [vmem:[#allocation3 + $0x1b8] sm:$0xff] %vm378_vm8, %v7748_v29 }
 0x420   : > { %435 = vst.msk [vmem:[#allocation3 + $0x1c8] sm:$0xff] %vm378_vm8, %v7748_v29 }
 0x421   : > { %437 = vst.msk [vmem:[#allocation3 + $0x1d8] sm:$0xff] %vm378_vm8, %v7748_v29 }
 0x422   : > { %439 = vst.msk [vmem:[#allocation3 + $0x1e8] sm:$0xff] %vm378_vm8, %v7748_v29 }
 0x423   : > { %441 = vst.msk [vmem:[#allocation3 + $0x1f8] sm:$0xff] %vm378_vm8, %v7748_v29 }
 0x424   : > { %443 = vst.msk [vmem:[#allocation3 + $0x208] sm:$0xff] %vm378_vm8, %v7748_v29 }
 0x425   : > { %445 = vst.msk [vmem:[#allocation3 + $0x218] sm:$0xff] %vm378_vm8, %v7748_v29 }
 0x426   : > { %447 = vst.msk [vmem:[#allocation3 + $0x228] sm:$0xff] %vm378_vm8, %v7748_v29 }
 0x427   : > { %449 = vst.msk [vmem:[#allocation3 + $0x238] sm:$0xff] %vm378_vm8, %v7748_v29 }
 0x428   : > { %451 = vst.msk [vmem:[#allocation3 + $0x248] sm:$0xff] %vm378_vm8, %v7748_v29 }
 0x429   : > { %453 = vst.msk [vmem:[#allocation3 + $0x258] sm:$0xff] %vm378_vm8, %v7748_v29 }
 0x42a   : > { %455 = vst.msk [vmem:[#allocation3 + $0x268] sm:$0xff] %vm378_vm8, %v7748_v29 }
 0x42b   : > { %457 = vst.msk [vmem:[#allocation3 + $0x278] sm:$0xff] %vm378_vm8, %v7748_v29 }
 0x42c   : > { %459 = vst.msk [vmem:[#allocation3 + $0x288] sm:$0xff] %vm378_vm8, %v7748_v29 }
 0x42d   : > { %461 = vst.msk [vmem:[#allocation3 + $0x298] sm:$0xff] %vm378_vm8, %v7748_v29 }
 0x42e   : > { %463 = vst.msk [vmem:[#allocation3 + $0x2a8] sm:$0xff] %vm378_vm8, %v7748_v29 }
 0x42f   : > { %465 = vst.msk [vmem:[#allocation3 + $0x2b8] sm:$0xff] %vm378_vm8, %v7748_v29 }
 0x430   : > { %467 = vst.msk [vmem:[#allocation3 + $0x2c8] sm:$0xff] %vm378_vm8, %v7748_v29 }
 0x431   : > { %469 = vst.msk [vmem:[#allocation3 + $0x2d8] sm:$0xff] %vm378_vm8, %v7748_v29 }
 0x432   : > { %471 = vst.msk [vmem:[#allocation3 + $0x2e8] sm:$0xff] %vm378_vm8, %v7748_v29 }
 0x433   : > { %473 = vst.msk [vmem:[#allocation3 + $0x2f8] sm:$0xff] %vm378_vm8, %v7748_v29 }
 0x434   : > { %475 = vst.msk [vmem:[#allocation3 + $0x308] sm:$0xff] %vm378_vm8, %v7748_v29 }
 0x435   : > { %477 = vst.msk [vmem:[#allocation3 + $0x318] sm:$0xff] %vm378_vm8, %v7748_v29 }
 0x436   : > { %479 = vst.msk [vmem:[#allocation3 + $0x328] sm:$0xff] %vm378_vm8, %v7748_v29 }
 0x437   : > { %481 = vst.msk [vmem:[#allocation3 + $0x338] sm:$0xff] %vm378_vm8, %v7748_v29 }
 0x438   : > { %483 = vst.msk [vmem:[#allocation3 + $0x348] sm:$0xff] %vm378_vm8, %v7748_v29 }
 0x439   : > { %485 = vst.msk [vmem:[#allocation3 + $0x358] sm:$0xff] %vm378_vm8, %v7748_v29 }
 0x43a   : > { %487 = vst.msk [vmem:[#allocation3 + $0x368] sm:$0xff] %vm378_vm8, %v7748_v29 }
 0x43b   : > { %489 = vst.msk [vmem:[#allocation3 + $0x378] sm:$0xff] %vm378_vm8, %v7748_v29 }
 0x43c   : > { %491 = vst.msk [vmem:[#allocation3 + $0x388] sm:$0xff] %vm378_vm8, %v7748_v29 }
 0x43d   : > { %493 = vst.msk [vmem:[#allocation3 + $0x398] sm:$0xff] %vm378_vm8, %v7748_v29 }
 0x43e   : > { %495 = vst.msk [vmem:[#allocation3 + $0x3a8] sm:$0xff] %vm378_vm8, %v7748_v29 }
 0x43f   : > { %497 = vst.msk [vmem:[#allocation3 + $0x3b8] sm:$0xff] %vm378_vm8, %v7748_v29 }
 0x440   : > { %499 = vst.msk [vmem:[#allocation3 + $0x3c8] sm:$0xff] %vm378_vm8, %v7748_v29 }
 0x441   : > { %501 = vst.msk [vmem:[#allocation3 + $0x3d8] sm:$0xff] %vm378_vm8, %v7748_v29 }
 0x442   : > { %503 = vst.msk [vmem:[#allocation3 + $0x3e8] sm:$0xff] %vm378_vm8, %v7748_v29 }
 0x443   : > { %505 = vst.msk [vmem:[#allocation3 + $0x3f8] sm:$0xff] %vm378_vm8, %v7748_v29 }
 0x444   : > { %507 = vst.msk [vmem:[#allocation3 + $0x408] sm:$0xff] %vm378_vm8, %v7748_v29 }
 0x445   : > { %509 = vst.msk [vmem:[#allocation3 + $0x418] sm:$0xff] %vm378_vm8, %v7748_v29 }
 0x446   : > { %511 = vst.msk [vmem:[#allocation3 + $0x428] sm:$0xff] %vm378_vm8, %v7748_v29 }
 0x447   : > { %513 = vst.msk [vmem:[#allocation3 + $0x438] sm:$0xff] %vm378_vm8, %v7748_v29 }
 0x448   : > { %515 = vst.msk [vmem:[#allocation3 + $0x448] sm:$0xff] %vm378_vm8, %v7748_v29 }
 0x449   : > { %517 = vst.msk [vmem:[#allocation3 + $0x458] sm:$0xff] %vm378_vm8, %v7748_v29 }
 0x44a   : > { %519 = vst.msk [vmem:[#allocation3 + $0x468] sm:$0xff] %vm378_vm8, %v7748_v29 }
 0x44b   : > { %521 = vst.msk [vmem:[#allocation3 + $0x478] sm:$0xff] %vm378_vm8, %v7748_v29 }
 0x44c   : > { %523 = vst.msk [vmem:[#allocation3 + $0x488] sm:$0xff] %vm378_vm8, %v7748_v29 }
 0x44d   : > { %525 = vst.msk [vmem:[#allocation3 + $0x498] sm:$0xff] %vm378_vm8, %v7748_v29 }
 0x44e   : > { %527 = vst.msk [vmem:[#allocation3 + $0x4a8] sm:$0xff] %vm378_vm8, %v7748_v29 }
 0x44f   : > { %529 = vst.msk [vmem:[#allocation3 + $0x4b8] sm:$0xff] %vm378_vm8, %v7748_v29 }
 0x450   : > { %531 = vst.msk [vmem:[#allocation3 + $0x4c8] sm:$0xff] %vm378_vm8, %v7748_v29 }
 0x451   : > { %533 = vst.msk [vmem:[#allocation3 + $0x4d8] sm:$0xff] %vm378_vm8, %v7748_v29 }
 0x452   : > { %535 = vst.msk [vmem:[#allocation3 + $0x4e8] sm:$0xff] %vm378_vm8, %v7748_v29 }
 0x453   : > { %537 = vst.msk [vmem:[#allocation3 + $0x4f8] sm:$0xff] %vm378_vm8, %v7748_v29 }
 0x454   : > { %539 = vst.msk [vmem:[#allocation3 + $0x508] sm:$0xff] %vm378_vm8, %v7748_v29 }
 0x455   : > { %541 = vst.msk [vmem:[#allocation3 + $0x518] sm:$0xff] %vm378_vm8, %v7748_v29 }
 0x456   : > { %543 = vst.msk [vmem:[#allocation3 + $0x528] sm:$0xff] %vm378_vm8, %v7748_v29 }
 0x457   : > { %545 = vst.msk [vmem:[#allocation3 + $0x538] sm:$0xff] %vm378_vm8, %v7748_v29 }
 0x458   : > { %547 = vst.msk [vmem:[#allocation3 + $0x548] sm:$0xff] %vm378_vm8, %v7748_v29 }
 0x459   : > { %549 = vst.msk [vmem:[#allocation3 + $0x558] sm:$0xff] %vm378_vm8, %v7748_v29 }
 0x45a   : > { %551 = vst.msk [vmem:[#allocation3 + $0x568] sm:$0xff] %vm378_vm8, %v7748_v29 }
 0x45b   : > { %553 = vst.msk [vmem:[#allocation3 + $0x578] sm:$0xff] %vm378_vm8, %v7748_v29 }
 0x45c   : > { %555 = vst.msk [vmem:[#allocation3 + $0x588] sm:$0xff] %vm378_vm8, %v7748_v29 }
 0x45d   : > { %557 = vst.msk [vmem:[#allocation3 + $0x598] sm:$0xff] %vm378_vm8, %v7748_v29 }
 0x45e   : > { %559 = vst.msk [vmem:[#allocation3 + $0x5a8] sm:$0xff] %vm378_vm8, %v7748_v29 }
 0x45f   : > { %561 = vst.msk [vmem:[#allocation3 + $0x5b8] sm:$0xff] %vm378_vm8, %v7748_v29 }
 0x460   : > { %563 = vst.msk [vmem:[#allocation3 + $0x5c8] sm:$0xff] %vm378_vm8, %v7748_v29 }
 0x461   : > { %565 = vst.msk [vmem:[#allocation3 + $0x5d8] sm:$0xff] %vm378_vm8, %v7748_v29 }
 0x462   : > { %567 = vst.msk [vmem:[#allocation3 + $0x5e8] sm:$0xff] %vm378_vm8, %v7748_v29 }
 0x463   : > { %569 = vst.msk [vmem:[#allocation3 + $0x5f8] sm:$0xff] %vm378_vm8, %v7748_v29 }
 0x464   : > { %571 = vst.msk [vmem:[#allocation3 + $0x608] sm:$0xff] %vm378_vm8, %v7748_v29 }
 0x465   : > { %573 = vst.msk [vmem:[#allocation3 + $0x618] sm:$0xff] %vm378_vm8, %v7748_v29 }
 0x466   : > { %575 = vst.msk [vmem:[#allocation3 + $0x628] sm:$0xff] %vm378_vm8, %v7748_v29 }
 0x467   : > { %577 = vst.msk [vmem:[#allocation3 + $0x638] sm:$0xff] %vm378_vm8, %v7748_v29 }
 0x468   : > { %579 = vst.msk [vmem:[#allocation3 + $0x648] sm:$0xff] %vm378_vm8, %v7748_v29 }
 0x469   : > { %581 = vst.msk [vmem:[#allocation3 + $0x658] sm:$0xff] %vm378_vm8, %v7748_v29 }
 0x46a   : > { %583 = vst.msk [vmem:[#allocation3 + $0x668] sm:$0xff] %vm378_vm8, %v7748_v29 }
 0x46b   : > { %585 = vst.msk [vmem:[#allocation3 + $0x678] sm:$0xff] %vm378_vm8, %v7748_v29 }
 0x46c   : > { %587 = vst.msk [vmem:[#allocation3 + $0x688] sm:$0xff] %vm378_vm8, %v7748_v29 }
 0x46d   : > { %589 = vst.msk [vmem:[#allocation3 + $0x698] sm:$0xff] %vm378_vm8, %v7748_v29 }
 0x46e   : > { %591 = vst.msk [vmem:[#allocation3 + $0x6a8] sm:$0xff] %vm378_vm8, %v7748_v29 }
 0x46f   : > { %593 = vst.msk [vmem:[#allocation3 + $0x6b8] sm:$0xff] %vm378_vm8, %v7748_v29 }
 0x470   : > { %595 = vst.msk [vmem:[#allocation3 + $0x6c8] sm:$0xff] %vm378_vm8, %v7748_v29 }
 0x471   : > { %597 = vst.msk [vmem:[#allocation3 + $0x6d8] sm:$0xff] %vm378_vm8, %v7748_v29 }
 0x472   : > { %599 = vst.msk [vmem:[#allocation3 + $0x6e8] sm:$0xff] %vm378_vm8, %v7748_v29 }
 0x473   : > { %601 = vst.msk [vmem:[#allocation3 + $0x6f8] sm:$0xff] %vm378_vm8, %v7748_v29 }
 0x474   : > { %603 = vst.msk [vmem:[#allocation3 + $0x708] sm:$0xff] %vm378_vm8, %v7748_v29 }
 0x475   : > { %605 = vst.msk [vmem:[#allocation3 + $0x718] sm:$0xff] %vm378_vm8, %v7748_v29 }
 0x476   : > { %607 = vst.msk [vmem:[#allocation3 + $0x728] sm:$0xff] %vm378_vm8, %v7748_v29 }
 0x477   : > { %609 = vst.msk [vmem:[#allocation3 + $0x738] sm:$0xff] %vm378_vm8, %v7748_v29 }
 0x478   : > { %611 = vst.msk [vmem:[#allocation3 + $0x748] sm:$0xff] %vm378_vm8, %v7748_v29 }
 0x479   : > { %613 = vst.msk [vmem:[#allocation3 + $0x758] sm:$0xff] %vm378_vm8, %v7748_v29 }
 0x47a   : > { %615 = vst.msk [vmem:[#allocation3 + $0x768] sm:$0xff] %vm378_vm8, %v7748_v29 }
 0x47b   : > { %617 = vst.msk [vmem:[#allocation3 + $0x778] sm:$0xff] %vm378_vm8, %v7748_v29 }
 0x47c   : > { %619 = vst.msk [vmem:[#allocation3 + $0x788] sm:$0xff] %vm378_vm8, %v7748_v29 }
 0x47d   : > { %621 = vst.msk [vmem:[#allocation3 + $0x798] sm:$0xff] %vm378_vm8, %v7748_v29 }
 0x47e   : > { %623 = vst.msk [vmem:[#allocation3 + $0x7a8] sm:$0xff] %vm378_vm8, %v7748_v29 }
 0x47f   : > { %625 = vst.msk [vmem:[#allocation3 + $0x7b8] sm:$0xff] %vm378_vm8, %v7748_v29 }
 0x480   : > { %627 = vst.msk [vmem:[#allocation3 + $0x7c8] sm:$0xff] %vm378_vm8, %v7748_v29 }
 0x481   : > { %629 = vst.msk [vmem:[#allocation3 + $0x7d8] sm:$0xff] %vm378_vm8, %v7748_v29 }
 0x482   : > { %631 = vst.msk [vmem:[#allocation3 + $0x7e8] sm:$0xff] %vm378_vm8, %v7748_v29 }
 0x483   : > { %633 = vst.msk [vmem:[#allocation3 + $0x7f8] sm:$0xff] %vm378_vm8, %v7748_v29 }
 0x484   : > { %635 = vst.msk [vmem:[#allocation3 + $0x808] sm:$0xff] %vm378_vm8, %v7748_v29 }
 0x485   : > { %637 = vst.msk [vmem:[#allocation3 + $0x818] sm:$0xff] %vm378_vm8, %v7748_v29 }
 0x486   : > { %639 = vst.msk [vmem:[#allocation3 + $0x828] sm:$0xff] %vm378_vm8, %v7748_v29 }
 0x487   : > { %641 = vst.msk [vmem:[#allocation3 + $0x838] sm:$0xff] %vm378_vm8, %v7748_v29 }
 0x488   : > { %643 = vst.msk [vmem:[#allocation3 + $0x848] sm:$0xff] %vm378_vm8, %v7748_v29 }
 0x489   : > { %645 = vst.msk [vmem:[#allocation3 + $0x858] sm:$0xff] %vm378_vm8, %v7748_v29 }
 0x48a   : > { %647 = vst.msk [vmem:[#allocation3 + $0x868] sm:$0xff] %vm378_vm8, %v7748_v29 }
 0x48b   : > { %649 = vst.msk [vmem:[#allocation3 + $0x878] sm:$0xff] %vm378_vm8, %v7748_v29 }
 0x48c   : > { %651 = vst.msk [vmem:[#allocation3 + $0x888] sm:$0xff] %vm378_vm8, %v7748_v29 }
 0x48d   : > { %653 = vst.msk [vmem:[#allocation3 + $0x898] sm:$0xff] %vm378_vm8, %v7748_v29 }
 0x48e   : > { %655 = vst.msk [vmem:[#allocation3 + $0x8a8] sm:$0xff] %vm378_vm8, %v7748_v29 }
 0x48f   : > { %657 = vst.msk [vmem:[#allocation3 + $0x8b8] sm:$0xff] %vm378_vm8, %v7748_v29 }
 0x490   : > { %659 = vst.msk [vmem:[#allocation3 + $0x8c8] sm:$0xff] %vm378_vm8, %v7748_v29 }
 0x491   : > { %661 = vst.msk [vmem:[#allocation3 + $0x8d8] sm:$0xff] %vm378_vm8, %v7748_v29 }
 0x492   : > { %663 = vst.msk [vmem:[#allocation3 + $0x8e8] sm:$0xff] %vm378_vm8, %v7748_v29 }
 0x493   : > { %665 = vst.msk [vmem:[#allocation3 + $0x8f8] sm:$0xff] %vm378_vm8, %v7748_v29 }
 0x494   : > { %667 = vst.msk [vmem:[#allocation3 + $0x908] sm:$0xff] %vm378_vm8, %v7748_v29 }
 0x495   : > { %669 = vst.msk [vmem:[#allocation3 + $0x918] sm:$0xff] %vm378_vm8, %v7748_v29 }
 0x496   : > { %671 = vst.msk [vmem:[#allocation3 + $0x928] sm:$0xff] %vm378_vm8, %v7748_v29 }
 0x497   : > { %673 = vst.msk [vmem:[#allocation3 + $0x938] sm:$0xff] %vm378_vm8, %v7748_v29 }
 0x498   : > { %675 = vst.msk [vmem:[#allocation3 + $0x948] sm:$0xff] %vm378_vm8, %v7748_v29 }
 0x499   : > { %677 = vst.msk [vmem:[#allocation3 + $0x958] sm:$0xff] %vm378_vm8, %v7748_v29 }
 0x49a   : > { %679 = vst.msk [vmem:[#allocation3 + $0x968] sm:$0xff] %vm378_vm8, %v7748_v29 }
 0x49b   : > { %681 = vst.msk [vmem:[#allocation3 + $0x978] sm:$0xff] %vm378_vm8, %v7748_v29 }
 0x49c   : > { %683 = vst.msk [vmem:[#allocation3 + $0x988] sm:$0xff] %vm378_vm8, %v7748_v29 }
 0x49d   : > { %685 = vst.msk [vmem:[#allocation3 + $0x998] sm:$0xff] %vm378_vm8, %v7748_v29 }
 0x49e   : > { %687 = vst.msk [vmem:[#allocation3 + $0x9a8] sm:$0xff] %vm378_vm8, %v7748_v29 }
 0x49f   : > { %689 = vst.msk [vmem:[#allocation3 + $0x9b8] sm:$0xff] %vm378_vm8, %v7748_v29 }
 0x4a0   : > { %691 = vst.msk [vmem:[#allocation3 + $0x9c8] sm:$0xff] %vm378_vm8, %v7748_v29 }
 0x4a1   : > { %693 = vst.msk [vmem:[#allocation3 + $0x9d8] sm:$0xff] %vm378_vm8, %v7748_v29 }
 0x4a2   : > { %695 = vst.msk [vmem:[#allocation3 + $0x9e8] sm:$0xff] %vm378_vm8, %v7748_v29 }
 0x4a3   : > { %697 = vst.msk [vmem:[#allocation3 + $0x9f8] sm:$0xff] %vm378_vm8, %v7748_v29 }
 0x4a4   : > { %699 = vst.msk [vmem:[#allocation3 + $0xa08] sm:$0xff] %vm378_vm8, %v7748_v29 }
 0x4a5   : > { %701 = vst.msk [vmem:[#allocation3 + $0xa18] sm:$0xff] %vm378_vm8, %v7748_v29 }
 0x4a6   : > { %703 = vst.msk [vmem:[#allocation3 + $0xa28] sm:$0xff] %vm378_vm8, %v7748_v29 }
 0x4a7   : > { %705 = vst.msk [vmem:[#allocation3 + $0xa38] sm:$0xff] %vm378_vm8, %v7748_v29 }
 0x4a8   : > { %707 = vst.msk [vmem:[#allocation3 + $0xa48] sm:$0xff] %vm378_vm8, %v7748_v29 }
 0x4a9   : > { %709 = vst.msk [vmem:[#allocation3 + $0xa58] sm:$0xff] %vm378_vm8, %v7748_v29 }
 0x4aa   : > { %711 = vst.msk [vmem:[#allocation3 + $0xa68] sm:$0xff] %vm378_vm8, %v7748_v29 }
 0x4ab   : > { %713 = vst.msk [vmem:[#allocation3 + $0xa78] sm:$0xff] %vm378_vm8, %v7748_v29 }
 0x4ac   : > { %715 = vst.msk [vmem:[#allocation3 + $0xa88] sm:$0xff] %vm378_vm8, %v7748_v29 }
 0x4ad   : > { %717 = vst.msk [vmem:[#allocation3 + $0xa98] sm:$0xff] %vm378_vm8, %v7748_v29 }
 0x4ae   : > { %719 = vst.msk [vmem:[#allocation3 + $0xaa8] sm:$0xff] %vm378_vm8, %v7748_v29 }
 0x4af   : > { %721 = vst.msk [vmem:[#allocation3 + $0xab8] sm:$0xff] %vm378_vm8, %v7748_v29 }
 0x4b0   : > { %723 = vst.msk [vmem:[#allocation3 + $0xac8] sm:$0xff] %vm378_vm8, %v7748_v29 }
 0x4b1   : > { %725 = vst.msk [vmem:[#allocation3 + $0xad8] sm:$0xff] %vm378_vm8, %v7748_v29 }
 0x4b2   : > { %727 = vst.msk [vmem:[#allocation3 + $0xae8] sm:$0xff] %vm378_vm8, %v7748_v29 }
 0x4b3   : > { %729 = vst.msk [vmem:[#allocation3 + $0xaf8] sm:$0xff] %vm378_vm8, %v7748_v29 }
 0x4b4   : > { %731 = vst.msk [vmem:[#allocation3 + $0xb08] sm:$0xff] %vm378_vm8, %v7748_v29 }
 0x4b5   : > { %733 = vst.msk [vmem:[#allocation3 + $0xb18] sm:$0xff] %vm378_vm8, %v7748_v29 }
 0x4b6   : > { %735 = vst.msk [vmem:[#allocation3 + $0xb28] sm:$0xff] %vm378_vm8, %v7748_v29 }
 0x4b7   : > { %737 = vst.msk [vmem:[#allocation3 + $0xb38] sm:$0xff] %vm378_vm8, %v7748_v29 }
 0x4b8   : > { %739 = vst.msk [vmem:[#allocation3 + $0xb48] sm:$0xff] %vm378_vm8, %v7748_v29 }
 0x4b9   : > { %741 = vst.msk [vmem:[#allocation3 + $0xb58] sm:$0xff] %vm378_vm8, %v7748_v29 }
 0x4ba   : > { %743 = vst.msk [vmem:[#allocation3 + $0xb68] sm:$0xff] %vm378_vm8, %v7748_v29 }
 0x4bb   : > { %745 = vst.msk [vmem:[#allocation3 + $0xb78] sm:$0xff] %vm378_vm8, %v7748_v29 }
 0x4bc   : > { %747 = vst.msk [vmem:[#allocation3 + $0xb88] sm:$0xff] %vm378_vm8, %v7748_v29 }
 0x4bd   : > { %749 = vst.msk [vmem:[#allocation3 + $0xb98] sm:$0xff] %vm378_vm8, %v7748_v29 }
 0x4be   : > { %751 = vst.msk [vmem:[#allocation3 + $0xba8] sm:$0xff] %vm378_vm8, %v7748_v29 }
 0x4bf   : > { %753 = vst.msk [vmem:[#allocation3 + $0xbb8] sm:$0xff] %vm378_vm8, %v7748_v29 }
 0x4c0   : > { %755 = vst.msk [vmem:[#allocation3 + $0xbc8] sm:$0xff] %vm378_vm8, %v7748_v29 }
 0x4c1   : > { %757 = vst.msk [vmem:[#allocation3 + $0xbd8] sm:$0xff] %vm378_vm8, %v7748_v29 }
 0x4c2   : > { %759 = vst.msk [vmem:[#allocation3 + $0xbe8] sm:$0xff] %vm378_vm8, %v7748_v29 }
 0x4c3   : > { %761 = vst.msk [vmem:[#allocation3 + $0xbf8] sm:$0xff] %vm378_vm8, %v7748_v29 }
 0x4c4   : > { %763 = vst.msk [vmem:[#allocation3 + $0xc08] sm:$0xff] %vm378_vm8, %v7748_v29 }
 0x4c5   : > { %765 = vst.msk [vmem:[#allocation3 + $0xc18] sm:$0xff] %vm378_vm8, %v7748_v29 }
 0x4c6   : > { %767 = vst.msk [vmem:[#allocation3 + $0xc28] sm:$0xff] %vm378_vm8, %v7748_v29 }
 0x4c7   : > { %769 = vst.msk [vmem:[#allocation3 + $0xc38] sm:$0xff] %vm378_vm8, %v7748_v29 }
 0x4c8   : > { %771 = vst.msk [vmem:[#allocation3 + $0xc48] sm:$0xff] %vm378_vm8, %v7748_v29 }
 0x4c9   : > { %773 = vst.msk [vmem:[#allocation3 + $0xc58] sm:$0xff] %vm378_vm8, %v7748_v29 }
 0x4ca   : > { %775 = vst.msk [vmem:[#allocation3 + $0xc68] sm:$0xff] %vm378_vm8, %v7748_v29 }
 0x4cb   : > { %777 = vst.msk [vmem:[#allocation3 + $0xc78] sm:$0xff] %vm378_vm8, %v7748_v29 }
 0x4cc   : > { %779 = vst.msk [vmem:[#allocation3 + $0xc88] sm:$0xff] %vm378_vm8, %v7748_v29 }
 0x4cd   : > { %781 = vst.msk [vmem:[#allocation3 + $0xc98] sm:$0xff] %vm378_vm8, %v7748_v29 }
 0x4ce   : > { %783 = vst.msk [vmem:[#allocation3 + $0xca8] sm:$0xff] %vm378_vm8, %v7748_v29 }
 0x4cf   : > { %785 = vst.msk [vmem:[#allocation3 + $0xcb8] sm:$0xff] %vm378_vm8, %v7748_v29 }
 0x4d0   : > { %787 = vst.msk [vmem:[#allocation3 + $0xcc8] sm:$0xff] %vm378_vm8, %v7748_v29 }
 0x4d1   : > { %789 = vst.msk [vmem:[#allocation3 + $0xcd8] sm:$0xff] %vm378_vm8, %v7748_v29 }
 0x4d2   : > { %791 = vst.msk [vmem:[#allocation3 + $0xce8] sm:$0xff] %vm378_vm8, %v7748_v29 }
 0x4d3   : > { %793 = vst.msk [vmem:[#allocation3 + $0xcf8] sm:$0xff] %vm378_vm8, %v7748_v29 }
 0x4d4   : > { %795 = vst.msk [vmem:[#allocation3 + $0xd08] sm:$0xff] %vm378_vm8, %v7748_v29 }
 0x4d5   : > { %797 = vst.msk [vmem:[#allocation3 + $0xd18] sm:$0xff] %vm378_vm8, %v7748_v29 }
 0x4d6   : > { %799 = vst.msk [vmem:[#allocation3 + $0xd28] sm:$0xff] %vm378_vm8, %v7748_v29 }
 0x4d7   : > { %801 = vst.msk [vmem:[#allocation3 + $0xd38] sm:$0xff] %vm378_vm8, %v7748_v29 }
 0x4d8   : > { %803 = vst.msk [vmem:[#allocation3 + $0xd48] sm:$0xff] %vm378_vm8, %v7748_v29 }
 0x4d9   : > { %805 = vst.msk [vmem:[#allocation3 + $0xd58] sm:$0xff] %vm378_vm8, %v7748_v29 }
 0x4da   : > { %807 = vst.msk [vmem:[#allocation3 + $0xd68] sm:$0xff] %vm378_vm8, %v7748_v29 }
 0x4db   : > { %809 = vst.msk [vmem:[#allocation3 + $0xd78] sm:$0xff] %vm378_vm8, %v7748_v29 }
 0x4dc   : > { %811 = vst.msk [vmem:[#allocation3 + $0xd88] sm:$0xff] %vm378_vm8, %v7748_v29 }
 0x4dd   : > { %813 = vst.msk [vmem:[#allocation3 + $0xd98] sm:$0xff] %vm378_vm8, %v7748_v29 }
 0x4de   : > { %815 = vst.msk [vmem:[#allocation3 + $0xda8] sm:$0xff] %vm378_vm8, %v7748_v29 }
 0x4df   : > { %817 = vst.msk [vmem:[#allocation3 + $0xdb8] sm:$0xff] %vm378_vm8, %v7748_v29 }
 0x4e0   : > { %819 = vst.msk [vmem:[#allocation3 + $0xdc8] sm:$0xff] %vm378_vm8, %v7748_v29 }
 0x4e1   : > { %821 = vst.msk [vmem:[#allocation3 + $0xdd8] sm:$0xff] %vm378_vm8, %v7748_v29 }
 0x4e2   : > { %823 = vst.msk [vmem:[#allocation3 + $0xde8] sm:$0xff] %vm378_vm8, %v7748_v29 }
 0x4e3   : > { %825 = vst.msk [vmem:[#allocation3 + $0xdf8] sm:$0xff] %vm378_vm8, %v7748_v29 }
 0x4e4   : > { %827 = vst.msk [vmem:[#allocation3 + $0xe08] sm:$0xff] %vm378_vm8, %v7748_v29 }
 0x4e5   : > { %829 = vst.msk [vmem:[#allocation3 + $0xe18] sm:$0xff] %vm378_vm8, %v7748_v29 }
 0x4e6   : > { %831 = vst.msk [vmem:[#allocation3 + $0xe28] sm:$0xff] %vm378_vm8, %v7748_v29 }
 0x4e7   : > { %833 = vst.msk [vmem:[#allocation3 + $0xe38] sm:$0xff] %vm378_vm8, %v7748_v29 }
 0x4e8   : > { %835 = vst.msk [vmem:[#allocation3 + $0xe48] sm:$0xff] %vm378_vm8, %v7748_v29 }
 0x4e9   : > { %837 = vst.msk [vmem:[#allocation3 + $0xe58] sm:$0xff] %vm378_vm8, %v7748_v29 }
 0x4ea   : > { %839 = vst.msk [vmem:[#allocation3 + $0xe68] sm:$0xff] %vm378_vm8, %v7748_v29 }
 0x4eb   : > { %841 = vst.msk [vmem:[#allocation3 + $0xe78] sm:$0xff] %vm378_vm8, %v7748_v29 }
 0x4ec   : > { %843 = vst.msk [vmem:[#allocation3 + $0xe88] sm:$0xff] %vm378_vm8, %v7748_v29 }
 0x4ed   : > { %845 = vst.msk [vmem:[#allocation3 + $0xe98] sm:$0xff] %vm378_vm8, %v7748_v29 }
 0x4ee   : > { %847 = vst.msk [vmem:[#allocation3 + $0xea8] sm:$0xff] %vm378_vm8, %v7748_v29 }
 0x4ef   : > { %849 = vst.msk [vmem:[#allocation3 + $0xeb8] sm:$0xff] %vm378_vm8, %v7748_v29 }
 0x4f0   : > { %851 = vst.msk [vmem:[#allocation3 + $0xec8] sm:$0xff] %vm378_vm8, %v7748_v29 }
 0x4f1   : > { %853 = vst.msk [vmem:[#allocation3 + $0xed8] sm:$0xff] %vm378_vm8, %v7748_v29 }
 0x4f2   : > { %855 = vst.msk [vmem:[#allocation3 + $0xee8] sm:$0xff] %vm378_vm8, %v7748_v29 }
 0x4f3   : > { %857 = vst.msk [vmem:[#allocation3 + $0xef8] sm:$0xff] %vm378_vm8, %v7748_v29 }
 0x4f4   : > { %859 = vst.msk [vmem:[#allocation3 + $0xf08] sm:$0xff] %vm378_vm8, %v7748_v29 }
 0x4f5   : > { %861 = vst.msk [vmem:[#allocation3 + $0xf18] sm:$0xff] %vm378_vm8, %v7748_v29 }
 0x4f6   : > { %863 = vst.msk [vmem:[#allocation3 + $0xf28] sm:$0xff] %vm378_vm8, %v7748_v29 }
 0x4f7   : > { %865 = vst.msk [vmem:[#allocation3 + $0xf38] sm:$0xff] %vm378_vm8, %v7748_v29 }
 0x4f8   : > { %867 = vst.msk [vmem:[#allocation3 + $0xf48] sm:$0xff] %vm378_vm8, %v7748_v29 }
 0x4f9   : > { %869 = vst.msk [vmem:[#allocation3 + $0xf58] sm:$0xff] %vm378_vm8, %v7748_v29 }
 0x4fa   : > { %871 = vst.msk [vmem:[#allocation3 + $0xf68] sm:$0xff] %vm378_vm8, %v7748_v29 }
 0x4fb   : > { %873 = vst.msk [vmem:[#allocation3 + $0xf78] sm:$0xff] %vm378_vm8, %v7748_v29 }
 0x4fc   : > { %875 = vst.msk [vmem:[#allocation3 + $0xf88] sm:$0xff] %vm378_vm8, %v7748_v29 }
 0x4fd   : > { %877 = vst.msk [vmem:[#allocation3 + $0xf98] sm:$0xff] %vm378_vm8, %v7748_v29 }
 0x4fe   : > { %879 = vst.msk [vmem:[#allocation3 + $0xfa8] sm:$0xff] %vm378_vm8, %v7748_v29 }
 0x4ff   : > { %881 = vst.msk [vmem:[#allocation3 + $0xfb8] sm:$0xff] %vm378_vm8, %v7748_v29 }
 0x500   : > { %883 = vst.msk [vmem:[#allocation3 + $0xfc8] sm:$0xff] %vm378_vm8, %v7748_v29 }
 0x501   : > { %885 = vst.msk [vmem:[#allocation3 + $0xfd8] sm:$0xff] %vm378_vm8, %v7748_v29 }
 0x502   : > { %887 = vst.msk [vmem:[#allocation3 + $0xfe8] sm:$0xff] %vm378_vm8, %v7748_v29 }
 0x503   : > { %889 = vst.msk [vmem:[#allocation3 + $0xff8] sm:$0xff] %vm378_vm8, %v7748_v29 }
 0x504   : > { %891 = vst.msk [vmem:[#allocation3 + $0x1008] sm:$0xff] %vm378_vm8, %v7748_v29 }
 0x505   : > { %893 = vst.msk [vmem:[#allocation3 + $0x1018] sm:$0xff] %vm378_vm8, %v7748_v29 }
 0x506   : > { %895 = vst.msk [vmem:[#allocation3 + $0x1028] sm:$0xff] %vm378_vm8, %v7748_v29 }
 0x507   : > { %897 = vst.msk [vmem:[#allocation3 + $0x1038] sm:$0xff] %vm378_vm8, %v7748_v29 }
 0x508   : > { %899 = vst.msk [vmem:[#allocation3 + $0x1048] sm:$0xff] %vm378_vm8, %v7748_v29 }
 0x509   : > { %901 = vst.msk [vmem:[#allocation3 + $0x1058] sm:$0xff] %vm378_vm8, %v7748_v29 }
 0x50a   : > { %903 = vst.msk [vmem:[#allocation3 + $0x1068] sm:$0xff] %vm378_vm8, %v7748_v29 }
 0x50b   : > { %905 = vst.msk [vmem:[#allocation3 + $0x1078] sm:$0xff] %vm378_vm8, %v7748_v29 }
 0x50c   : > { %907 = vst.msk [vmem:[#allocation3 + $0x1088] sm:$0xff] %vm378_vm8, %v7748_v29 }
 0x50d   : > { %909 = vst.msk [vmem:[#allocation3 + $0x1098] sm:$0xff] %vm378_vm8, %v7748_v29 }
 0x50e   : > { %911 = vst.msk [vmem:[#allocation3 + $0x10a8] sm:$0xff] %vm378_vm8, %v7748_v29 }
 0x50f   : > { %913 = vst.msk [vmem:[#allocation3 + $0x10b8] sm:$0xff] %vm378_vm8, %v7748_v29 }
 0x510   : > { %915 = vst.msk [vmem:[#allocation3 + $0x10c8] sm:$0xff] %vm378_vm8, %v7748_v29 }
 0x511   : > { %917 = vst.msk [vmem:[#allocation3 + $0x10d8] sm:$0xff] %vm378_vm8, %v7748_v29 }
 0x512   : > { %919 = vst.msk [vmem:[#allocation3 + $0x10e8] sm:$0xff] %vm378_vm8, %v7748_v29 }
 0x513   : > { %921 = vst.msk [vmem:[#allocation3 + $0x10f8] sm:$0xff] %vm378_vm8, %v7748_v29 }
 0x514   : > { %923 = vst.msk [vmem:[#allocation3 + $0x1108] sm:$0xff] %vm378_vm8, %v7748_v29 }
 0x515   : > { %925 = vst.msk [vmem:[#allocation3 + $0x1118] sm:$0xff] %vm378_vm8, %v7748_v29 }
 0x516   : > { %927 = vst.msk [vmem:[#allocation3 + $0x1128] sm:$0xff] %vm378_vm8, %v7748_v29 }
 0x517   : > { %929 = vst.msk [vmem:[#allocation3 + $0x1138] sm:$0xff] %vm378_vm8, %v7748_v29 }
 0x518   : > { %931 = vst.msk [vmem:[#allocation3 + $0x1148] sm:$0xff] %vm378_vm8, %v7748_v29 }
 0x519   : > { %933 = vst.msk [vmem:[#allocation3 + $0x1158] sm:$0xff] %vm378_vm8, %v7748_v29 }
 0x51a   : > { %935 = vst.msk [vmem:[#allocation3 + $0x1168] sm:$0xff] %vm378_vm8, %v7748_v29 }
 0x51b   : > { %937 = vst.msk [vmem:[#allocation3 + $0x1178] sm:$0xff] %vm378_vm8, %v7748_v29 }
 0x51c   : > { %939 = vst.msk [vmem:[#allocation3 + $0x1188] sm:$0xff] %vm378_vm8, %v7748_v29 }
 0x51d   : > { %941 = vst.msk [vmem:[#allocation3 + $0x1198] sm:$0xff] %vm378_vm8, %v7748_v29 }
 0x51e   : > { %943 = vst.msk [vmem:[#allocation3 + $0x11a8] sm:$0xff] %vm378_vm8, %v7748_v29 }
 0x51f   : > { %945 = vst.msk [vmem:[#allocation3 + $0x11b8] sm:$0xff] %vm378_vm8, %v7748_v29 }
 0x520   : > { %947 = vst.msk [vmem:[#allocation3 + $0x11c8] sm:$0xff] %vm378_vm8, %v7748_v29 }
 0x521   : > { %949 = vst.msk [vmem:[#allocation3 + $0x11d8] sm:$0xff] %vm378_vm8, %v7748_v29 }
 0x522   : > { %951 = vst.msk [vmem:[#allocation3 + $0x11e8] sm:$0xff] %vm378_vm8, %v7748_v29 }
 0x523   : > { %953 = vst.msk [vmem:[#allocation3 + $0x11f8] sm:$0xff] %vm378_vm8, %v7748_v29 }
 0x524   : > { %955 = vst.msk [vmem:[#allocation3 + $0x1208] sm:$0xff] %vm378_vm8, %v7748_v29 }
 0x525   : > { %957 = vst.msk [vmem:[#allocation3 + $0x1218] sm:$0xff] %vm378_vm8, %v7748_v29 }
 0x526   : > { %959 = vst.msk [vmem:[#allocation3 + $0x1228] sm:$0xff] %vm378_vm8, %v7748_v29 }
 0x527   : > { %961 = vst.msk [vmem:[#allocation3 + $0x1238] sm:$0xff] %vm378_vm8, %v7748_v29 }
 0x528   : > { %963 = vst.msk [vmem:[#allocation3 + $0x1248] sm:$0xff] %vm378_vm8, %v7748_v29 }
 0x529   : > { %965 = vst.msk [vmem:[#allocation3 + $0x1258] sm:$0xff] %vm378_vm8, %v7748_v29 }
 0x52a   : > { %967 = vst.msk [vmem:[#allocation3 + $0x1268] sm:$0xff] %vm378_vm8, %v7748_v29 }
 0x52b   : > { %969 = vst.msk [vmem:[#allocation3 + $0x1278] sm:$0xff] %vm378_vm8, %v7748_v29 }
 0x52c   : > { %971 = vst.msk [vmem:[#allocation3 + $0x1288] sm:$0xff] %vm378_vm8, %v7748_v29 }
 0x52d   : > { %973 = vst.msk [vmem:[#allocation3 + $0x1298] sm:$0xff] %vm378_vm8, %v7748_v29 }
 0x52e   : > { %975 = vst.msk [vmem:[#allocation3 + $0x12a8] sm:$0xff] %vm378_vm8, %v7748_v29 }
 0x52f   : > { %977 = vst.msk [vmem:[#allocation3 + $0x12b8] sm:$0xff] %vm378_vm8, %v7748_v29 }
 0x530   : > { %979 = vst.msk [vmem:[#allocation3 + $0x12c8] sm:$0xff] %vm378_vm8, %v7748_v29 }
 0x531   : > { %981 = vst.msk [vmem:[#allocation3 + $0x12d8] sm:$0xff] %vm378_vm8, %v7748_v29 }
 0x532   : > { %983 = vst.msk [vmem:[#allocation3 + $0x12e8] sm:$0xff] %vm378_vm8, %v7748_v29 }
 0x533   : > { %985 = vst.msk [vmem:[#allocation3 + $0x12f8] sm:$0xff] %vm378_vm8, %v7748_v29 }
 0x534   : > { %987 = vst.msk [vmem:[#allocation3 + $0x1308] sm:$0xff] %vm378_vm8, %v7748_v29 }
 0x535   : > { %989 = vst.msk [vmem:[#allocation3 + $0x1318] sm:$0xff] %vm378_vm8, %v7748_v29 }
 0x536   : > { %991 = vst.msk [vmem:[#allocation3 + $0x1328] sm:$0xff] %vm378_vm8, %v7748_v29 }
 0x537   : > { %993 = vst.msk [vmem:[#allocation3 + $0x1338] sm:$0xff] %vm378_vm8, %v7748_v29 }
 0x538   : > { %996 = vst.msk [vmem:[#allocation4 + $0x8] sm:$0xff] %vm995_vm11, %v7748_v29 }
 0x539   : > { %998 = vst.msk [vmem:[#allocation4 + $0x18] sm:$0xff] %vm995_vm11, %v7748_v29 }
 0x53a   : > { %1000 = vst.msk [vmem:[#allocation4 + $0x28] sm:$0xff] %vm995_vm11, %v7748_v29 }
 0x53b   : > { %1002 = vst.msk [vmem:[#allocation4 + $0x38] sm:$0xff] %vm995_vm11, %v7748_v29 }
 0x53c   : > { %1004 = vst.msk [vmem:[#allocation4 + $0x48] sm:$0xff] %vm995_vm11, %v7748_v29 }
 0x53d   : > { %1006 = vst.msk [vmem:[#allocation4 + $0x58] sm:$0xff] %vm995_vm11, %v7748_v29 }
 0x53e   : > { %1008 = vst.msk [vmem:[#allocation4 + $0x68] sm:$0xff] %vm995_vm11, %v7748_v29 }
 0x53f   : > { %1010 = vst.msk [vmem:[#allocation4 + $0x78] sm:$0xff] %vm995_vm11, %v7748_v29 }
 0x540   : > { %1012 = vst.msk [vmem:[#allocation4 + $0x88] sm:$0xff] %vm995_vm11, %v7748_v29 }
 0x541   : > { %1014 = vst.msk [vmem:[#allocation4 + $0x98] sm:$0xff] %vm995_vm11, %v7748_v29 }
 0x542   : > { %1016 = vst.msk [vmem:[#allocation4 + $0xa8] sm:$0xff] %vm995_vm11, %v7748_v29 }
 0x543   : > { %1018 = vst.msk [vmem:[#allocation4 + $0xb8] sm:$0xff] %vm995_vm11, %v7748_v29 }
 0x544   : > { %1020 = vst.msk [vmem:[#allocation4 + $0xc8] sm:$0xff] %vm995_vm11, %v7748_v29 }
 0x545   : > { %1022 = vst.msk [vmem:[#allocation4 + $0xd8] sm:$0xff] %vm995_vm11, %v7748_v29 }
 0x546   : > { %1024 = vst.msk [vmem:[#allocation4 + $0xe8] sm:$0xff] %vm995_vm11, %v7748_v29 }
 0x547   : > { %1026 = vst.msk [vmem:[#allocation4 + $0xf8] sm:$0xff] %vm995_vm11, %v7748_v29 }
 0x548   : > { %1028 = vst.msk [vmem:[#allocation4 + $0x108] sm:$0xff] %vm995_vm11, %v7748_v29 }
 0x549   : > { %1030 = vst.msk [vmem:[#allocation4 + $0x118] sm:$0xff] %vm995_vm11, %v7748_v29 }
 0x54a   : > { %1032 = vst.msk [vmem:[#allocation4 + $0x128] sm:$0xff] %vm995_vm11, %v7748_v29 }
 0x54b   : > { %1034 = vst.msk [vmem:[#allocation4 + $0x138] sm:$0xff] %vm995_vm11, %v7748_v29 }
 0x54c   : > { %1036 = vst.msk [vmem:[#allocation4 + $0x148] sm:$0xff] %vm995_vm11, %v7748_v29 }
 0x54d   : > { %1038 = vst.msk [vmem:[#allocation4 + $0x158] sm:$0xff] %vm995_vm11, %v7748_v29 }
 0x54e   : > { %1040 = vst.msk [vmem:[#allocation4 + $0x168] sm:$0xff] %vm995_vm11, %v7748_v29 }
 0x54f   : > { %1042 = vst.msk [vmem:[#allocation4 + $0x178] sm:$0xff] %vm995_vm11, %v7748_v29 }
 0x550   : > { %1044 = vst.msk [vmem:[#allocation4 + $0x188] sm:$0xff] %vm995_vm11, %v7748_v29 }
 0x551   : > { %1046 = vst.msk [vmem:[#allocation4 + $0x198] sm:$0xff] %vm995_vm11, %v7748_v29 }
 0x552   : > { %1048 = vst.msk [vmem:[#allocation4 + $0x1a8] sm:$0xff] %vm995_vm11, %v7748_v29 }
 0x553   : > { %1050 = vst.msk [vmem:[#allocation4 + $0x1b8] sm:$0xff] %vm995_vm11, %v7748_v29 }
 0x554   : > { %1052 = vst.msk [vmem:[#allocation4 + $0x1c8] sm:$0xff] %vm995_vm11, %v7748_v29 }
 0x555   : > { %1054 = vst.msk [vmem:[#allocation4 + $0x1d8] sm:$0xff] %vm995_vm11, %v7748_v29 }
 0x556   : > { %1056 = vst.msk [vmem:[#allocation4 + $0x1e8] sm:$0xff] %vm995_vm11, %v7748_v29 }
 0x557   : > { %1058 = vst.msk [vmem:[#allocation4 + $0x1f8] sm:$0xff] %vm995_vm11, %v7748_v29 }
 0x558   : > { %1060 = vst.msk [vmem:[#allocation4 + $0x208] sm:$0xff] %vm995_vm11, %v7748_v29 }
 0x559   : > { %1062 = vst.msk [vmem:[#allocation4 + $0x218] sm:$0xff] %vm995_vm11, %v7748_v29 }
 0x55a   : > { %1064 = vst.msk [vmem:[#allocation4 + $0x228] sm:$0xff] %vm995_vm11, %v7748_v29 }
 0x55b   : > { %1066 = vst.msk [vmem:[#allocation4 + $0x238] sm:$0xff] %vm995_vm11, %v7748_v29 }
 0x55c   : > { %1068 = vst.msk [vmem:[#allocation4 + $0x248] sm:$0xff] %vm995_vm11, %v7748_v29 }
 0x55d   : > { %1070 = vst.msk [vmem:[#allocation4 + $0x258] sm:$0xff] %vm995_vm11, %v7748_v29 }
 0x55e   : > { %1072 = vst.msk [vmem:[#allocation4 + $0x268] sm:$0xff] %vm995_vm11, %v7748_v29 }
 0x55f   : > { %1074 = vst.msk [vmem:[#allocation4 + $0x278] sm:$0xff] %vm995_vm11, %v7748_v29 }
 0x560   : > { %1076 = vst.msk [vmem:[#allocation4 + $0x288] sm:$0xff] %vm995_vm11, %v7748_v29 }
 0x561   : > { %1078 = vst.msk [vmem:[#allocation4 + $0x298] sm:$0xff] %vm995_vm11, %v7748_v29 }
 0x562   : > { %1080 = vst.msk [vmem:[#allocation4 + $0x2a8] sm:$0xff] %vm995_vm11, %v7748_v29 }
 0x563   : > { %1082 = vst.msk [vmem:[#allocation4 + $0x2b8] sm:$0xff] %vm995_vm11, %v7748_v29 }
 0x564   : > { %1084 = vst.msk [vmem:[#allocation4 + $0x2c8] sm:$0xff] %vm995_vm11, %v7748_v29 }
 0x565   : > { %1086 = vst.msk [vmem:[#allocation4 + $0x2d8] sm:$0xff] %vm995_vm11, %v7748_v29 }
 0x566   : > { %1088 = vst.msk [vmem:[#allocation4 + $0x2e8] sm:$0xff] %vm995_vm11, %v7748_v29 }
 0x567   : > { %1090 = vst.msk [vmem:[#allocation4 + $0x2f8] sm:$0xff] %vm995_vm11, %v7748_v29 }
 0x568   : > { %1092 = vst.msk [vmem:[#allocation4 + $0x308] sm:$0xff] %vm995_vm11, %v7748_v29 }
 0x569   : > { %1094 = vst.msk [vmem:[#allocation4 + $0x318] sm:$0xff] %vm995_vm11, %v7748_v29 }
 0x56a   : > { %1096 = vst.msk [vmem:[#allocation4 + $0x328] sm:$0xff] %vm995_vm11, %v7748_v29 }
 0x56b   : > { %1098 = vst.msk [vmem:[#allocation4 + $0x338] sm:$0xff] %vm995_vm11, %v7748_v29 }
 0x56c   : > { %1100 = vst.msk [vmem:[#allocation4 + $0x348] sm:$0xff] %vm995_vm11, %v7748_v29 }
 0x56d   : > { %1102 = vst.msk [vmem:[#allocation4 + $0x358] sm:$0xff] %vm995_vm11, %v7748_v29 }
 0x56e   : > { %1104 = vst.msk [vmem:[#allocation4 + $0x368] sm:$0xff] %vm995_vm11, %v7748_v29 }
 0x56f   : > { %1106 = vst.msk [vmem:[#allocation4 + $0x378] sm:$0xff] %vm995_vm11, %v7748_v29 }
 0x570   : > { %1108 = vst.msk [vmem:[#allocation4 + $0x388] sm:$0xff] %vm995_vm11, %v7748_v29 }
 0x571   : > { %1110 = vst.msk [vmem:[#allocation4 + $0x398] sm:$0xff] %vm995_vm11, %v7748_v29 }
 0x572   : > { %1112 = vst.msk [vmem:[#allocation4 + $0x3a8] sm:$0xff] %vm995_vm11, %v7748_v29 }
 0x573   : > { %1114 = vst.msk [vmem:[#allocation4 + $0x3b8] sm:$0xff] %vm995_vm11, %v7748_v29 }
 0x574   : > { %1116 = vst.msk [vmem:[#allocation4 + $0x3c8] sm:$0xff] %vm995_vm11, %v7748_v29 }
 0x575   : > { %1118 = vst.msk [vmem:[#allocation4 + $0x3d8] sm:$0xff] %vm995_vm11, %v7748_v29 }
 0x576   : > { %1120 = vst.msk [vmem:[#allocation4 + $0x3e8] sm:$0xff] %vm995_vm11, %v7748_v29 }
 0x577   : > { %1122 = vst.msk [vmem:[#allocation4 + $0x3f8] sm:$0xff] %vm995_vm11, %v7748_v29 }
 0x578   : > { %1124 = vst.msk [vmem:[#allocation4 + $0x408] sm:$0xff] %vm995_vm11, %v7748_v29 }
 0x579   : > { %1126 = vst.msk [vmem:[#allocation4 + $0x418] sm:$0xff] %vm995_vm11, %v7748_v29 }
 0x57a   : > { %1128 = vst.msk [vmem:[#allocation4 + $0x428] sm:$0xff] %vm995_vm11, %v7748_v29 }
 0x57b   : > { %1130 = vst.msk [vmem:[#allocation4 + $0x438] sm:$0xff] %vm995_vm11, %v7748_v29 }
 0x57c   : > { %1132 = vst.msk [vmem:[#allocation4 + $0x448] sm:$0xff] %vm995_vm11, %v7748_v29 }
 0x57d   : > { %1134 = vst.msk [vmem:[#allocation4 + $0x458] sm:$0xff] %vm995_vm11, %v7748_v29 }
 0x57e   : > { %1136 = vst.msk [vmem:[#allocation4 + $0x468] sm:$0xff] %vm995_vm11, %v7748_v29 }
 0x57f   : > { %1138 = vst.msk [vmem:[#allocation4 + $0x478] sm:$0xff] %vm995_vm11, %v7748_v29 }
 0x580   : > { %1140 = vst.msk [vmem:[#allocation4 + $0x488] sm:$0xff] %vm995_vm11, %v7748_v29 }
 0x581   : > { %1142 = vst.msk [vmem:[#allocation4 + $0x498] sm:$0xff] %vm995_vm11, %v7748_v29 }
 0x582   : > { %1144 = vst.msk [vmem:[#allocation4 + $0x4a8] sm:$0xff] %vm995_vm11, %v7748_v29 }
 0x583   : > { %1146 = vst.msk [vmem:[#allocation4 + $0x4b8] sm:$0xff] %vm995_vm11, %v7748_v29 }
 0x584   : > { %1148 = vst.msk [vmem:[#allocation4 + $0x4c8] sm:$0xff] %vm995_vm11, %v7748_v29 }
 0x585   : > { %1150 = vst.msk [vmem:[#allocation4 + $0x4d8] sm:$0xff] %vm995_vm11, %v7748_v29 }
 0x586   : > { %1152 = vst.msk [vmem:[#allocation4 + $0x4e8] sm:$0xff] %vm995_vm11, %v7748_v29 }
 0x587   : > { %1154 = vst.msk [vmem:[#allocation4 + $0x4f8] sm:$0xff] %vm995_vm11, %v7748_v29 }
 0x588   : > { %1156 = vst.msk [vmem:[#allocation4 + $0x508] sm:$0xff] %vm995_vm11, %v7748_v29 }
 0x589   : > { %1158 = vst.msk [vmem:[#allocation4 + $0x518] sm:$0xff] %vm995_vm11, %v7748_v29 }
 0x58a   : > { %1160 = vst.msk [vmem:[#allocation4 + $0x528] sm:$0xff] %vm995_vm11, %v7748_v29 }
 0x58b   : > { %1162 = vst.msk [vmem:[#allocation4 + $0x538] sm:$0xff] %vm995_vm11, %v7748_v29 }
 0x58c   : > { %1164 = vst.msk [vmem:[#allocation4 + $0x548] sm:$0xff] %vm995_vm11, %v7748_v29 }
 0x58d   : > { %1166 = vst.msk [vmem:[#allocation4 + $0x558] sm:$0xff] %vm995_vm11, %v7748_v29 }
 0x58e   : > { %1168 = vst.msk [vmem:[#allocation4 + $0x568] sm:$0xff] %vm995_vm11, %v7748_v29 }
 0x58f   : > { %1170 = vst.msk [vmem:[#allocation4 + $0x578] sm:$0xff] %vm995_vm11, %v7748_v29 }
 0x590   : > { %1172 = vst.msk [vmem:[#allocation4 + $0x588] sm:$0xff] %vm995_vm11, %v7748_v29 }
 0x591   : > { %1174 = vst.msk [vmem:[#allocation4 + $0x598] sm:$0xff] %vm995_vm11, %v7748_v29 }
 0x592   : > { %1176 = vst.msk [vmem:[#allocation4 + $0x5a8] sm:$0xff] %vm995_vm11, %v7748_v29 }
 0x593   : > { %1178 = vst.msk [vmem:[#allocation4 + $0x5b8] sm:$0xff] %vm995_vm11, %v7748_v29 }
 0x594   : > { %1180 = vst.msk [vmem:[#allocation4 + $0x5c8] sm:$0xff] %vm995_vm11, %v7748_v29 }
 0x595   : > { %1182 = vst.msk [vmem:[#allocation4 + $0x5d8] sm:$0xff] %vm995_vm11, %v7748_v29 }
 0x596   : > { %1184 = vst.msk [vmem:[#allocation4 + $0x5e8] sm:$0xff] %vm995_vm11, %v7748_v29 }
 0x597   : > { %1186 = vst.msk [vmem:[#allocation4 + $0x5f8] sm:$0xff] %vm995_vm11, %v7748_v29 }
 0x598   : > { %1188 = vst.msk [vmem:[#allocation4 + $0x608] sm:$0xff] %vm995_vm11, %v7748_v29 }
 0x599   : > { %1190 = vst.msk [vmem:[#allocation4 + $0x618] sm:$0xff] %vm995_vm11, %v7748_v29 }
 0x59a   : > { %1192 = vst.msk [vmem:[#allocation4 + $0x628] sm:$0xff] %vm995_vm11, %v7748_v29 }
 0x59b   : > { %1194 = vst.msk [vmem:[#allocation4 + $0x638] sm:$0xff] %vm995_vm11, %v7748_v29 }
 0x59c   : > { %1196 = vst.msk [vmem:[#allocation4 + $0x648] sm:$0xff] %vm995_vm11, %v7748_v29 }
 0x59d   : > { %1198 = vst.msk [vmem:[#allocation4 + $0x658] sm:$0xff] %vm995_vm11, %v7748_v29 }
 0x59e   : > { %1200 = vst.msk [vmem:[#allocation4 + $0x668] sm:$0xff] %vm995_vm11, %v7748_v29 }
 0x59f   : > { %1202 = vst.msk [vmem:[#allocation4 + $0x678] sm:$0xff] %vm995_vm11, %v7748_v29 }
 0x5a0   : > { %1204 = vst.msk [vmem:[#allocation4 + $0x688] sm:$0xff] %vm995_vm11, %v7748_v29 }
 0x5a1   : > { %1206 = vst.msk [vmem:[#allocation4 + $0x698] sm:$0xff] %vm995_vm11, %v7748_v29 }
 0x5a2   : > { %1208 = vst.msk [vmem:[#allocation4 + $0x6a8] sm:$0xff] %vm995_vm11, %v7748_v29 }
 0x5a3   : > { %1210 = vst.msk [vmem:[#allocation4 + $0x6b8] sm:$0xff] %vm995_vm11, %v7748_v29 }
 0x5a4   : > { %1212 = vst.msk [vmem:[#allocation4 + $0x6c8] sm:$0xff] %vm995_vm11, %v7748_v29 }
 0x5a5   : > { %1214 = vst.msk [vmem:[#allocation4 + $0x6d8] sm:$0xff] %vm995_vm11, %v7748_v29 }
 0x5a6   : > { %1216 = vst.msk [vmem:[#allocation4 + $0x6e8] sm:$0xff] %vm995_vm11, %v7748_v29 }
 0x5a7   : > { %1218 = vst.msk [vmem:[#allocation4 + $0x6f8] sm:$0xff] %vm995_vm11, %v7748_v29 }
 0x5a8   : > { %1220 = vst.msk [vmem:[#allocation4 + $0x708] sm:$0xff] %vm995_vm11, %v7748_v29 }
 0x5a9   : > { %1222 = vst.msk [vmem:[#allocation4 + $0x718] sm:$0xff] %vm995_vm11, %v7748_v29 }
 0x5aa   : > { %1224 = vst.msk [vmem:[#allocation4 + $0x728] sm:$0xff] %vm995_vm11, %v7748_v29 }
 0x5ab   : > { %1226 = vst.msk [vmem:[#allocation4 + $0x738] sm:$0xff] %vm995_vm11, %v7748_v29 }
 0x5ac   : > { %1228 = vst.msk [vmem:[#allocation4 + $0x748] sm:$0xff] %vm995_vm11, %v7748_v29 }
 0x5ad   : > { %1230 = vst.msk [vmem:[#allocation4 + $0x758] sm:$0xff] %vm995_vm11, %v7748_v29 }
 0x5ae   : > { %1232 = vst.msk [vmem:[#allocation4 + $0x768] sm:$0xff] %vm995_vm11, %v7748_v29 }
 0x5af   : > { %1234 = vst.msk [vmem:[#allocation4 + $0x778] sm:$0xff] %vm995_vm11, %v7748_v29 }
 0x5b0   : > { %1236 = vst.msk [vmem:[#allocation4 + $0x788] sm:$0xff] %vm995_vm11, %v7748_v29 }
 0x5b1   : > { %1238 = vst.msk [vmem:[#allocation4 + $0x798] sm:$0xff] %vm995_vm11, %v7748_v29 }
 0x5b2   : > { %1240 = vst.msk [vmem:[#allocation4 + $0x7a8] sm:$0xff] %vm995_vm11, %v7748_v29 }
 0x5b3   : > { %1242 = vst.msk [vmem:[#allocation4 + $0x7b8] sm:$0xff] %vm995_vm11, %v7748_v29 }
 0x5b4   : > { %1244 = vst.msk [vmem:[#allocation4 + $0x7c8] sm:$0xff] %vm995_vm11, %v7748_v29 }
 0x5b5   : > { %1246 = vst.msk [vmem:[#allocation4 + $0x7d8] sm:$0xff] %vm995_vm11, %v7748_v29 }
 0x5b6   : > { %1248 = vst.msk [vmem:[#allocation4 + $0x7e8] sm:$0xff] %vm995_vm11, %v7748_v29 }
 0x5b7   : > { %1250 = vst.msk [vmem:[#allocation4 + $0x7f8] sm:$0xff] %vm995_vm11, %v7748_v29 }
 0x5b8   : > { %1252 = vst.msk [vmem:[#allocation4 + $0x808] sm:$0xff] %vm995_vm11, %v7748_v29 }
 0x5b9   : > { %1254 = vst.msk [vmem:[#allocation4 + $0x818] sm:$0xff] %vm995_vm11, %v7748_v29 }
 0x5ba   : > { %1256 = vst.msk [vmem:[#allocation4 + $0x828] sm:$0xff] %vm995_vm11, %v7748_v29 }
 0x5bb   : > { %1258 = vst.msk [vmem:[#allocation4 + $0x838] sm:$0xff] %vm995_vm11, %v7748_v29 }
 0x5bc   : > { %1260 = vst.msk [vmem:[#allocation4 + $0x848] sm:$0xff] %vm995_vm11, %v7748_v29 }
 0x5bd   : > { %1262 = vst.msk [vmem:[#allocation4 + $0x858] sm:$0xff] %vm995_vm11, %v7748_v29 }
 0x5be   : > { %1264 = vst.msk [vmem:[#allocation4 + $0x868] sm:$0xff] %vm995_vm11, %v7748_v29 }
 0x5bf   : > { %1266 = vst.msk [vmem:[#allocation4 + $0x878] sm:$0xff] %vm995_vm11, %v7748_v29 }
 0x5c0   : > { %1268 = vst.msk [vmem:[#allocation4 + $0x888] sm:$0xff] %vm995_vm11, %v7748_v29 }
 0x5c1   : > { %1270 = vst.msk [vmem:[#allocation4 + $0x898] sm:$0xff] %vm995_vm11, %v7748_v29 }
 0x5c2   : > { %1272 = vst.msk [vmem:[#allocation4 + $0x8a8] sm:$0xff] %vm995_vm11, %v7748_v29 }
 0x5c3   : > { %1274 = vst.msk [vmem:[#allocation4 + $0x8b8] sm:$0xff] %vm995_vm11, %v7748_v29 }
 0x5c4   : > { %1276 = vst.msk [vmem:[#allocation4 + $0x8c8] sm:$0xff] %vm995_vm11, %v7748_v29 }
 0x5c5   : > { %1278 = vst.msk [vmem:[#allocation4 + $0x8d8] sm:$0xff] %vm995_vm11, %v7748_v29 }
 0x5c6   : > { %1280 = vst.msk [vmem:[#allocation4 + $0x8e8] sm:$0xff] %vm995_vm11, %v7748_v29 }
 0x5c7   : > { %1282 = vst.msk [vmem:[#allocation4 + $0x8f8] sm:$0xff] %vm995_vm11, %v7748_v29 }
 0x5c8   : > { %1284 = vst.msk [vmem:[#allocation4 + $0x908] sm:$0xff] %vm995_vm11, %v7748_v29 }
 0x5c9   : > { %1286 = vst.msk [vmem:[#allocation4 + $0x918] sm:$0xff] %vm995_vm11, %v7748_v29 }
 0x5ca   : > { %1288 = vst.msk [vmem:[#allocation4 + $0x928] sm:$0xff] %vm995_vm11, %v7748_v29 }
 0x5cb   : > { %1290 = vst.msk [vmem:[#allocation4 + $0x938] sm:$0xff] %vm995_vm11, %v7748_v29 }
 0x5cc   : > { %1292 = vst.msk [vmem:[#allocation4 + $0x948] sm:$0xff] %vm995_vm11, %v7748_v29 }
 0x5cd   : > { %1294 = vst.msk [vmem:[#allocation4 + $0x958] sm:$0xff] %vm995_vm11, %v7748_v29 }
 0x5ce   : > { %1296 = vst.msk [vmem:[#allocation4 + $0x968] sm:$0xff] %vm995_vm11, %v7748_v29 }
 0x5cf   : > { %1298 = vst.msk [vmem:[#allocation4 + $0x978] sm:$0xff] %vm995_vm11, %v7748_v29 }
 0x5d0   : > { %1300 = vst.msk [vmem:[#allocation4 + $0x988] sm:$0xff] %vm995_vm11, %v7748_v29 }
 0x5d1   : > { %1302 = vst.msk [vmem:[#allocation4 + $0x998] sm:$0xff] %vm995_vm11, %v7748_v29 }
 0x5d2   : > { %1304 = vst.msk [vmem:[#allocation4 + $0x9a8] sm:$0xff] %vm995_vm11, %v7748_v29 }
 0x5d3   : > { %1306 = vst.msk [vmem:[#allocation4 + $0x9b8] sm:$0xff] %vm995_vm11, %v7748_v29 }
 0x5d4   : > { %1308 = vst.msk [vmem:[#allocation4 + $0x9c8] sm:$0xff] %vm995_vm11, %v7748_v29 }
 0x5d5   : > { %1310 = vst.msk [vmem:[#allocation4 + $0x9d8] sm:$0xff] %vm995_vm11, %v7748_v29 }
 0x5d6   : > { %1312 = vst.msk [vmem:[#allocation4 + $0x9e8] sm:$0xff] %vm995_vm11, %v7748_v29 }
 0x5d7   : > { %1314 = vst.msk [vmem:[#allocation4 + $0x9f8] sm:$0xff] %vm995_vm11, %v7748_v29 }
 0x5d8   : > { %1316 = vst.msk [vmem:[#allocation4 + $0xa08] sm:$0xff] %vm995_vm11, %v7748_v29 }
 0x5d9   : > { %1318 = vst.msk [vmem:[#allocation4 + $0xa18] sm:$0xff] %vm995_vm11, %v7748_v29 }
 0x5da   : > { %1320 = vst.msk [vmem:[#allocation4 + $0xa28] sm:$0xff] %vm995_vm11, %v7748_v29 }
 0x5db   : > { %1322 = vst.msk [vmem:[#allocation4 + $0xa38] sm:$0xff] %vm995_vm11, %v7748_v29 }
 0x5dc   : > { %1324 = vst.msk [vmem:[#allocation4 + $0xa48] sm:$0xff] %vm995_vm11, %v7748_v29 }
 0x5dd   : > { %1326 = vst.msk [vmem:[#allocation4 + $0xa58] sm:$0xff] %vm995_vm11, %v7748_v29 }
 0x5de   : > { %1328 = vst.msk [vmem:[#allocation4 + $0xa68] sm:$0xff] %vm995_vm11, %v7748_v29 }
 0x5df   : > { %1330 = vst.msk [vmem:[#allocation4 + $0xa78] sm:$0xff] %vm995_vm11, %v7748_v29 }
 0x5e0   : > { %1332 = vst.msk [vmem:[#allocation4 + $0xa88] sm:$0xff] %vm995_vm11, %v8720_v48 }
 0x5e1   : > { %1334 = vst.msk [vmem:[#allocation4 + $0xa98] sm:$0xff] %vm995_vm11, %v8720_v48 }
 0x5e2   : > { %1336 = vst.msk [vmem:[#allocation4 + $0xaa8] sm:$0xff] %vm995_vm11, %v8720_v48 }
 0x5e3   : > { %1338 = vst.msk [vmem:[#allocation4 + $0xab8] sm:$0xff] %vm995_vm11, %v8720_v48 }
 0x5e4   : > { %1340 = vst.msk [vmem:[#allocation4 + $0xac8] sm:$0xff] %vm995_vm11, %v8720_v48 }
 0x5e5   : > { %1342 = vst.msk [vmem:[#allocation4 + $0xad8] sm:$0xff] %vm995_vm11, %v8720_v48 }
 0x5e6   : > { %1344 = vst.msk [vmem:[#allocation4 + $0xae8] sm:$0xff] %vm995_vm11, %v8720_v48 }
 0x5e7   : > { %1346 = vst.msk [vmem:[#allocation4 + $0xaf8] sm:$0xff] %vm995_vm11, %v8720_v48 }
 0x5e8   : > { %1348 = vst.msk [vmem:[#allocation4 + $0xb08] sm:$0xff] %vm995_vm11, %v8720_v48 }
 0x5e9   : > { %1350 = vst.msk [vmem:[#allocation4 + $0xb18] sm:$0xff] %vm995_vm11, %v8720_v48 }
 0x5ea   : > { %1352 = vst.msk [vmem:[#allocation4 + $0xb28] sm:$0xff] %vm995_vm11, %v8720_v48 }
 0x5eb   : > { %1354 = vst.msk [vmem:[#allocation4 + $0xb38] sm:$0xff] %vm995_vm11, %v8720_v48 }
 0x5ec   : > { %1356 = vst.msk [vmem:[#allocation4 + $0xb48] sm:$0xff] %vm995_vm11, %v8720_v48 }
 0x5ed   : > { %1358 = vst.msk [vmem:[#allocation4 + $0xb58] sm:$0xff] %vm995_vm11, %v8720_v48 }
 0x5ee   : > { %1360 = vst.msk [vmem:[#allocation4 + $0xb68] sm:$0xff] %vm995_vm11, %v8720_v48 }
 0x5ef   : > { %1362 = vst.msk [vmem:[#allocation4 + $0xb78] sm:$0xff] %vm995_vm11, %v8720_v48 }
 0x5f0   : > { %1364 = vst.msk [vmem:[#allocation4 + $0xb88] sm:$0xff] %vm995_vm11, %v8720_v48 }
 0x5f1   : > { %1366 = vst.msk [vmem:[#allocation4 + $0xb98] sm:$0xff] %vm995_vm11, %v8720_v48 }
 0x5f2   : > { %1368 = vst.msk [vmem:[#allocation4 + $0xba8] sm:$0xff] %vm995_vm11, %v8720_v48 }
 0x5f3   : > { %1370 = vst.msk [vmem:[#allocation4 + $0xbb8] sm:$0xff] %vm995_vm11, %v8720_v48 }
 0x5f4   : > { %1372 = vst.msk [vmem:[#allocation4 + $0xbc8] sm:$0xff] %vm995_vm11, %v8720_v48 }
 0x5f5   : > { %1374 = vst.msk [vmem:[#allocation4 + $0xbd8] sm:$0xff] %vm995_vm11, %v8720_v48 }
 0x5f6   : > { %1376 = vst.msk [vmem:[#allocation4 + $0xbe8] sm:$0xff] %vm995_vm11, %v8720_v48 }
 0x5f7   : > { %1378 = vst.msk [vmem:[#allocation4 + $0xbf8] sm:$0xff] %vm995_vm11, %v8720_v48 }
 0x5f8   : > { %1380 = vst.msk [vmem:[#allocation4 + $0xc08] sm:$0xff] %vm995_vm11, %v8720_v48 }
 0x5f9   : > { %1382 = vst.msk [vmem:[#allocation4 + $0xc18] sm:$0xff] %vm995_vm11, %v8720_v48 }
 0x5fa   : > { %1384 = vst.msk [vmem:[#allocation4 + $0xc28] sm:$0xff] %vm995_vm11, %v8720_v48 }
 0x5fb   : > { %1386 = vst.msk [vmem:[#allocation4 + $0xc38] sm:$0xff] %vm995_vm11, %v8720_v48 }
 0x5fc   : > { %1388 = vst.msk [vmem:[#allocation4 + $0xc48] sm:$0xff] %vm995_vm11, %v8720_v48 }
 0x5fd   : > { %1390 = vst.msk [vmem:[#allocation4 + $0xc58] sm:$0xff] %vm995_vm11, %v8720_v48 }
 0x5fe   : > { %1392 = vst.msk [vmem:[#allocation4 + $0xc68] sm:$0xff] %vm995_vm11, %v8720_v48 }
 0x5ff   : > { %1394 = vst.msk [vmem:[#allocation4 + $0xc78] sm:$0xff] %vm995_vm11, %v8720_v48 }
 0x600   : > { %1396 = vst.msk [vmem:[#allocation4 + $0xc88] sm:$0xff] %vm995_vm11, %v8720_v48 }
 0x601   : > { %1398 = vst.msk [vmem:[#allocation4 + $0xc98] sm:$0xff] %vm995_vm11, %v8720_v48 }
 0x602   : > { %1400 = vst.msk [vmem:[#allocation4 + $0xca8] sm:$0xff] %vm995_vm11, %v8720_v48 }
 0x603   : > { %1402 = vst.msk [vmem:[#allocation4 + $0xcb8] sm:$0xff] %vm995_vm11, %v8720_v48 }
 0x604   : > { %1404 = vst.msk [vmem:[#allocation4 + $0xcc8] sm:$0xff] %vm995_vm11, %v8720_v48 }
 0x605   : > { %1406 = vst.msk [vmem:[#allocation4 + $0xcd8] sm:$0xff] %vm995_vm11, %v8720_v48 }
 0x606   : > { %1408 = vst.msk [vmem:[#allocation4 + $0xce8] sm:$0xff] %vm995_vm11, %v8720_v48 }
 0x607   : > { %1410 = vst.msk [vmem:[#allocation4 + $0xcf8] sm:$0xff] %vm995_vm11, %v8720_v48 }
 0x608   : > { %1412 = vst.msk [vmem:[#allocation4 + $0xd08] sm:$0xff] %vm995_vm11, %v8720_v48 }
 0x609   : > { %1414 = vst.msk [vmem:[#allocation4 + $0xd18] sm:$0xff] %vm995_vm11, %v8720_v48 }
 0x60a   : > { %1416 = vst.msk [vmem:[#allocation4 + $0xd28] sm:$0xff] %vm995_vm11, %v8720_v48 }
 0x60b   : > { %1418 = vst.msk [vmem:[#allocation4 + $0xd38] sm:$0xff] %vm995_vm11, %v8720_v48 }
 0x60c   : > { %1420 = vst.msk [vmem:[#allocation4 + $0xd48] sm:$0xff] %vm995_vm11, %v8720_v48 }
 0x60d   : > { %1422 = vst.msk [vmem:[#allocation4 + $0xd58] sm:$0xff] %vm995_vm11, %v8720_v48 }
 0x60e   : > { %1424 = vst.msk [vmem:[#allocation4 + $0xd68] sm:$0xff] %vm995_vm11, %v8720_v48 }
 0x60f   : > { %1426 = vst.msk [vmem:[#allocation4 + $0xd78] sm:$0xff] %vm995_vm11, %v8720_v48 }
 0x610   : > { %1428 = vst.msk [vmem:[#allocation4 + $0xd88] sm:$0xff] %vm995_vm11, %v8720_v48 }
 0x611   : > { %1430 = vst.msk [vmem:[#allocation4 + $0xd98] sm:$0xff] %vm995_vm11, %v8720_v48 }
 0x612   : > { %1432 = vst.msk [vmem:[#allocation4 + $0xda8] sm:$0xff] %vm995_vm11, %v8720_v48 }
 0x613   : > { %1434 = vst.msk [vmem:[#allocation4 + $0xdb8] sm:$0xff] %vm995_vm11, %v8720_v48 }
 0x614   : > { %1436 = vst.msk [vmem:[#allocation4 + $0xdc8] sm:$0xff] %vm995_vm11, %v8720_v48 }
 0x615   : > { %1438 = vst.msk [vmem:[#allocation4 + $0xdd8] sm:$0xff] %vm995_vm11, %v8720_v48 }
 0x616   : > { %1440 = vst.msk [vmem:[#allocation4 + $0xde8] sm:$0xff] %vm995_vm11, %v8720_v48 }
 0x617   : > { %1442 = vst.msk [vmem:[#allocation4 + $0xdf8] sm:$0xff] %vm995_vm11, %v8720_v48 }
 0x618   : > { %1444 = vst.msk [vmem:[#allocation4 + $0xe08] sm:$0xff] %vm995_vm11, %v8720_v48 }
 0x619   : > { %1446 = vst.msk [vmem:[#allocation4 + $0xe18] sm:$0xff] %vm995_vm11, %v8720_v48 }
 0x61a   : > { %1448 = vst.msk [vmem:[#allocation4 + $0xe28] sm:$0xff] %vm995_vm11, %v8720_v48 }
 0x61b   : > { %1450 = vst.msk [vmem:[#allocation4 + $0xe38] sm:$0xff] %vm995_vm11, %v8720_v48 }
 0x61c   : > { %1452 = vst.msk [vmem:[#allocation4 + $0xe48] sm:$0xff] %vm995_vm11, %v8720_v48 }
 0x61d   : > { %1454 = vst.msk [vmem:[#allocation4 + $0xe58] sm:$0xff] %vm995_vm11, %v8720_v48 }
 0x61e   : > { %1456 = vst.msk [vmem:[#allocation4 + $0xe68] sm:$0xff] %vm995_vm11, %v8720_v48 }
 0x61f   : > { %1458 = vst.msk [vmem:[#allocation4 + $0xe78] sm:$0xff] %vm995_vm11, %v8720_v48 }
 0x620   : > { %1460 = vst.msk [vmem:[#allocation4 + $0xe88] sm:$0xff] %vm995_vm11, %v8720_v48 }
 0x621   : > { %1462 = vst.msk [vmem:[#allocation4 + $0xe98] sm:$0xff] %vm995_vm11, %v8720_v48 }
 0x622   : > { %1464 = vst.msk [vmem:[#allocation4 + $0xea8] sm:$0xff] %vm995_vm11, %v8720_v48 }
 0x623   : > { %1466 = vst.msk [vmem:[#allocation4 + $0xeb8] sm:$0xff] %vm995_vm11, %v8720_v48 }
 0x624   : > { %1468 = vst.msk [vmem:[#allocation4 + $0xec8] sm:$0xff] %vm995_vm11, %v8720_v48 }
 0x625   : > { %1470 = vst.msk [vmem:[#allocation4 + $0xed8] sm:$0xff] %vm995_vm11, %v8720_v48 }
 0x626   : > { %1472 = vst.msk [vmem:[#allocation4 + $0xee8] sm:$0xff] %vm995_vm11, %v8720_v48 }
 0x627   : > { %1474 = vst.msk [vmem:[#allocation4 + $0xef8] sm:$0xff] %vm995_vm11, %v8720_v48 }
 0x628   : > { %1476 = vst.msk [vmem:[#allocation4 + $0xf08] sm:$0xff] %vm995_vm11, %v8720_v48 }
 0x629   : > { %1478 = vst.msk [vmem:[#allocation4 + $0xf18] sm:$0xff] %vm995_vm11, %v8720_v48 }
 0x62a   : > { %1480 = vst.msk [vmem:[#allocation4 + $0xf28] sm:$0xff] %vm995_vm11, %v8720_v48 }
 0x62b   : > { %1482 = vst.msk [vmem:[#allocation4 + $0xf38] sm:$0xff] %vm995_vm11, %v8720_v48 }
 0x62c   : > { %1484 = vst.msk [vmem:[#allocation4 + $0xf48] sm:$0xff] %vm995_vm11, %v8720_v48 }
 0x62d   : > { %1486 = vst.msk [vmem:[#allocation4 + $0xf58] sm:$0xff] %vm995_vm11, %v8720_v48 }
 0x62e   : > { %1488 = vst.msk [vmem:[#allocation4 + $0xf68] sm:$0xff] %vm995_vm11, %v8720_v48 }
 0x62f   : > { %1490 = vst.msk [vmem:[#allocation4 + $0xf78] sm:$0xff] %vm995_vm11, %v8720_v48 }
 0x630   : > { %1492 = vst.msk [vmem:[#allocation4 + $0xf88] sm:$0xff] %vm995_vm11, %v8720_v48 }
 0x631   : > { %1494 = vst.msk [vmem:[#allocation4 + $0xf98] sm:$0xff] %vm995_vm11, %v8720_v48 }
 0x632   : > { %1496 = vst.msk [vmem:[#allocation4 + $0xfa8] sm:$0xff] %vm995_vm11, %v8720_v48 }
 0x633   : > { %1498 = vst.msk [vmem:[#allocation4 + $0xfb8] sm:$0xff] %vm995_vm11, %v8720_v48 }
 0x634   : > { %1500 = vst.msk [vmem:[#allocation4 + $0xfc8] sm:$0xff] %vm995_vm11, %v8720_v48 }
 0x635   : > { %1502 = vst.msk [vmem:[#allocation4 + $0xfd8] sm:$0xff] %vm995_vm11, %v8720_v48 }
 0x636   : > { %1504 = vst.msk [vmem:[#allocation4 + $0xfe8] sm:$0xff] %vm995_vm11, %v8720_v48 }
 0x637   : > { %1506 = vst.msk [vmem:[#allocation4 + $0xff8] sm:$0xff] %vm995_vm11, %v8720_v48 }
 0x638   : > { %1508 = vst.msk [vmem:[#allocation4 + $0x1008] sm:$0xff] %vm995_vm11, %v8720_v48 }
 0x639   : > { %1510 = vst.msk [vmem:[#allocation4 + $0x1018] sm:$0xff] %vm995_vm11, %v8720_v48 }
 0x63a   : > { %1512 = vst.msk [vmem:[#allocation4 + $0x1028] sm:$0xff] %vm995_vm11, %v8720_v48 }
 0x63b   : > { %1514 = vst.msk [vmem:[#allocation4 + $0x1038] sm:$0xff] %vm995_vm11, %v8720_v48 }
 0x63c   : > { %1516 = vst.msk [vmem:[#allocation4 + $0x1048] sm:$0xff] %vm995_vm11, %v8720_v48 }
 0x63d   : > { %1518 = vst.msk [vmem:[#allocation4 + $0x1058] sm:$0xff] %vm995_vm11, %v8720_v48 }
 0x63e   : > { %1520 = vst.msk [vmem:[#allocation4 + $0x1068] sm:$0xff] %vm995_vm11, %v8720_v48 }
 0x63f   : > { %1522 = vst.msk [vmem:[#allocation4 + $0x1078] sm:$0xff] %vm995_vm11, %v8720_v48 }
 0x640   : > { %1524 = vst.msk [vmem:[#allocation4 + $0x1088] sm:$0xff] %vm995_vm11, %v8720_v48 }
 0x641   : > { %1526 = vst.msk [vmem:[#allocation4 + $0x1098] sm:$0xff] %vm995_vm11, %v8720_v48 }
 0x642   : > { %1528 = vst.msk [vmem:[#allocation4 + $0x10a8] sm:$0xff] %vm995_vm11, %v8720_v48 }
 0x643   : > { %1530 = vst.msk [vmem:[#allocation4 + $0x10b8] sm:$0xff] %vm995_vm11, %v8720_v48 }
 0x644   : > { %1532 = vst.msk [vmem:[#allocation4 + $0x10c8] sm:$0xff] %vm995_vm11, %v8720_v48 }
 0x645   : > { %1534 = vst.msk [vmem:[#allocation4 + $0x10d8] sm:$0xff] %vm995_vm11, %v8720_v48 }
 0x646   : > { %1536 = vst.msk [vmem:[#allocation4 + $0x10e8] sm:$0xff] %vm995_vm11, %v8720_v48 }
 0x647   : > { %1538 = vst.msk [vmem:[#allocation4 + $0x10f8] sm:$0xff] %vm995_vm11, %v8720_v48 }
 0x648   : > { %1540 = vst.msk [vmem:[#allocation4 + $0x1108] sm:$0xff] %vm995_vm11, %v8720_v48 }
 0x649   : > { %1542 = vst.msk [vmem:[#allocation4 + $0x1118] sm:$0xff] %vm995_vm11, %v8720_v48 }
 0x64a   : > { %1544 = vst.msk [vmem:[#allocation4 + $0x1128] sm:$0xff] %vm995_vm11, %v8720_v48 }
 0x64b   : > { %1546 = vst.msk [vmem:[#allocation4 + $0x1138] sm:$0xff] %vm995_vm11, %v8720_v48 }
 0x64c   : > { %1548 = vst.msk [vmem:[#allocation4 + $0x1148] sm:$0xff] %vm995_vm11, %v8720_v48 }
 0x64d   : > { %1550 = vst.msk [vmem:[#allocation4 + $0x1158] sm:$0xff] %vm995_vm11, %v8720_v48 }
 0x64e   : > { %1552 = vst.msk [vmem:[#allocation4 + $0x1168] sm:$0xff] %vm995_vm11, %v8720_v48 }
 0x64f   : > { %1554 = vst.msk [vmem:[#allocation4 + $0x1178] sm:$0xff] %vm995_vm11, %v8720_v48 }
 0x650   : > { %1556 = vst.msk [vmem:[#allocation4 + $0x1188] sm:$0xff] %vm995_vm11, %v8720_v48 }
 0x651   : > { %1558 = vst.msk [vmem:[#allocation4 + $0x1198] sm:$0xff] %vm995_vm11, %v8720_v48 }
 0x652   : > { %1560 = vst.msk [vmem:[#allocation4 + $0x11a8] sm:$0xff] %vm995_vm11, %v8720_v48 }
 0x653   : > { %1562 = vst.msk [vmem:[#allocation4 + $0x11b8] sm:$0xff] %vm995_vm11, %v8720_v48 }
 0x654   : > { %1564 = vst.msk [vmem:[#allocation4 + $0x11c8] sm:$0xff] %vm995_vm11, %v8720_v48 }
 0x655   : > { %1566 = vst.msk [vmem:[#allocation4 + $0x11d8] sm:$0xff] %vm995_vm11, %v8720_v48 }
 0x656   : > { %1568 = vst.msk [vmem:[#allocation4 + $0x11e8] sm:$0xff] %vm995_vm11, %v8720_v48 }
 0x657   : > { %1570 = vst.msk [vmem:[#allocation4 + $0x11f8] sm:$0xff] %vm995_vm11, %v8720_v48 }
 0x658   : > { %1572 = vst.msk [vmem:[#allocation4 + $0x1208] sm:$0xff] %vm995_vm11, %v8720_v48 }
 0x659   : > { %1574 = vst.msk [vmem:[#allocation4 + $0x1218] sm:$0xff] %vm995_vm11, %v8720_v48 }
 0x65a   : > { %1576 = vst.msk [vmem:[#allocation4 + $0x1228] sm:$0xff] %vm995_vm11, %v8720_v48 }
 0x65b   : > { %1578 = vst.msk [vmem:[#allocation4 + $0x1238] sm:$0xff] %vm995_vm11, %v8720_v48 }
 0x65c   : > { %1580 = vst.msk [vmem:[#allocation4 + $0x1248] sm:$0xff] %vm995_vm11, %v8720_v48 }
 0x65d   : > { %1582 = vst.msk [vmem:[#allocation4 + $0x1258] sm:$0xff] %vm995_vm11, %v8720_v48 }
 0x65e   : > { %1584 = vst.msk [vmem:[#allocation4 + $0x1268] sm:$0xff] %vm995_vm11, %v8720_v48 }
 0x65f   : > { %1586 = vst.msk [vmem:[#allocation4 + $0x1278] sm:$0xff] %vm995_vm11, %v8720_v48 }
 0x660   : > { %1588 = vst.msk [vmem:[#allocation4 + $0x1288] sm:$0xff] %vm995_vm11, %v8720_v48 }
 0x661   : > { %1590 = vst.msk [vmem:[#allocation4 + $0x1298] sm:$0xff] %vm995_vm11, %v8720_v48 }
 0x662   : > { %1592 = vst.msk [vmem:[#allocation4 + $0x12a8] sm:$0xff] %vm995_vm11, %v8720_v48 }
 0x663   : > { %1594 = vst.msk [vmem:[#allocation4 + $0x12b8] sm:$0xff] %vm995_vm11, %v8720_v48 }
 0x664   : > { %1596 = vst.msk [vmem:[#allocation4 + $0x12c8] sm:$0xff] %vm995_vm11, %v8720_v48 }
 0x665   : > { %1598 = vst.msk [vmem:[#allocation4 + $0x12d8] sm:$0xff] %vm995_vm11, %v8720_v48 }
 0x666   : > { %1600 = vst.msk [vmem:[#allocation4 + $0x12e8] sm:$0xff] %vm995_vm11, %v8720_v48 }
 0x667   : > { %1602 = vst.msk [vmem:[#allocation4 + $0x12f8] sm:$0xff] %vm995_vm11, %v8720_v48 }
 0x668   : > { %1604 = vst.msk [vmem:[#allocation4 + $0x1308] sm:$0xff] %vm995_vm11, %v8720_v48 }
 0x669   : > { %1606 = vst.msk [vmem:[#allocation4 + $0x1318] sm:$0xff] %vm995_vm11, %v8720_v48 }
 0x66a   : > { %1608 = vst.msk [vmem:[#allocation4 + $0x1328] sm:$0xff] %vm995_vm11, %v8720_v48 }
 0x66b   : > { %1610 = vst.msk [vmem:[#allocation4 + $0x1338] sm:$0xff] %vm995_vm11, %v8720_v48 }
 0x66c   : > { %1612 = vst.msk [vmem:[#allocation4 + $0x1348] sm:$0xff] %vm995_vm11, %v8720_v48 }
 0x66d   : > { %1614 = vst.msk [vmem:[#allocation4 + $0x1358] sm:$0xff] %vm995_vm11, %v8720_v48 }
 0x66e   : > { %1616 = vst.msk [vmem:[#allocation4 + $0x1368] sm:$0xff] %vm995_vm11, %v8720_v48 }
 0x66f   : > { %1618 = vst.msk [vmem:[#allocation4 + $0x1378] sm:$0xff] %vm995_vm11, %v8720_v48 }
 0x670   : > { %1620 = vst.msk [vmem:[#allocation4 + $0x1388] sm:$0xff] %vm995_vm11, %v8720_v48 }
 0x671   : > { %1622 = vst.msk [vmem:[#allocation4 + $0x1398] sm:$0xff] %vm995_vm11, %v8720_v48 }
 0x672   : > { %1624 = vst.msk [vmem:[#allocation4 + $0x13a8] sm:$0xff] %vm995_vm11, %v8720_v48 }
 0x673   : > { %1626 = vst.msk [vmem:[#allocation4 + $0x13b8] sm:$0xff] %vm995_vm11, %v8720_v48 }
 0x674   : > { %1628 = vst.msk [vmem:[#allocation4 + $0x13c8] sm:$0xff] %vm995_vm11, %v8720_v48 }
 0x675   : > { %1630 = vst.msk [vmem:[#allocation4 + $0x13d8] sm:$0xff] %vm995_vm11, %v8720_v48 }
 0x676   : > { %1632 = vst.msk [vmem:[#allocation4 + $0x13e8] sm:$0xff] %vm995_vm11, %v8720_v48 }
 0x677   : > { %1634 = vst.msk [vmem:[#allocation4 + $0x13f8] sm:$0xff] %vm995_vm11, %v8720_v48 }
 0x678   : > { %1636 = vst.msk [vmem:[#allocation4 + $0x1408] sm:$0xff] %vm995_vm11, %v8720_v48 }
 0x679   : > { %1638 = vst.msk [vmem:[#allocation4 + $0x1418] sm:$0xff] %vm995_vm11, %v8720_v48 }
 0x67a   : > { %1640 = vst.msk [vmem:[#allocation4 + $0x1428] sm:$0xff] %vm995_vm11, %v8720_v48 }
 0x67b   : > { %1642 = vst.msk [vmem:[#allocation4 + $0x1438] sm:$0xff] %vm995_vm11, %v8720_v48 }
 0x67c   : > { %1644 = vst.msk [vmem:[#allocation4 + $0x1448] sm:$0xff] %vm995_vm11, %v8720_v48 }
 0x67d   : > { %1646 = vst.msk [vmem:[#allocation4 + $0x1458] sm:$0xff] %vm995_vm11, %v8720_v48 }
 0x67e   : > { %1648 = vst.msk [vmem:[#allocation4 + $0x1468] sm:$0xff] %vm995_vm11, %v8720_v48 }
 0x67f   : > { %1650 = vst.msk [vmem:[#allocation4 + $0x1478] sm:$0xff] %vm995_vm11, %v8720_v48 }
 0x680   : > { %1652 = vst.msk [vmem:[#allocation4 + $0x1488] sm:$0xff] %vm995_vm11, %v8720_v48 }
 0x681   : > { %1654 = vst.msk [vmem:[#allocation4 + $0x1498] sm:$0xff] %vm995_vm11, %v8720_v48 }
 0x682   : > { %1656 = vst.msk [vmem:[#allocation4 + $0x14a8] sm:$0xff] %vm995_vm11, %v8720_v48 }
 0x683   : > { %1658 = vst.msk [vmem:[#allocation4 + $0x14b8] sm:$0xff] %vm995_vm11, %v8720_v48 }
 0x684   : > { %1660 = vst.msk [vmem:[#allocation4 + $0x14c8] sm:$0xff] %vm995_vm11, %v8720_v48 }
 0x685   : > { %1662 = vst.msk [vmem:[#allocation4 + $0x14d8] sm:$0xff] %vm995_vm11, %v8720_v48 }
 0x686   : > { %1664 = vst.msk [vmem:[#allocation4 + $0x14e8] sm:$0xff] %vm995_vm11, %v8720_v48 }
 0x687   : > { %1666 = vst.msk [vmem:[#allocation4 + $0x14f8] sm:$0xff] %vm995_vm11, %v8720_v48 }
 0x688   : > { %1668 = vst.msk [vmem:[#allocation4 + $0x1508] sm:$0xff] %vm995_vm11, %v8720_v48 }
 0x689   : > { %1670 = vst.msk [vmem:[#allocation4 + $0x1518] sm:$0xff] %vm995_vm11, %v8720_v48 }
 0x68a   : > { %1672 = vst.msk [vmem:[#allocation4 + $0x1528] sm:$0xff] %vm995_vm11, %v8720_v48 }
 0x68b   : > { %1674 = vst.msk [vmem:[#allocation4 + $0x1538] sm:$0xff] %vm995_vm11, %v8720_v48 }
 0x68c   : > { %1676 = vst.msk [vmem:[#allocation4 + $0x1548] sm:$0xff] %vm995_vm11, %v8720_v48 }
 0x68d   : > { %1678 = vst.msk [vmem:[#allocation4 + $0x1558] sm:$0xff] %vm995_vm11, %v8720_v48 }
 0x68e   : > { %1680 = vst.msk [vmem:[#allocation4 + $0x1568] sm:$0xff] %vm995_vm11, %v8720_v48 }
 0x68f   : > { %1682 = vst.msk [vmem:[#allocation4 + $0x1578] sm:$0xff] %vm995_vm11, %v8720_v48 }
 0x690   : > { %1684 = vst.msk [vmem:[#allocation4 + $0x1588] sm:$0xff] %vm995_vm11, %v8720_v48 }
 0x691   : > { %1686 = vst.msk [vmem:[#allocation4 + $0x1598] sm:$0xff] %vm995_vm11, %v8720_v48 }
 0x692   : > { %1688 = vst.msk [vmem:[#allocation4 + $0x15a8] sm:$0xff] %vm995_vm11, %v8720_v48 }
 0x693   : > { %1690 = vst.msk [vmem:[#allocation4 + $0x15b8] sm:$0xff] %vm995_vm11, %v8720_v48 }
 0x694   : > { %1692 = vst.msk [vmem:[#allocation4 + $0x15c8] sm:$0xff] %vm995_vm11, %v8720_v48 }
 0x695   : > { %1694 = vst.msk [vmem:[#allocation4 + $0x15d8] sm:$0xff] %vm995_vm11, %v8720_v48 }
 0x696   : > { %1696 = vst.msk [vmem:[#allocation4 + $0x15e8] sm:$0xff] %vm995_vm11, %v8720_v48 }
 0x697   : > { %1698 = vst.msk [vmem:[#allocation4 + $0x15f8] sm:$0xff] %vm995_vm11, %v8720_v48 }
 0x698   : > { %1700 = vst.msk [vmem:[#allocation4 + $0x1608] sm:$0xff] %vm995_vm11, %v8720_v48 }
 0x699   : > { %1702 = vst.msk [vmem:[#allocation4 + $0x1618] sm:$0xff] %vm995_vm11, %v8720_v48 }
 0x69a   : > { %1704 = vst.msk [vmem:[#allocation4 + $0x1628] sm:$0xff] %vm995_vm11, %v8720_v48 }
 0x69b   : > { %1706 = vst.msk [vmem:[#allocation4 + $0x1638] sm:$0xff] %vm995_vm11, %v8720_v48 }
 0x69c   : > { %1708 = vst.msk [vmem:[#allocation4 + $0x1648] sm:$0xff] %vm995_vm11, %v8720_v48 }
 0x69d   : > { %1710 = vst.msk [vmem:[#allocation4 + $0x1658] sm:$0xff] %vm995_vm11, %v8720_v48 }
 0x69e   : > { %1712 = vst.msk [vmem:[#allocation4 + $0x1668] sm:$0xff] %vm995_vm11, %v8720_v48 }
 0x69f   : > { %1714 = vst.msk [vmem:[#allocation4 + $0x1678] sm:$0xff] %vm995_vm11, %v8720_v48 }
 0x6a0   : > { %1716 = vst.msk [vmem:[#allocation4 + $0x1688] sm:$0xff] %vm995_vm11, %v8720_v48 }
 0x6a1   : > { %1718 = vst.msk [vmem:[#allocation4 + $0x1698] sm:$0xff] %vm995_vm11, %v8720_v48 }
 0x6a2   : > { %1720 = vst.msk [vmem:[#allocation4 + $0x16a8] sm:$0xff] %vm995_vm11, %v8720_v48 }
 0x6a3   : > { %1722 = vst.msk [vmem:[#allocation4 + $0x16b8] sm:$0xff] %vm995_vm11, %v8720_v48 }
 0x6a4   : > { %1724 = vst.msk [vmem:[#allocation4 + $0x16c8] sm:$0xff] %vm995_vm11, %v8720_v48 }
 0x6a5   : > { %1726 = vst.msk [vmem:[#allocation4 + $0x16d8] sm:$0xff] %vm995_vm11, %v8720_v48 }
 0x6a6   : > { %1728 = vst.msk [vmem:[#allocation4 + $0x16e8] sm:$0xff] %vm995_vm11, %v8720_v48 }
 0x6a7   : > { %1730 = vst.msk [vmem:[#allocation4 + $0x16f8] sm:$0xff] %vm995_vm11, %v8720_v48 }
 0x6a8   : > { %1732 = vst.msk [vmem:[#allocation4 + $0x1708] sm:$0xff] %vm995_vm11, %v8720_v48 }
 0x6a9   : > { %1734 = vst.msk [vmem:[#allocation4 + $0x1718] sm:$0xff] %vm995_vm11, %v8720_v48 }
 0x6aa   : > { %1736 = vst.msk [vmem:[#allocation4 + $0x1728] sm:$0xff] %vm995_vm11, %v8720_v48 }
 0x6ab   : > { %1738 = vst.msk [vmem:[#allocation4 + $0x1738] sm:$0xff] %vm995_vm11, %v8720_v48 }
 0x6ac   : > { %1740 = vst.msk [vmem:[#allocation4 + $0x1748] sm:$0xff] %vm995_vm11, %v8720_v48 }
 0x6ad   : > { %1742 = vst.msk [vmem:[#allocation4 + $0x1758] sm:$0xff] %vm995_vm11, %v8720_v48 }
 0x6ae   : > { %1744 = vst.msk [vmem:[#allocation4 + $0x1768] sm:$0xff] %vm995_vm11, %v8720_v48 }
 0x6af   : > { %1746 = vst.msk [vmem:[#allocation4 + $0x1778] sm:$0xff] %vm995_vm11, %v8720_v48 }
 0x6b0   : > { %1748 = vst.msk [vmem:[#allocation4 + $0x1788] sm:$0xff] %vm995_vm11, %v8720_v48 }
 0x6b1   : > { %1750 = vst.msk [vmem:[#allocation4 + $0x1798] sm:$0xff] %vm995_vm11, %v8720_v48 }
 0x6b2   : > { %1752 = vst.msk [vmem:[#allocation4 + $0x17a8] sm:$0xff] %vm995_vm11, %v8720_v48 }
 0x6b3   : > { %1754 = vst.msk [vmem:[#allocation4 + $0x17b8] sm:$0xff] %vm995_vm11, %v8720_v48 }
 0x6b4   : > { %1756 = vst.msk [vmem:[#allocation4 + $0x17c8] sm:$0xff] %vm995_vm11, %v8720_v48 }
 0x6b5   : > { %1758 = vst.msk [vmem:[#allocation4 + $0x17d8] sm:$0xff] %vm995_vm11, %v8720_v48 }
 0x6b6   : > { %1760 = vst.msk [vmem:[#allocation4 + $0x17e8] sm:$0xff] %vm995_vm11, %v8720_v48 }
 0x6b7   : > { %1762 = vst.msk [vmem:[#allocation4 + $0x17f8] sm:$0xff] %vm995_vm11, %v8720_v48 }
 0x6b8   : > { %1764 = vst.msk [vmem:[#allocation4 + $0x1808] sm:$0xff] %vm995_vm11, %v8720_v48 }
 0x6b9   : > { %1766 = vst.msk [vmem:[#allocation4 + $0x1818] sm:$0xff] %vm995_vm11, %v8720_v48 }
 0x6ba   : > { %1768 = vst.msk [vmem:[#allocation4 + $0x1828] sm:$0xff] %vm995_vm11, %v8720_v48 }
 0x6bb   : > { %1770 = vst.msk [vmem:[#allocation4 + $0x1838] sm:$0xff] %vm995_vm11, %v8720_v48 }
 0x6bc   : > { %1772 = vst.msk [vmem:[#allocation4 + $0x1848] sm:$0xff] %vm995_vm11, %v8720_v48 }
 0x6bd   : > { %1774 = vst.msk [vmem:[#allocation4 + $0x1858] sm:$0xff] %vm995_vm11, %v8720_v48 }
 0x6be   : > { %1776 = vst.msk [vmem:[#allocation4 + $0x1868] sm:$0xff] %vm995_vm11, %v8720_v48 }
 0x6bf   : > { %1778 = vst.msk [vmem:[#allocation4 + $0x1878] sm:$0xff] %vm995_vm11, %v8720_v48 }
 0x6c0   : > { %1780 = vst.msk [vmem:[#allocation4 + $0x1888] sm:$0xff] %vm995_vm11, %v8720_v48 }
 0x6c1   : > { %1782 = vst.msk [vmem:[#allocation4 + $0x1898] sm:$0xff] %vm995_vm11, %v8720_v48 }
 0x6c2   : > { %1784 = vst.msk [vmem:[#allocation4 + $0x18a8] sm:$0xff] %vm995_vm11, %v8720_v48 }
 0x6c3   : > { %1786 = vst.msk [vmem:[#allocation4 + $0x18b8] sm:$0xff] %vm995_vm11, %v8720_v48 }
 0x6c4   : > { %1788 = vst.msk [vmem:[#allocation4 + $0x18c8] sm:$0xff] %vm995_vm11, %v8720_v48 }
 0x6c5   : > { %1790 = vst.msk [vmem:[#allocation4 + $0x18d8] sm:$0xff] %vm995_vm11, %v8720_v48 }
 0x6c6   : > { %1792 = vst.msk [vmem:[#allocation4 + $0x18e8] sm:$0xff] %vm995_vm11, %v8720_v48 }
 0x6c7   : > { %1794 = vst.msk [vmem:[#allocation4 + $0x18f8] sm:$0xff] %vm995_vm11, %v8720_v48 }
 0x6c8   : > { %1796 = vst.msk [vmem:[#allocation4 + $0x1908] sm:$0xff] %vm995_vm11, %v8720_v48 }
 0x6c9   : > { %1798 = vst.msk [vmem:[#allocation4 + $0x1918] sm:$0xff] %vm995_vm11, %v8720_v48 }
 0x6ca   : > { %1800 = vst.msk [vmem:[#allocation4 + $0x1928] sm:$0xff] %vm995_vm11, %v8720_v48 }
 0x6cb   : > { %1802 = vst.msk [vmem:[#allocation4 + $0x1938] sm:$0xff] %vm995_vm11, %v8720_v48 }
 0x6cc   : > { %1804 = vst.msk [vmem:[#allocation4 + $0x1948] sm:$0xff] %vm995_vm11, %v8720_v48 }
 0x6cd   : > { %1806 = vst.msk [vmem:[#allocation4 + $0x1958] sm:$0xff] %vm995_vm11, %v8720_v48 }
 0x6ce   : > { %1808 = vst.msk [vmem:[#allocation4 + $0x1968] sm:$0xff] %vm995_vm11, %v8720_v48 }
 0x6cf   : > { %1810 = vst.msk [vmem:[#allocation4 + $0x1978] sm:$0xff] %vm995_vm11, %v8720_v48 }
 0x6d0   : > { %1812 = vst.msk [vmem:[#allocation4 + $0x1988] sm:$0xff] %vm995_vm11, %v8720_v48 }
 0x6d1   : > { %1814 = vst.msk [vmem:[#allocation4 + $0x1998] sm:$0xff] %vm995_vm11, %v8720_v48 }
 0x6d2   : > { %1816 = vst.msk [vmem:[#allocation4 + $0x19a8] sm:$0xff] %vm995_vm11, %v8720_v48 }
 0x6d3   : > { %1818 = vst.msk [vmem:[#allocation4 + $0x19b8] sm:$0xff] %vm995_vm11, %v8720_v48 }
 0x6d4   : > { %1820 = vst.msk [vmem:[#allocation4 + $0x19c8] sm:$0xff] %vm995_vm11, %v8720_v48 }
 0x6d5   : > { %1822 = vst.msk [vmem:[#allocation4 + $0x19d8] sm:$0xff] %vm995_vm11, %v8720_v48 }
 0x6d6   : > { %1824 = vst.msk [vmem:[#allocation4 + $0x19e8] sm:$0xff] %vm995_vm11, %v8720_v48 }
 0x6d7   : > { %1826 = vst.msk [vmem:[#allocation4 + $0x19f8] sm:$0xff] %vm995_vm11, %v8720_v48 }
 0x6d8   : > { %1828 = vst.msk [vmem:[#allocation4 + $0x1a08] sm:$0xff] %vm995_vm11, %v8720_v48 }
 0x6d9   : > { %1830 = vst.msk [vmem:[#allocation4 + $0x1a18] sm:$0xff] %vm995_vm11, %v8720_v48 }
 0x6da   : > { %1832 = vst.msk [vmem:[#allocation4 + $0x1a28] sm:$0xff] %vm995_vm11, %v8720_v48 }
 0x6db   : > { %1834 = vst.msk [vmem:[#allocation4 + $0x1a38] sm:$0xff] %vm995_vm11, %v8720_v48 }
 0x6dc   : > { %1836 = vst.msk [vmem:[#allocation4 + $0x1a48] sm:$0xff] %vm995_vm11, %v8720_v48 }
 0x6dd   : > { %1838 = vst.msk [vmem:[#allocation4 + $0x1a58] sm:$0xff] %vm995_vm11, %v8720_v48 }
 0x6de   : > { %1840 = vst.msk [vmem:[#allocation4 + $0x1a68] sm:$0xff] %vm995_vm11, %v8720_v48 }
 0x6df   : > { %1842 = vst.msk [vmem:[#allocation4 + $0x1a78] sm:$0xff] %vm995_vm11, %v8720_v48 }
 0x6e0   : > { %1844 = vst.msk [vmem:[#allocation4 + $0x1a88] sm:$0xff] %vm995_vm11, %v8720_v48 }
 0x6e1   : > { %1846 = vst.msk [vmem:[#allocation4 + $0x1a98] sm:$0xff] %vm995_vm11, %v8720_v48 }
 0x6e2   : > { %1848 = vst.msk [vmem:[#allocation4 + $0x1aa8] sm:$0xff] %vm995_vm11, %v8720_v48 }
 0x6e3   : > { %1850 = vst.msk [vmem:[#allocation4 + $0x1ab8] sm:$0xff] %vm995_vm11, %v8720_v48 }
 0x6e4   : > { %1852 = vst.msk [vmem:[#allocation4 + $0x1ac8] sm:$0xff] %vm995_vm11, %v8720_v48 }
 0x6e5   : > { %1854 = vst.msk [vmem:[#allocation4 + $0x1ad8] sm:$0xff] %vm995_vm11, %v8720_v48 }
 0x6e6   : > { %1856 = vst.msk [vmem:[#allocation4 + $0x1ae8] sm:$0xff] %vm995_vm11, %v8720_v48 }
 0x6e7   : > { %1858 = vst.msk [vmem:[#allocation4 + $0x1af8] sm:$0xff] %vm995_vm11, %v8720_v48 }
 0x6e8   : > { %1860 = vst.msk [vmem:[#allocation4 + $0x1b08] sm:$0xff] %vm995_vm11, %v8720_v48 }
 0x6e9   : > { %1862 = vst.msk [vmem:[#allocation4 + $0x1b18] sm:$0xff] %vm995_vm11, %v8720_v48 }
 0x6ea   : > { %1864 = vst.msk [vmem:[#allocation4 + $0x1b28] sm:$0xff] %vm995_vm11, %v8720_v48 }
 0x6eb   : > { %1866 = vst.msk [vmem:[#allocation4 + $0x1b38] sm:$0xff] %vm995_vm11, %v8720_v48 }
 0x6ec   : > { %1868 = vst.msk [vmem:[#allocation4 + $0x1b48] sm:$0xff] %vm995_vm11, %v8720_v48 }
 0x6ed   : > { %1870 = vst.msk [vmem:[#allocation4 + $0x1b58] sm:$0xff] %vm995_vm11, %v8720_v48 }
 0x6ee   : > { %1872 = vst.msk [vmem:[#allocation4 + $0x1b68] sm:$0xff] %vm995_vm11, %v8720_v48 }
 0x6ef   : > { %1874 = vst.msk [vmem:[#allocation4 + $0x1b78] sm:$0xff] %vm995_vm11, %v8720_v48 }
 0x6f0   : > { %1876 = vst.msk [vmem:[#allocation4 + $0x1b88] sm:$0xff] %vm995_vm11, %v8720_v48 }
 0x6f1   : > { %1878 = vst.msk [vmem:[#allocation4 + $0x1b98] sm:$0xff] %vm995_vm11, %v8720_v48 }
 0x6f2   : > { %1880 = vst.msk [vmem:[#allocation4 + $0x1ba8] sm:$0xff] %vm995_vm11, %v8720_v48 }
 0x6f3   : > { %1882 = vst.msk [vmem:[#allocation4 + $0x1bb8] sm:$0xff] %vm995_vm11, %v8720_v48 }
 0x6f4   : > { %1884 = vst.msk [vmem:[#allocation4 + $0x1bc8] sm:$0xff] %vm995_vm11, %v8720_v48 }
 0x6f5   : > { %1886 = vst.msk [vmem:[#allocation4 + $0x1bd8] sm:$0xff] %vm995_vm11, %v8720_v48 }
 0x6f6   : > { %1888 = vst.msk [vmem:[#allocation4 + $0x1be8] sm:$0xff] %vm995_vm11, %v8720_v48 }
 0x6f7   : > { %1890 = vst.msk [vmem:[#allocation4 + $0x1bf8] sm:$0xff] %vm995_vm11, %v8720_v48 }
 0x6f8   : > { %1892 = vst.msk [vmem:[#allocation4 + $0x1c08] sm:$0xff] %vm995_vm11, %v8720_v48 }
 0x6f9   : > { %1894 = vst.msk [vmem:[#allocation4 + $0x1c18] sm:$0xff] %vm995_vm11, %v8720_v48 }
 0x6fa   : > { %1896 = vst.msk [vmem:[#allocation4 + $0x1c28] sm:$0xff] %vm995_vm11, %v8720_v48 }
 0x6fb   : > { %1898 = vst.msk [vmem:[#allocation4 + $0x1c38] sm:$0xff] %vm995_vm11, %v8720_v48 }
 0x6fc   : > { %1900 = vst.msk [vmem:[#allocation4 + $0x1c48] sm:$0xff] %vm995_vm11, %v8720_v48 }
 0x6fd   : > { %1902 = vst.msk [vmem:[#allocation4 + $0x1c58] sm:$0xff] %vm995_vm11, %v8720_v48 }
 0x6fe   : > { %1904 = vst.msk [vmem:[#allocation4 + $0x1c68] sm:$0xff] %vm995_vm11, %v8720_v48 }
 0x6ff   : > { %1906 = vst.msk [vmem:[#allocation4 + $0x1c78] sm:$0xff] %vm995_vm11, %v8720_v48 }
 0x700   : > { %1908 = vst.msk [vmem:[#allocation4 + $0x1c88] sm:$0xff] %vm995_vm11, %v8720_v48 }
 0x701   : > { %1910 = vst.msk [vmem:[#allocation4 + $0x1c98] sm:$0xff] %vm995_vm11, %v8720_v48 }
 0x702   : > { %1912 = vst.msk [vmem:[#allocation4 + $0x1ca8] sm:$0xff] %vm995_vm11, %v8720_v48 }
 0x703   : > { %1914 = vst.msk [vmem:[#allocation4 + $0x1cb8] sm:$0xff] %vm995_vm11, %v8720_v48 }
 0x704   : > { %1916 = vst.msk [vmem:[#allocation4 + $0x1cc8] sm:$0xff] %vm995_vm11, %v8720_v48 }
 0x705   : > { %1918 = vst.msk [vmem:[#allocation4 + $0x1cd8] sm:$0xff] %vm995_vm11, %v8720_v48 }
 0x706   : > { %1920 = vst.msk [vmem:[#allocation4 + $0x1ce8] sm:$0xff] %vm995_vm11, %v8720_v48 }
 0x707   : > { %1922 = vst.msk [vmem:[#allocation4 + $0x1cf8] sm:$0xff] %vm995_vm11, %v8720_v48 }
 0x708   : > { %1924 = vst.msk [vmem:[#allocation4 + $0x1d08] sm:$0xff] %vm995_vm11, %v8720_v48 }
 0x709   : > { %1926 = vst.msk [vmem:[#allocation4 + $0x1d18] sm:$0xff] %vm995_vm11, %v8720_v48 }
 0x70a   : > { %1928 = vst.msk [vmem:[#allocation4 + $0x1d28] sm:$0xff] %vm995_vm11, %v8720_v48 }
 0x70b   : > { %1930 = vst.msk [vmem:[#allocation4 + $0x1d38] sm:$0xff] %vm995_vm11, %v8720_v48 }
 0x70c   : > { %1932 = vst.msk [vmem:[#allocation4 + $0x1d48] sm:$0xff] %vm995_vm11, %v8720_v48 }
 0x70d   : > { %1934 = vst.msk [vmem:[#allocation4 + $0x1d58] sm:$0xff] %vm995_vm11, %v8720_v48 }
 0x70e   : > { %1936 = vst.msk [vmem:[#allocation4 + $0x1d68] sm:$0xff] %vm995_vm11, %v8720_v48 }
 0x70f   : > { %1938 = vst.msk [vmem:[#allocation4 + $0x1d78] sm:$0xff] %vm995_vm11, %v8720_v48 }
 0x710   : > { %1940 = vst.msk [vmem:[#allocation4 + $0x1d88] sm:$0xff] %vm995_vm11, %v8720_v48 }
 0x711   : > { %1942 = vst.msk [vmem:[#allocation4 + $0x1d98] sm:$0xff] %vm995_vm11, %v8720_v48 }
 0x712   : > { %1944 = vst.msk [vmem:[#allocation4 + $0x1da8] sm:$0xff] %vm995_vm11, %v8720_v48 }
 0x713   : > { %1946 = vst.msk [vmem:[#allocation4 + $0x1db8] sm:$0xff] %vm995_vm11, %v8720_v48 }
 0x714   : > { %1948 = vst.msk [vmem:[#allocation4 + $0x1dc8] sm:$0xff] %vm995_vm11, %v8720_v48 }
 0x715   : > { %1950 = vst.msk [vmem:[#allocation4 + $0x1dd8] sm:$0xff] %vm995_vm11, %v8720_v48 }
 0x716   : > { %1952 = vst.msk [vmem:[#allocation4 + $0x1de8] sm:$0xff] %vm995_vm11, %v8720_v48 }
 0x717   : > { %1954 = vst.msk [vmem:[#allocation4 + $0x1df8] sm:$0xff] %vm995_vm11, %v8720_v48 }
 0x718   : > { %1956 = vst.msk [vmem:[#allocation4 + $0x1e08] sm:$0xff] %vm995_vm11, %v8720_v48 }
 0x719   : > { %1958 = vst.msk [vmem:[#allocation4 + $0x1e18] sm:$0xff] %vm995_vm11, %v8720_v48 }
 0x71a   : > { %1960 = vst.msk [vmem:[#allocation4 + $0x1e28] sm:$0xff] %vm995_vm11, %v8720_v48 }
 0x71b   : > { %1962 = vst.msk [vmem:[#allocation4 + $0x1e38] sm:$0xff] %vm995_vm11, %v8720_v48 }
 0x71c   : > { %1964 = vst.msk [vmem:[#allocation4 + $0x1e48] sm:$0xff] %vm995_vm11, %v8720_v48 }
 0x71d   : > { %1966 = vst.msk [vmem:[#allocation4 + $0x1e58] sm:$0xff] %vm995_vm11, %v8720_v48 }
 0x71e   : > { %1968 = vst.msk [vmem:[#allocation4 + $0x1e68] sm:$0xff] %vm995_vm11, %v8720_v48 }
 0x71f   : > { %1970 = vst.msk [vmem:[#allocation4 + $0x1e78] sm:$0xff] %vm995_vm11, %v8720_v48 }
 0x720   : > { %1972 = vst.msk [vmem:[#allocation4 + $0x1e88] sm:$0xff] %vm995_vm11, %v8720_v48 }
 0x721   : > { %1974 = vst.msk [vmem:[#allocation4 + $0x1e98] sm:$0xff] %vm995_vm11, %v8720_v48 }
 0x722   : > { %1976 = vst.msk [vmem:[#allocation4 + $0x1ea8] sm:$0xff] %vm995_vm11, %v8720_v48 }
 0x723   : > { %1978 = vst.msk [vmem:[#allocation4 + $0x1eb8] sm:$0xff] %vm995_vm11, %v8720_v48 }
 0x724   : > { %1980 = vst.msk [vmem:[#allocation4 + $0x1ec8] sm:$0xff] %vm995_vm11, %v8720_v48 }
 0x725   : > { %1982 = vst.msk [vmem:[#allocation4 + $0x1ed8] sm:$0xff] %vm995_vm11, %v8720_v48 }
 0x726   : > { %1984 = vst.msk [vmem:[#allocation4 + $0x1ee8] sm:$0xff] %vm995_vm11, %v8720_v48 }
 0x727   : > { %1986 = vst.msk [vmem:[#allocation4 + $0x1ef8] sm:$0xff] %vm995_vm11, %v8720_v48 }
 0x728   : > { %1988 = vst.msk [vmem:[#allocation4 + $0x1f08] sm:$0xff] %vm995_vm11, %v8720_v48 }
 0x729   : > { %1990 = vst.msk [vmem:[#allocation4 + $0x1f18] sm:$0xff] %vm995_vm11, %v8720_v48 }
 0x72a   : > { %1992 = vst.msk [vmem:[#allocation4 + $0x1f28] sm:$0xff] %vm995_vm11, %v8720_v48 }
 0x72b   : > { %1994 = vst.msk [vmem:[#allocation4 + $0x1f38] sm:$0xff] %vm995_vm11, %v8720_v48 }
 0x72c   : > { %1996 = vst.msk [vmem:[#allocation4 + $0x1f48] sm:$0xff] %vm995_vm11, %v8720_v48 }
 0x72d   : > { %1998 = vst.msk [vmem:[#allocation4 + $0x1f58] sm:$0xff] %vm995_vm11, %v8720_v48 }
 0x72e   : > { %2000 = vst.msk [vmem:[#allocation4 + $0x1f68] sm:$0xff] %vm995_vm11, %v8720_v48 }
 0x72f   : > { %2002 = vst.msk [vmem:[#allocation4 + $0x1f78] sm:$0xff] %vm995_vm11, %v8720_v48 }
 0x730   : > { %2004 = vst.msk [vmem:[#allocation4 + $0x1f88] sm:$0xff] %vm995_vm11, %v8720_v48 }
 0x731   : > { %2006 = vst.msk [vmem:[#allocation4 + $0x1f98] sm:$0xff] %vm995_vm11, %v8720_v48 }
 0x732   : > { %2008 = vst.msk [vmem:[#allocation4 + $0x1fa8] sm:$0xff] %vm995_vm11, %v8720_v48 }
 0x733   : > { %2010 = vst.msk [vmem:[#allocation4 + $0x1fb8] sm:$0xff] %vm995_vm11, %v8720_v48 }
 0x734   : > { %2012 = vst.msk [vmem:[#allocation4 + $0x1fc8] sm:$0xff] %vm995_vm11, %v8720_v48 }
 0x735   : > { %2014 = vst.msk [vmem:[#allocation4 + $0x1fd8] sm:$0xff] %vm995_vm11, %v8720_v48 }
 0x736   : > { %2016 = vst.msk [vmem:[#allocation4 + $0x1fe8] sm:$0xff] %vm995_vm11, %v8720_v48 }
 0x737   : > { %2018 = vst.msk [vmem:[#allocation4 + $0x1ff8] sm:$0xff] %vm995_vm11, %v8720_v48 }
 0x738   : > { %2020 = vst.msk [vmem:[#allocation4 + $0x2008] sm:$0xff] %vm995_vm11, %v8720_v48 }
 0x739   : > { %2022 = vst.msk [vmem:[#allocation4 + $0x2018] sm:$0xff] %vm995_vm11, %v8720_v48 }
 0x73a   : > { %2024 = vst.msk [vmem:[#allocation4 + $0x2028] sm:$0xff] %vm995_vm11, %v8720_v48 }
 0x73b   : > { %2026 = vst.msk [vmem:[#allocation4 + $0x2038] sm:$0xff] %vm995_vm11, %v8720_v48 }
 0x73c   : > { %2028 = vst.msk [vmem:[#allocation4 + $0x2048] sm:$0xff] %vm995_vm11, %v8720_v48 }
 0x73d   : > { %2030 = vst.msk [vmem:[#allocation4 + $0x2058] sm:$0xff] %vm995_vm11, %v8720_v48 }
 0x73e   : > { %2032 = vst.msk [vmem:[#allocation4 + $0x2068] sm:$0xff] %vm995_vm11, %v8720_v48 }
 0x73f   : > { %2034 = vst.msk [vmem:[#allocation4 + $0x2078] sm:$0xff] %vm995_vm11, %v8720_v48 }
 0x740   : > { %2036 = vst.msk [vmem:[#allocation4 + $0x2088] sm:$0xff] %vm995_vm11, %v8720_v48 }
 0x741   : > { %2038 = vst.msk [vmem:[#allocation4 + $0x2098] sm:$0xff] %vm995_vm11, %v8720_v48 }
 0x742   : > { %2040 = vst.msk [vmem:[#allocation4 + $0x20a8] sm:$0xff] %vm995_vm11, %v8720_v48 }
 0x743   : > { %2042 = vst.msk [vmem:[#allocation4 + $0x20b8] sm:$0xff] %vm995_vm11, %v8720_v48 }
 0x744   : > { %2044 = vst.msk [vmem:[#allocation4 + $0x20c8] sm:$0xff] %vm995_vm11, %v8720_v48 }
 0x745   : > { %2046 = vst.msk [vmem:[#allocation4 + $0x20d8] sm:$0xff] %vm995_vm11, %v8720_v48 }
 0x746   : > { %2048 = vst.msk [vmem:[#allocation4 + $0x20e8] sm:$0xff] %vm995_vm11, %v8720_v48 }
 0x747   : > { %2050 = vst.msk [vmem:[#allocation4 + $0x20f8] sm:$0xff] %vm995_vm11, %v8720_v48 }
 0x748   : > { %2052 = vst.msk [vmem:[#allocation4 + $0x2108] sm:$0xff] %vm995_vm11, %v8720_v48 }
 0x749   : > { %2054 = vst.msk [vmem:[#allocation4 + $0x2118] sm:$0xff] %vm995_vm11, %v8720_v48 }
 0x74a   : > { %2056 = vst.msk [vmem:[#allocation4 + $0x2128] sm:$0xff] %vm995_vm11, %v8720_v48 }
 0x74b   : > { %2058 = vst.msk [vmem:[#allocation4 + $0x2138] sm:$0xff] %vm995_vm11, %v8720_v48 }
 0x74c   : > { %2060 = vst.msk [vmem:[#allocation4 + $0x2148] sm:$0xff] %vm995_vm11, %v8720_v48 }
 0x74d   : > { %2062 = vst.msk [vmem:[#allocation4 + $0x2158] sm:$0xff] %vm995_vm11, %v8720_v48 }
 0x74e   : > { %2064 = vst.msk [vmem:[#allocation4 + $0x2168] sm:$0xff] %vm995_vm11, %v8720_v48 }
 0x74f   : > { %2066 = vst.msk [vmem:[#allocation4 + $0x2178] sm:$0xff] %vm995_vm11, %v8720_v48 }
 0x750   : > { %2068 = vst.msk [vmem:[#allocation4 + $0x2188] sm:$0xff] %vm995_vm11, %v8720_v48 }
 0x751   : > { %2070 = vst.msk [vmem:[#allocation4 + $0x2198] sm:$0xff] %vm995_vm11, %v8720_v48 }
 0x752   : > { %2072 = vst.msk [vmem:[#allocation4 + $0x21a8] sm:$0xff] %vm995_vm11, %v8720_v48 }
 0x753   : > { %2074 = vst.msk [vmem:[#allocation4 + $0x21b8] sm:$0xff] %vm995_vm11, %v8720_v48 }
 0x754   : > { %2076 = vst.msk [vmem:[#allocation4 + $0x21c8] sm:$0xff] %vm995_vm11, %v8720_v48 }
 0x755   : > { %2078 = vst.msk [vmem:[#allocation4 + $0x21d8] sm:$0xff] %vm995_vm11, %v8720_v48 }
 0x756   : > { %2080 = vst.msk [vmem:[#allocation4 + $0x21e8] sm:$0xff] %vm995_vm11, %v8720_v48 }
 0x757   : > { %2082 = vst.msk [vmem:[#allocation4 + $0x21f8] sm:$0xff] %vm995_vm11, %v8720_v48 }
 0x758   : > { %2084 = vst.msk [vmem:[#allocation4 + $0x2208] sm:$0xff] %vm995_vm11, %v8720_v48 }
 0x759   : > { %2086 = vst.msk [vmem:[#allocation4 + $0x2218] sm:$0xff] %vm995_vm11, %v8720_v48 }
 0x75a   : > { %2088 = vst.msk [vmem:[#allocation4 + $0x2228] sm:$0xff] %vm995_vm11, %v8720_v48 }
 0x75b   : > { %2090 = vst.msk [vmem:[#allocation4 + $0x2238] sm:$0xff] %vm995_vm11, %v8720_v48 }
 0x75c   : > { %2092 = vst.msk [vmem:[#allocation4 + $0x2248] sm:$0xff] %vm995_vm11, %v8720_v48 }
 0x75d   : > { %2094 = vst.msk [vmem:[#allocation4 + $0x2258] sm:$0xff] %vm995_vm11, %v8720_v48 }
 0x75e   : > { %2096 = vst.msk [vmem:[#allocation4 + $0x2268] sm:$0xff] %vm995_vm11, %v8720_v48 }
 0x75f   : > { %2098 = vst.msk [vmem:[#allocation4 + $0x2278] sm:$0xff] %vm995_vm11, %v8720_v48 }
 0x760   : > { %2100 = vst.msk [vmem:[#allocation4 + $0x2288] sm:$0xff] %vm995_vm11, %v8720_v48 }
 0x761   : > { %2102 = vst.msk [vmem:[#allocation4 + $0x2298] sm:$0xff] %vm995_vm11, %v8720_v48 }
 0x762   : > { %2104 = vst.msk [vmem:[#allocation4 + $0x22a8] sm:$0xff] %vm995_vm11, %v8720_v48 }
 0x763   : > { %2106 = vst.msk [vmem:[#allocation4 + $0x22b8] sm:$0xff] %vm995_vm11, %v8720_v48 }
 0x764   : > { %2108 = vst.msk [vmem:[#allocation4 + $0x22c8] sm:$0xff] %vm995_vm11, %v8720_v48 }
 0x765   : > { %2110 = vst.msk [vmem:[#allocation4 + $0x22d8] sm:$0xff] %vm995_vm11, %v8720_v48 }
 0x766   : > { %2112 = vst.msk [vmem:[#allocation4 + $0x22e8] sm:$0xff] %vm995_vm11, %v8720_v48 }
 0x767   : > { %2114 = vst.msk [vmem:[#allocation4 + $0x22f8] sm:$0xff] %vm995_vm11, %v8720_v48 }
 0x768   : > { %2116 = vst.msk [vmem:[#allocation4 + $0x2308] sm:$0xff] %vm995_vm11, %v8720_v48 }
 0x769   : > { %2118 = vst.msk [vmem:[#allocation4 + $0x2318] sm:$0xff] %vm995_vm11, %v8720_v48 }
 0x76a   : > { %2120 = vst.msk [vmem:[#allocation4 + $0x2328] sm:$0xff] %vm995_vm11, %v8720_v48 }
 0x76b   : > { %2122 = vst.msk [vmem:[#allocation4 + $0x2338] sm:$0xff] %vm995_vm11, %v8720_v48 }
 0x76c   : > { %2124 = vst.msk [vmem:[#allocation4 + $0x2348] sm:$0xff] %vm995_vm11, %v8720_v48 }
 0x76d   : > { %2126 = vst.msk [vmem:[#allocation4 + $0x2358] sm:$0xff] %vm995_vm11, %v8720_v48 }
 0x76e   : > { %2128 = vst.msk [vmem:[#allocation4 + $0x2368] sm:$0xff] %vm995_vm11, %v8720_v48 }
 0x76f   : > { %2130 = vst.msk [vmem:[#allocation4 + $0x2378] sm:$0xff] %vm995_vm11, %v8720_v48 }
 0x770   : > { %2132 = vst.msk [vmem:[#allocation4 + $0x2388] sm:$0xff] %vm995_vm11, %v8720_v48 }
 0x771   : > { %2134 = vst.msk [vmem:[#allocation4 + $0x2398] sm:$0xff] %vm995_vm11, %v8720_v48 }
 0x772   : > { %2136 = vst.msk [vmem:[#allocation4 + $0x23a8] sm:$0xff] %vm995_vm11, %v8720_v48 }
 0x773   : > { %2138 = vst.msk [vmem:[#allocation4 + $0x23b8] sm:$0xff] %vm995_vm11, %v8720_v48 }
 0x774   : > { %2140 = vst.msk [vmem:[#allocation4 + $0x23c8] sm:$0xff] %vm995_vm11, %v8720_v48 }
 0x775   : > { %2142 = vst.msk [vmem:[#allocation4 + $0x23d8] sm:$0xff] %vm995_vm11, %v8720_v48 }
 0x776   : > { %2144 = vst.msk [vmem:[#allocation4 + $0x23e8] sm:$0xff] %vm995_vm11, %v8720_v48 }
 0x777   : > { %2146 = vst.msk [vmem:[#allocation4 + $0x23f8] sm:$0xff] %vm995_vm11, %v8720_v48 }
 0x778   : > { %2148 = vst.msk [vmem:[#allocation4 + $0x2408] sm:$0xff] %vm995_vm11, %v8720_v48 }
 0x779   : > { %2150 = vst.msk [vmem:[#allocation4 + $0x2418] sm:$0xff] %vm995_vm11, %v8720_v48 }
 0x77a   : > { %2152 = vst.msk [vmem:[#allocation4 + $0x2428] sm:$0xff] %vm995_vm11, %v8720_v48 }
 0x77b   : > { %2154 = vst.msk [vmem:[#allocation4 + $0x2438] sm:$0xff] %vm995_vm11, %v8720_v48 }
 0x77c   : > { %2156 = vst.msk [vmem:[#allocation4 + $0x2448] sm:$0xff] %vm995_vm11, %v8720_v48 }
 0x77d   : > { %2158 = vst.msk [vmem:[#allocation4 + $0x2458] sm:$0xff] %vm995_vm11, %v8720_v48 }
 0x77e   : > { %2160 = vst.msk [vmem:[#allocation4 + $0x2468] sm:$0xff] %vm995_vm11, %v8720_v48 }
 0x77f   : > { %2162 = vst.msk [vmem:[#allocation4 + $0x2478] sm:$0xff] %vm995_vm11, %v8720_v48 }
 0x780   : > { %2164 = vst.msk [vmem:[#allocation4 + $0x2488] sm:$0xff] %vm995_vm11, %v8720_v48 }
 0x781   : > { %2166 = vst.msk [vmem:[#allocation4 + $0x2498] sm:$0xff] %vm995_vm11, %v8720_v48 }
 0x782   : > { %2168 = vst.msk [vmem:[#allocation4 + $0x24a8] sm:$0xff] %vm995_vm11, %v8720_v48 }
 0x783   : > { %2170 = vst.msk [vmem:[#allocation4 + $0x24b8] sm:$0xff] %vm995_vm11, %v8720_v48 }
 0x784   : > { %2172 = vst.msk [vmem:[#allocation4 + $0x24c8] sm:$0xff] %vm995_vm11, %v8720_v48 }
 0x785   : > { %2174 = vst.msk [vmem:[#allocation4 + $0x24d8] sm:$0xff] %vm995_vm11, %v8720_v48 }
 0x786   : > { %2176 = vst.msk [vmem:[#allocation4 + $0x24e8] sm:$0xff] %vm995_vm11, %v8720_v48 }
 0x787   : > { %2178 = vst.msk [vmem:[#allocation4 + $0x24f8] sm:$0xff] %vm995_vm11, %v8720_v48 }
 0x788   : > { %2180 = vst.msk [vmem:[#allocation4 + $0x2508] sm:$0xff] %vm995_vm11, %v8720_v48 }
 0x789   : > { %2182 = vst.msk [vmem:[#allocation4 + $0x2518] sm:$0xff] %vm995_vm11, %v8720_v48 }
 0x78a   : > { %2184 = vst.msk [vmem:[#allocation4 + $0x2528] sm:$0xff] %vm995_vm11, %v8720_v48 }
 0x78b   : > { %2186 = vst.msk [vmem:[#allocation4 + $0x2538] sm:$0xff] %vm995_vm11, %v8720_v48 }
 0x78c   : > { %2188 = vst.msk [vmem:[#allocation4 + $0x2548] sm:$0xff] %vm995_vm11, %v8720_v48 }
 0x78d   : > { %2190 = vst.msk [vmem:[#allocation4 + $0x2558] sm:$0xff] %vm995_vm11, %v8720_v48 }
 0x78e   : > { %2192 = vst.msk [vmem:[#allocation4 + $0x2568] sm:$0xff] %vm995_vm11, %v8720_v48 }
 0x78f   : > { %2194 = vst.msk [vmem:[#allocation4 + $0x2578] sm:$0xff] %vm995_vm11, %v8720_v48 }
 0x790   : > { %2196 = vst.msk [vmem:[#allocation4 + $0x2588] sm:$0xff] %vm995_vm11, %v8720_v48 }
 0x791   : > { %2198 = vst.msk [vmem:[#allocation4 + $0x2598] sm:$0xff] %vm995_vm11, %v8720_v48 }
 0x792   : > { %2200 = vst.msk [vmem:[#allocation4 + $0x25a8] sm:$0xff] %vm995_vm11, %v8720_v48 }
 0x793   : > { %2202 = vst.msk [vmem:[#allocation4 + $0x25b8] sm:$0xff] %vm995_vm11, %v8720_v48 }
 0x794   : > { %2204 = vst.msk [vmem:[#allocation4 + $0x25c8] sm:$0xff] %vm995_vm11, %v8720_v48 }
 0x795   : > { %2206 = vst.msk [vmem:[#allocation4 + $0x25d8] sm:$0xff] %vm995_vm11, %v8720_v48 }
 0x796   : > { %2208 = vst.msk [vmem:[#allocation4 + $0x25e8] sm:$0xff] %vm995_vm11, %v8720_v48 }
 0x797   : > { %2210 = vst.msk [vmem:[#allocation4 + $0x25f8] sm:$0xff] %vm995_vm11, %v8720_v48 }
 0x798   : > { %2212 = vst.msk [vmem:[#allocation5] sm:$0xff] %vm2211_vm12, %v8720_v48 }
 0x799   : > { %2213 = vst.msk [vmem:[#allocation5 + $0x8] sm:$0xff] %vm2211_vm12, %v8720_v48 }
 0x79a   : > { %2214 = vst.msk [vmem:[#allocation5 + $0x10] sm:$0xff] %vm2211_vm12, %v8720_v48 }
 0x79b   : > { %2215 = vst.msk [vmem:[#allocation5 + $0x18] sm:$0xff] %vm2211_vm12, %v8720_v48 }
 0x79c   : > { %2216 = vst.msk [vmem:[#allocation5 + $0x20] sm:$0xff] %vm2211_vm12, %v8720_v48 }
 0x79d   : > { %2217 = vst.msk [vmem:[#allocation5 + $0x28] sm:$0xff] %vm2211_vm12, %v8720_v48 }
 0x79e   : > { %2218 = vst.msk [vmem:[#allocation5 + $0x30] sm:$0xff] %vm2211_vm12, %v8720_v48 }
 0x79f   : > { %2219 = vst.msk [vmem:[#allocation5 + $0x38] sm:$0xff] %vm2211_vm12, %v8720_v48 }
 0x7a0 LB: >> { %s2623_s22 = sadd.s32 6, %s6483_s21  ;;  %s2613_s23 = sadd.s32 5, %s6483_s21  ;;  %vm2650_vm13 = vcmask 1031168   ;;  %vm2642_vm14 = vcmask 1039360   ;;  %vm2745_vm15 = vcmask 1040384   ;;  %vm2916_vm1 = vcmask 31744   ;;  %s6483_s21 = sphi %s9618_s21, %s11244_s21  }
 0x7a1   : >> { %s2624_s24 = sshra.s32 %s2623_s22, 3  ;;  %s2627_s25 = sand.u32 7, %s2623_s22  ;;  %vm2748_vm2 = vcmask 1041408   ;;  %vm2807_vm4 = vcmask 15360   ;;  %vm2753_vm5 = vcmask 1043456   ;;  %vm11243_vm3 = vcmask 23552  }
 0x7a2   : >> { %s5786_s26 = sshll.u32 %s2624_s24, 4  ;;  %s2614_s27 = sshra.s32 %s2613_s23, 3  ;;  %vm2756_vm6 = vcmask 1044480   ;;  %vm2658_vm7 = vcmask 1022976   ;;  %vm2759_vm8 = vcmask 1045504   ;;  %vm2762_vm9 = vcmask 1046528  }
 0x7a3   : >> { %s2630_s28 = sadd.s32 %s5786_s26, %s2627_s25  ;;  %s2617_s29 = sand.u32 7, %s2613_s23  ;;  %vm2666_vm10 = vcmask 1014784  }
 0x7a4   : >> { %s5785_s30 = sshll.u32 %s2614_s27, 4  ;;  %s2631_s10 = scalar_lea.vmem [#allocation2], %s2630_s28 }
 0x7a5   : >> { %v2632_v49 = vld [vmem:[%s2631_s10] ss:$8 sm:$0x3]  ;;  %s2620_s12 = sadd.s32 %s5785_s30, %s2617_s29  ;;  %s2603_s13 = sadd.s32 4, %s6483_s21 }
 0x7a6   : >> { %v9625_v50 = vperm.slane %v2632_v49, 0  ;;  %v9627_v51 = vperm.slane %v2632_v49, 1  ;;  %s2621_s8 = scalar_lea.vmem [#allocation2], %s2620_s12  ;;  %s2604_s14 = sshra.s32 %s2603_s13, 3 }
 0x7a7   : >> { %v9630_v52 = vld [vmem:[%s2621_s8] ss:$8 sm:$0x3]  ;;  %s2607_s15 = sand.u32 7, %s2603_s13  ;;  %s5784_s17 = sshll.u32 %s2604_s14, 4 }
 0x7a8   : >> { %v5896_v53 = vpack.i.bf16 %v9627_v51, %v9625_v50  ;;  %v2910_v54 = vperm.slane %v9630_v52, 0  ;;  %v2911_v55 = vperm.slane %v9630_v52, 1  ;;  %s2610_s18 = sadd.s32 %s5784_s17, %s2607_s15  ;;  %s6495_s19 = smov 4  }
 0x7a9   : >> { %s6496_s20 = smov 3   ;;  %s2593_s22 = sadd.s32 3, %s6483_s21 }
 0x7aa   : >> { %5897 = vrot.lane.b32.xlu1 %v5896_v53, %s6495_s19  ;;  %v5886_v56 = vpack.i.bf16 %v2911_v55, %v2910_v54  ;;  %5907 = vrot.lane.b32.xlu2 %v5896_v53, %s6496_s20  ;;  %s2611_s23 = scalar_lea.vmem [#allocation2], %s2610_s18  ;;  %s2594_s24 = sshra.s32 %s2593_s22, 3 }
 0x7ab   : >> { %v2612_v57 = vld [vmem:[%s2611_s23] ss:$8 sm:$0x3]  ;;  %s2597_s25 = sand.u32 7, %s2593_s22  ;;  %s6497_s26 = smov 127  }
 0x7ac   : >> { %5887 = vrot.lane.b32.xlu0 %v5886_v56, %s6497_s26  ;;  %v9644_v58 = vperm.slane %v2612_v57, 0  ;;  %v9646_v59 = vperm.slane %v2612_v57, 1  ;;  %s5783_s27 = sshll.u32 %s2594_s24, 4  ;;  %s2583_s30 = sadd.s32 2, %s6483_s21 }
 0x7ad   : >> { %s2600_s28 = sadd.s32 %s5783_s27, %s2597_s25  ;;  %s6498_s10 = smov 126  }
 0x7ae   : >> { %v5901_v60 = vpack.i.bf16 %v9646_v59, %v9644_v58  ;;  %s2601_s29 = scalar_lea.vmem [#allocation2], %s2600_s28  ;;  %s2584_s12 = sshra.s32 %s2583_s30, 3 }
 0x7af   : >> { %v9650_v61 = vld [vmem:[%s2601_s29] ss:$8 sm:$0x3]  ;;  %s2587_s13 = sand.u32 7, %s2583_s30  ;;  %s5782_s8 = sshll.u32 %s2584_s12, 4 }
 0x7b0   : >> { %v2801_v62 = vperm.slane %v9650_v61, 0  ;;  %v2802_v63 = vperm.slane %v9650_v61, 1  ;;  %s2590_s14 = sadd.s32 %s5782_s8, %s2587_s13  ;;  %s6499_s15 = smov 2  }
 0x7b1   : >> { %s2591_s17 = scalar_lea.vmem [#allocation2], %s2590_s14  ;;  %s6500_s18 = smov 1  }
 0x7b2   : >> { %5902 = vrot.lane.b32.xlu1 %v5901_v60, %s6497_s26  ;;  %5912 = vrot.lane.b32.xlu2 %v5901_v60, %s6498_s10  ;;  %v5921_v0 = vpack.i.bf16 %v2802_v63, %v2801_v62  ;;  %v2592_v1 = vld [vmem:[%s2591_s17] ss:$8 sm:$0x3]  ;;  %s6501_s22 = smov 125   ;;  %s6502_s23 = smov 124  }
 0x7b3   : >> { %v9666_v2 = vperm.slane %v2592_v1, 0  ;;  %v9668_v3 = vperm.slane %v2592_v1, 1  ;;  %s2564_s28 = sshra.s32 %s6483_s21, 3  ;;  %s2567_s29 = sand.u32 7, %s6483_s21 }
 0x7b4   : >> { %5892 = vrot.lane.b32.xlu0 %v5886_v56, %s6498_s10  ;;  %s5780_s30 = sshll.u32 %s2564_s28, 4  ;;  %s6503_s8 = smov 122  }
 0x7b5   : >> { %v5951_v4 = vpack.i.bf16 %v9668_v3, %v9666_v2  ;;  %s2570_s13 = sadd.s32 %s5780_s30, %s2567_s29  ;;  %s6504_s17 = smov 123  }
 0x7b6   : >> { %s2571_s14 = scalar_lea.vmem [#allocation2], %s2570_s13 }
 0x7b7   : >> { %v9706_v9 = vld [vmem:[%s2571_s14] ss:$8 sm:$0x3] }
 0x7b8   : >> { %v2634_v10 = vperm.slane %v9706_v9, 0  ;;  %v2635_v11 = vperm.slane %v9706_v9, 1 }
 0x7ba   : >> { %5922 = vrot.lane.b32.xlu1 %v5921_v0, %s6497_s26  ;;  %5927 = vrot.lane.b32.xlu2 %v5921_v0, %s6498_s10  ;;  %v9717_v12 = vpack.i.bf16 %v2635_v11, %v2634_v10 }
 0x7bc   : >> { %5917 = vrot.lane.b32.xlu0 %v5896_v53, %s6499_s15 }
 0x7c2   : >> { %5937 = vrot.lane.b32.xlu1 %v5896_v53, %s6500_s18  ;;  %5942 = vrot.lane.b32.xlu2 %v5921_v0, %s6501_s22 }
 0x7c4   : >> { %5932 = vrot.lane.b32.xlu0 %v5886_v56, %s6495_s19  ;;  %s9683_s19 = sadd.s32 1, %s6483_s21  }
 0x7c5   : >> { %s2574_s24 = sshra.s32 %s9683_s19, 3  ;;  %s2577_s25 = sand.u32 7, %s9683_s19 }
 0x7c6   : >> { %p2560_p4 = scmp.ge.s32.totalorder %s9683_s19, 150  }
 0x7ca   : >> { %5952 = vrot.lane.b32.xlu1 %v5951_v4, %s6497_s26  ;;  %5957 = vrot.lane.b32.xlu2 %v5921_v0, %s6502_s23 }
 0x7cc   : >> { %5947 = vrot.lane.b32.xlu0 %v5886_v56, %s6496_s20  ;;  %s5781_s20 = sshll.u32 %s2574_s24, 4 }
 0x7cd   : >> { %s2580_s27 = sadd.s32 %s5781_s20, %s2577_s25 }
 0x7ce   : >> { %s2581_s12 = scalar_lea.vmem [#allocation2], %s2580_s27  ;;  %s5538_s27 = sshll.u32 %s6483_s21, 5 }
 0x7cf   : >> { %v9693_v5 = vld [vmem:[%s2581_s12] ss:$8 sm:$0x3]  ;;  %s5435_s28 = scalar_lea.vmem [#allocation3], %s5538_s27  ;;  %s11244_s21 = smov %s9683_s19 }
 0x7d0   : >> { %v2687_v6 = vperm.slane %v9693_v5, 0  ;;  %v2688_v7 = vperm.slane %v9693_v5, 1  ;;  %s9994_s21 = smov (%p2560_p4), 0  }
 0x7d2   : >> { %5967 = vrot.lane.b32.xlu1 %v5896_v53, %s6497_s26  ;;  %5972 = vrot.lane.b32.xlu2 %v5951_v4, %s6498_s10  ;;  %v6011_v8 = vpack.i.bf16 %v2688_v7, %v2687_v6 }
 0x7d4   : >> { %5962 = vrot.lane.b32.xlu0 %v5886_v56, %s6499_s15 }
 0x7da   : >> { %5982 = vrot.lane.b32.xlu1 %v5886_v56, %s6500_s18  ;;  %5987 = vrot.lane.b32.xlu2 %v5951_v4, %s6501_s22 }
 0x7dc   : >> { %5977 = vrot.lane.b32.xlu0 %v5901_v60, %s6499_s15 }
 0x7e2   : >> { %5997 = vrot.lane.b32.xlu1 %v5951_v4, %s6502_s23  ;;  %6002 = vrot.lane.b32.xlu2 %v5921_v0, %s6499_s15 }
 0x7e4   : >> { %5992 = vrot.lane.b32.xlu0 %v5901_v60, %s6500_s18 }
 0x7ea   : >> { %3061 = vrot.lane.b32.xlu1 %v9625_v50, %s6503_s8  ;;  %3063 = vrot.lane.b32.xlu2 %v9627_v51, %s6503_s8 }
 0x7ec   : >> { %6007 = vrot.lane.b32.xlu0 %v5921_v0, %s6500_s18 }
 0x7f2   : >> { %6012 = vrot.lane.b32.xlu1 %v6011_v8, %s6497_s26  ;;  %6017 = vrot.lane.b32.xlu2 %v6011_v8, %s6498_s10 }
 0x7f4   : >> { %6022 = vrot.lane.b32.xlu0 %v6011_v8, %s6501_s22 }
 0x7fa   : >> { %6027 = vrot.lane.b32.xlu2 %v9717_v12, %s6497_s26  ;;  %6037 = vrot.lane.b32.xlu1 %v9717_v12, %s6498_s10 }
 0x7fc   : >> { %6032 = vrot.lane.b32.xlu0 %v6011_v8, %s6502_s23 }
 0x802   : >> { %6042 = vrot.lane.b32.xlu2 %v6011_v8, %s6504_s17  ;;  %6047 = vrot.lane.b32.xlu1 %v9717_v12, %s6501_s22 }
 0x804   : >> { %v5908_v13 = vpop.permute.xlu2 %5907  ;;  %6057 = vrot.lane.b32.xlu0 %v9717_v12, %s6502_s23 }
 0x805   : >> { %v5910_v35 = vunpack.i.h.bf16 %v5908_v13  ;;  %v5909_v41 = vunpack.i.l.bf16 %v5908_v13 }
 0x807   : >> { %v2971_v1 = vsel %vm11243_vm3, %v5909_v41, %v5910_v35 }
 0x80a   : >> { %6052 = vrot.lane.b32.xlu2 %v6011_v8, %s6503_s8 }
 0x80c   : >> { %v9724_v14 = vpop.permute.xlu2 %5912 }
 0x80d   : >> { %v5915_v46 = vunpack.i.h.bf16 %v9724_v14  ;;  %v5914_v47 = vunpack.i.l.bf16 %v9724_v14 }
 0x80f   : >> { %v2906_v14 = vsel %vm2650_vm13, %v5914_v47, %v5915_v46 }
 0x812   : >> { %6082 = vrot.lane.b32.xlu2 %v9717_v12, %s6504_s17 }
 0x814   : >> { %v9726_v15 = vpop.permute.xlu2 %5927 }
 0x81c   : >> { %v5898_v16 = vpop.permute.xlu1 %5897  ;;  %v9728_v17 = vpop.permute.xlu2 %5942 }
 0x81d   : >> { %v5900_v33 = vunpack.i.h.bf16 %v5898_v16  ;;  %v5899_v34 = vunpack.i.l.bf16 %v5898_v16 }
 0x81e   : >> { %v5888_v18 = vpop.permute.xlu0 %5887 }
 0x81f   : >> { %v5890_v29 = vunpack.i.h.bf16 %v5888_v18  ;;  %v5889_v30 = vunpack.i.l.bf16 %v5888_v18  ;;  %v2964_v48 = vsel %vm2916_vm1, %v5899_v34, %v5900_v33 }
 0x821   : >> { %v2947_v36 = vsel %vm2642_vm14, %v5889_v30, %v5890_v29 }
 0x824   : >> { %v5903_v19 = vpop.permute.xlu1 %5902  ;;  %v9730_v20 = vpop.permute.xlu2 %5957 }
 0x825   : >> { %v9758_v53 = vunpack.i.h.bf16 %v5903_v19  ;;  %v5904_v56 = vunpack.i.l.bf16 %v5903_v19 }
 0x826   : >> { %v5893_v21 = vpop.permute.xlu0 %5892 }
 0x827   : >> { %v5895_v25 = vunpack.i.h.bf16 %v5893_v21  ;;  %v5894_v26 = vunpack.i.l.bf16 %v5893_v21  ;;  %v9769_v16 = vsel %vm2642_vm14, %v5904_v56, %v9758_v53  ;;  %v5930_v21 = vunpack.i.h.bf16 %v9726_v15 }
 0x829   : >> { %v2954_v32 = vsel %vm2650_vm13, %v5894_v26, %v5895_v25  ;;  %v3012_v38 = vsel %vm2745_vm15, %v5890_v29, %v5895_v25  ;;  %v5929_v26 = vunpack.i.l.bf16 %v9726_v15  ;;  %v5944_v29 = vunpack.i.l.bf16 %v9728_v17 }
 0x82a   : >> { %v3011_v37 = vsel %vm2745_vm15, %v2947_v36, %v2954_v32  ;;  %v3014_v49 = vsel %vm2748_vm2, %v3012_v38, %v2964_v48 }
 0x82b   : >> { %v3013_v57 = vsel %vm2748_vm2, %v3011_v37, %v5899_v34  ;;  %v3016_v8 = vsel %vm2296_vm0, %v3014_v49, %v2971_v1  ;;  %v2997_v34 = vsel %vm2745_vm15, %v9644_v58, %v9769_v16 }
 0x82c   : >> { %v9736_v22 = vpop.permute.xlu1 %5922  ;;  %v9738_v23 = vpop.permute.xlu2 %5972  ;;  %v3015_v13 = vsel %vm2296_vm0, %v3013_v57, %v5909_v41  ;;  %v2831_v57 = vsel %vm2650_vm13, %v5929_v26, %v5930_v21 }
 0x82d   : >> { %v5925_v33 = vunpack.i.h.bf16 %v9736_v22 }
 0x82e   : >> { %v5918_v24 = vpop.permute.xlu0 %5917 }
 0x82f   : >> { %v5920_v39 = vunpack.i.h.bf16 %v5918_v24  ;;  %v5919_v40 = vunpack.i.l.bf16 %v5918_v24 }
 0x831   : >> { %v2978_v0 = vsel %vm2807_vm4, %v5919_v40, %v5920_v39  ;;  %v3017_v18 = vsel %vm2753_vm5, %v3015_v13, %v5919_v40 }
 0x832   : >> { %v3018_v19 = vsel %vm2753_vm5, %v3016_v8, %v2978_v0  ;;  %v2999_v0 = vsel %vm2748_vm2, %v2997_v34, %v2906_v14 }
 0x834   : >> { %v5938_v27 = vpop.permute.xlu1 %5937  ;;  %v9742_v28 = vpop.permute.xlu2 %5987 }
 0x835   : >> { %v5940_v42 = vunpack.i.h.bf16 %v5938_v27  ;;  %v5939_v43 = vunpack.i.l.bf16 %v5938_v27  ;;  %v5945_v27 = vunpack.i.h.bf16 %v9728_v17 }
 0x836   : >> { %v9744_v31 = vpop.permute.xlu0 %5932 }
 0x837   : >> { %v2985_v4 = vsel %vm2211_vm12, %v5939_v43, %v5940_v42  ;;  %v3019_v24 = vsel %vm2756_vm6, %v3017_v18, %v5939_v43  ;;  %v5935_v15 = vunpack.i.h.bf16 %v9744_v31  ;;  %v5934_v17 = vunpack.i.l.bf16 %v9744_v31 }
 0x838   : >> { %v3020_v25 = vsel %vm2756_vm6, %v3018_v19, %v2985_v4  ;;  %v3021_v38 = vsel %vm2759_vm8, %v3019_v24, %v9625_v50  ;;  %v2998_v31 = vsel %vm2745_vm15, %v9646_v59, %v9758_v53  ;;  %v5924_v50 = vunpack.i.l.bf16 %v9736_v22 }
 0x839   : >> { %v3022_v39 = vsel %vm2759_vm8, %v3020_v25, %v9627_v51  ;;  %v2917_v51 = vsel %vm2916_vm1, %v5934_v17, %v5935_v15  ;;  %v2889_v4 = vsel %vm2745_vm15, %v5925_v33, %v5930_v21  ;;  %v3000_v22 = vsel %vm2748_vm2, %v2998_v31, %v5915_v46 }
 0x83a   : >> { %v3001_v8 = vsel %vm2296_vm0, %v2999_v0, %v5934_v17  ;;  %v3002_v19 = vsel %vm2296_vm0, %v3000_v22, %v2917_v51  ;;  %v2824_v14 = vsel %vm2642_vm14, %v5924_v50, %v5925_v33  ;;  %v5960_v17 = vunpack.i.h.bf16 %v9730_v20 }
 0x83b   : >> { %v5959_v33 = vunpack.i.l.bf16 %v9730_v20  ;;  %v5990_v31 = vunpack.i.h.bf16 %v9742_v28  ;;  %vm2682_vm1 = vcmask 998400  }
 0x83c   : >> { %v9750_v44 = vpop.permute.xlu1 %5952  ;;  %v9752_v45 = vpop.permute.xlu2 %6002 }
 0x83d   : >> { %v5954_v34 = vunpack.i.l.bf16 %v9750_v44 }
 0x83e   : >> { %v5948_v60 = vpop.permute.xlu0 %5947 }
 0x83f   : >> { %v5950_v40 = vunpack.i.h.bf16 %v5948_v60  ;;  %v5949_v41 = vunpack.i.l.bf16 %v5948_v60  ;;  %v2838_v60 = vsel %vm2658_vm7, %v5944_v29, %v5945_v27 }
 0x841   : >> { %v2924_v1 = vsel %vm11243_vm3, %v5949_v41, %v5950_v40  ;;  %v3003_v24 = vsel %vm2753_vm5, %v3001_v8, %v5949_v41  ;;  %v5974_v40 = vunpack.i.l.bf16 %v9738_v23  ;;  %v6005_v8 = vunpack.i.h.bf16 %v9752_v45 }
 0x842   : >> { %v3004_v29 = vsel %vm2753_vm5, %v3002_v19, %v2924_v1  ;;  %vm2674_vm3 = vcmask 1006592  }
 0x844   : >> { %v5968_v30 = vpop.permute.xlu1 %5967  ;;  %v9779_v32 = vpop.permute.xlu2 %3063 }
 0x845   : >> { %v5970_v35 = vunpack.i.h.bf16 %v5968_v30  ;;  %v5969_v36 = vunpack.i.l.bf16 %v5968_v30  ;;  %5535 = vmatpush.msk.msra.mxu1 %vm2745_vm15, %v9779_v32  ;;  %5801 = vmatpush.msk.msra.mxu3 %vm2745_vm15, %v9779_v32  ;;  %v9819_v30 = vunpack.i.h.bf16 %v9750_v44  ;;  %v5975_v44 = vunpack.i.h.bf16 %v9738_v23 }
 0x846   : >> { %v5963_v37 = vpop.permute.xlu0 %5962  ;;  %v5989_v23 = vunpack.i.l.bf16 %v9742_v28 }
 0x847   : >> { %v2994_v42 = vsel %vm2642_vm14, %v5969_v36, %v5970_v35  ;;  %v3024_v43 = vsel %vm2762_vm9, %v3022_v39, %v5970_v35  ;;  %v5965_v47 = vunpack.i.h.bf16 %v5963_v37  ;;  %v5964_v48 = vunpack.i.l.bf16 %v5963_v37 }
 0x848   : >> { %v3023_v49 = vsel %vm2762_vm9, %v3021_v38, %v2994_v42  ;;  %v2888_v39 = vsel %vm2745_vm15, %v2824_v14, %v2831_v57  ;;  %v2891_v42 = vsel %vm2748_vm2, %v2889_v4, %v5945_v27  ;;  %v2783_v27 = vsel %vm2650_vm13, %v5974_v40, %v5975_v44 }
 0x849   : >> { %v6061_v56 = vpack.i.bf16 %v3024_v43, %v3023_v49  ;;  %v2931_v13 = vsel %vm2807_vm4, %v5964_v48, %v5965_v47  ;;  %v3005_v46 = vsel %vm2756_vm6, %v3003_v24, %v5964_v48  ;;  %v9841_v48 = vsel %vm2642_vm14, %v5954_v34, %v9819_v30 }
 0x84a   : >> { %v3006_v35 = vsel %vm2756_vm6, %v3004_v29, %v2931_v13  ;;  %v2890_v49 = vsel %vm2748_vm2, %v2888_v39, %v2838_v60  ;;  %v2875_v28 = vsel %vm2745_vm15, %v9668_v3, %v9819_v30  ;;  %v2790_v22 = vsel %vm2658_vm7, %v5989_v23, %v5990_v31 }
 0x84b   : >> { %6062 = vrot.lane.b32.xlu0 %v6061_v56, %s6502_s23  ;;  %v2874_v56 = vsel %vm2745_vm15, %v9666_v2, %v9841_v48  ;;  %v6004_v13 = vunpack.i.l.bf16 %v9752_v45  ;;  %v2877_v14 = vsel %vm2748_vm2, %v2875_v28, %v5975_v44 }
 0x84c   : >> { %v5983_v18 = vpop.permute.xlu1 %5982  ;;  %v2876_v19 = vsel %vm2748_vm2, %v2874_v56, %v2783_v27  ;;  %v6018_v23 = vpop.permute.xlu2 %6017 }
 0x84d   : >> { %v5985_v25 = vunpack.i.h.bf16 %v5983_v18  ;;  %v5984_v26 = vunpack.i.l.bf16 %v5983_v18  ;;  %v6019_v28 = vunpack.i.l.bf16 %v6018_v23 }
 0x84e   : >> { %v5978_v21 = vpop.permute.xlu0 %5977 }
 0x84f   : >> { %v2938_v36 = vsel %vm2211_vm12, %v5984_v26, %v5985_v25  ;;  %v3007_v15 = vsel %vm2759_vm8, %v3005_v46, %v5984_v26  ;;  %v5980_v43 = vunpack.i.h.bf16 %v5978_v21  ;;  %v5979_v20 = vunpack.i.l.bf16 %v5978_v21 }
 0x850   : >> { %v3008_v37 = vsel %vm2759_vm8, %v3006_v35, %v2938_v36  ;;  %v3009_v38 = vsel %vm2762_vm9, %v3007_v15, %v2910_v54  ;;  %v2845_v54 = vsel %vm2666_vm10, %v5959_v33, %v5960_v17  ;;  %v2878_v35 = vsel %vm2296_vm0, %v2876_v19, %v2790_v22 }
 0x851   : >> { %v3010_v41 = vsel %vm2762_vm9, %v3008_v37, %v2911_v55  ;;  %v2893_v55 = vsel %vm2296_vm0, %v2891_v42, %v5960_v17  ;;  %v2855_v50 = vsel %vm2807_vm4, %v5979_v20, %v5980_v43  ;;  %v2892_v0 = vsel %vm2296_vm0, %v2890_v49, %v2845_v54 }
 0x852   : >> { %v6066_v47 = vpack.i.bf16 %v3010_v41, %v3009_v38  ;;  %v2894_v18 = vsel %vm2753_vm5, %v2892_v0, %v5979_v20  ;;  %v2895_v25 = vsel %vm2753_vm5, %v2893_v55, %v2855_v50  ;;  %v2879_v17 = vsel %vm2296_vm0, %v2877_v14, %v5990_v31 }
 0x853   : >> { %v6020_v0 = vunpack.i.h.bf16 %v6018_v23 }
 0x854   : >> { %v5998_v52 = vpop.permute.xlu1 %5997  ;;  %6067 = vrot.lane.b32.xlu1 %v6066_v47, %s6502_s23  ;;  %v6028_v27 = vpop.permute.xlu2 %6027 }
 0x855   : >> { %v6000_v57 = vunpack.i.h.bf16 %v5998_v52  ;;  %v5999_v60 = vunpack.i.l.bf16 %v5998_v52  ;;  %v6030_v14 = vunpack.i.h.bf16 %v6028_v27 }
 0x856   : >> { %v5993_v51 = vpop.permute.xlu0 %5992 }
 0x857   : >> { %v5995_v1 = vunpack.i.h.bf16 %v5993_v51  ;;  %v5994_v4 = vunpack.i.l.bf16 %v5993_v51  ;;  %v2797_v46 = vsel %vm2666_vm10, %v5999_v60, %v6000_v57  ;;  %v2881_v38 = vsel %vm2753_vm5, %v2879_v17, %v6000_v57  ;;  %v3069_v57 = vld [vmem:[%s11234_s2 + $0x8] sm:$0xff] }
 0x858   : >> { %v2880_v33 = vsel %vm2753_vm5, %v2878_v35, %v2797_v46  ;;  %v6505_v60 = vmov 0  }
 0x859   : >> { %v2862_v24 = vsel %vm2211_vm12, %v5994_v4, %v5995_v1  ;;  %v2896_v26 = vsel %vm2756_vm6, %v2894_v18, %v5994_v4  ;;  %v2882_v44 = vsel %vm2756_vm6, %v2880_v33, %v6004_v13  ;;  %6091 = vset.pattern.permute.xlu1 %v6505_v60  ;;  %6092 = vset.pattern.permute.xlu2 %v6505_v60 }
 0x85a   : >> { %v2897_v29 = vsel %vm2756_vm6, %v2895_v25, %v2862_v24  ;;  %v2898_v21 = vsel %vm2759_vm8, %v2896_v26, %v9644_v58  ;;  %3077 = vperm.xlu2 %6092, %v3069_v57   ;;  %6093 = vset.pattern.permute.xlu0 %v6505_v60  ;;  %v2702_v24 = vsel %vm2650_vm13, %v6019_v28, %v6020_v0 }
 0x85b   : >> { %v2899_v45 = vsel %vm2759_vm8, %v2897_v29, %v9646_v59  ;;  %v2900_v34 = vsel %vm2762_vm9, %v2898_v21, %v9769_v16  ;;  %v2808_v59 = vsel %vm2807_vm4, %v6004_v13, %v6005_v8  ;;  %v6029_v29 = vunpack.i.l.bf16 %v6028_v27 }
 0x85c   : >> { %v2901_v36 = vsel %vm2762_vm9, %v2899_v45, %v9758_v53  ;;  %v3062_v15 = vpop.permute.xlu1 %3061  ;;  %v2883_v41 = vsel %vm2756_vm6, %v2881_v38, %v2808_v59  ;;  %v6043_v50 = vpop.permute.xlu2 %6042 }
 0x85d   : >> { %v6071_v37 = vpack.i.bf16 %v2901_v36, %v2900_v34  ;;  %v3065_v58 = vsel %vm2682_vm1, %v3062_v15, %v9779_v32  ;;  %v6044_v59 = vunpack.i.l.bf16 %v6043_v50 }
 0x85e   : >> { %v6008_v16 = vpop.permute.xlu0 %6007  ;;  %5532 = vmatpush.msk.msra.mxu0 %vm2745_vm15, %v3065_v58  ;;  %5794 = vmatpush.msk.msra.mxu2 %vm2745_vm15, %v3065_v58  ;;  %v6045_v58 = vunpack.i.h.bf16 %v6043_v50 }
 0x85f   : >> { %v6010_v53 = vunpack.i.h.bf16 %v6008_v16  ;;  %v6009_v39 = vunpack.i.l.bf16 %v6008_v16  ;;  %6072 = vrot.lane.b32.xlu0 %v6071_v37, %s6498_s10  ;;  %v2643_v37 = vsel %vm2642_vm14, %v6029_v29, %v6030_v14 }
 0x861   : >> { %v2815_v40 = vsel %vm2211_vm12, %v6009_v39, %v6010_v53  ;;  %v2884_v32 = vsel %vm2759_vm8, %v2882_v44, %v6009_v39  ;;  %v2747_v39 = vsel %vm2745_vm15, %v2635_v11, %v6030_v14 }
 0x862   : >> { %v2885_v42 = vsel %vm2759_vm8, %v2883_v41, %v2815_v40  ;;  %v2886_v43 = vsel %vm2762_vm9, %v2884_v32, %v2801_v62  ;;  %v2746_v41 = vsel %vm2745_vm15, %v2634_v10, %v2643_v37 }
 0x863   : >> { %v2887_v20 = vsel %vm2762_vm9, %v2885_v42, %v2802_v63 }
 0x864   : >> { %v6076_v47 = vpack.i.bf16 %v2887_v20, %v2886_v43  ;;  %v6013_v49 = vpop.permute.xlu1 %6012  ;;  %v6053_v34 = vpop.permute.xlu2 %6052  ;;  %v2723_v20 = vsel %vm2674_vm3, %v6044_v59, %v6045_v58 }
 0x865   : >> { %v6015_v1 = vunpack.i.h.bf16 %v6013_v49  ;;  %v6014_v4 = vunpack.i.l.bf16 %v6013_v49  ;;  %v6055_v32 = vunpack.i.h.bf16 %v6053_v34  ;;  %v6054_v42 = vunpack.i.l.bf16 %v6053_v34 }
 0x866   : >> { %6077 = vrot.lane.b32.xlu1 %v6076_v47, %s6498_s10  ;;  %v6023_v54 = vpop.permute.xlu0 %6022 }
 0x867   : >> { %6087 = vrot.lane.b32.xlu0 %v9717_v12, %s6503_s8  ;;  %v3068_v12 = vld [vmem:[%s11234_s2] sm:$0xff]  ;;  %v6025_v8 = vunpack.i.h.bf16 %v6023_v54  ;;  %v6024_v13 = vunpack.i.l.bf16 %v6023_v54  ;;  %v2766_v25 = vsel %vm2745_vm15, %v6015_v1, %v6020_v0  ;;  %v2695_v26 = vsel %vm2642_vm14, %v6014_v4, %v6015_v1 }
 0x868   : >> { %v2765_v36 = vsel %vm2745_vm15, %v2695_v26, %v2702_v24 }
 0x869   : >> { %v2709_v35 = vsel %vm2658_vm7, %v6024_v13, %v6025_v8  ;;  %v2768_v15 = vsel %vm2748_vm2, %v2766_v25, %v6025_v8 }
 0x86a   : >> { %v2767_v16 = vsel %vm2748_vm2, %v2765_v36, %v2709_v35  ;;  %v3066_v36 = vld [vmem:[%s11233_s1] sm:$0xff] }
 0x86c   : >> { %v9901_v52 = vpop.permute.xlu1 %6037  ;;  %v6083_v9 = vpop.permute.xlu2 %6082 }
 0x86d   : >> { %v6040_v17 = vunpack.i.h.bf16 %v9901_v52  ;;  %v6039_v33 = vunpack.i.l.bf16 %v9901_v52 }
 0x86e   : >> { %v6033_v31 = vpop.permute.xlu0 %6032  ;;  %3072 = vperm.xlu1 %6091, %v3068_v12  }
 0x86f   : >> { %v6035_v21 = vunpack.i.h.bf16 %v6033_v31  ;;  %v6034_v45 = vunpack.i.l.bf16 %v6033_v31  ;;  %v2651_v43 = vsel %vm2650_vm13, %v6039_v33, %v6040_v17  ;;  %v2750_v23 = vsel %vm2748_vm2, %v2747_v39, %v6040_v17 }
 0x871   : >> { %v2716_v38 = vsel %vm2666_vm10, %v6034_v45, %v6035_v21  ;;  %v2770_v53 = vsel %vm2296_vm0, %v2768_v15, %v6035_v21 }
 0x872   : >> { %v2769_v47 = vsel %vm2296_vm0, %v2767_v16, %v2716_v38  ;;  %v2772_v54 = vsel %vm2753_vm5, %v2770_v53, %v6045_v58 }
 0x873   : >> { %v2774_v12 = vsel %vm2756_vm6, %v2772_v54, %v6055_v32 }
 0x874   : >> { %v9905_v62 = vpop.permute.xlu1 %6047  ;;  %v2776_v4 = vsel %vm2759_vm8, %v2774_v12, %v9668_v3 }
 0x875   : >> { %v6050_v44 = vunpack.i.h.bf16 %v9905_v62  ;;  %v6049_v40 = vunpack.i.l.bf16 %v9905_v62  ;;  %v2749_v62 = vsel %vm2748_vm2, %v2746_v41, %v2651_v43  ;;  %v2778_v29 = vsel %vm2762_vm9, %v2776_v4, %v9819_v30 }
 0x876   : >> { %v9903_v55 = vpop.permute.xlu0 %6057 }
 0x877   : >> { %v6060_v11 = vunpack.i.h.bf16 %v9903_v55  ;;  %v6059_v31 = vunpack.i.l.bf16 %v9903_v55  ;;  %v2659_v27 = vsel %vm2658_vm7, %v6049_v40, %v6050_v44  ;;  %v2752_v50 = vsel %vm2296_vm0, %v2750_v23, %v6050_v44 }
 0x878   : >> { %v6085_v55 = vunpack.i.h.bf16 %v6083_v9  ;;  %v2751_v60 = vsel %vm2296_vm0, %v2749_v62, %v2659_v27 }
 0x879   : >> { %v2667_v57 = vsel %vm2666_vm10, %v6059_v31, %v6060_v11  ;;  %v2755_v28 = vsel %vm2753_vm5, %v2752_v50, %v6060_v11 }
 0x87a   : >> { %v2758_v3 = vsel %vm2756_vm6, %v2755_v28, %v6085_v55 }
 0x8b4   : >> { %v3078_v59 = vpop.permute.xlu2 %3077 }
 0x8bd   : >> { %v6063_v61 = vpop.permute.xlu0 %6062 }
 0x8be   : >> { %v6065_v56 = vunpack.i.h.bf16 %v6063_v61  ;;  %v6064_v63 = vunpack.i.l.bf16 %v6063_v61  ;;  %v2730_v61 = vsel %vm2682_vm1, %v6054_v42, %v6055_v32 }
 0x8c0   : >> { %3124 = vmatpush.msra.mxu1 %v6065_v56  ;;  %5802 = vmatpush.msra.mxu3 %v6065_v56  ;;  %v3056_v51 = vsel %vm2666_vm10, %v6064_v63, %v6065_v56  ;;  %v2771_v63 = vsel %vm2753_vm5, %v2769_v47, %v2723_v20 }
 0x8c1   : >> { %3101 = vmatpush.msra.mxu0 %v3056_v51  ;;  %5795 = vmatpush.msra.mxu2 %v3056_v51  ;;  %v6084_v51 = vunpack.i.l.bf16 %v6083_v9  ;;  %v2773_v0 = vsel %vm2756_vm6, %v2771_v63, %v2730_v61 }
 0x8c2   : >> { %v2775_v26 = vsel %vm2759_vm8, %v2773_v0, %v9666_v2 }
 0x8c3   : >> { %v2777_v2 = vsel %vm2762_vm9, %v2775_v26, %v9841_v48  ;;  %v3067_v48 = vld [vmem:[%s11233_s1 + $0x8] sm:$0xff] }
 0x8c6   : >> { %v6068_v22 = vpop.permute.xlu1 %6067 }
 0x8c7   : >> { %v6070_v18 = vunpack.i.h.bf16 %v6068_v22  ;;  %v6069_v19 = vunpack.i.l.bf16 %v6068_v22  ;;  %v2675_v22 = vsel %vm2674_vm3, %v6084_v51, %v6085_v55  ;;  %vm3080_vm3 = vcmask 400384  }
 0x8c9   : >> { %3125 = vmatpush.msra.mxu1 %v6070_v18  ;;  %5803 = vmatpush.msra.mxu3 %v6070_v18  ;;  %v3055_v46 = vsel %vm2666_vm10, %v6069_v19, %v6070_v18  ;;  %v2754_v19 = vsel %vm2753_vm5, %v2751_v60, %v2667_v57 }
 0x8ca   : >> { %3102 = vmatpush.msra.mxu0 %v3055_v46  ;;  %5796 = vmatpush.msra.mxu2 %v3055_v46  ;;  %v2757_v45 = vsel %vm2756_vm6, %v2754_v19, %v2675_v22 }
 0x8d1   : >> { %v6073_v49 = vpop.permute.xlu0 %6072 }
 0x8d2   : >> { %v6075_v52 = vunpack.i.h.bf16 %v6073_v49  ;;  %v6074_v10 = vunpack.i.l.bf16 %v6073_v49 }
 0x8d4   : >> { %3126 = vmatpush.msra.mxu1 %v6075_v52  ;;  %5804 = vmatpush.msra.mxu3 %v6075_v52  ;;  %v3038_v56 = vsel %vm2650_vm13, %v6074_v10, %v6075_v52 }
 0x8d5   : >> { %3103 = vmatpush.msra.mxu0 %v3038_v56  ;;  %5797 = vmatpush.msra.mxu2 %v3038_v56 }
 0x8d8   : >> { %v6078_v1 = vpop.permute.xlu1 %6077 }
 0x8d9   : >> { %v6080_v8 = vunpack.i.h.bf16 %v6078_v1  ;;  %v6079_v13 = vunpack.i.l.bf16 %v6078_v1  ;;  %v6088_v18 = vpop.permute.xlu0 %6087 }
 0x8da   : >> { %v6090_v24 = vunpack.i.h.bf16 %v6088_v18  ;;  %v6089_v25 = vunpack.i.l.bf16 %v6088_v18 }
 0x8db   : >> { %3127 = vmatpush.msra.mxu1 %v6080_v8  ;;  %5805 = vmatpush.msra.mxu3 %v6080_v8  ;;  %v3037_v14 = vsel %vm2650_vm13, %v6079_v13, %v6080_v8 }
 0x8dc   : >> { %3104 = vmatpush.msra.mxu0 %v3037_v14  ;;  %5798 = vmatpush.msra.mxu2 %v3037_v14  ;;  %v2761_v46 = vsel %vm2759_vm8, %v2758_v3, %v6090_v24  ;;  %v2683_v21 = vsel %vm2682_vm1, %v6089_v25, %v6090_v24 }
 0x8dd   : >> { %3128 = vmatpush.msra.mxu1 %v2778_v29  ;;  %5806 = vmatpush.msra.mxu3 %v2778_v29  ;;  %v2764_v34 = vsel %vm2762_vm9, %v2761_v46, %v2688_v7  ;;  %v2760_v30 = vsel %vm2759_vm8, %v2757_v45, %v2683_v21  ;;  %vm3170_vm8 = vcmask 1047568  }
 0x8de   : >> { %3105 = vmatpush.msra.mxu0 %v2777_v2  ;;  %5799 = vmatpush.msra.mxu2 %v2777_v2  ;;  %v2763_v35 = vsel %vm2762_vm9, %v2760_v30, %v2687_v6 }
 0x8df   : >> { %3129 = vmatpush.msra.mxu1 %v2764_v34  ;;  %5807 = vmatpush.msra.mxu3 %v2764_v34 }
 0x8e0   : >> { %3106 = vmatpush.msra.mxu0 %v2763_v35  ;;  %5800 = vmatpush.msra.mxu2 %v2763_v35  ;;  %v3073_v5 = vpop.permute.xlu1 %3072 }
 0x8e1   : >> { %5536 = vmatmul.msk.f32.vlgmr.msra.gmra.mxu1 %vm3080_vm3, %v3066_v36  ;;  %5533 = vmatmul.msk.f32.vlgmr.msra.gmra.mxu0 %vm3080_vm3, %v3066_v36 }
 0x8e2   : >> { %5534 = vmatmul.msk.f32.vlgmr.msra.gmra.mxu2 %vm3080_vm3, %v3067_v48  ;;  %5537 = vmatmul.msk.f32.vlgmr.msra.gmra.mxu3 %vm3080_vm3, %v3067_v48 }
 0x95e   : >> { %v3131_v7 = vpop.f32.mrf.mxu1  ;;  %v3108_v6 = vpop.f32.mrf.mxu0 }
 0x95f   : >> { %v3132_v15 = vadd.f32 %v3131_v7, %v3073_v5  ;;  %v3109_v17 = vadd.f32 %v3108_v6, %v3073_v5 }
 0x961   : >> { %v3142_v33 = vmul.f32 0.01, %v3132_v15  ;;  %v3141_v37 = vmul.f32 0.01, %v3109_v17  ;;  %vm3138_vm15 = vcmp.gt.f32.partialorder %v3132_v15, 0.0  ;;  %vm3137_vm2 = vcmp.gt.f32.partialorder %v3109_v17, 0.0 }
 0x963   : >> { %v3146_v58 = vsel %vm3138_vm15, %v3132_v15, %v3142_v33  ;;  %v3145_v38 = vsel %vm3137_vm2, %v3109_v17, %v3141_v37 }
 0x964   : >> { %3155 = vrot.lane.b32.xlu1 %v3146_v58, %s6499_s15  ;;  %3153 = vrot.lane.b32.xlu0 %v3145_v38, %s6499_s15 }
 0x965   : >> { %v3111_v16 = vpop.f32.mrf.mxu2  ;;  %v3134_v53 = vpop.f32.mrf.mxu3 }
 0x966   : >> { %v3112_v39 = vadd.f32 %v3111_v16, %v3078_v59  ;;  %v3135_v44 = vadd.f32 %v3134_v53, %v3078_v59 }
 0x968   : >> { %v3143_v40 = vmul.f32 0.01, %v3112_v39  ;;  %v3144_v41 = vmul.f32 0.01, %v3135_v44  ;;  %vm3139_vm5 = vcmp.gt.f32.partialorder %v3112_v39, 0.0  ;;  %vm3140_vm6 = vcmp.gt.f32.partialorder %v3135_v44, 0.0 }
 0x96a   : >> { %v3147_v32 = vsel %vm3139_vm5, %v3112_v39, %v3143_v40  ;;  %v3148_v42 = vsel %vm3140_vm6, %v3135_v44, %v3144_v41 }
 0x96b   : >> { %3157 = vrot.lane.b32.xlu2 %v3147_v32, %s6499_s15 }
 0x96c   : >> { %3159 = vrot.lane.b32.xlu0 %v3148_v42, %s6499_s15 }
 0x9c5   : >> { %v3158_v43 = vpop.permute.xlu2 %3157 }
 0x9c6   : >> { %5541 = vst.msk [vmem:[%s5435_s28 + $0x50] sm:$0xff] %vm3170_vm8, %v3158_v43 }
 0x9d6   : >> { %v3156_v20 = vpop.permute.xlu1 %3155  ;;  %v3154_v47 = vpop.permute.xlu0 %3153 }
 0x9d7   : >> { %v3161_v54 = vsel %vm2807_vm4, %v3154_v47, %v3156_v20  ;;  %5539 = vst.msk [vmem:[%s5435_s28 + $0x40] sm:$0xff] %vm3170_vm8, %v3154_v47 }
 0x9d8   : >> { %5540 = vst.msk [vmem:[%s5435_s28 + $0x48] sm:$0xff] %vm995_vm11, %v3161_v54 }
 0x9dc   : > { %2562 = sbr.rel (!%p2560_p4) target bundleno = 1952 (0x7a0), region = 132 }
 0x9de   : >> { %v3160_v11 = vpop.permute.xlu0 %3159 }
 0x9df   : >> { %v3162_v49 = vsel %vm2807_vm4, %v3158_v43, %v3160_v11 }
 0x9e0   : >> { %5542 = vst.msk [vmem:[%s5435_s28 + $0x58] sm:$0xff] %vm995_vm11, %v3162_v49 }
 0x9e1 LB: >> { %s5787_s15 = sshll.u32 %s6487_s21, 5  ;;  %s6506_s19 = smov 125   ;;  %vm3329_vm0 = vcmask 654336   ;;  %vm4018_vm6 = vcmask 1047560   ;;  %vm4020_vm8 = vcmask 121856   ;;  %s6487_s21 = sphi %s9994_s21, %s3180_s21  }
 0x9e2   : >> { %s10000_s29 = scalar_lea.vmem [#allocation3], %s5787_s15  ;;  %s6507_s30 = smov 124  }
 0x9e3   : >> { %s6508_s12 = smov 126   ;;  %s6509_s13 = smov 127  }
 0x9e4   : >> { %s6511_s20 = smov 1   ;;  %s5621_s27 = sshll.u32 %s6487_s21, 6 }
 0x9e5   : >> { %s5452_s28 = scalar_lea.vmem [#allocation4], %s5621_s27  ;;  %s3180_s21 = sadd.s32 1, %s6487_s21  }
 0x9e6   : >> { %p3177_p5 = scmp.ge.s32.totalorder %s3180_s21, 150  }
 0x9e7   : >> { %v10003_v31 = vld [vmem:[%s10000_s29 + $0x10] sm:$0xff]  ;;  %v10006_v23 = vld [vmem:[%s10000_s29 + $0x18] sm:$0xff]  ;;  %v10021_v62 = vld [vmem:[%s10000_s29] sm:$0xff]  ;;  %s10326_s15 = smov (%p3177_p5), 0  }
 0x9e8   : >> { %v6104_v9 = vpack.i.bf16 %v10006_v23, %v10003_v31  ;;  %v10011_v52 = vld [vmem:[%s10000_s29 + $0x30] sm:$0xff]  ;;  %v10014_v10 = vld [vmem:[%s10000_s29 + $0x38] sm:$0xff]  ;;  %v10024_v61 = vld [vmem:[%s10000_s29 + $0x8] sm:$0xff] }
 0x9e9   : >> { %v6114_v27 = vpack.i.bf16 %v10014_v10, %v10011_v52  ;;  %v6109_v56 = vpack.i.bf16 %v10024_v61, %v10021_v62  ;;  %v10032_v63 = vld [vmem:[%s10000_s29 + $0x20] sm:$0xff]  ;;  %v10035_v50 = vld [vmem:[%s10000_s29 + $0x28] sm:$0xff]  ;;  %v10049_v51 = vld [vmem:[%s10000_s29 + $0x70] sm:$0xff] }
 0x9ea   : >> { %6105 = vrot.lane.b32.xlu1 %v6104_v9, %s6506_s19  ;;  %6095 = vrot.lane.b32.xlu0 %v6104_v9, %s6507_s30  ;;  %v6124_v55 = vpack.i.bf16 %v10035_v50, %v10032_v63  ;;  %v10052_v12 = vld [vmem:[%s10000_s29 + $0x78] sm:$0xff]  ;;  %v10058_v60 = vld [vmem:[%s10000_s29 + $0x60] sm:$0xff] }
 0x9eb   : >> { %6115 = vrot.lane.b32.xlu2 %v6114_v27, %s6507_s30  ;;  %v6174_v57 = vpack.i.bf16 %v10052_v12, %v10049_v51  ;;  %v10061_v0 = vld [vmem:[%s10000_s29 + $0x68] sm:$0xff]  ;;  %v10068_v1 = vld [vmem:[%s10000_s29 + $0x50] sm:$0xff]  ;;  %v10071_v4 = vld [vmem:[%s10000_s29 + $0x58] sm:$0xff] }
 0x9ec   : >> { %v6179_v28 = vpack.i.bf16 %v10061_v0, %v10058_v60  ;;  %v6189_v22 = vpack.i.bf16 %v10071_v4, %v10068_v1  ;;  %v10079_v8 = vld [vmem:[%s10000_s29 + $0x40] sm:$0xff]  ;;  %v10082_v13 = vld [vmem:[%s10000_s29 + $0x48] sm:$0xff]  ;;  %v10097_v19 = vld [vmem:[%s10000_s29 + $0x90] sm:$0xff] }
 0x9ed   : >> { %v6199_v18 = vpack.i.bf16 %v10082_v13, %v10079_v8  ;;  %v10100_v24 = vld [vmem:[%s10000_s29 + $0x98] sm:$0xff]  ;;  %v10107_v26 = vld [vmem:[%s10000_s29 + $0x80] sm:$0xff]  ;;  %v10110_v14 = vld [vmem:[%s10000_s29 + $0x88] sm:$0xff] }
 0x9ee   : >> { %v6254_v25 = vpack.i.bf16 %v10100_v24, %v10097_v19  ;;  %v6259_v29 = vpack.i.bf16 %v10110_v14, %v10107_v26 }
 0x9f2   : >> { %6110 = vrot.lane.b32.xlu1 %v6109_v56, %s6506_s19  ;;  %6100 = vrot.lane.b32.xlu0 %v6109_v56, %s6507_s30 }
 0x9f3   : >> { %6120 = vrot.lane.b32.xlu2 %v6104_v9, %s6508_s12 }
 0x9fa   : >> { %6130 = vrot.lane.b32.xlu1 %v6109_v56, %s6508_s12  ;;  %6125 = vrot.lane.b32.xlu0 %v6124_v55, %s6507_s30 }
 0x9fb   : >> { %6135 = vrot.lane.b32.xlu2 %v6114_v27, %s6506_s19 }
 0xa02   : >> { %6145 = vrot.lane.b32.xlu1 %v6124_v55, %s6506_s19  ;;  %6140 = vrot.lane.b32.xlu0 %v6104_v9, %s6509_s13 }
 0xa03   : >> { %6150 = vrot.lane.b32.xlu2 %v6109_v56, %s6509_s13 }
 0xa0a   : >> { %6160 = vrot.lane.b32.xlu1 %v6124_v55, %s6508_s12  ;;  %6155 = vrot.lane.b32.xlu0 %v6114_v27, %s6508_s12 }
 0xa0b   : >> { %6165 = vrot.lane.b32.xlu2 %v6114_v27, %s6509_s13 }
 0xa12   : >> { %6175 = vrot.lane.b32.xlu1 %v6174_v57, %s6507_s30  ;;  %6170 = vrot.lane.b32.xlu0 %v6124_v55, %s6509_s13 }
 0xa13   : >> { %6180 = vrot.lane.b32.xlu2 %v6179_v28, %s6507_s30 }
 0xa1a   : >> { %6190 = vrot.lane.b32.xlu1 %v6189_v22, %s6507_s30  ;;  %6185 = vrot.lane.b32.xlu0 %v6174_v57, %s6506_s19 }
 0xa1b   : >> { %6195 = vrot.lane.b32.xlu2 %v6179_v28, %s6506_s19 }
 0xa22   : >> { %6205 = vrot.lane.b32.xlu1 %v6174_v57, %s6508_s12  ;;  %6200 = vrot.lane.b32.xlu0 %v6199_v18, %s6507_s30 }
 0xa23   : >> { %6210 = vrot.lane.b32.xlu2 %v6189_v22, %s6506_s19 }
 0xa2a   : >> { %6220 = vrot.lane.b32.xlu1 %v6199_v18, %s6506_s19  ;;  %6215 = vrot.lane.b32.xlu0 %v6179_v28, %s6508_s12 }
 0xa2b   : >> { %6225 = vrot.lane.b32.xlu2 %v6174_v57, %s6509_s13 }
 0xa32   : >> { %6235 = vrot.lane.b32.xlu1 %v6179_v28, %s6509_s13  ;;  %6230 = vrot.lane.b32.xlu0 %v6189_v22, %s6508_s12 }
 0xa33   : >> { %6240 = vrot.lane.b32.xlu2 %v6199_v18, %s6508_s12 }
 0xa3a   : >> { %6245 = vrot.lane.b32.xlu0 %v6189_v22, %s6509_s13  ;;  %6250 = vrot.lane.b32.xlu1 %v6199_v18, %s6509_s13 }
 0xa3b   : >> { %6255 = vrot.lane.b32.xlu2 %v6254_v25, %s6507_s30 }
 0xa42   : >> { %6260 = vrot.lane.b32.xlu0 %v6259_v29, %s6507_s30  ;;  %6265 = vrot.lane.b32.xlu1 %v6254_v25, %s6506_s19 }
 0xa43   : >> { %6270 = vrot.lane.b32.xlu2 %v6259_v29, %s6506_s19 }
 0xa45   : >> { %v6116_v3 = vpop.permute.xlu2 %6115 }
 0xa46   : >> { %v6118_v46 = vunpack.i.h.bf16 %v6116_v3  ;;  %v6117_v21 = vunpack.i.l.bf16 %v6116_v3 }
 0xa48   : >> { %3377 = vmatpush.msra.mxu1 %v6118_v46  ;;  %v3319_v45 = vsel %vm2666_vm10, %v6117_v21, %v6118_v46 }
 0xa49   : >> { %3348 = vmatpush.msra.mxu0 %v3319_v45 }
 0xa4a   : >> { %6275 = vrot.lane.b32.xlu0 %v6254_v25, %s6508_s12  ;;  %6280 = vrot.lane.b32.xlu1 %v6259_v29, %s6508_s12 }
 0xa4b   : >> { %6285 = vrot.lane.b32.xlu2 %v6254_v25, %s6509_s13 }
 0xa4d   : >> { %v6121_v2 = vpop.permute.xlu2 %6120 }
 0xa4e   : >> { %v6122_v59 = vunpack.i.l.bf16 %v6121_v2  ;;  %v6123_v39 = vunpack.i.h.bf16 %v6121_v2 }
 0xa50   : >> { %v3217_v32 = vsel %vm2650_vm13, %v6122_v59, %v6123_v39 }
 0xa52   : >> { %6290 = vrot.lane.b32.xlu0 %v6259_v29, %s6509_s13 }
 0xa55   : >> { %v6136_v34 = vpop.permute.xlu2 %6135 }
 0xa56   : >> { %v6137_v42 = vunpack.i.l.bf16 %v6136_v34  ;;  %v6138_v43 = vunpack.i.h.bf16 %v6136_v34 }
 0xa58   : >> { %v3305_v55 = vsel %vm2658_vm7, %v6137_v42, %v6138_v43 }
 0xa5c   : >> { %v6106_v30 = vpop.permute.xlu1 %6105  ;;  %v6096_v35 = vpop.permute.xlu0 %6095 }
 0xa5d   : >> { %v6098_v36 = vunpack.i.h.bf16 %v6096_v35  ;;  %v6097_v48 = vunpack.i.l.bf16 %v6096_v35  ;;  %v6151_v7 = vpop.permute.xlu2 %6150  ;;  %v6107_v17 = vunpack.i.l.bf16 %v6106_v30  ;;  %v6108_v58 = vunpack.i.h.bf16 %v6106_v30  ;;  %v3252_v30 = vld [vmem:[%s11235_s3] sm:$0xff] }
 0xa5e   : >> { %v6152_v57 = vunpack.i.l.bf16 %v6151_v7  ;;  %v6153_v28 = vunpack.i.h.bf16 %v6151_v7 }
 0xa5f   : >> { %3447 = vmatpush.msra.mxu3 %v6098_v36  ;;  %v3247_v5 = vsel %vm2666_vm10, %v6097_v48, %v6098_v36  ;;  %v3232_v44 = vsel %vm2658_vm7, %v6107_v17, %v6108_v58 }
 0xa60   : >> { %3418 = vmatpush.msra.mxu2 %v3247_v5  ;;  %v3201_v34 = vsel %vm2642_vm14, %v6152_v57, %v6153_v28 }
 0xa64   : >> { %v6111_v6 = vpop.permute.xlu1 %6110  ;;  %v6101_v15 = vpop.permute.xlu0 %6100 }
 0xa65   : >> { %v6102_v33 = vunpack.i.l.bf16 %v6101_v15  ;;  %v6103_v37 = vunpack.i.h.bf16 %v6101_v15  ;;  %v6112_v38 = vunpack.i.l.bf16 %v6111_v6  ;;  %v6113_v53 = vunpack.i.h.bf16 %v6111_v6  ;;  %v10126_v40 = vpop.permute.xlu2 %6165 }
 0xa66   : >> { %v6167_v48 = vunpack.i.l.bf16 %v10126_v40  ;;  %v6168_v5 = vunpack.i.h.bf16 %v10126_v40 }
 0xa67   : >> { %3448 = vmatpush.msra.mxu3 %v6103_v37  ;;  %v3246_v16 = vsel %vm2666_vm10, %v6102_v33, %v6103_v37  ;;  %v3231_v41 = vsel %vm2658_vm7, %v6112_v38, %v6113_v53 }
 0xa68   : >> { %3419 = vmatpush.msra.mxu2 %v3246_v16 }
 0xa69   : >> { %3449 = vmatpush.msra.mxu3 %v6108_v58 }
 0xa6a   : >> { %3420 = vmatpush.msra.mxu2 %v3232_v44 }
 0xa6b   : >> { %3450 = vmatpush.msra.mxu3 %v6113_v53 }
 0xa6c   : >> { %v6131_v20 = vpop.permute.xlu1 %6130  ;;  %v6126_v47 = vpop.permute.xlu0 %6125  ;;  %3421 = vmatpush.msra.mxu2 %v3231_v41 }
 0xa6d   : >> { %v6132_v54 = vunpack.i.l.bf16 %v6131_v20  ;;  %v6127_v11 = vunpack.i.l.bf16 %v6126_v47  ;;  %3451 = vmatpush.msra.mxu3 %v6123_v39  ;;  %v6128_v49 = vunpack.i.h.bf16 %v6126_v47  ;;  %v6133_v9 = vunpack.i.h.bf16 %v6131_v20  ;;  %v6181_v22 = vpop.permute.xlu2 %6180 }
 0xa6e   : >> { %3422 = vmatpush.msra.mxu2 %v3217_v32  ;;  %v6182_v58 = vunpack.i.l.bf16 %v6181_v22 }
 0xa6f   : >> { %3378 = vmatpush.msra.mxu1 %v6128_v49  ;;  %v3318_v27 = vsel %vm2666_vm10, %v6127_v11, %v6128_v49  ;;  %3452 = vmatpush.msra.mxu3 %v6133_v9  ;;  %v3216_v56 = vsel %vm2650_vm13, %v6132_v54, %v6133_v9  ;;  %v3254_v54 = vld [vmem:[%s11235_s3 + $0x10] sm:$0xff] }
 0xa70   : >> { %3349 = vmatpush.msra.mxu0 %v3318_v27  ;;  %3423 = vmatpush.msra.mxu2 %v3216_v56 }
 0xa71   : >> { %3379 = vmatpush.msra.mxu1 %v6138_v43  ;;  %v5550_v43 = vld [vmem:[%s11235_s3 + $0x20] sm:$0xff] }
 0xa72   : >> { %3350 = vmatpush.msra.mxu0 %v3305_v55 }
 0xa74   : >> { %v6146_v18 = vpop.permute.xlu1 %6145  ;;  %v6141_v25 = vpop.permute.xlu0 %6140 }
 0xa75   : >> { %v6147_v29 = vunpack.i.l.bf16 %v6146_v18  ;;  %v6142_v3 = vunpack.i.l.bf16 %v6141_v25  ;;  %v6143_v46 = vunpack.i.h.bf16 %v6141_v25  ;;  %v6148_v21 = vunpack.i.h.bf16 %v6146_v18  ;;  %v3255_v18 = vld [vmem:[%s11235_s3 + $0x18] sm:$0xff] }
 0xa77   : >> { %3453 = vmatpush.msra.mxu3 %v6143_v46  ;;  %v3202_v45 = vsel %vm2642_vm14, %v6142_v3, %v6143_v46  ;;  %3380 = vmatpush.msra.mxu1 %v6148_v21  ;;  %v3304_v2 = vsel %vm2658_vm7, %v6147_v29, %v6148_v21 }
 0xa78   : >> { %3424 = vmatpush.msra.mxu2 %v3202_v45  ;;  %3351 = vmatpush.msra.mxu0 %v3304_v2 }
 0xa79   : >> { %3454 = vmatpush.msra.mxu3 %v6153_v28 }
 0xa7a   : >> { %3425 = vmatpush.msra.mxu2 %v3201_v34 }
 0xa7b   : >> { %3455 = vmatpush.msra.mxu3 %v10006_v23  ;;  %v6196_v23 = vpop.permute.xlu2 %6195 }
 0xa7c   : >> { %v6161_v35 = vpop.permute.xlu1 %6160  ;;  %v6156_v36 = vpop.permute.xlu0 %6155  ;;  %3426 = vmatpush.msra.mxu2 %v10003_v31  ;;  %v3277_v31 = vsel %vm2642_vm14, %v6167_v48, %v6168_v5  ;;  %v6197_v20 = vunpack.i.l.bf16 %v6196_v23  ;;  %v6198_v47 = vunpack.i.h.bf16 %v6196_v23 }
 0xa7d   : >> { %v6162_v7 = vunpack.i.l.bf16 %v6161_v35  ;;  %v6157_v6 = vunpack.i.l.bf16 %v6156_v36  ;;  %v6158_v15 = vunpack.i.h.bf16 %v6156_v36  ;;  %v6163_v17 = vunpack.i.h.bf16 %v6161_v35  ;;  %3456 = vmatpush.msra.mxu3 %v10024_v61  ;;  %v5552_v35 = vld [vmem:[%s11235_s3 + $0x30] sm:$0xff] }
 0xa7e   : >> { %3427 = vmatpush.msra.mxu2 %v10021_v62  ;;  %5566 = vmatmul.msk.f32.vlgmr.msra.gmra.mxu3 %vm3329_vm0, %v3252_v30  ;;  %v6183_v61 = vunpack.i.h.bf16 %v6181_v22  ;;  %v3253_v62 = vld [vmem:[%s11235_s3 + $0x8] sm:$0xff]  ;;  %v3669_v55 = vsel %vm2658_vm7, %v6197_v20, %v6198_v47 }
 0xa7f   : >> { %3381 = vmatpush.msra.mxu1 %v6158_v15  ;;  %v3291_v33 = vsel %vm2650_vm13, %v6157_v6, %v6158_v15  ;;  %v3290_v37 = vsel %vm2650_vm13, %v6162_v7, %v6163_v17  ;;  %5562 = vmatmul.msk.f32.vlgmr.msra.gmra.mxu2 %vm3329_vm0, %v3252_v30 }
 0xa80   : >> { %3352 = vmatpush.msra.mxu0 %v3291_v33  ;;  %v3683_v32 = vsel %vm2666_vm10, %v6182_v58, %v6183_v61 }
 0xa81   : >> { %3382 = vmatpush.msra.mxu1 %v6163_v17 }
 0xa82   : >> { %3353 = vmatpush.msra.mxu0 %v3290_v37 }
 0xa83   : >> { %3383 = vmatpush.msra.mxu1 %v6168_v5  ;;  %v6211_v42 = vpop.permute.xlu2 %6210 }
 0xa84   : >> { %v6176_v59 = vpop.permute.xlu1 %6175  ;;  %v6171_v38 = vpop.permute.xlu0 %6170  ;;  %3354 = vmatpush.msra.mxu0 %v3277_v31  ;;  %v6212_v28 = vunpack.i.l.bf16 %v6211_v42  ;;  %v6213_v22 = vunpack.i.h.bf16 %v6211_v42 }
 0xa85   : >> { %v6177_v16 = vunpack.i.l.bf16 %v6176_v59  ;;  %v6172_v53 = vunpack.i.l.bf16 %v6171_v38  ;;  %v6173_v39 = vunpack.i.h.bf16 %v6171_v38  ;;  %v6178_v44 = vunpack.i.h.bf16 %v6176_v59 }
 0xa86   : >> { %5567 = vmatmul.msk.f32.gmra.mxu3 %vm3329_vm0, %v3253_v62  ;;  %v3519_v30 = vsel %vm2658_vm7, %v6212_v28, %v6213_v22 }
 0xa87   : >> { %3384 = vmatpush.msra.mxu1 %v6173_v39  ;;  %v3276_v40 = vsel %vm2642_vm14, %v6172_v53, %v6173_v39  ;;  %3741 = vmatpush.msrb.mxu3 %v6178_v44  ;;  %v3684_v41 = vsel %vm2666_vm10, %v6177_v16, %v6178_v44 }
 0xa88   : >> { %3355 = vmatpush.msra.mxu0 %v3276_v40  ;;  %3712 = vmatpush.msrb.mxu2 %v3684_v41 }
 0xa89   : >> { %3742 = vmatpush.msrb.mxu3 %v6183_v61  ;;  %3385 = vmatpush.msra.mxu1 %v10014_v10  ;;  %v5553_v61 = vld [vmem:[%s11235_s3 + $0x38] sm:$0xff] }
 0xa8a   : >> { %3713 = vmatpush.msrb.mxu2 %v3683_v32  ;;  %3356 = vmatpush.msra.mxu0 %v10011_v52 }
 0xa8b   : >> { %3386 = vmatpush.msra.mxu1 %v10035_v50  ;;  %5563 = vmatmul.msk.f32.gmra.mxu2 %vm3329_vm0, %v3253_v62  ;;  %v6226_v57 = vpop.permute.xlu2 %6225 }
 0xa8c   : >> { %v6191_v11 = vpop.permute.xlu1 %6190  ;;  %v6186_v49 = vpop.permute.xlu0 %6185  ;;  %3357 = vmatpush.msra.mxu0 %v10032_v63  ;;  %5558 = vmatmul.msk.f32.vlgmr.msra.gmra.mxu1 %vm3329_vm0, %v5550_v43  ;;  %v5551_v63 = vld [vmem:[%s11235_s3 + $0x28] sm:$0xff]  ;;  %v6227_v36 = vunpack.i.l.bf16 %v6226_v57  ;;  %v6228_v48 = vunpack.i.h.bf16 %v6226_v57 }
 0xa8d   : >> { %v6192_v10 = vunpack.i.l.bf16 %v6191_v11  ;;  %v6187_v9 = vunpack.i.l.bf16 %v6186_v49  ;;  %v6188_v27 = vunpack.i.h.bf16 %v6186_v49  ;;  %v6193_v52 = vunpack.i.h.bf16 %v6191_v11  ;;  %5554 = vmatmul.msk.f32.vlgmr.msra.gmra.mxu0 %vm3329_vm0, %v5550_v43 }
 0xa8e   : >> { %5568 = vmatmul.msk.f32.gmra.mxu3 %vm3329_vm0, %v3254_v54  ;;  %v3642_v58 = vsel %vm2642_vm14, %v6227_v36, %v6228_v48 }
 0xa8f   : >> { %3743 = vmatpush.msrb.mxu3 %v6188_v27  ;;  %v3670_v50 = vsel %vm2658_vm7, %v6187_v9, %v6188_v27  ;;  %3590 = vmatpush.msrb.mxu1 %v6193_v52  ;;  %v3533_v56 = vsel %vm2666_vm10, %v6192_v10, %v6193_v52 }
 0xa90   : >> { %3714 = vmatpush.msrb.mxu2 %v3670_v50  ;;  %3561 = vmatpush.msrb.mxu0 %v3533_v56  ;;  %v5575_v56 = vld [vmem:[%s11235_s3 + $0x40] sm:$0xff] }
 0xa91   : >> { %3744 = vmatpush.msrb.mxu3 %v6198_v47 }
 0xa92   : >> { %3715 = vmatpush.msrb.mxu2 %v3669_v55 }
 0xa93   : >> { %5564 = vmatmul.msk.f32.gmra.mxu2 %vm3329_vm0, %v3254_v54  ;;  %v6241_v5 = vpop.permute.xlu2 %6240  ;;  %v5592_v54 = vld [vmem:[%s11235_s3 + $0x60] sm:$0xff] }
 0xa94   : >> { %v6206_v25 = vpop.permute.xlu1 %6205  ;;  %v6201_v29 = vpop.permute.xlu0 %6200  ;;  %5559 = vmatmul.msk.f32.gmra.mxu1 %vm3329_vm0, %v5551_v63  ;;  %v6242_v62 = vunpack.i.l.bf16 %v6241_v5  ;;  %v6243_v59 = vunpack.i.h.bf16 %v6241_v5 }
 0xa95   : >> { %v6207_v3 = vunpack.i.l.bf16 %v6206_v25  ;;  %v6202_v46 = vunpack.i.l.bf16 %v6201_v29  ;;  %v6203_v21 = vunpack.i.h.bf16 %v6201_v29  ;;  %v6208_v45 = vunpack.i.h.bf16 %v6206_v25  ;;  %5555 = vmatmul.msk.f32.gmra.mxu0 %vm3329_vm0, %v5551_v63 }
 0xa96   : >> { %5569 = vmatmul.msk.f32.gmra.mxu3 %vm3329_vm0, %v3255_v18  ;;  %v3504_v32 = vsel %vm2650_vm13, %v6242_v62, %v6243_v59  ;;  %v3925_v62 = vld [vmem:[%s11236_s4 + $0x10] sm:$0xff] }
 0xa97   : >> { %3591 = vmatpush.msrb.mxu1 %v6203_v21  ;;  %v3532_v2 = vsel %vm2666_vm10, %v6202_v46, %v6203_v21  ;;  %3745 = vmatpush.msrb.mxu3 %v6208_v45  ;;  %v3656_v34 = vsel %vm2650_vm13, %v6207_v3, %v6208_v45  ;;  %v5576_v3 = vld [vmem:[%s11235_s3 + $0x48] sm:$0xff] }
 0xa98   : >> { %3562 = vmatpush.msrb.mxu0 %v3532_v2  ;;  %3716 = vmatpush.msrb.mxu2 %v3656_v34 }
 0xa99   : >> { %3592 = vmatpush.msrb.mxu1 %v6213_v22 }
 0xa9a   : >> { %3563 = vmatpush.msrb.mxu0 %v3519_v30 }
 0xa9b   : >> { %5565 = vmatmul.msk.f32.gmra.mxu2 %vm3329_vm0, %v3255_v18  ;;  %v6256_v41 = vpop.permute.xlu2 %6255 }
 0xa9c   : >> { %v6221_v7 = vpop.permute.xlu1 %6220  ;;  %v6216_v6 = vpop.permute.xlu0 %6215  ;;  %5560 = vmatmul.msk.f32.gmra.mxu1 %vm3329_vm0, %v5552_v35  ;;  %v6258_v20 = vunpack.i.h.bf16 %v6256_v41  ;;  %v6257_v47 = vunpack.i.l.bf16 %v6256_v41 }
 0xa9d   : >> { %v6222_v15 = vunpack.i.l.bf16 %v6221_v7  ;;  %v6217_v17 = vunpack.i.l.bf16 %v6216_v6  ;;  %v6218_v23 = vunpack.i.h.bf16 %v6216_v6  ;;  %v6223_v33 = vunpack.i.h.bf16 %v6221_v7  ;;  %5556 = vmatmul.msk.f32.gmra.mxu0 %vm3329_vm0, %v5552_v35  ;;  %v5595_v6 = vld [vmem:[%s11235_s3 + $0x78] sm:$0xff] }
 0xa9e   : >> { %v3835_v11 = vsel %vm2666_vm10, %v6257_v47, %v6258_v20 }
 0xa9f   : >> { %3746 = vmatpush.msrb.mxu3 %v6218_v23  ;;  %v3655_v37 = vsel %vm2650_vm13, %v6217_v17, %v6218_v23  ;;  %3593 = vmatpush.msrb.mxu1 %v6223_v33  ;;  %v3518_v31 = vsel %vm2658_vm7, %v6222_v15, %v6223_v33  ;;  %v5577_v17 = vld [vmem:[%s11235_s3 + $0x50] sm:$0xff] }
 0xaa0   : >> { %3717 = vmatpush.msrb.mxu2 %v3655_v37  ;;  %3564 = vmatpush.msrb.mxu0 %v3518_v31 }
 0xaa1   : >> { %3747 = vmatpush.msrb.mxu3 %v6228_v48 }
 0xaa2   : >> { %3718 = vmatpush.msrb.mxu2 %v3642_v58  ;;  %v5611_v58 = vld [vmem:[%s11235_s3 + $0x90] sm:$0xff] }
 0xaa3   : >> { %v6271_v50 = vpop.permute.xlu2 %6270 }
 0xaa4   : >> { %v6236_v38 = vpop.permute.xlu1 %6235  ;;  %v6231_v16 = vpop.permute.xlu0 %6230  ;;  %5561 = vmatmul.msk.f32.gmra.mxu1 %vm3329_vm0, %v5553_v61  ;;  %v6272_v25 = vunpack.i.l.bf16 %v6271_v50 }
 0xaa5   : >> { %v6237_v53 = vunpack.i.l.bf16 %v6236_v38  ;;  %v6232_v39 = vunpack.i.l.bf16 %v6231_v16  ;;  %v6233_v44 = vunpack.i.h.bf16 %v6231_v16  ;;  %v6238_v40 = vunpack.i.h.bf16 %v6236_v38  ;;  %5557 = vmatmul.msk.f32.gmra.mxu0 %vm3329_vm0, %v5553_v61  ;;  %v5578_v61 = vld [vmem:[%s11235_s3 + $0x58] sm:$0xff]  ;;  %v5610_v16 = vld [vmem:[%s11235_s3 + $0x88] sm:$0xff] }
 0xaa6   : >> { %v6510_v38 = vmov 0  }
 0xaa7   : >> { %3594 = vmatpush.msrb.mxu1 %v6233_v44  ;;  %3748 = vmatpush.msrb.mxu3 %v6238_v40  ;;  %v3505_v42 = vsel %vm2650_vm13, %v6232_v39, %v6233_v44  ;;  %v3641_v43 = vsel %vm2642_vm14, %v6237_v53, %v6238_v40 }
 0xaa8   : >> { %3565 = vmatpush.msrb.mxu0 %v3505_v42  ;;  %3719 = vmatpush.msrb.mxu2 %v3641_v43 }
 0xaa9   : >> { %3749 = vmatpush.msrb.mxu3 %v10052_v12  ;;  %3595 = vmatpush.msrb.mxu1 %v6243_v59  ;;  %v3923_v59 = vld [vmem:[%s11236_s4] sm:$0xff] }
 0xaaa   : >> { %3720 = vmatpush.msrb.mxu2 %v10049_v51  ;;  %3566 = vmatpush.msrb.mxu0 %v3504_v32 }
 0xaab   : >> { %3750 = vmatpush.msrb.mxu3 %v10061_v0  ;;  %6296 = vset.pattern.permute.xlu0 %v6510_v38 }
 0xaac   : >> { %v6246_v49 = vpop.permute.xlu0 %6245  ;;  %3721 = vmatpush.msrb.mxu2 %v10058_v60  ;;  %5600 = vmatmul.msk.f32.vlgmr.msrb.gmra.mxu3 %vm3329_vm0, %v5592_v54  ;;  %v6251_v10 = vpop.permute.xlu1 %6250  ;;  %v5593_v60 = vld [vmem:[%s11235_s3 + $0x68] sm:$0xff] }
 0xaad   : >> { %v6247_v9 = vunpack.i.l.bf16 %v6246_v49  ;;  %5596 = vmatmul.msk.f32.vlgmr.msrb.gmra.mxu2 %vm3329_vm0, %v5592_v54  ;;  %v6252_v12 = vunpack.i.l.bf16 %v6251_v10  ;;  %v6248_v27 = vunpack.i.h.bf16 %v6246_v49  ;;  %v6253_v52 = vunpack.i.h.bf16 %v6251_v10  ;;  %5818 = vmatpush.msra.mxu3 %v6258_v20 }
 0xaae   : >> { %5808 = vmatpush.msra.mxu2 %v3835_v11  ;;  %6294 = vset.pattern.permute.xlu1 %v6510_v38 }
 0xaaf   : >> { %3596 = vmatpush.msrb.mxu1 %v6248_v27  ;;  %v3491_v51 = vsel %vm2642_vm14, %v6247_v9, %v6248_v27  ;;  %v3490_v0 = vsel %vm2642_vm14, %v6252_v12, %v6253_v52  ;;  %3939 = vperm.xlu0 %6296, %v3925_v62  }
 0xab0   : >> { %3567 = vmatpush.msrb.mxu0 %v3491_v51  ;;  %3929 = vperm.xlu1 %6294, %v3923_v59  }
 0xab1   : >> { %3597 = vmatpush.msrb.mxu1 %v6253_v52  ;;  %6295 = vset.pattern.permute.xlu2 %v6510_v38 }
 0xab2   : >> { %3568 = vmatpush.msrb.mxu0 %v3490_v0 }
 0xab3   : >> { %3598 = vmatpush.msrb.mxu1 %v10071_v4  ;;  %v6273_v4 = vunpack.i.h.bf16 %v6271_v50 }
 0xab4   : >> { %v6261_v55 = vpop.permute.xlu0 %6260  ;;  %3569 = vmatpush.msrb.mxu0 %v10068_v1  ;;  %5601 = vmatmul.msk.f32.gmra.mxu3 %vm3329_vm0, %v5593_v60  ;;  %v6266_v63 = vpop.permute.xlu1 %6265 }
 0xab5   : >> { %v6263_v57 = vunpack.i.h.bf16 %v6261_v55  ;;  %v6262_v28 = vunpack.i.l.bf16 %v6261_v55  ;;  %3599 = vmatpush.msrb.mxu1 %v10082_v13  ;;  %5597 = vmatmul.msk.f32.gmra.mxu2 %vm3329_vm0, %v5593_v60  ;;  %v6268_v22 = vunpack.i.h.bf16 %v6266_v63  ;;  %v6267_v18 = vunpack.i.l.bf16 %v6266_v63  ;;  %v5594_v13 = vld [vmem:[%s11235_s3 + $0x70] sm:$0xff] }
 0xab6   : >> { %3570 = vmatpush.msrb.mxu0 %v10079_v8  ;;  %5583 = vmatmul.msk.f32.vlgmr.msrb.gmra.mxu1 %vm3329_vm0, %v5575_v56  ;;  %v6286_v8 = vpop.permute.xlu2 %6285  ;;  %v3820_v46 = vsel %vm2658_vm7, %v6272_v25, %v6273_v4 }
 0xab7   : >> { %5579 = vmatmul.msk.f32.vlgmr.msrb.gmra.mxu0 %vm3329_vm0, %v5575_v56  ;;  %3892 = vmatpush.msra.mxu1 %v6258_v20  ;;  %v3834_v1 = vsel %vm2666_vm10, %v6262_v28, %v6263_v57  ;;  %v3821_v29 = vsel %vm2658_vm7, %v6267_v18, %v6268_v22  ;;  %v6288_v2 = vunpack.i.h.bf16 %v6286_v8  ;;  %v6287_v34 = vunpack.i.l.bf16 %v6286_v8 }
 0xab8   : >> { %5819 = vmatpush.msra.mxu3 %v6263_v57  ;;  %3863 = vmatpush.msra.mxu0 %v3835_v11 }
 0xab9   : >> { %5809 = vmatpush.msra.mxu2 %v3834_v1  ;;  %3893 = vmatpush.msra.mxu1 %v6263_v57  ;;  %v3793_v15 = vsel %vm2642_vm14, %v6287_v34, %v6288_v2 }
 0xaba   : >> { %5820 = vmatpush.msra.mxu3 %v6268_v22  ;;  %3864 = vmatpush.msra.mxu0 %v3834_v1 }
 0xabb   : >> { %5810 = vmatpush.msra.mxu2 %v3821_v29  ;;  %3894 = vmatpush.msra.mxu1 %v6268_v22 }
 0xabc   : >> { %v6276_v21 = vpop.permute.xlu0 %6275  ;;  %5602 = vmatmul.msk.f32.gmra.mxu3 %vm3329_vm0, %v5594_v13  ;;  %v6281_v45 = vpop.permute.xlu1 %6280  ;;  %3865 = vmatpush.msra.mxu0 %v3821_v29 }
 0xabd   : >> { %v6278_v30 = vunpack.i.h.bf16 %v6276_v21  ;;  %v6277_v35 = vunpack.i.l.bf16 %v6276_v21  ;;  %5598 = vmatmul.msk.f32.gmra.mxu2 %vm3329_vm0, %v5594_v13  ;;  %5821 = vmatpush.msra.mxu3 %v6273_v4  ;;  %v6283_v36 = vunpack.i.h.bf16 %v6281_v45  ;;  %v6282_v48 = vunpack.i.l.bf16 %v6281_v45 }
 0xabe   : >> { %5584 = vmatmul.msk.f32.gmra.mxu1 %vm3329_vm0, %v5576_v3  ;;  %5811 = vmatpush.msra.mxu2 %v3820_v46 }
 0xabf   : >> { %5580 = vmatmul.msk.f32.gmra.mxu0 %vm3329_vm0, %v5576_v3  ;;  %5822 = vmatpush.msra.mxu3 %v6278_v30  ;;  %v3807_v5 = vsel %vm2650_vm13, %v6277_v35, %v6278_v30  ;;  %v3806_v7 = vsel %vm2650_vm13, %v6282_v48, %v6283_v36 }
 0xac0   : >> { %5812 = vmatpush.msra.mxu2 %v3807_v5  ;;  %3895 = vmatpush.msra.mxu1 %v6273_v4 }
 0xac1   : >> { %5823 = vmatpush.msra.mxu3 %v6283_v36  ;;  %3866 = vmatpush.msra.mxu0 %v3820_v46 }
 0xac2   : >> { %5813 = vmatpush.msra.mxu2 %v3806_v7  ;;  %3896 = vmatpush.msra.mxu1 %v6278_v30 }
 0xac3   : >> { %5824 = vmatpush.msra.mxu3 %v6288_v2  ;;  %3867 = vmatpush.msra.mxu0 %v3807_v5 }
 0xac4   : >> { %v6291_v23 = vpop.permute.xlu0 %6290  ;;  %5603 = vmatmul.msk.f32.gmra.mxu3 %vm3329_vm0, %v5595_v6  ;;  %5814 = vmatpush.msra.mxu2 %v3793_v15 }
 0xac5   : >> { %v6293_v33 = vunpack.i.h.bf16 %v6291_v23  ;;  %v6292_v37 = vunpack.i.l.bf16 %v6291_v23  ;;  %5599 = vmatmul.msk.f32.gmra.mxu2 %vm3329_vm0, %v5595_v6  ;;  %3897 = vmatpush.msra.mxu1 %v6283_v36 }
 0xac6   : >> { %5585 = vmatmul.msk.f32.gmra.mxu1 %vm3329_vm0, %v5577_v17  ;;  %3868 = vmatpush.msra.mxu0 %v3806_v7 }
 0xac7   : >> { %5581 = vmatmul.msk.f32.gmra.mxu0 %vm3329_vm0, %v5577_v17  ;;  %5825 = vmatpush.msra.mxu3 %v6293_v33  ;;  %v3792_v31 = vsel %vm2642_vm14, %v6292_v37, %v6293_v33 }
 0xac8   : >> { %5815 = vmatpush.msra.mxu2 %v3792_v31  ;;  %3898 = vmatpush.msra.mxu1 %v6288_v2 }
 0xac9   : >> { %5826 = vmatpush.msra.mxu3 %v10100_v24  ;;  %3869 = vmatpush.msra.mxu0 %v3793_v15 }
 0xaca   : >> { %5816 = vmatpush.msra.mxu2 %v10097_v19  ;;  %3899 = vmatpush.msra.mxu1 %v6293_v33 }
 0xacb   : >> { %5827 = vmatpush.msra.mxu3 %v10110_v14  ;;  %3870 = vmatpush.msra.mxu0 %v3792_v31 }
 0xacc   : >> { %5817 = vmatpush.msra.mxu2 %v10107_v26  ;;  %5619 = vmatmul.msk.f32.vlgmr.msra.gmra.mxu3 %vm3329_vm0, %v5611_v58 }
 0xacd   : >> { %5615 = vmatmul.msk.f32.vlgmr.msra.gmra.mxu2 %vm3329_vm0, %v5611_v58  ;;  %3900 = vmatpush.msra.mxu1 %v10100_v24  ;;  %v5612_v24 = vld [vmem:[%s11235_s3 + $0x98] sm:$0xff] }
 0xace   : >> { %5586 = vmatmul.msk.f32.gmra.mxu1 %vm3329_vm0, %v5578_v61  ;;  %3871 = vmatpush.msra.mxu0 %v10097_v19  ;;  %v3924_v19 = vld [vmem:[%s11236_s4 + $0x8] sm:$0xff] }
 0xacf   : >> { %5582 = vmatmul.msk.f32.gmra.mxu0 %vm3329_vm0, %v5578_v61  ;;  %3901 = vmatpush.msra.mxu1 %v10110_v14  ;;  %v5609_v14 = vld [vmem:[%s11235_s3 + $0x80] sm:$0xff] }
 0xad0   : >> { %3872 = vmatpush.msra.mxu0 %v10107_v26  ;;  %3934 = vperm.xlu2 %6295, %v3924_v19   ;;  %v3926_v26 = vld [vmem:[%s11236_s4 + $0x18] sm:$0xff] }
 0xad1   : >> { %3944 = vperm.xlu1 %6294, %v3926_v26  }
 0xad4   : >> { %5620 = vmatmul.msk.f32.gmra.mxu3 %vm3329_vm0, %v5612_v24 }
 0xad5   : >> { %5616 = vmatmul.msk.f32.gmra.mxu2 %vm3329_vm0, %v5612_v24 }
 0xad6   : >> { %5617 = vmatmul.msk.f32.vlgmr.msra.gmra.mxu1 %vm3329_vm0, %v5609_v14 }
 0xad7   : >> { %5613 = vmatmul.msk.f32.vlgmr.msra.gmra.mxu0 %vm3329_vm0, %v5609_v14 }
 0xade   : >> { %5618 = vmatmul.msk.f32.gmra.mxu1 %vm3329_vm0, %v5610_v16 }
 0xadf   : >> { %5614 = vmatmul.msk.f32.gmra.mxu0 %vm3329_vm0, %v5610_v16 }
 0xb01   : >> { %v3458_v53 = vpop.f32.mrf.mxu3 }
 0xb02   : >> { %v3429_v39 = vpop.f32.mrf.mxu2 }
 0xb09   : >> { %v3388_v44 = vpop.f32.mrf.mxu1  ;;  %v3461_v41 = vpop.f32.mrf.mxu3 }
 0xb0a   : >> { %v3359_v40 = vpop.f32.mrf.mxu0  ;;  %v3459_v1 = vadd.f32 %v3458_v53, %v3388_v44 }
 0xb0b   : >> { %v3430_v13 = vadd.f32 %v3429_v39, %v3359_v40 }
 0xb0e   : >> { %v3432_v32 = vpop.f32.mrf.mxu2 }
 0xb11   : >> { %v3391_v42 = vpop.f32.mrf.mxu1  ;;  %v3464_v20 = vpop.f32.mrf.mxu3 }
 0xb12   : >> { %v3362_v43 = vpop.f32.mrf.mxu0  ;;  %v3462_v36 = vadd.f32 %v3461_v41, %v3391_v42 }
 0xb13   : >> { %v3433_v6 = vadd.f32 %v3432_v32, %v3362_v43 }
 0xb16   : >> { %v3435_v47 = vpop.f32.mrf.mxu2 }
 0xb19   : >> { %v3394_v54 = vpop.f32.mrf.mxu1  ;;  %v3467_v49 = vpop.f32.mrf.mxu3 }
 0xb1a   : >> { %v3365_v11 = vpop.f32.mrf.mxu0  ;;  %v3465_v61 = vadd.f32 %v3464_v20, %v3394_v54 }
 0xb1b   : >> { %v3436_v8 = vadd.f32 %v3435_v47, %v3365_v11 }
 0xb1e   : >> { %v3438_v10 = vpop.f32.mrf.mxu2 }
 0xb21   : >> { %v3397_v9 = vpop.f32.mrf.mxu1  ;;  %v3940_v59 = vpop.permute.xlu0 %3939 }
 0xb22   : >> { %v3368_v12 = vpop.f32.mrf.mxu0  ;;  %v3468_v15 = vadd.f32 %v3467_v49, %v3397_v9  ;;  %v3930_v17 = vpop.permute.xlu1 %3929 }
 0xb23   : >> { %v3439_v33 = vadd.f32 %v3438_v10, %v3368_v12 }
 0xb2a   : >> { %v3935_v41 = vpop.permute.xlu2 %3934 }
 0xb2f   : >> { %v3752_v27 = vpop.f32.mrf.mxu3 }
 0xb30   : >> { %v3723_v52 = vpop.f32.mrf.mxu2 }
 0xb33   : >> { %v3601_v51 = vpop.f32.mrf.mxu1 }
 0xb34   : >> { %v3572_v0 = vpop.f32.mrf.mxu0  ;;  %v3614_v3 = vadd.f32 %v3601_v51, %v3459_v1 }
 0xb35   : >> { %v3613_v46 = vadd.f32 %v3572_v0, %v3430_v13 }
 0xb36   : >> { %v3765_v34 = vadd.f32 %v3752_v27, %v3614_v3 }
 0xb37   : >> { %v3755_v50 = vpop.f32.mrf.mxu3  ;;  %v3764_v35 = vadd.f32 %v3723_v52, %v3613_v46 }
 0xb38   : >> { %v3726_v60 = vpop.f32.mrf.mxu2 }
 0xb3b   : >> { %v3604_v56 = vpop.f32.mrf.mxu1 }
 0xb3c   : >> { %v3575_v55 = vpop.f32.mrf.mxu0  ;;  %v3616_v37 = vadd.f32 %v3604_v56, %v3462_v36 }
 0xb3d   : >> { %v3615_v62 = vadd.f32 %v3575_v55, %v3433_v6 }
 0xb3e   : >> { %v3767_v44 = vadd.f32 %v3755_v50, %v3616_v37 }
 0xb3f   : >> { %v3758_v63 = vpop.f32.mrf.mxu3  ;;  %v3766_v43 = vadd.f32 %v3726_v60, %v3615_v62 }
 0xb40   : >> { %v3729_v57 = vpop.f32.mrf.mxu2 }
 0xb43   : >> { %v3607_v28 = vpop.f32.mrf.mxu1  ;;  %v3945_v55 = vpop.permute.xlu1 %3944 }
 0xb44   : >> { %v3578_v22 = vpop.f32.mrf.mxu0  ;;  %v3618_v26 = vadd.f32 %v3607_v28, %v3465_v61 }
 0xb45   : >> { %v3617_v21 = vadd.f32 %v3578_v22, %v3436_v8 }
 0xb46   : >> { %v3769_v10 = vadd.f32 %v3758_v63, %v3618_v26 }
 0xb47   : >> { %v3761_v18 = vpop.f32.mrf.mxu3  ;;  %v3768_v48 = vadd.f32 %v3729_v57, %v3617_v21 }
 0xb48   : >> { %v3732_v4 = vpop.f32.mrf.mxu2 }
 0xb4b   : >> { %v3610_v25 = vpop.f32.mrf.mxu1 }
 0xb4c   : >> { %v3581_v29 = vpop.f32.mrf.mxu0  ;;  %v3620_v19 = vadd.f32 %v3610_v25, %v3468_v15 }
 0xb4d   : >> { %v3619_v24 = vadd.f32 %v3581_v29, %v3439_v33 }
 0xb4e   : >> { %v3771_v47 = vadd.f32 %v3761_v18, %v3620_v19 }
 0xb4f   : >> { %v3909_v45 = vpop.f32.mrf.mxu3  ;;  %v3770_v54 = vadd.f32 %v3732_v4, %v3619_v24 }
 0xb50   : >> { %v3880_v2 = vpop.f32.mrf.mxu2  ;;  %v3920_v0 = vadd.f32 %v3909_v45, %v3769_v10 }
 0xb51   : >> { %v3919_v31 = vadd.f32 %v3880_v2, %v3768_v48 }
 0xb52   : >> { %v3952_v4 = vadd.f32 %v3940_v59, %v3920_v0 }
 0xb53   : >> { %v3903_v30 = vpop.f32.mrf.mxu1  ;;  %v3951_v53 = vadd.f32 %v3940_v59, %v3919_v31 }
 0xb54   : >> { %v3916_v5 = vadd.f32 %v3903_v30, %v3765_v34  ;;  %v3874_v7 = vpop.f32.mrf.mxu0  ;;  %v3968_v29 = vmul.f32 0.01, %v3952_v4  ;;  %vm3960_vm5 = vcmp.gt.f32.partialorder %v3952_v4, 0.0 }
 0xb55   : >> { %v3915_v23 = vadd.f32 %v3874_v7, %v3764_v35  ;;  %v3967_v51 = vmul.f32 0.01, %v3951_v53  ;;  %vm3959_vm9 = vcmp.gt.f32.partialorder %v3951_v53, 0.0 }
 0xb56   : >> { %v3948_v58 = vadd.f32 %v3930_v17, %v3916_v5  ;;  %v3976_v3 = vsel %vm3960_vm5, %v3952_v4, %v3968_v29 }
 0xb57   : >> { %v3947_v38 = vadd.f32 %v3930_v17, %v3915_v23  ;;  %v3912_v39 = vpop.f32.mrf.mxu3  ;;  %v3975_v18 = vsel %vm3959_vm9, %v3951_v53, %v3967_v51 }
 0xb58   : >> { %vm3956_vm11 = vcmp.gt.f32.partialorder %v3948_v58, 0.0  ;;  %v3964_v14 = vmul.f32 0.01, %v3948_v58  ;;  %v3883_v32 = vpop.f32.mrf.mxu2  ;;  %v3922_v12 = vadd.f32 %v3912_v39, %v3771_v47 }
 0xb59   : >> { %vm3955_vm4 = vcmp.gt.f32.partialorder %v3947_v38, 0.0  ;;  %v3963_v16 = vmul.f32 0.01, %v3947_v38  ;;  %v3921_v27 = vadd.f32 %v3883_v32, %v3770_v54 }
 0xb5a   : >> { %v3972_v40 = vsel %vm3956_vm11, %v3948_v58, %v3964_v14  ;;  %v3954_v28 = vadd.f32 %v3945_v55, %v3922_v12 }
 0xb5b   : >> { %v3906_v42 = vpop.f32.mrf.mxu1  ;;  %3989 = vrot.lane.b32.xlu1 %v3972_v40, %s6511_s20  ;;  %v3971_v20 = vsel %vm3955_vm4, %v3947_v38, %v3963_v16  ;;  %v3953_v57 = vadd.f32 %v3945_v55, %v3921_v27 }
 0xb5c   : >> { %v3918_v11 = vadd.f32 %v3906_v42, %v3767_v44  ;;  %v3877_v49 = vpop.f32.mrf.mxu0  ;;  %3987 = vrot.lane.b32.xlu2 %v3971_v20, %s6511_s20  ;;  %v3970_v1 = vmul.f32 0.01, %v3954_v28  ;;  %vm3962_vm2 = vcmp.gt.f32.partialorder %v3954_v28, 0.0 }
 0xb5d   : >> { %v3917_v9 = vadd.f32 %v3877_v49, %v3766_v43  ;;  %v3969_v25 = vmul.f32 0.01, %v3953_v57  ;;  %vm3961_vm15 = vcmp.gt.f32.partialorder %v3953_v57, 0.0 }
 0xb5e   : >> { %v3950_v52 = vadd.f32 %v3935_v41, %v3918_v11  ;;  %v3978_v8 = vsel %vm3962_vm2, %v3954_v28, %v3970_v1 }
 0xb5f   : >> { %v3949_v50 = vadd.f32 %v3935_v41, %v3917_v9  ;;  %v3977_v13 = vsel %vm3961_vm15, %v3953_v57, %v3969_v25 }
 0xb60   : >> { %vm3958_vm1 = vcmp.gt.f32.partialorder %v3950_v52, 0.0  ;;  %v3966_v56 = vmul.f32 0.01, %v3950_v52 }
 0xb61   : >> { %vm3957_vm3 = vcmp.gt.f32.partialorder %v3949_v50, 0.0  ;;  %v3965_v60 = vmul.f32 0.01, %v3949_v50 }
 0xb62   : >> { %v3974_v22 = vsel %vm3958_vm1, %v3950_v52, %v3966_v56 }
 0xb63   : >> { %3993 = vrot.lane.b32.xlu0 %v3974_v22, %s6511_s20  ;;  %3995 = vrot.lane.b32.xlu1 %v3975_v18, %s6511_s20  ;;  %v3973_v63 = vsel %vm3957_vm3, %v3949_v50, %v3965_v60 }
 0xb64   : >> { %3991 = vrot.lane.b32.xlu2 %v3973_v63, %s6511_s20 }
 0xb6b   : >> { %3999 = vrot.lane.b32.xlu0 %v3977_v13, %s6511_s20  ;;  %4001 = vrot.lane.b32.xlu1 %v3978_v8, %s6511_s20 }
 0xb6c   : >> { %3997 = vrot.lane.b32.xlu2 %v3976_v3, %s6511_s20 }
 0xbb6   : >> { %v3988_v46 = vpop.permute.xlu2 %3987 }
 0xbb7   : >> { %5622 = vst.msk [vmem:[%s5452_s28 + $0x40] sm:$0xff] %vm4018_vm6, %v3988_v46 }
 0xbbe   : >> { %v3992_v21 = vpop.permute.xlu2 %3991 }
 0xbbf   : >> { %5624 = vst.msk [vmem:[%s5452_s28 + $0x50] sm:$0xff] %vm4018_vm6, %v3992_v21 }
 0xbc6   : >> { %v3998_v34 = vpop.permute.xlu2 %3997 }
 0xbcd   : >> { %v3990_v45 = vpop.permute.xlu1 %3989 }
 0xbce   : >> { %v4003_v2 = vsel %vm2211_vm12, %v3988_v46, %v3990_v45 }
 0xbcf   : >> { %5623 = vst.msk [vmem:[%s5452_s28 + $0x48] sm:$0xff] %vm4020_vm8, %v4003_v2 }
 0xbd5   : >> { %v3994_v30 = vpop.permute.xlu0 %3993  ;;  %v3996_v35 = vpop.permute.xlu1 %3995 }
 0xbd6   : >> { %v4004_v36 = vsel %vm2211_vm12, %v3992_v21, %v3994_v30  ;;  %v4005_v48 = vsel %vm2211_vm12, %v3996_v35, %v3998_v34  ;;  %5626 = vst.msk [vmem:[%s5452_s28 + $0x60] sm:$0xff] %vm4018_vm6, %v3996_v35 }
 0xbd7   : >> { %5625 = vst.msk [vmem:[%s5452_s28 + $0x58] sm:$0xff] %vm4020_vm8, %v4004_v36 }
 0xbd8   : >> { %5627 = vst.msk [vmem:[%s5452_s28 + $0x68] sm:$0xff] %vm4020_vm8, %v4005_v48 }
 0xbdb   : > { %3179 = sbr.rel (!%p3177_p5) target bundleno = 2529 (0x9e1), region = 143 }
 0xbdd   : >> { %v4000_v5 = vpop.permute.xlu0 %3999  ;;  %v4002_v7 = vpop.permute.xlu1 %4001 }
 0xbde   : >> { %5628 = vst.msk [vmem:[%s5452_s28 + $0x70] sm:$0xff] %vm4018_vm6, %v4000_v5  ;;  %v4006_v6 = vsel %vm2211_vm12, %v4000_v5, %v4002_v7 }
 0xbdf   : >> { %5629 = vst.msk [vmem:[%s5452_s28 + $0x78] sm:$0xff] %vm4020_vm8, %v4006_v6 }
 0xbe0 LB: >> { %s5789_s29 = sshll.u32 %s6491_s15, 7  ;;  %s6512_s21 = smov 126   ;;  %vm4205_vm7 = vcmask 785408   ;;  %s6491_s15 = sphi %s10326_s15, %s4033_s15  }
 0xbe1   : >> { %s10332_s19 = scalar_lea.vmem [#allocation4], %s5789_s29  ;;  %s6513_s30 = smov 127  }
 0xbe2   : >> { %s5243_s24 = sshra.s32 %s6491_s15, 3  ;;  %s5246_s25 = sand.u32 7, %s6491_s15 }
 0xbe3   : >> { %s5793_s20 = sshll.u32 %s5243_s24, 4  ;;  %s4033_s15 = sadd.s32 1, %s6491_s15  }
 0xbe4   : >> { %s5249_s27 = sadd.s32 %s5793_s20, %s5246_s25  ;;  %p4030_p6 = scmp.ge.s32.totalorder %s4033_s15, 75  }
 0xbe6   : >> { %v10335_v15 = vld [vmem:[%s10332_s19 + $0x30] sm:$0xff]  ;;  %v10338_v17 = vld [vmem:[%s10332_s19 + $0x38] sm:$0xff]  ;;  %v10352_v58 = vld [vmem:[%s10332_s19 + $0x20] sm:$0xff] }
 0xbe7   : >> { %v10341_v23 = vld [vmem:[%s10332_s19 + $0x10] sm:$0xff]  ;;  %v6297_v33 = vpack.i.bf16 %v10338_v17, %v10335_v15  ;;  %v10346_v37 = vld [vmem:[%s10332_s19 + $0x18] sm:$0xff]  ;;  %v10356_v61 = vld [vmem:[%s10332_s19 + $0x28] sm:$0xff] }
 0xbe8   : >> { %v6307_v31 = vpack.i.bf16 %v10346_v37, %v10341_v23  ;;  %v10359_v62 = vld [vmem:[%s10332_s19] sm:$0xff]  ;;  %v10362_v59 = vld [vmem:[%s10332_s19 + $0x8] sm:$0xff]  ;;  %v10365_v38 = vld [vmem:[%s10332_s19 + $0x70] sm:$0xff]  ;;  %v6302_v14 = vpack.i.bf16 %v10356_v61, %v10352_v58 }
 0xbe9   : >> { %6298 = vrot.lane.b32.xlu0 %v6297_v33, %s6512_s21  ;;  %v10368_v19 = vld [vmem:[%s10332_s19 + $0x78] sm:$0xff]  ;;  %v6317_v24 = vpack.i.bf16 %v10362_v59, %v10359_v62  ;;  %v10378_v16 = vld [vmem:[%s10332_s19 + $0x60] sm:$0xff]  ;;  %v10381_v53 = vld [vmem:[%s10332_s19 + $0x68] sm:$0xff] }
 0xbea   : >> { %6308 = vrot.lane.b32.xlu1 %v6307_v31, %s6512_s21  ;;  %v6312_v26 = vpack.i.bf16 %v10368_v19, %v10365_v38  ;;  %v6322_v39 = vpack.i.bf16 %v10381_v53, %v10378_v16  ;;  %v10388_v44 = vld [vmem:[%s10332_s19 + $0x50] sm:$0xff]  ;;  %v10391_v40 = vld [vmem:[%s10332_s19 + $0x58] sm:$0xff]  ;;  %v10399_v32 = vld [vmem:[%s10332_s19 + $0x40] sm:$0xff] }
 0xbeb   : >> { %6318 = vrot.lane.b32.xlu2 %v6317_v24, %s6512_s21  ;;  %v6332_v41 = vpack.i.bf16 %v10391_v40, %v10388_v44  ;;  %v10402_v42 = vld [vmem:[%s10332_s19 + $0x48] sm:$0xff]  ;;  %v10413_v20 = vld [vmem:[%s10332_s19 + $0xb0] sm:$0xff]  ;;  %v10416_v47 = vld [vmem:[%s10332_s19 + $0xb8] sm:$0xff] }
 0xbec   : >> { %v6342_v43 = vpack.i.bf16 %v10402_v42, %v10399_v32  ;;  %v6377_v54 = vpack.i.bf16 %v10416_v47, %v10413_v20  ;;  %v10422_v11 = vld [vmem:[%s10332_s19 + $0xa0] sm:$0xff]  ;;  %v10425_v49 = vld [vmem:[%s10332_s19 + $0xa8] sm:$0xff]  ;;  %v10432_v9 = vld [vmem:[%s10332_s19 + $0x90] sm:$0xff] }
 0xbed   : >> { %v6382_v10 = vpack.i.bf16 %v10425_v49, %v10422_v11  ;;  %v10435_v12 = vld [vmem:[%s10332_s19 + $0x98] sm:$0xff]  ;;  %v10438_v27 = vld [vmem:[%s10332_s19 + $0x80] sm:$0xff]  ;;  %v10441_v52 = vld [vmem:[%s10332_s19 + $0x88] sm:$0xff] }
 0xbee   : >> { %v6387_v51 = vpack.i.bf16 %v10435_v12, %v10432_v9  ;;  %v6392_v0 = vpack.i.bf16 %v10441_v52, %v10438_v27  ;;  %v10454_v50 = vld [vmem:[%s10332_s19 + $0xf0] sm:$0xff]  ;;  %v10457_v56 = vld [vmem:[%s10332_s19 + $0xf8] sm:$0xff]  ;;  %v10464_v60 = vld [vmem:[%s10332_s19 + $0xe0] sm:$0xff] }
 0xbef   : >> { %v6417_v55 = vpack.i.bf16 %v10457_v56, %v10454_v50  ;;  %v10467_v57 = vld [vmem:[%s10332_s19 + $0xe8] sm:$0xff]  ;;  %v10473_v22 = vld [vmem:[%s10332_s19 + $0xc0] sm:$0xff]  ;;  %v10483_v25 = vld [vmem:[%s10332_s19 + $0xd0] sm:$0xff] }
 0xbf0   : >> { %v6422_v28 = vpack.i.bf16 %v10467_v57, %v10464_v60  ;;  %v10476_v18 = vld [vmem:[%s10332_s19 + $0xc8] sm:$0xff]  ;;  %v10486_v1 = vld [vmem:[%s10332_s19 + $0xd8] sm:$0xff]  ;;  %s5250_s19 = scalar_lea.vmem %s11239_s7, %s5249_s27 }
 0xbf1   : >> { %6303 = vrot.lane.b32.xlu0 %v6302_v14, %s6512_s21  ;;  %v6432_v4 = vpack.i.bf16 %v10476_v18, %v10473_v22  ;;  %v6447_v29 = vpack.i.bf16 %v10486_v1, %v10483_v25 }
 0xbf2   : >> { %6313 = vrot.lane.b32.xlu1 %v6312_v26, %s6512_s21 }
 0xbf3   : >> { %6323 = vrot.lane.b32.xlu2 %v6322_v39, %s6512_s21 }
 0xbf9   : >> { %6328 = vrot.lane.b32.xlu0 %v6297_v33, %s6513_s30 }
 0xbfa   : >> { %6333 = vrot.lane.b32.xlu1 %v6332_v41, %s6512_s21 }
 0xbfb   : >> { %6338 = vrot.lane.b32.xlu2 %v6302_v14, %s6513_s30 }
 0xc01   : >> { %6343 = vrot.lane.b32.xlu0 %v6342_v43, %s6512_s21 }
 0xc02   : >> { %6348 = vrot.lane.b32.xlu1 %v6307_v31, %s6513_s30 }
 0xc03   : >> { %6353 = vrot.lane.b32.xlu2 %v6312_v26, %s6513_s30 }
 0xc09   : >> { %6358 = vrot.lane.b32.xlu0 %v6317_v24, %s6513_s30 }
 0xc0a   : >> { %6363 = vrot.lane.b32.xlu1 %v6322_v39, %s6513_s30 }
 0xc0b   : >> { %6368 = vrot.lane.b32.xlu2 %v6332_v41, %s6513_s30 }
 0xc11   : >> { %6373 = vrot.lane.b32.xlu0 %v6342_v43, %s6513_s30 }
 0xc12   : >> { %6378 = vrot.lane.b32.xlu1 %v6377_v54, %s6512_s21 }
 0xc13   : >> { %6383 = vrot.lane.b32.xlu2 %v6382_v10, %s6512_s21 }
 0xc19   : >> { %6388 = vrot.lane.b32.xlu0 %v6387_v51, %s6512_s21 }
 0xc1a   : >> { %6393 = vrot.lane.b32.xlu1 %v6392_v0, %s6512_s21 }
 0xc1b   : >> { %6398 = vrot.lane.b32.xlu2 %v6377_v54, %s6513_s30 }
 0xc21   : >> { %6403 = vrot.lane.b32.xlu0 %v6382_v10, %s6513_s30 }
 0xc22   : >> { %6408 = vrot.lane.b32.xlu1 %v6387_v51, %s6513_s30 }
 0xc23   : >> { %6413 = vrot.lane.b32.xlu2 %v6392_v0, %s6513_s30 }
 0xc29   : >> { %6418 = vrot.lane.b32.xlu0 %v6417_v55, %s6512_s21 }
 0xc2a   : >> { %6423 = vrot.lane.b32.xlu1 %v6422_v28, %s6512_s21 }
 0xc2b   : >> { %6428 = vrot.lane.b32.xlu2 %v6447_v29, %s6512_s21 }
 0xc31   : >> { %6433 = vrot.lane.b32.xlu0 %v6432_v4, %s6512_s21 }
 0xc32   : >> { %6438 = vrot.lane.b32.xlu1 %v6417_v55, %s6513_s30 }
 0xc33   : >> { %6443 = vrot.lane.b32.xlu2 %v6422_v28, %s6513_s30 }
 0xc39   : >> { %6448 = vrot.lane.b32.xlu0 %v6447_v29, %s6513_s30 }
 0xc3a   : >> { %6453 = vrot.lane.b32.xlu1 %v6432_v4, %s6513_s30 }
 0xc45   : >> { %v6319_v63 = vpop.permute.xlu2 %6318 }
 0xc46   : >> { %v6320_v24 = vunpack.i.l.bf16 %v6319_v63  ;;  %v6321_v26 = vunpack.i.h.bf16 %v6319_v63 }
 0xc48   : >> { %v4100_v54 = vsel %vm2650_vm13, %v6320_v24, %v6321_v26 }
 0xc4d   : >> { %v6324_v13 = vpop.permute.xlu2 %6323 }
 0xc4e   : >> { %v10494_v34 = vunpack.i.h.bf16 %v6324_v13  ;;  %v6325_v30 = vunpack.i.l.bf16 %v6324_v13 }
 0xc50   : >> { %v10506_v41 = vsel %vm2650_vm13, %v6325_v30, %v10494_v34 }
 0xc55   : >> { %v6339_v35 = vpop.permute.xlu2 %6338 }
 0xc56   : >> { %v6340_v10 = vunpack.i.l.bf16 %v6339_v35  ;;  %v6341_v51 = vunpack.i.h.bf16 %v6339_v35 }
 0xc5b   : >> { %v6299_v8 = vpop.permute.xlu0 %6298 }
 0xc5c   : >> { %v6301_v3 = vunpack.i.h.bf16 %v6299_v8  ;;  %v6300_v46 = vunpack.i.l.bf16 %v6299_v8  ;;  %v6309_v21 = vpop.permute.xlu1 %6308 }
 0xc5d   : >> { %v6310_v36 = vunpack.i.l.bf16 %v6309_v21  ;;  %v6311_v6 = vunpack.i.h.bf16 %v6309_v21  ;;  %v6354_v8 = vpop.permute.xlu2 %6353 }
 0xc5e   : >> { %4381 = vmatpush.msra.mxu3 %v6301_v3  ;;  %v4103_v45 = vsel %vm2650_vm13, %v6300_v46, %v6301_v3  ;;  %v4073_v46 = vsel %vm2642_vm14, %v6340_v10, %v6341_v51  ;;  %v10524_v28 = vunpack.i.h.bf16 %v6354_v8 }
 0xc5f   : >> { %4340 = vmatpush.msra.mxu2 %v4103_v45  ;;  %v4101_v43 = vsel %vm2650_vm13, %v6310_v36, %v6311_v6  ;;  %v6355_v45 = vunpack.i.l.bf16 %v6354_v8 }
 0xc63   : >> { %v6304_v2 = vpop.permute.xlu0 %6303 }
 0xc64   : >> { %v6305_v48 = vunpack.i.l.bf16 %v6304_v2  ;;  %v6306_v5 = vunpack.i.h.bf16 %v6304_v2  ;;  %v6314_v7 = vpop.permute.xlu1 %6313 }
 0xc65   : >> { %v10496_v33 = vunpack.i.h.bf16 %v6314_v7  ;;  %v6315_v31 = vunpack.i.l.bf16 %v6314_v7  ;;  %v6369_v24 = vpop.permute.xlu2 %6368 }
 0xc66   : >> { %4382 = vmatpush.msra.mxu3 %v6306_v5  ;;  %v4102_v14 = vsel %vm2650_vm13, %v6305_v48, %v6306_v5 }
 0xc67   : >> { %4341 = vmatpush.msra.mxu2 %v4102_v14  ;;  %4275 = vmatpush.msra.mxu1 %v10496_v33  ;;  %v10502_v39 = vsel %vm2650_vm13, %v6315_v31, %v10496_v33 }
 0xc68   : >> { %4383 = vmatpush.msra.mxu3 %v6311_v6  ;;  %4234 = vmatpush.msra.mxu0 %v10502_v39  ;;  %v10535_v6 = vsel %vm2642_vm14, %v6355_v45, %v10524_v28 }
 0xc69   : >> { %4342 = vmatpush.msra.mxu2 %v4101_v43  ;;  %4276 = vmatpush.msra.mxu1 %v10494_v34  ;;  %v6370_v43 = vunpack.i.l.bf16 %v6369_v24 }
 0xc6a   : >> { %4384 = vmatpush.msra.mxu3 %v6321_v26  ;;  %4235 = vmatpush.msra.mxu0 %v10506_v41  ;;  %v10541_v26 = vunpack.i.h.bf16 %v6369_v24 }
 0xc6b   : >> { %v6329_v0 = vpop.permute.xlu0 %6328  ;;  %4343 = vmatpush.msra.mxu2 %v4100_v54 }
 0xc6c   : >> { %v6330_v55 = vunpack.i.l.bf16 %v6329_v0  ;;  %v6331_v4 = vunpack.i.h.bf16 %v6329_v0  ;;  %v6334_v63 = vpop.permute.xlu1 %6333 }
 0xc6d   : >> { %v10514_v29 = vunpack.i.h.bf16 %v6334_v63  ;;  %v6335_v13 = vunpack.i.l.bf16 %v6334_v63  ;;  %v6384_v8 = vpop.permute.xlu2 %6383 }
 0xc6e   : >> { %4385 = vmatpush.msra.mxu3 %v6331_v4  ;;  %v4074_v3 = vsel %vm2642_vm14, %v6330_v55, %v6331_v4 }
 0xc6f   : >> { %4344 = vmatpush.msra.mxu2 %v4074_v3  ;;  %4277 = vmatpush.msra.mxu1 %v10514_v29  ;;  %v10521_v21 = vsel %vm2650_vm13, %v6335_v13, %v10514_v29  ;;  %v10553_v13 = vsel %vm2642_vm14, %v6370_v43, %v10541_v26 }
 0xc70   : >> { %4236 = vmatpush.msra.mxu0 %v10521_v21  ;;  %4386 = vmatpush.msra.mxu3 %v6341_v51 }
 0xc71   : >> { %4345 = vmatpush.msra.mxu2 %v4073_v46 }
 0xc73   : >> { %v6344_v2 = vpop.permute.xlu0 %6343 }
 0xc74   : >> { %v10526_v30 = vunpack.i.h.bf16 %v6344_v2  ;;  %v6345_v35 = vunpack.i.l.bf16 %v6344_v2  ;;  %v6349_v36 = vpop.permute.xlu1 %6348 }
 0xc75   : >> { %v6350_v48 = vunpack.i.l.bf16 %v6349_v36  ;;  %v6351_v5 = vunpack.i.h.bf16 %v6349_v36 }
 0xc76   : >> { %4278 = vmatpush.msra.mxu1 %v10526_v30  ;;  %v10531_v7 = vsel %vm2650_vm13, %v6345_v35, %v10526_v30  ;;  %v6399_v35 = vpop.permute.xlu2 %6398 }
 0xc77   : >> { %4237 = vmatpush.msra.mxu0 %v10531_v7  ;;  %4387 = vmatpush.msra.mxu3 %v6351_v5  ;;  %v4072_v31 = vsel %vm2642_vm14, %v6350_v48, %v6351_v5  ;;  %v10592_v48 = vld [vmem:[%s11237_s5 + $0x40] sm:$0xff] }
 0xc78   : >> { %4346 = vmatpush.msra.mxu2 %v4072_v31  ;;  %4279 = vmatpush.msra.mxu1 %v10524_v28 }
 0xc79   : >> { %4238 = vmatpush.msra.mxu0 %v10535_v6 }
 0xc7b   : >> { %v6359_v14 = vpop.permute.xlu0 %6358 }
 0xc7c   : >> { %v6360_v54 = vunpack.i.l.bf16 %v6359_v14  ;;  %v6361_v10 = vunpack.i.h.bf16 %v6359_v14  ;;  %v6364_v51 = vpop.permute.xlu1 %6363  ;;  %v10600_v14 = vld [vmem:[%s11237_s5 + $0x8] sm:$0xff] }
 0xc7d   : >> { %v10543_v0 = vunpack.i.h.bf16 %v6364_v51  ;;  %v6365_v55 = vunpack.i.l.bf16 %v6364_v51  ;;  %v6400_v51 = vunpack.i.l.bf16 %v6399_v35 }
 0xc7e   : >> { %4388 = vmatpush.msra.mxu3 %v6361_v10  ;;  %v4071_v4 = vsel %vm2642_vm14, %v6360_v54, %v6361_v10  ;;  %v6401_v10 = vunpack.i.h.bf16 %v6399_v35 }
 0xc7f   : >> { %4347 = vmatpush.msra.mxu2 %v4071_v4  ;;  %4280 = vmatpush.msra.mxu1 %v10543_v0  ;;  %v10549_v63 = vsel %vm2642_vm14, %v6365_v55, %v10543_v0 }
 0xc80   : >> { %4239 = vmatpush.msra.mxu0 %v10549_v63  ;;  %4389 = vmatpush.msra.mxu3 %v10338_v17 }
 0xc81   : >> { %4348 = vmatpush.msra.mxu2 %v10335_v15  ;;  %4281 = vmatpush.msra.mxu1 %v10541_v26  ;;  %v10569_v15 = vld [vmem:[%s11237_s5] sm:$0xff] }
 0xc82   : >> { %4240 = vmatpush.msra.mxu0 %v10553_v13  ;;  %4390 = vmatpush.msra.mxu3 %v10356_v61 }
 0xc83   : >> { %v6374_v3 = vpop.permute.xlu0 %6373  ;;  %4349 = vmatpush.msra.mxu2 %v10352_v58 }
 0xc84   : >> { %v10562_v46 = vunpack.i.h.bf16 %v6374_v3  ;;  %v6375_v45 = vunpack.i.l.bf16 %v6374_v3  ;;  %v6379_v2 = vpop.permute.xlu1 %6378  ;;  %4391 = vmatpush.msra.mxu3 %v10346_v37  ;;  %v6385_v37 = vunpack.i.l.bf16 %v6384_v8 }
 0xc85   : >> { %4350 = vmatpush.msra.mxu2 %v10341_v23  ;;  %v6381_v58 = vunpack.i.h.bf16 %v6379_v2  ;;  %v6380_v61 = vunpack.i.l.bf16 %v6379_v2  ;;  %v6386_v23 = vunpack.i.h.bf16 %v6384_v8  ;;  %v10616_v2 = vld [vmem:[%s11237_s5 + $0x48] sm:$0xff] }
 0xc86   : >> { %4282 = vmatpush.msra.mxu1 %v10562_v46  ;;  %v10574_v17 = vsel %vm2642_vm14, %v6375_v45, %v10562_v46  ;;  %4392 = vmatpush.msra.mxu3 %v10362_v59 }
 0xc87   : >> { %4241 = vmatpush.msra.mxu0 %v10574_v17  ;;  %4351 = vmatpush.msra.mxu2 %v10359_v62  ;;  %v4485_v59 = vsel %vm2650_vm13, %v6380_v61, %v6381_v58  ;;  %v4484_v31 = vsel %vm2650_vm13, %v6385_v37, %v6386_v23  ;;  %v6414_v61 = vpop.permute.xlu2 %6413 }
 0xc88   : >> { %4283 = vmatpush.msra.mxu1 %v10368_v19  ;;  %5667 = vmatmul.msk.f32.vlgmr.msra.gmra.mxu2 %vm4205_vm7, %v10569_v15  ;;  %v6416_v35 = vunpack.i.h.bf16 %v6414_v61 }
 0xc89   : >> { %4242 = vmatpush.msra.mxu0 %v10365_v38  ;;  %5675 = vmatmul.msk.f32.vlgmr.msra.gmra.mxu3 %vm4205_vm7, %v10569_v15 }
 0xc8a   : >> { %4284 = vmatpush.msra.mxu1 %v10381_v53  ;;  %4782 = vmatpush.msrb.mxu3 %v6381_v58 }
 0xc8b   : >> { %4243 = vmatpush.msra.mxu0 %v10378_v16  ;;  %4741 = vmatpush.msrb.mxu2 %v4485_v59  ;;  %v6389_v62 = vpop.permute.xlu0 %6388 }
 0xc8c   : >> { %4285 = vmatpush.msra.mxu1 %v10391_v40  ;;  %v6391_v36 = vunpack.i.h.bf16 %v6389_v62  ;;  %v6394_v5 = vpop.permute.xlu1 %6393  ;;  %4783 = vmatpush.msrb.mxu3 %v6386_v23  ;;  %v6390_v24 = vunpack.i.l.bf16 %v6389_v62  ;;  %v10622_v62 = vld [vmem:[%s11237_s5 + $0x10] sm:$0xff] }
 0xc8d   : >> { %4244 = vmatpush.msra.mxu0 %v10388_v44  ;;  %4742 = vmatpush.msrb.mxu2 %v4484_v31  ;;  %v6396_v43 = vunpack.i.h.bf16 %v6394_v5  ;;  %v6395_v54 = vunpack.i.l.bf16 %v6394_v5 }
 0xc8e   : >> { %4286 = vmatpush.msra.mxu1 %v10402_v42  ;;  %4784 = vmatpush.msrb.mxu3 %v6391_v36  ;;  %v4483_v55 = vsel %vm2650_vm13, %v6390_v24, %v6391_v36 }
 0xc8f   : >> { %4245 = vmatpush.msra.mxu0 %v10399_v32  ;;  %5659 = vmatmul.msk.f32.vlgmr.msra.gmra.mxu1 %vm4205_vm7, %v10592_v48  ;;  %v4482_v45 = vsel %vm2650_vm13, %v6395_v54, %v6396_v43  ;;  %v10643_v54 = vld [vmem:[%s11237_s5 + $0x18] sm:$0xff] }
 0xc90   : >> { %4572 = vmatpush.msrb.mxu1 %v6381_v58  ;;  %5651 = vmatmul.msk.f32.vlgmr.msra.gmra.mxu0 %vm4205_vm7, %v10592_v48 }
 0xc91   : >> { %4531 = vmatpush.msrb.mxu0 %v4485_v59  ;;  %5668 = vmatmul.msk.f32.gmra.mxu2 %vm4205_vm7, %v10600_v14  ;;  %v4457_v59 = vsel %vm2642_vm14, %v6400_v51, %v6401_v10  ;;  %v10671_v51 = vld [vmem:[%s11237_s5 + $0x20] sm:$0xff] }
 0xc92   : >> { %4573 = vmatpush.msrb.mxu1 %v6386_v23  ;;  %5676 = vmatmul.msk.f32.gmra.mxu3 %vm4205_vm7, %v10600_v14 }
 0xc93   : >> { %4532 = vmatpush.msrb.mxu0 %v4484_v31  ;;  %v6404_v4 = vpop.permute.xlu0 %6403  ;;  %4743 = vmatpush.msrb.mxu2 %v4483_v55 }
 0xc94   : >> { %4574 = vmatpush.msrb.mxu1 %v6391_v36  ;;  %v6406_v8 = vunpack.i.h.bf16 %v6404_v4  ;;  %v6405_v3 = vunpack.i.l.bf16 %v6404_v4  ;;  %v6409_v58 = vpop.permute.xlu1 %6408  ;;  %4785 = vmatpush.msrb.mxu3 %v6396_v43  ;;  %v6415_v36 = vunpack.i.l.bf16 %v6414_v61  ;;  %v10794_v61 = vld [vmem:[%s11237_s5 + $0x80] sm:$0xff] }
 0xc95   : >> { %4533 = vmatpush.msrb.mxu0 %v4483_v55  ;;  %4744 = vmatpush.msrb.mxu2 %v4482_v45  ;;  %v6411_v23 = vunpack.i.h.bf16 %v6409_v58  ;;  %v6410_v37 = vunpack.i.l.bf16 %v6409_v58 }
 0xc96   : >> { %4575 = vmatpush.msrb.mxu1 %v6396_v43  ;;  %4786 = vmatpush.msrb.mxu3 %v6401_v10  ;;  %v4456_v5 = vsel %vm2642_vm14, %v6405_v3, %v6406_v8  ;;  %v4454_v24 = vsel %vm2642_vm14, %v6415_v36, %v6416_v35  ;;  %v10638_v43 = vld [vmem:[%s11237_s5 + $0x50] sm:$0xff]  ;;  %v10811_v36 = vld [vmem:[%s11237_s5 + $0x88] sm:$0xff] }
 0xc97   : >> { %4534 = vmatpush.msrb.mxu0 %v4482_v45  ;;  %5660 = vmatmul.msk.f32.gmra.mxu1 %vm4205_vm7, %v10616_v2  ;;  %v4455_v31 = vsel %vm2642_vm14, %v6410_v37, %v6411_v23 }
 0xc98   : >> { %4576 = vmatpush.msrb.mxu1 %v6401_v10  ;;  %5652 = vmatmul.msk.f32.gmra.mxu0 %vm4205_vm7, %v10616_v2  ;;  %v10662_v10 = vld [vmem:[%s11237_s5 + $0x58] sm:$0xff] }
 0xc99   : >> { %4535 = vmatpush.msrb.mxu0 %v4457_v59  ;;  %5669 = vmatmul.msk.f32.gmra.mxu2 %vm4205_vm7, %v10622_v62 }
 0xc9a   : >> { %4577 = vmatpush.msrb.mxu1 %v6406_v8  ;;  %5677 = vmatmul.msk.f32.gmra.mxu3 %vm4205_vm7, %v10622_v62 }
 0xc9b   : >> { %4536 = vmatpush.msrb.mxu0 %v4456_v5  ;;  %4745 = vmatpush.msrb.mxu2 %v4457_v59 }
 0xc9c   : >> { %4578 = vmatpush.msrb.mxu1 %v6411_v23  ;;  %4787 = vmatpush.msrb.mxu3 %v6406_v8 }
 0xc9d   : >> { %4537 = vmatpush.msrb.mxu0 %v4455_v31  ;;  %4746 = vmatpush.msrb.mxu2 %v4456_v5  ;;  %v10891_v5 = vld [vmem:[%s11237_s5 + $0xb0] sm:$0xff] }
 0xc9e   : >> { %4579 = vmatpush.msrb.mxu1 %v6416_v35  ;;  %4788 = vmatpush.msrb.mxu3 %v6411_v23 }
 0xc9f   : >> { %4538 = vmatpush.msrb.mxu0 %v4454_v24  ;;  %5661 = vmatmul.msk.f32.gmra.mxu1 %vm4205_vm7, %v10638_v43 }
 0xca0   : >> { %4580 = vmatpush.msrb.mxu1 %v10416_v47  ;;  %5653 = vmatmul.msk.f32.gmra.mxu0 %vm4205_vm7, %v10638_v43 }
 0xca1   : >> { %4539 = vmatpush.msrb.mxu0 %v10413_v20  ;;  %5670 = vmatmul.msk.f32.gmra.mxu2 %vm4205_vm7, %v10643_v54 }
 0xca2   : >> { %4581 = vmatpush.msrb.mxu1 %v10425_v49  ;;  %5678 = vmatmul.msk.f32.gmra.mxu3 %vm4205_vm7, %v10643_v54 }
 0xca3   : >> { %4540 = vmatpush.msrb.mxu0 %v10422_v11  ;;  %4747 = vmatpush.msrb.mxu2 %v4455_v31  ;;  %v10904_v31 = vld [vmem:[%s11237_s5 + $0xb8] sm:$0xff] }
 0xca4   : >> { %4582 = vmatpush.msrb.mxu1 %v10435_v12  ;;  %4789 = vmatpush.msrb.mxu3 %v6416_v35  ;;  %v4625_v35 = vld [vmem:[%s11238_s6] sm:$0xff] }
 0xca5   : >> { %4541 = vmatpush.msrb.mxu0 %v10432_v9  ;;  %4748 = vmatpush.msrb.mxu2 %v4454_v24 }
 0xca6   : >> { %4583 = vmatpush.msrb.mxu1 %v10441_v52  ;;  %4790 = vmatpush.msrb.mxu3 %v10416_v47  ;;  %v10691_v47 = vld [vmem:[%s11237_s5 + $0x60] sm:$0xff] }
 0xca7   : >> { %4542 = vmatpush.msrb.mxu0 %v10438_v27  ;;  %5662 = vmatmul.msk.f32.gmra.mxu1 %vm4205_vm7, %v10662_v10 }
 0xca8   : >> { %4864 = vmatpush.msra.mxu1 %v10496_v33  ;;  %5654 = vmatmul.msk.f32.gmra.mxu0 %vm4205_vm7, %v10662_v10 }
 0xca9   : >> { %4823 = vmatpush.msra.mxu0 %v10502_v39  ;;  %5671 = vmatmul.msk.f32.gmra.mxu2 %vm4205_vm7, %v10671_v51 }
 0xcaa   : >> { %4865 = vmatpush.msra.mxu1 %v10494_v34  ;;  %5679 = vmatmul.msk.f32.gmra.mxu3 %vm4205_vm7, %v10671_v51  ;;  %v6419_v34 = vpop.permute.xlu0 %6418 }
 0xcab   : >> { %4824 = vmatpush.msra.mxu0 %v10506_v41  ;;  %4749 = vmatpush.msrb.mxu2 %v10413_v20  ;;  %v10700_v20 = vld [vmem:[%s11237_s5 + $0x28] sm:$0xff]  ;;  %v6420_v33 = vunpack.i.l.bf16 %v6419_v34 }
 0xcac   : >> { %4866 = vmatpush.msra.mxu1 %v10514_v29  ;;  %4791 = vmatpush.msrb.mxu3 %v10425_v49  ;;  %v6421_v49 = vunpack.i.h.bf16 %v6419_v34 }
 0xcad   : >> { %4825 = vmatpush.msra.mxu0 %v10521_v21  ;;  %4750 = vmatpush.msrb.mxu2 %v10422_v11  ;;  %v6424_v11 = vpop.permute.xlu1 %6423  ;;  %v10722_v21 = vld [vmem:[%s11237_s5 + $0x68] sm:$0xff] }
 0xcae   : >> { %4867 = vmatpush.msra.mxu1 %v10526_v30  ;;  %4792 = vmatpush.msrb.mxu3 %v10435_v12  ;;  %v6429_v12 = vpop.permute.xlu2 %6428  ;;  %v4968_v39 = vsel %vm2650_vm13, %v6420_v33, %v6421_v49  ;;  %v6426_v41 = vunpack.i.h.bf16 %v6424_v11  ;;  %v6425_v29 = vunpack.i.l.bf16 %v6424_v11 }
 0xcaf   : >> { %4826 = vmatpush.msra.mxu0 %v10531_v7  ;;  %5663 = vmatmul.msk.f32.gmra.mxu1 %vm4205_vm7, %v10691_v47  ;;  %v6430_v30 = vunpack.i.l.bf16 %v6429_v12 }
 0xcb0   : >> { %4868 = vmatpush.msra.mxu1 %v10524_v28  ;;  %5655 = vmatmul.msk.f32.gmra.mxu0 %vm4205_vm7, %v10691_v47  ;;  %v6431_v28 = vunpack.i.h.bf16 %v6429_v12  ;;  %v4967_v7 = vsel %vm2650_vm13, %v6425_v29, %v6426_v41 }
 0xcb1   : >> { %4827 = vmatpush.msra.mxu0 %v10535_v6  ;;  %5672 = vmatmul.msk.f32.gmra.mxu2 %vm4205_vm7, %v10700_v20 }
 0xcb2   : >> { %4869 = vmatpush.msra.mxu1 %v10543_v0  ;;  %5680 = vmatmul.msk.f32.gmra.mxu3 %vm4205_vm7, %v10700_v20  ;;  %v10756_v0 = vld [vmem:[%s11237_s5 + $0x38] sm:$0xff] }
 0xcb3   : >> { %4828 = vmatpush.msra.mxu0 %v10549_v63  ;;  %4751 = vmatpush.msrb.mxu2 %v10432_v9  ;;  %v10730_v9 = vld [vmem:[%s11237_s5 + $0x30] sm:$0xff] }
 0xcb4   : >> { %4870 = vmatpush.msra.mxu1 %v10541_v26  ;;  %4793 = vmatpush.msrb.mxu3 %v10441_v52  ;;  %v6434_v52 = vpop.permute.xlu0 %6433 }
 0xcb5   : >> { %4829 = vmatpush.msra.mxu0 %v10553_v13  ;;  %4752 = vmatpush.msrb.mxu2 %v10438_v27  ;;  %v4966_v27 = vsel %vm2650_vm13, %v6430_v30, %v6431_v28  ;;  %v6436_v6 = vunpack.i.h.bf16 %v6434_v52  ;;  %v6435_v26 = vunpack.i.l.bf16 %v6434_v52  ;;  %v4626_v13 = vld [vmem:[%s11238_s6 + $0x8] sm:$0xff] }
 0xcb6   : >> { %4871 = vmatpush.msra.mxu1 %v10562_v46  ;;  %5022 = vmatpush.msra.mxu3 %v6421_v49  ;;  %v6444_v46 = vpop.permute.xlu2 %6443 }
 0xcb7   : >> { %4830 = vmatpush.msra.mxu0 %v10574_v17  ;;  %4981 = vmatpush.msra.mxu2 %v4968_v39  ;;  %v6446_v17 = vunpack.i.h.bf16 %v6444_v46  ;;  %v6445_v55 = vunpack.i.l.bf16 %v6444_v46 }
 0xcb8   : >> { %5664 = vmatmul.msk.f32.gmra.mxu1 %vm4205_vm7, %v10722_v21  ;;  %5656 = vmatmul.msk.f32.gmra.mxu0 %vm4205_vm7, %v10722_v21 }
 0xcb9   : >> { %4831 = vmatpush.msra.mxu0 %v10365_v38  ;;  %5023 = vmatpush.msra.mxu3 %v6426_v41  ;;  %v10748_v38 = vld [vmem:[%s11237_s5 + $0x70] sm:$0xff]  ;;  %v4939_v4 = vsel %vm2642_vm14, %v6445_v55, %v6446_v17 }
 0xcba   : >> { %5673 = vmatmul.msk.f32.gmra.mxu2 %vm4205_vm7, %v10730_v9  ;;  %5681 = vmatmul.msk.f32.gmra.mxu3 %vm4205_vm7, %v10730_v9 }
 0xcbb   : >> { %4832 = vmatpush.msra.mxu0 %v10378_v16  ;;  %4982 = vmatpush.msra.mxu2 %v4967_v7  ;;  %v4965_v16 = vsel %vm2650_vm13, %v6435_v26, %v6436_v6 }
 0xcbc   : >> { %5024 = vmatpush.msra.mxu3 %v6431_v28  ;;  %4872 = vmatpush.msra.mxu1 %v10368_v19  ;;  %v6439_v19 = vpop.permute.xlu1 %6438  ;;  %v6449_v8 = vpop.permute.xlu0 %6448 }
 0xcbd   : >> { %4983 = vmatpush.msra.mxu2 %v4966_v27  ;;  %4833 = vmatpush.msra.mxu0 %v10388_v44  ;;  %v6441_v44 = vunpack.i.h.bf16 %v6439_v19  ;;  %v6440_v63 = vunpack.i.l.bf16 %v6439_v19  ;;  %v6451_v3 = vunpack.i.h.bf16 %v6449_v8  ;;  %v6450_v45 = vunpack.i.l.bf16 %v6449_v8 }
 0xcbe   : >> { %5025 = vmatpush.msra.mxu3 %v6436_v6  ;;  %4873 = vmatpush.msra.mxu1 %v10381_v53  ;;  %v6514_v53 = vmov 0  }
 0xcbf   : >> { %4984 = vmatpush.msra.mxu2 %v4965_v16  ;;  %4834 = vmatpush.msra.mxu0 %v10399_v32  ;;  %v4940_v32 = vsel %vm2642_vm14, %v6440_v63, %v6441_v44  ;;  %v4938_v58 = vsel %vm2642_vm14, %v6450_v45, %v6451_v3 }
 0xcc0   : >> { %5665 = vmatmul.msk.f32.gmra.mxu1 %vm4205_vm7, %v10748_v38  ;;  %5657 = vmatmul.msk.f32.gmra.mxu0 %vm4205_vm7, %v10748_v38 }
 0xcc1   : >> { %4874 = vmatpush.msra.mxu1 %v10391_v40  ;;  %6458 = vset.pattern.permute.xlu0 %v6514_v53  ;;  %v10775_v40 = vld [vmem:[%s11237_s5 + $0x78] sm:$0xff] }
 0xcc2   : >> { %5674 = vmatmul.msk.f32.gmra.mxu2 %vm4205_vm7, %v10756_v0  ;;  %5682 = vmatmul.msk.f32.gmra.mxu3 %vm4205_vm7, %v10756_v0 }
 0xcc3   : >> { %6459 = vset.pattern.permute.xlu1 %v6514_v53  ;;  %5026 = vmatpush.msra.mxu3 %v6441_v44 }
 0xcc4   : >> { %4985 = vmatpush.msra.mxu2 %v4940_v32  ;;  %4640 = vperm.xlu0 %6458, %v4626_v13   ;;  %v6454_v23 = vpop.permute.xlu1 %6453 }
 0xcc5   : >> { %6457 = vset.pattern.permute.xlu2 %v6514_v53  ;;  %4875 = vmatpush.msra.mxu1 %v10402_v42  ;;  %v4627_v42 = vld [vmem:[%s11238_s6 + $0x10] sm:$0xff]  ;;  %v6455_v37 = vunpack.i.l.bf16 %v6454_v23 }
 0xcc6   : >> { %5027 = vmatpush.msra.mxu3 %v6446_v17  ;;  %4986 = vmatpush.msra.mxu2 %v4939_v4 }
 0xcc7   : >> { %4645 = vperm.xlu1 %6459, %v4627_v42   ;;  %4635 = vperm.xlu2 %6457, %v4625_v35  }
 0xcc8   : >> { %5666 = vmatmul.msk.f32.gmra.mxu1 %vm4205_vm7, %v10775_v40  ;;  %5658 = vmatmul.msk.f32.gmra.mxu0 %vm4205_vm7, %v10775_v40 }
 0xcc9   : >> { %5028 = vmatpush.msra.mxu3 %v6451_v3  ;;  %4987 = vmatpush.msra.mxu2 %v4938_v58 }
 0xcca   : >> { %5717 = vmatmul.msk.f32.vlgmr.msrb.gmra.mxu2 %vm4205_vm7, %v10592_v48  ;;  %5725 = vmatmul.msk.f32.vlgmr.msrb.gmra.mxu3 %vm4205_vm7, %v10592_v48  ;;  %v6456_v48 = vunpack.i.h.bf16 %v6454_v23 }
 0xccc   : >> { %v4937_v59 = vsel %vm2642_vm14, %v6455_v37, %v6456_v48  ;;  %5029 = vmatpush.msra.mxu3 %v6456_v48 }
 0xccd   : >> { %4988 = vmatpush.msra.mxu2 %v4937_v59 }
 0xcce   : >> { %5030 = vmatpush.msra.mxu3 %v10457_v56  ;;  %v5695_v56 = vld [vmem:[%s11237_s5 + $0x90] sm:$0xff] }
 0xccf   : >> { %4989 = vmatpush.msra.mxu2 %v10454_v50  ;;  %v4629_v50 = vld [vmem:[%s11238_s6 + $0x20] sm:$0xff] }
 0xcd0   : >> { %5709 = vmatmul.msk.f32.vlgmr.msrb.gmra.mxu1 %vm4205_vm7, %v10794_v61  ;;  %5701 = vmatmul.msk.f32.vlgmr.msrb.gmra.mxu0 %vm4205_vm7, %v10794_v61 }
 0xcd1   : >> { %4990 = vmatpush.msra.mxu2 %v10464_v60  ;;  %5031 = vmatpush.msra.mxu3 %v10467_v57  ;;  %v5696_v60 = vld [vmem:[%s11237_s5 + $0x98] sm:$0xff]  ;;  %v4631_v57 = vld [vmem:[%s11238_s6 + $0x30] sm:$0xff] }
 0xcd2   : >> { %5718 = vmatmul.msk.f32.gmra.mxu2 %vm4205_vm7, %v10616_v2  ;;  %5726 = vmatmul.msk.f32.gmra.mxu3 %vm4205_vm7, %v10616_v2  ;;  %v4630_v2 = vld [vmem:[%s11238_s6 + $0x28] sm:$0xff] }
 0xcd3   : >> { %4991 = vmatpush.msra.mxu2 %v10483_v25  ;;  %4655 = vperm.xlu1 %6459, %v4629_v50   ;;  %v4632_v25 = vld [vmem:[%s11238_s6 + $0x38] sm:$0xff] }
 0xcd4   : >> { %5032 = vmatpush.msra.mxu3 %v10486_v1  ;;  %4665 = vperm.xlu0 %6458, %v4631_v57   ;;  %v10875_v1 = vld [vmem:[%s11237_s5 + $0xa8] sm:$0xff] }
 0xcd5   : >> { %4992 = vmatpush.msra.mxu2 %v10473_v22  ;;  %v4628_v22 = vld [vmem:[%s11238_s6 + $0x18] sm:$0xff] }
 0xcd6   : >> { %5033 = vmatpush.msra.mxu3 %v10476_v18  ;;  %4650 = vperm.xlu2 %6457, %v4628_v22   ;;  %v10859_v18 = vld [vmem:[%s11237_s5 + $0xa0] sm:$0xff] }
 0xcd8   : >> { %5710 = vmatmul.msk.f32.gmra.mxu1 %vm4205_vm7, %v10811_v36  ;;  %5702 = vmatmul.msk.f32.gmra.mxu0 %vm4205_vm7, %v10811_v36 }
 0xcda   : >> { %5719 = vmatmul.msk.f32.gmra.mxu2 %vm4205_vm7, %v10638_v43  ;;  %5727 = vmatmul.msk.f32.gmra.mxu3 %vm4205_vm7, %v10638_v43 }
 0xcdb   : >> { %4670 = vperm.xlu1 %6459, %v4632_v25  }
 0xcde   : >> { %4660 = vperm.xlu2 %6457, %v4630_v2  }
 0xce0   : >> { %5711 = vmatmul.msk.f32.gmra.mxu1 %vm4205_vm7, %v5695_v56  ;;  %5703 = vmatmul.msk.f32.gmra.mxu0 %vm4205_vm7, %v5695_v56 }
 0xce2   : >> { %5720 = vmatmul.msk.f32.gmra.mxu2 %vm4205_vm7, %v10662_v10  ;;  %5728 = vmatmul.msk.f32.gmra.mxu3 %vm4205_vm7, %v10662_v10 }
 0xce8   : >> { %5712 = vmatmul.msk.f32.gmra.mxu1 %vm4205_vm7, %v5696_v60  ;;  %5704 = vmatmul.msk.f32.gmra.mxu0 %vm4205_vm7, %v5696_v60 }
 0xcea   : >> { %5721 = vmatmul.msk.f32.gmra.mxu2 %vm4205_vm7, %v10691_v47  ;;  %5729 = vmatmul.msk.f32.gmra.mxu3 %vm4205_vm7, %v10691_v47 }
 0xcf0   : >> { %5713 = vmatmul.msk.f32.gmra.mxu1 %vm4205_vm7, %v10859_v18  ;;  %5705 = vmatmul.msk.f32.gmra.mxu0 %vm4205_vm7, %v10859_v18 }
 0xcf2   : >> { %5722 = vmatmul.msk.f32.gmra.mxu2 %vm4205_vm7, %v10722_v21  ;;  %5730 = vmatmul.msk.f32.gmra.mxu3 %vm4205_vm7, %v10722_v21 }
 0xcf8   : >> { %5714 = vmatmul.msk.f32.gmra.mxu1 %vm4205_vm7, %v10875_v1  ;;  %5706 = vmatmul.msk.f32.gmra.mxu0 %vm4205_vm7, %v10875_v1 }
 0xcfa   : >> { %5723 = vmatmul.msk.f32.gmra.mxu2 %vm4205_vm7, %v10748_v38  ;;  %5731 = vmatmul.msk.f32.gmra.mxu3 %vm4205_vm7, %v10748_v38 }
 0xd00   : >> { %5715 = vmatmul.msk.f32.gmra.mxu1 %vm4205_vm7, %v10891_v5  ;;  %5707 = vmatmul.msk.f32.gmra.mxu0 %vm4205_vm7, %v10891_v5 }
 0xd02   : >> { %5724 = vmatmul.msk.f32.gmra.mxu2 %vm4205_vm7, %v10775_v40  ;;  %5732 = vmatmul.msk.f32.gmra.mxu3 %vm4205_vm7, %v10775_v40 }
 0xd08   : >> { %5716 = vmatmul.msk.f32.gmra.mxu1 %vm4205_vm7, %v10904_v31  ;;  %5708 = vmatmul.msk.f32.gmra.mxu0 %vm4205_vm7, %v10904_v31 }
 0xd0a   : >> { %5759 = vmatmul.msk.f32.vlgmr.msra.gmra.mxu2 %vm4205_vm7, %v10794_v61  ;;  %5767 = vmatmul.msk.f32.vlgmr.msra.gmra.mxu3 %vm4205_vm7, %v10794_v61 }
 0xd0b   : >> { %v4353_v24 = vpop.f32.mrf.mxu2 }
 0xd0c   : >> { %v4288_v43 = vpop.f32.mrf.mxu1  ;;  %v4394_v10 = vpop.f32.mrf.mxu3 }
 0xd0d   : >> { %v4247_v47 = vpop.f32.mrf.mxu0  ;;  %v10914_v34 = vadd.f32 %v4394_v10, %v4288_v43 }
 0xd0e   : >> { %v10916_v49 = vadd.f32 %v4353_v24, %v4247_v47 }
 0xd10   : >> { %5741 = vmatmul.msk.f32.vlgmr.msra.gmra.mxu1 %vm4205_vm7, %v10569_v15  ;;  %5733 = vmatmul.msk.f32.vlgmr.msra.gmra.mxu0 %vm4205_vm7, %v10569_v15 }
 0xd12   : >> { %5760 = vmatmul.msk.f32.gmra.mxu2 %vm4205_vm7, %v10811_v36  ;;  %5768 = vmatmul.msk.f32.gmra.mxu3 %vm4205_vm7, %v10811_v36 }
 0xd14   : >> { %v4291_v33 = vpop.f32.mrf.mxu1  ;;  %v4356_v11 = vpop.f32.mrf.mxu2 }
 0xd15   : >> { %v4250_v12 = vpop.f32.mrf.mxu0  ;;  %v4397_v39 = vpop.f32.mrf.mxu3 }
 0xd16   : >> { %v10926_v41 = vadd.f32 %v4356_v11, %v4250_v12  ;;  %v10928_v29 = vadd.f32 %v4397_v39, %v4291_v33 }
 0xd18   : >> { %5742 = vmatmul.msk.f32.gmra.mxu1 %vm4205_vm7, %v10600_v14  ;;  %5734 = vmatmul.msk.f32.gmra.mxu0 %vm4205_vm7, %v10600_v14 }
 0xd1a   : >> { %5761 = vmatmul.msk.f32.gmra.mxu2 %vm4205_vm7, %v5695_v56  ;;  %5769 = vmatmul.msk.f32.gmra.mxu3 %vm4205_vm7, %v5695_v56 }
 0xd1c   : >> { %v4294_v15 = vpop.f32.mrf.mxu1  ;;  %v4359_v21 = vpop.f32.mrf.mxu2 }
 0xd1d   : >> { %v4253_v28 = vpop.f32.mrf.mxu0  ;;  %v4400_v30 = vpop.f32.mrf.mxu3 }
 0xd1e   : >> { %v10936_v7 = vadd.f32 %v4359_v21, %v4253_v28  ;;  %v10938_v27 = vadd.f32 %v4400_v30, %v4294_v15 }
 0xd20   : >> { %5743 = vmatmul.msk.f32.gmra.mxu1 %vm4205_vm7, %v10622_v62  ;;  %5735 = vmatmul.msk.f32.gmra.mxu0 %vm4205_vm7, %v10622_v62 }
 0xd22   : >> { %5762 = vmatmul.msk.f32.gmra.mxu2 %vm4205_vm7, %v5696_v60  ;;  %5770 = vmatmul.msk.f32.gmra.mxu3 %vm4205_vm7, %v5696_v60 }
 0xd24   : >> { %v4362_v14 = vpop.f32.mrf.mxu2  ;;  %v4297_v52 = vpop.f32.mrf.mxu1 }
 0xd25   : >> { %v4403_v6 = vpop.f32.mrf.mxu3  ;;  %v4256_v26 = vpop.f32.mrf.mxu0 }
 0xd26   : >> { %v10946_v38 = vadd.f32 %v4403_v6, %v4297_v52  ;;  %v10948_v16 = vadd.f32 %v4362_v14, %v4256_v26 }
 0xd28   : >> { %5744 = vmatmul.msk.f32.gmra.mxu1 %vm4205_vm7, %v10643_v54  ;;  %5736 = vmatmul.msk.f32.gmra.mxu0 %vm4205_vm7, %v10643_v54 }
 0xd2a   : >> { %5763 = vmatmul.msk.f32.gmra.mxu2 %vm4205_vm7, %v10859_v18  ;;  %5771 = vmatmul.msk.f32.gmra.mxu3 %vm4205_vm7, %v10859_v18 }
 0xd2c   : >> { %v4300_v62 = vpop.f32.mrf.mxu1  ;;  %v4365_v19 = vpop.f32.mrf.mxu2 }
 0xd2d   : >> { %v4259_v44 = vpop.f32.mrf.mxu0  ;;  %v4406_v63 = vpop.f32.mrf.mxu3 }
 0xd2e   : >> { %v10958_v53 = vadd.f32 %v4365_v19, %v4259_v44  ;;  %v4407_v32 = vadd.f32 %v4406_v63, %v4300_v62 }
 0xd30   : >> { %5745 = vmatmul.msk.f32.gmra.mxu1 %vm4205_vm7, %v10671_v51  ;;  %5737 = vmatmul.msk.f32.gmra.mxu0 %vm4205_vm7, %v10671_v51 }
 0xd32   : >> { %5764 = vmatmul.msk.f32.gmra.mxu2 %vm4205_vm7, %v10875_v1  ;;  %5772 = vmatmul.msk.f32.gmra.mxu3 %vm4205_vm7, %v10875_v1 }
 0xd34   : >> { %v4368_v13 = vpop.f32.mrf.mxu2 }
 0xd35   : >> { %v4303_v54 = vpop.f32.mrf.mxu1  ;;  %v4262_v40 = vpop.f32.mrf.mxu0 }
 0xd36   : >> { %v4409_v46 = vpop.f32.mrf.mxu3  ;;  %v4369_v17 = vadd.f32 %v4368_v13, %v4262_v40  ;;  %v4636_v40 = vpop.permute.xlu2 %4635 }
 0xd37   : >> { %v4410_v55 = vadd.f32 %v4409_v46, %v4303_v54 }
 0xd38   : >> { %5746 = vmatmul.msk.f32.gmra.mxu1 %vm4205_vm7, %v10700_v20  ;;  %5738 = vmatmul.msk.f32.gmra.mxu0 %vm4205_vm7, %v10700_v20 }
 0xd3a   : >> { %5765 = vmatmul.msk.f32.gmra.mxu2 %vm4205_vm7, %v10891_v5  ;;  %5773 = vmatmul.msk.f32.gmra.mxu3 %vm4205_vm7, %v10891_v5 }
 0xd3d   : >> { %v4306_v51 = vpop.f32.mrf.mxu1  ;;  %v4371_v4 = vpop.f32.mrf.mxu2 }
 0xd3e   : >> { %v4265_v8 = vpop.f32.mrf.mxu0  ;;  %v4412_v3 = vpop.f32.mrf.mxu3 }
 0xd3f   : >> { %v4372_v45 = vadd.f32 %v4371_v4, %v4265_v8  ;;  %v4413_v42 = vadd.f32 %v4412_v3, %v4306_v51 }
 0xd40   : >> { %5747 = vmatmul.msk.f32.gmra.mxu1 %vm4205_vm7, %v10730_v9  ;;  %5739 = vmatmul.msk.f32.gmra.mxu0 %vm4205_vm7, %v10730_v9 }
 0xd42   : >> { %5766 = vmatmul.msk.f32.gmra.mxu2 %vm4205_vm7, %v10904_v31  ;;  %5774 = vmatmul.msk.f32.gmra.mxu3 %vm4205_vm7, %v10904_v31 }
 0xd45   : >> { %v4309_v20 = vpop.f32.mrf.mxu1  ;;  %v4374_v58 = vpop.f32.mrf.mxu2 }
 0xd46   : >> { %v4268_v61 = vpop.f32.mrf.mxu0  ;;  %v4415_v23 = vpop.f32.mrf.mxu3 }
 0xd47   : >> { %v4375_v48 = vadd.f32 %v4374_v58, %v4268_v61  ;;  %v4416_v37 = vadd.f32 %v4415_v23, %v4309_v20 }
 0xd48   : >> { %5748 = vmatmul.msk.f32.gmra.mxu1 %vm4205_vm7, %v10756_v0  ;;  %5740 = vmatmul.msk.f32.gmra.mxu0 %vm4205_vm7, %v10756_v0 }
 0xd4d   : >> { %v4585_v59 = vpop.f32.mrf.mxu1  ;;  %v4754_v9 = vpop.f32.mrf.mxu2 }
 0xd4e   : >> { %v4610_v35 = vadd.f32 %v4585_v59, %v10914_v34  ;;  %v4544_v36 = vpop.f32.mrf.mxu0  ;;  %v4795_v50 = vpop.f32.mrf.mxu3 }
 0xd4f   : >> { %v4609_v56 = vadd.f32 %v4544_v36, %v10916_v49 }
 0xd50   : >> { %v4674_v46 = vadd.f32 %v4636_v40, %v4610_v35 }
 0xd51   : >> { %v4673_v51 = vadd.f32 %v4636_v40, %v4609_v56 }
 0xd52   : >> { %v4706_v58 = vmul.f32 0.01, %v4674_v46  ;;  %vm4690_vm10 = vcmp.gt.f32.partialorder %v4674_v46, 0.0 }
 0xd53   : >> { %v4705_v23 = vmul.f32 0.01, %v4673_v51  ;;  %vm4689_vm0 = vcmp.gt.f32.partialorder %v4673_v51, 0.0 }
 0xd54   : >> { %v4722_v56 = vsel %vm4690_vm10, %v4674_v46, %v4706_v58 }
 0xd55   : >> { %v4588_v60 = vpop.f32.mrf.mxu1  ;;  %v10990_v57 = vpop.f32.mrf.mxu2 }
 0xd56   : >> { %v10993_v22 = vadd.f32 %v4588_v60, %v10928_v29  ;;  %v4547_v18 = vpop.f32.mrf.mxu0  ;;  %v10995_v25 = vpop.f32.mrf.mxu3 }
 0xd57   : >> { %v10998_v1 = vadd.f32 %v4547_v18, %v10926_v41 }
 0xd5d   : >> { %v4591_v0 = vpop.f32.mrf.mxu1  ;;  %v11000_v2 = vpop.f32.mrf.mxu2 }
 0xd5e   : >> { %v11003_v5 = vadd.f32 %v4591_v0, %v10938_v27  ;;  %v4550_v31 = vpop.f32.mrf.mxu0  ;;  %v11005_v24 = vpop.f32.mrf.mxu3 }
 0xd5f   : >> { %v11008_v43 = vadd.f32 %v4550_v31, %v10936_v7 }
 0xd65   : >> { %v4594_v10 = vpop.f32.mrf.mxu1  ;;  %v11010_v47 = vpop.f32.mrf.mxu2 }
 0xd66   : >> { %v11013_v34 = vadd.f32 %v4594_v10, %v10946_v38  ;;  %v4553_v49 = vpop.f32.mrf.mxu0  ;;  %v11015_v33 = vpop.f32.mrf.mxu3  ;;  %v4721_v10 = vsel %vm4689_vm0, %v4673_v51, %v4705_v23 }
 0xd67   : >> { %v11018_v11 = vadd.f32 %v4553_v49, %v10948_v16 }
 0xd6d   : >> { %v4597_v12 = vpop.f32.mrf.mxu1  ;;  %v11020_v39 = vpop.f32.mrf.mxu2 }
 0xd6e   : >> { %v11022_v41 = vadd.f32 %v4597_v12, %v4407_v32  ;;  %v4556_v29 = vpop.f32.mrf.mxu0  ;;  %v11024_v15 = vpop.f32.mrf.mxu3 }
 0xd6f   : >> { %v11027_v21 = vadd.f32 %v4556_v29, %v10958_v53 }
 0xd75   : >> { %v4600_v28 = vpop.f32.mrf.mxu1  ;;  %v11029_v30 = vpop.f32.mrf.mxu2 }
 0xd76   : >> { %v11031_v7 = vadd.f32 %v4600_v28, %v4410_v55  ;;  %v4559_v27 = vpop.f32.mrf.mxu0  ;;  %v11033_v14 = vpop.f32.mrf.mxu3 }
 0xd77   : >> { %v11035_v52 = vadd.f32 %v4559_v27, %v4369_v17 }
 0xd7d   : >> { %v4603_v6 = vpop.f32.mrf.mxu1  ;;  %v11037_v26 = vpop.f32.mrf.mxu2 }
 0xd7e   : >> { %v11039_v38 = vadd.f32 %v4603_v6, %v4413_v42  ;;  %v4562_v16 = vpop.f32.mrf.mxu0  ;;  %v11041_v62 = vpop.f32.mrf.mxu3 }
 0xd7f   : >> { %v11043_v19 = vadd.f32 %v4562_v16, %v4372_v45 }
 0xd85   : >> { %v4606_v44 = vpop.f32.mrf.mxu1  ;;  %v11045_v63 = vpop.f32.mrf.mxu2 }
 0xd86   : >> { %v11047_v53 = vadd.f32 %v4606_v44, %v4416_v37  ;;  %v4565_v32 = vpop.f32.mrf.mxu0  ;;  %v11049_v54 = vpop.f32.mrf.mxu3 }
 0xd87   : >> { %v11051_v13 = vadd.f32 %v4565_v32, %v4375_v48  ;;  %v4641_v37 = vpop.permute.xlu0 %4640 }
 0xd88   : >> { %v4675_v49 = vadd.f32 %v4641_v37, %v10998_v1 }
 0xd8a   : >> { %v4707_v1 = vmul.f32 0.01, %v4675_v49  ;;  %vm4691_vm3 = vcmp.gt.f32.partialorder %v4675_v49, 0.0 }
 0xd8c   : >> { %v4723_v58 = vsel %vm4691_vm3, %v4675_v49, %v4707_v1 }
 0xd8d   : >> { %v4877_v17 = vpop.f32.mrf.mxu1  ;;  %v4994_v55 = vpop.f32.mrf.mxu2 }
 0xd8e   : >> { %v4878_v4 = vadd.f32 %v4877_v17, %v4795_v50  ;;  %v4836_v8 = vpop.f32.mrf.mxu0  ;;  %v5035_v3 = vpop.f32.mrf.mxu3  ;;  %v4676_v50 = vadd.f32 %v4641_v37, %v10993_v22 }
 0xd8f   : >> { %v4837_v45 = vadd.f32 %v4836_v8, %v4754_v9  ;;  %v4646_v22 = vpop.permute.xlu1 %4645 }
 0xd90   : >> { %v5060_v42 = vadd.f32 %v5035_v3, %v4878_v4  ;;  %v4708_v44 = vmul.f32 0.01, %v4676_v50  ;;  %vm4692_vm9 = vcmp.gt.f32.partialorder %v4676_v50, 0.0  ;;  %v4677_v51 = vadd.f32 %v4646_v22, %v11008_v43  ;;  %v4651_v43 = vpop.permute.xlu2 %4650 }
 0xd91   : >> { %v5059_v20 = vadd.f32 %v4994_v55, %v4837_v45 }
 0xd92   : >> { %v5076_v61 = vadd.f32 %v5060_v42, %v4636_v40  ;;  %v4724_v45 = vsel %vm4692_vm9, %v4676_v50, %v4708_v44  ;;  %vm4693_vm5 = vcmp.gt.f32.partialorder %v4677_v51, 0.0 }
 0xd93   : >> { %v5075_v59 = vadd.f32 %v5059_v20, %v4636_v40  ;;  %v4678_v40 = vadd.f32 %v4646_v22, %v11003_v5 }
 0xd94   : >> { %vm5092_vm11 = vcmp.gt.f32.partialorder %v5076_v61, 0.0  ;;  %v5108_v48 = vmul.f32 0.01, %v5076_v61 }
 0xd95   : >> { %vm5091_vm4 = vcmp.gt.f32.partialorder %v5075_v59, 0.0  ;;  %v5107_v35 = vmul.f32 0.01, %v5075_v59  ;;  %v4880_v36 = vpop.f32.mrf.mxu1  ;;  %v4997_v60 = vpop.f32.mrf.mxu2  ;;  %vm4694_vm2 = vcmp.gt.f32.partialorder %v4678_v40, 0.0 }
 0xd96   : >> { %v4881_v9 = vadd.f32 %v4880_v36, %v10995_v25  ;;  %v4839_v18 = vpop.f32.mrf.mxu0  ;;  %v5038_v0 = vpop.f32.mrf.mxu3  ;;  %v5124_v31 = vsel %vm5092_vm11, %v5076_v61, %v5108_v48  ;;  %v4710_v48 = vmul.f32 0.01, %v4678_v40 }
 0xd97   : >> { %v4840_v12 = vadd.f32 %v4839_v18, %v10990_v57  ;;  %v11057_v29 = vmax.f32 %v4722_v56, %v5124_v31  ;;  %v5123_v28 = vsel %vm5091_vm4, %v5075_v59, %v5107_v35  ;;  %v4680_v18 = vadd.f32 %v4651_v43, %v11013_v34  ;;  %v4656_v1 = vpop.permute.xlu1 %4655 }
 0xd98   : >> { %v5062_v27 = vadd.f32 %v5038_v0, %v4881_v9  ;;  %v11059_v6 = vmax.f32 %v4721_v10, %v5123_v28  ;;  %v4726_v9 = vsel %vm4694_vm2, %v4678_v40, %v4710_v48  ;;  %v4679_v28 = vadd.f32 %v4651_v43, %v11018_v11 }
 0xd99   : >> { %v5061_v16 = vadd.f32 %v4997_v60, %v4840_v12  ;;  %5173 = vrot.lane.b32.xlu0 %v11057_v29, %s6513_s30  ;;  %v4712_v34 = vmul.f32 0.01, %v4680_v18  ;;  %vm4696_vm7 = vcmp.gt.f32.partialorder %v4680_v18, 0.0  ;;  %v4682_v40 = vadd.f32 %v4656_v1, %v11022_v41 }
 0xd9a   : >> { %v5078_v25 = vadd.f32 %v5062_v27, %v4641_v37  ;;  %5171 = vrot.lane.b32.xlu2 %v11059_v6, %s6513_s30  ;;  %v4711_v11 = vmul.f32 0.01, %v4679_v28  ;;  %vm4695_vm0 = vcmp.gt.f32.partialorder %v4679_v28, 0.0 }
 0xd9b   : >> { %v5077_v32 = vadd.f32 %v5061_v16, %v4641_v37  ;;  %vm4698_vm4 = vcmp.gt.f32.partialorder %v4682_v40, 0.0 }
 0xd9c   : >> { %vm5094_vm1 = vcmp.gt.f32.partialorder %v5078_v25, 0.0  ;;  %v5110_v57 = vmul.f32 0.01, %v5078_v25 }
 0xd9d   : >> { %vm5093_vm15 = vcmp.gt.f32.partialorder %v5077_v32, 0.0  ;;  %v5109_v46 = vmul.f32 0.01, %v5077_v32  ;;  %v4883_v17 = vpop.f32.mrf.mxu1  ;;  %v5000_v55 = vpop.f32.mrf.mxu2 }
 0xd9e   : >> { %v4884_v4 = vadd.f32 %v4883_v17, %v11005_v24  ;;  %v4842_v8 = vpop.f32.mrf.mxu0  ;;  %v5041_v3 = vpop.f32.mrf.mxu3  ;;  %v5126_v42 = vsel %vm5094_vm1, %v5078_v25, %v5110_v57  ;;  %v4709_v24 = vmul.f32 0.01, %v4677_v51 }
 0xd9f   : >> { %v4843_v20 = vadd.f32 %v4842_v8, %v11000_v2  ;;  %v5125_v61 = vsel %vm5093_vm15, %v5077_v32, %v5109_v46  ;;  %v11069_v23 = vmax.f32 %v4724_v45, %v5126_v42  ;;  %v4728_v45 = vsel %vm4696_vm7, %v4680_v18, %v4712_v34 }
 0xda0   : >> { %v5064_v37 = vadd.f32 %v5041_v3, %v4884_v4  ;;  %v11071_v5 = vmax.f32 %v4723_v58, %v5125_v61  ;;  %v4725_v49 = vsel %vm4693_vm5, %v4677_v51, %v4709_v24  ;;  %v4681_v51 = vadd.f32 %v4656_v1, %v11027_v21  ;;  %v4661_v21 = vpop.permute.xlu2 %4660 }
 0xda1   : >> { %v5063_v59 = vadd.f32 %v5000_v55, %v4843_v20  ;;  %v4727_v61 = vsel %vm4695_vm0, %v4679_v28, %v4711_v11 }
 0xda2   : >> { %v5080_v35 = vadd.f32 %v5064_v37, %v4646_v22  ;;  %5175 = vrot.lane.b32.xlu1 %v11071_v5, %s6513_s30  ;;  %5177 = vrot.lane.b32.xlu2 %v11069_v23, %s6513_s30  ;;  %vm4697_vm9 = vcmp.gt.f32.partialorder %v4681_v51, 0.0 }
 0xda3   : >> { %v5079_v2 = vadd.f32 %v5063_v59, %v4646_v22 }
 0xda4   : >> { %vm5096_vm6 = vcmp.gt.f32.partialorder %v5080_v35, 0.0  ;;  %v5112_v36 = vmul.f32 0.01, %v5080_v35 }
 0xda5   : >> { %vm5095_vm8 = vcmp.gt.f32.partialorder %v5079_v2, 0.0  ;;  %v5111_v60 = vmul.f32 0.01, %v5079_v2  ;;  %v4886_v56 = vpop.f32.mrf.mxu1  ;;  %v5003_v50 = vpop.f32.mrf.mxu2 }
 0xda6   : >> { %v4887_v0 = vadd.f32 %v4886_v56, %v11015_v33  ;;  %v4845_v31 = vpop.f32.mrf.mxu0  ;;  %v5044_v10 = vpop.f32.mrf.mxu3  ;;  %v5128_v12 = vsel %vm5096_vm6, %v5080_v35, %v5112_v36  ;;  %v4714_v35 = vmul.f32 0.01, %v4682_v40 }
 0xda7   : >> { %v4846_v27 = vadd.f32 %v4845_v31, %v11010_v47  ;;  %v5127_v16 = vsel %vm5095_vm8, %v5079_v2, %v5111_v60  ;;  %v11081_v22 = vmax.f32 %v4726_v9, %v5128_v12 }
 0xda8   : >> { %v5066_v25 = vadd.f32 %v5044_v10, %v4887_v0  ;;  %v11083_v44 = vmax.f32 %v4725_v49, %v5127_v16  ;;  %v4730_v56 = vsel %vm4698_vm4, %v4682_v40, %v4714_v35  ;;  %v4683_v49 = vadd.f32 %v4661_v21, %v11035_v52 }
 0xda9   : >> { %v5065_v32 = vadd.f32 %v5003_v50, %v4846_v27  ;;  %v4684_v50 = vadd.f32 %v4661_v21, %v11031_v7 }
 0xdaa   : >> { %v5082_v57 = vadd.f32 %v5066_v25, %v4651_v43  ;;  %5179 = vrot.lane.b32.xlu0 %v11083_v44, %s6513_s30  ;;  %5181 = vrot.lane.b32.xlu1 %v11081_v22, %s6513_s30  ;;  %v4715_v52 = vmul.f32 0.01, %v4683_v49  ;;  %vm4699_vm5 = vcmp.gt.f32.partialorder %v4683_v49, 0.0 }
 0xdab   : >> { %v5081_v33 = vadd.f32 %v5065_v32, %v4651_v43  ;;  %v4716_v7 = vmul.f32 0.01, %v4684_v50  ;;  %vm4700_vm15 = vcmp.gt.f32.partialorder %v4684_v50, 0.0 }
 0xdac   : >> { %vm5098_vm10 = vcmp.gt.f32.partialorder %v5082_v57, 0.0  ;;  %v5114_v47 = vmul.f32 0.01, %v5082_v57 }
 0xdad   : >> { %vm5097_vm11 = vcmp.gt.f32.partialorder %v5081_v33, 0.0  ;;  %v5113_v46 = vmul.f32 0.01, %v5081_v33  ;;  %v4889_v17 = vpop.f32.mrf.mxu1  ;;  %v5006_v55 = vpop.f32.mrf.mxu2 }
 0xdae   : >> { %v4890_v4 = vadd.f32 %v4889_v17, %v11024_v15  ;;  %v4848_v8 = vpop.f32.mrf.mxu0  ;;  %v5047_v3 = vpop.f32.mrf.mxu3  ;;  %v5130_v42 = vsel %vm5098_vm10, %v5082_v57, %v5114_v47  ;;  %v4713_v15 = vmul.f32 0.01, %v4681_v51 }
 0xdaf   : >> { %v4849_v20 = vadd.f32 %v4848_v8, %v11020_v39  ;;  %v11093_v58 = vmax.f32 %v4728_v45, %v5130_v42  ;;  %v5129_v37 = vsel %vm5097_vm11, %v5081_v33, %v5113_v46 }
 0xdb0   : >> { %v5068_v59 = vadd.f32 %v5047_v3, %v4890_v4  ;;  %v11095_v41 = vmax.f32 %v4727_v61, %v5129_v37  ;;  %v4729_v31 = vsel %vm4697_vm9, %v4681_v51, %v4713_v15  ;;  %v4732_v51 = vsel %vm4700_vm15, %v4684_v50, %v4716_v7 }
 0xdb1   : >> { %v5067_v48 = vadd.f32 %v5006_v55, %v4849_v20  ;;  %v4731_v3 = vsel %vm4699_vm5, %v4683_v49, %v4715_v52 }
 0xdb2   : >> { %v5084_v24 = vadd.f32 %v5068_v59, %v4656_v1  ;;  %5185 = vrot.lane.b32.xlu0 %v11093_v58, %s6513_s30  ;;  %5183 = vrot.lane.b32.xlu2 %v11095_v41, %s6513_s30 }
 0xdb3   : >> { %v5083_v39 = vadd.f32 %v5067_v48, %v4656_v1  ;;  %v4666_v1 = vpop.permute.xlu0 %4665 }
 0xdb4   : >> { %vm5100_vm1 = vcmp.gt.f32.partialorder %v5084_v24, 0.0  ;;  %v5116_v43 = vmul.f32 0.01, %v5084_v24  ;;  %v4686_v34 = vadd.f32 %v4666_v1, %v11039_v38  ;;  %v4685_v40 = vadd.f32 %v4666_v1, %v11043_v19  ;;  %v4671_v19 = vpop.permute.xlu1 %4670 }
 0xdb5   : >> { %vm5099_vm3 = vcmp.gt.f32.partialorder %v5083_v39, 0.0  ;;  %v5115_v2 = vmul.f32 0.01, %v5083_v39  ;;  %v4892_v36 = vpop.f32.mrf.mxu1  ;;  %v5009_v60 = vpop.f32.mrf.mxu2  ;;  %v4687_v50 = vadd.f32 %v4671_v19, %v11051_v13 }
 0xdb6   : >> { %v4893_v9 = vadd.f32 %v4892_v36, %v11033_v14  ;;  %v4851_v18 = vpop.f32.mrf.mxu0  ;;  %v5050_v0 = vpop.f32.mrf.mxu3  ;;  %v5132_v10 = vsel %vm5100_vm1, %v5084_v24, %v5116_v43  ;;  %v4718_v37 = vmul.f32 0.01, %v4686_v34  ;;  %vm4702_vm8 = vcmp.gt.f32.partialorder %v4686_v34, 0.0 }
 0xdb7   : >> { %v4852_v12 = vadd.f32 %v4851_v18, %v11029_v30  ;;  %v5131_v28 = vsel %vm5099_vm3, %v5083_v39, %v5115_v2  ;;  %v11105_v27 = vmax.f32 %v4730_v56, %v5132_v10  ;;  %vm4701_vm7 = vcmp.gt.f32.partialorder %v4685_v40, 0.0 }
 0xdb8   : >> { %v5070_v16 = vadd.f32 %v5050_v0, %v4893_v9  ;;  %v11107_v25 = vmax.f32 %v4729_v31, %v5131_v28  ;;  %v4688_v39 = vadd.f32 %v4671_v19, %v11047_v53  ;;  %v4719_v13 = vmul.f32 0.01, %v4687_v50 }
 0xdb9   : >> { %v5069_v32 = vadd.f32 %v5009_v60, %v4852_v12  ;;  %vm4703_vm9 = vcmp.gt.f32.partialorder %v4687_v50, 0.0  ;;  %vm5281_vm3 = vcmask 105472  }
 0xdba   : >> { %v5086_v57 = vadd.f32 %v5070_v16, %v4661_v21  ;;  %5187 = vrot.lane.b32.xlu1 %v11107_v25, %s6513_s30  ;;  %5189 = vrot.lane.b32.xlu2 %v11105_v27, %s6513_s30  ;;  %v4720_v53 = vmul.f32 0.01, %v4688_v39  ;;  %vm4704_vm11 = vcmp.gt.f32.partialorder %v4688_v39, 0.0 }
 0xdbb   : >> { %v5085_v14 = vadd.f32 %v5069_v32, %v4661_v21  ;;  %v4734_v21 = vsel %vm4702_vm8, %v4686_v34, %v4718_v37 }
 0xdbc   : >> { %vm5102_vm2 = vcmp.gt.f32.partialorder %v5086_v57, 0.0  ;;  %v5118_v30 = vmul.f32 0.01, %v5086_v57  ;;  %v4736_v16 = vsel %vm4704_vm11, %v4688_v39, %v4720_v53 }
 0xdbd   : >> { %vm5101_vm6 = vcmp.gt.f32.partialorder %v5085_v14, 0.0  ;;  %v5117_v33 = vmul.f32 0.01, %v5085_v14  ;;  %v4895_v11 = vpop.f32.mrf.mxu1  ;;  %v5012_v47 = vpop.f32.mrf.mxu2 }
 0xdbe   : >> { %v4896_v46 = vadd.f32 %v4895_v11, %v11041_v62  ;;  %v4854_v17 = vpop.f32.mrf.mxu0  ;;  %v5053_v55 = vpop.f32.mrf.mxu3  ;;  %v5134_v4 = vsel %vm5102_vm2, %v5086_v57, %v5118_v30  ;;  %v4717_v62 = vmul.f32 0.01, %v4685_v40  ;;  %v5251_v30 = vld [vmem:[%s5250_s19] ss:$8 sm:$0x3] }
 0xdbf   : >> { %v4855_v8 = vadd.f32 %v4854_v17, %v11037_v26  ;;  %v5133_v45 = vsel %vm5101_vm6, %v5085_v14, %v5117_v33  ;;  %v11117_v42 = vmax.f32 %v4732_v51, %v5134_v4  ;;  %v11150_v33 = vperm.slane %v5251_v30, 0 }
 0xdc0   : >> { %v5072_v20 = vadd.f32 %v5053_v55, %v4896_v46  ;;  %v11119_v38 = vmax.f32 %v4731_v3, %v5133_v45  ;;  %v4733_v56 = vsel %vm4701_vm7, %v4685_v40, %v4717_v62  ;;  %v11152_v11 = vperm.slane %v5251_v30, 1 }
 0xdc1   : >> { %v5071_v61 = vadd.f32 %v5012_v47, %v4855_v8 }
 0xdc2   : >> { %v5088_v59 = vadd.f32 %v5072_v20, %v4666_v1  ;;  %5191 = vrot.lane.b32.xlu0 %v11119_v38, %s6513_s30  ;;  %5193 = vrot.lane.b32.xlu1 %v11117_v42, %s6513_s30 }
 0xdc3   : >> { %v5087_v26 = vadd.f32 %v5071_v61, %v4666_v1  ;;  %v4735_v1 = vsel %vm4703_vm9, %v4687_v50, %v4719_v13 }
 0xdc4   : >> { %vm5104_vm10 = vcmp.gt.f32.partialorder %v5088_v59, 0.0  ;;  %v5120_v48 = vmul.f32 0.01, %v5088_v59 }
 0xdc5   : >> { %vm5103_vm0 = vcmp.gt.f32.partialorder %v5087_v26, 0.0  ;;  %v5119_v35 = vmul.f32 0.01, %v5087_v26  ;;  %v4898_v24 = vpop.f32.mrf.mxu1  ;;  %v5015_v15 = vpop.f32.mrf.mxu2 }
 0xdc6   : >> { %v4899_v43 = vadd.f32 %v4898_v24, %v11049_v54  ;;  %v4857_v2 = vpop.f32.mrf.mxu0  ;;  %v5056_v36 = vpop.f32.mrf.mxu3  ;;  %v5136_v60 = vsel %vm5104_vm10, %v5088_v59, %v5120_v48 }
 0xdc7   : >> { %v4858_v9 = vadd.f32 %v4857_v2, %v11045_v63  ;;  %v11129_v18 = vmax.f32 %v4734_v21, %v5136_v60  ;;  %v5135_v0 = vsel %vm5103_vm0, %v5087_v26, %v5119_v35 }
 0xdc8   : >> { %v5074_v31 = vadd.f32 %v5056_v36, %v4899_v43  ;;  %v11131_v10 = vmax.f32 %v4733_v56, %v5135_v0 }
 0xdc9   : >> { %v5073_v49 = vadd.f32 %v5015_v15, %v4858_v9 }
 0xdca   : >> { %v5090_v12 = vadd.f32 %v5074_v31, %v4671_v19  ;;  %5197 = vrot.lane.b32.xlu0 %v11129_v18, %s6513_s30  ;;  %5195 = vrot.lane.b32.xlu2 %v11131_v10, %s6513_s30 }
 0xdcb   : >> { %v5089_v54 = vadd.f32 %v5073_v49, %v4671_v19 }
 0xdcc   : >> { %vm5106_vm4 = vcmp.gt.f32.partialorder %v5090_v12, 0.0  ;;  %v5122_v63 = vmul.f32 0.01, %v5090_v12 }
 0xdcd   : >> { %vm5105_vm1 = vcmp.gt.f32.partialorder %v5089_v54, 0.0  ;;  %v5121_v28 = vmul.f32 0.01, %v5089_v54 }
 0xdce   : >> { %v5138_v32 = vsel %vm5106_vm4, %v5090_v12, %v5122_v63 }
 0xdcf   : >> { %v5137_v57 = vsel %vm5105_vm1, %v5089_v54, %v5121_v28  ;;  %v11137_v7 = vmax.f32 %v4736_v16, %v5138_v32 }
 0xdd0   : >> { %v11139_v14 = vmax.f32 %v4735_v1, %v5137_v57 }
 0xdd2   : >> { %5199 = vrot.lane.b32.xlu1 %v11139_v14, %s6513_s30  ;;  %5201 = vrot.lane.b32.xlu2 %v11137_v7, %s6513_s30 }
 0xdf4   : >> { %v5172_v52 = vpop.permute.xlu2 %5171 }
 0xdfc   : >> { %v5178_v17 = vpop.permute.xlu2 %5177 }
 0xdfd   : >> { %v5230_v8 = vmax.f32 %v11069_v23, %v5178_v17 }
 0xdff   : >> { %v5268_v20 = vmul.f32 %v11152_v11, %v5230_v8 }
 0xe01   : >> { %v5286_v37 = vsel %vm5281_vm3, %v5268_v20, 0.0  ;;  %v5252_v20 = vld [vmem:[#allocation5] sm:$0xff] }
 0xe0b   : >> { %v5174_v34 = vpop.permute.xlu0 %5173 }
 0xe0c   : >> { %v5203_v47 = vsel %vm2642_vm14, %v5172_v52, %v5174_v34  ;;  %v5228_v40 = vmax.f32 %v11057_v29, %v5174_v34  ;;  %v5184_v62 = vpop.permute.xlu2 %5183 }
 0xe0d   : >> { %v5227_v46 = vmax.f32 %v11059_v6, %v5203_v47 }
 0xe0e   : >> { %v5266_v55 = vmul.f32 %v11152_v11, %v5228_v40 }
 0xe0f   : >> { %v5265_v51 = vmul.f32 %v11150_v33, %v5227_v46 }
 0xe10   : >> { %v5282_v4 = vsel %vm5281_vm3, %v5266_v55, 0.0 }
 0xe11   : >> { %v5283_v3 = vadd.f32 %v5282_v4, %v5265_v51 }
 0xe13   : >> { %5284 = vadd.xlane.f32.xlu0 %v5283_v3 }
 0xe14   : >> { %v5176_v45 = vpop.permute.xlu1 %5175  ;;  %v5190_v36 = vpop.permute.xlu2 %5189 }
 0xe15   : >> { %v5204_v61 = vsel %vm2642_vm14, %v5176_v45, %v5178_v17  ;;  %v5236_v56 = vmax.f32 %v11105_v27, %v5190_v36 }
 0xe16   : >> { %v5229_v29 = vmax.f32 %v11071_v5, %v5204_v61 }
 0xe17   : >> { %v5274_v31 = vmul.f32 %v11152_v11, %v5236_v56 }
 0xe18   : >> { %v5267_v6 = vmul.f32 %v11150_v33, %v5229_v29  ;;  %v5253_v29 = vld [vmem:[#allocation5 + $0x8] sm:$0xff] }
 0xe1a   : >> { %v5287_v59 = vadd.f32 %v5286_v37, %v5267_v6 }
 0xe1c   : >> { %v5180_v19 = vpop.permute.xlu0 %5179  ;;  %v5182_v26 = vpop.permute.xlu1 %5181  ;;  %5288 = vadd.xlane.f32.xlu1 %v5287_v59 }
 0xe1d   : >> { %v5205_v23 = vsel %vm2642_vm14, %v5180_v19, %v5182_v26  ;;  %v5232_v48 = vmax.f32 %v11081_v22, %v5182_v26  ;;  %v5256_v26 = vld [vmem:[#allocation5 + $0x20] sm:$0xff] }
 0xe1e   : >> { %v5231_v35 = vmax.f32 %v11083_v44, %v5205_v23 }
 0xe1f   : >> { %v5270_v24 = vmul.f32 %v11152_v11, %v5232_v48 }
 0xe20   : >> { %v5269_v15 = vmul.f32 %v11150_v33, %v5231_v35  ;;  %v5257_v35 = vld [vmem:[#allocation5 + $0x28] sm:$0xff] }
 0xe21   : >> { %v5290_v5 = vsel %vm5281_vm3, %v5270_v24, 0.0 }
 0xe22   : >> { %v5291_v21 = vadd.f32 %v5290_v5, %v5269_v15  ;;  %v5258_v5 = vld [vmem:[#allocation5 + $0x30] sm:$0xff] }
 0xe24   : >> { %v5186_v39 = vpop.permute.xlu0 %5185  ;;  %5292 = vadd.xlane.f32.xlu2 %v5291_v21  ;;  %v5196_v54 = vpop.permute.xlu2 %5195 }
 0xe25   : >> { %v5206_v43 = vsel %vm2642_vm14, %v5184_v62, %v5186_v39  ;;  %v5234_v2 = vmax.f32 %v11093_v58, %v5186_v39 }
 0xe26   : >> { %v5233_v60 = vmax.f32 %v11095_v41, %v5206_v43  ;;  %v5298_v41 = vsel %vm5281_vm3, %v5274_v31, 0.0  ;;  %v5259_v43 = vld [vmem:[#allocation5 + $0x38] sm:$0xff] }
 0xe27   : >> { %v5272_v22 = vmul.f32 %v11152_v11, %v5234_v2 }
 0xe28   : >> { %v5271_v44 = vmul.f32 %v11150_v33, %v5233_v60 }
 0xe29   : >> { %v5294_v50 = vsel %vm5281_vm3, %v5272_v22, 0.0  ;;  %v6460_v22 = vld [vmem:[#allocation6] ss:$0 sm:$0xff] (%p4030_p6) }
 0xe2a   : >> { %v5295_v9 = vadd.f32 %v5294_v50, %v5271_v44 }
 0xe2c   : >> { %v5188_v0 = vpop.permute.xlu1 %5187  ;;  %5296 = vadd.xlane.f32.xlu2 %v5295_v9  ;;  %v5202_v47 = vpop.permute.xlu2 %5201 }
 0xe2d   : >> { %v5207_v49 = vsel %vm2642_vm14, %v5188_v0, %v5190_v36  ;;  %v5242_v46 = vmax.f32 %v11137_v7, %v5202_v47 }
 0xe2e   : >> { %v5235_v58 = vmax.f32 %v11107_v25, %v5207_v49 }
 0xe2f   : >> { %v5280_v4 = vmul.f32 %v11152_v11, %v5242_v46 }
 0xe30   : >> { %v5273_v12 = vmul.f32 %v11150_v33, %v5235_v58 }
 0xe32   : >> { %v5299_v53 = vadd.f32 %v5298_v41, %v5273_v12 }
 0xe34   : >> { %v5192_v13 = vpop.permute.xlu0 %5191  ;;  %v5194_v63 = vpop.permute.xlu1 %5193  ;;  %5300 = vadd.xlane.f32.xlu0 %v5299_v53 }
 0xe35   : >> { %v5208_v27 = vsel %vm2642_vm14, %v5192_v13, %v5194_v63  ;;  %v5238_v28 = vmax.f32 %v11117_v42, %v5194_v63 }
 0xe36   : >> { %v5237_v16 = vmax.f32 %v11119_v38, %v5208_v27 }
 0xe37   : >> { %v5276_v32 = vmul.f32 %v11152_v11, %v5238_v28 }
 0xe38   : >> { %v5275_v1 = vmul.f32 %v11150_v33, %v5237_v16 }
 0xe39   : >> { %v5302_v25 = vsel %vm5281_vm3, %v5276_v32, 0.0 }
 0xe3a   : >> { %v5303_v57 = vadd.f32 %v5302_v25, %v5275_v1 }
 0xe3c   : >> { %v5198_v52 = vpop.permute.xlu0 %5197  ;;  %5304 = vadd.xlane.f32.xlu1 %v5303_v57 }
 0xe3d   : >> { %v5209_v30 = vsel %vm2642_vm14, %v5196_v54, %v5198_v52  ;;  %v5240_v34 = vmax.f32 %v11129_v18, %v5198_v52 }
 0xe3e   : >> { %v5239_v40 = vmax.f32 %v11131_v10, %v5209_v30  ;;  %v5310_v10 = vsel %vm5281_vm3, %v5280_v4, 0.0 }
 0xe3f   : >> { %v5278_v42 = vmul.f32 %v11152_v11, %v5240_v34  ;;  %v5254_v11 = vld [vmem:[#allocation5 + $0x10] sm:$0xff] }
 0xe40   : >> { %v5277_v38 = vmul.f32 %v11150_v33, %v5239_v40 }
 0xe41   : >> { %v5306_v17 = vsel %vm5281_vm3, %v5278_v42, 0.0 }
 0xe42   : >> { %v5307_v55 = vadd.f32 %v5306_v17, %v5277_v38 }
 0xe44   : >> { %v5200_v51 = vpop.permute.xlu1 %5199  ;;  %5308 = vadd.xlane.f32.xlu2 %v5307_v55 }
 0xe45   : >> { %v5210_v8 = vsel %vm2642_vm14, %v5200_v51, %v5202_v47 }
 0xe46   : >> { %v5241_v18 = vmax.f32 %v11139_v14, %v5210_v8  ;;  %v5255_v14 = vld [vmem:[#allocation5 + $0x18] sm:$0xff] }
 0xe48   : >> { %v5279_v3 = vmul.f32 %v11150_v33, %v5241_v18 }
 0xe4a   : >> { %v5311_v45 = vadd.f32 %v5310_v10, %v5279_v3 }
 0xe4c   : >> { %5312 = vadd.xlane.f32.xlu0 %v5311_v45 }
 0xe86   : >> { %v5285_v61 = vpop.xlane.xlu0 %5284 }
 0xe87   : >> { %v5314_v7 = vadd.f32 %v5285_v61, %v5252_v20 }
 0xe89   : >> { %5322 = vst.msk [vmem:[#allocation5] sm:$0xff] %vm2211_vm12, %v5314_v7 }
 0xe8f   : >> { %v5289_v6 = vpop.xlane.xlu1 %5288 }
 0xe90   : >> { %v5315_v37 = vadd.f32 %v5289_v6, %v5253_v29  ;;  %v5330_v60 = vld [vmem:[#allocation5] sm:$0xff] (%p4030_p6) }
 0xe91   : > { %v5342_v9 = vadd.f32 (%p4030_p6), %v6460_v22, %v5330_v60 }
 0xe92   : >> { %5323 = vst.msk [vmem:[#allocation5 + $0x8] sm:$0xff] %vm2211_vm12, %v5315_v37 }
 0xe93   : > { %vm5350_vm15 = vcmp.gt.f32.partialorder (%p4030_p6), %v5342_v9, 0.0  ;;  %v5358_v27 = vmul.f32 (%p4030_p6), 0.01, %v5342_v9 }
 0xe95   : > { %v5366_v1 = vsel (%p4030_p6), %vm5350_vm15, %v5342_v9, %v5358_v27 }
 0xe96   : > { %5374 = vst.msk [vmem:[%s6579_s16] sm:$0xff] (%p4030_p6), %vm2211_vm12, %v5366_v1 }
 0xe97   : >> { %v5293_v59 = vpop.xlane.xlu2 %5292 }
 0xe98   : >> { %v5316_v62 = vadd.f32 %v5293_v59, %v5254_v11 }
 0xe99   : > { %v5331_v44 = vld [vmem:[#allocation5 + $0x8] sm:$0xff] (%p4030_p6) }
 0xe9a   : >> { %5324 = vst.msk [vmem:[#allocation5 + $0x10] sm:$0xff] %vm2211_vm12, %v5316_v62  ;;  %v5343_v0 = vadd.f32 (%p4030_p6), %v6460_v22, %v5331_v44 }
 0xe9c   : > { %vm5351_vm13 = vcmp.gt.f32.partialorder (%p4030_p6), %v5343_v0, 0.0  ;;  %v5359_v28 = vmul.f32 (%p4030_p6), 0.01, %v5343_v0 }
 0xe9e   : > { %v5367_v25 = vsel (%p4030_p6), %vm5351_vm13, %v5343_v0, %v5359_v28 }
 0xe9f   : >> { %v5297_v33 = vpop.xlane.xlu2 %5296  ;;  %5375 = vst.msk [vmem:[%s6579_s16 + $0x8] sm:$0xff] (%p4030_p6), %vm2211_vm12, %v5367_v25 }
 0xea0   : >> { %v5317_v19 = vadd.f32 %v5297_v33, %v5255_v14 }
 0xea1   : > { %v5332_v56 = vld [vmem:[#allocation5 + $0x10] sm:$0xff] (%p4030_p6) }
 0xea2   : >> { %5325 = vst.msk [vmem:[#allocation5 + $0x18] sm:$0xff] %vm2211_vm12, %v5317_v19  ;;  %v5344_v31 = vadd.f32 (%p4030_p6), %v6460_v22, %v5332_v56 }
 0xea4   : > { %vm5352_vm14 = vcmp.gt.f32.partialorder (%p4030_p6), %v5344_v31, 0.0  ;;  %v5360_v16 = vmul.f32 (%p4030_p6), 0.01, %v5344_v31 }
 0xea6   : > { %v5368_v52 = vsel (%p4030_p6), %vm5352_vm14, %v5344_v31, %v5360_v16 }
 0xea7   : >> { %v5301_v23 = vpop.xlane.xlu0 %5300  ;;  %5376 = vst.msk [vmem:[%s6579_s16 + $0x10] sm:$0xff] (%p4030_p6), %vm2211_vm12, %v5368_v52 }
 0xea8   : >> { %v5318_v48 = vadd.f32 %v5301_v23, %v5256_v26 }
 0xea9   : > { %v5333_v50 = vld [vmem:[#allocation5 + $0x18] sm:$0xff] (%p4030_p6) }
 0xeaa   : >> { %5326 = vst.msk [vmem:[#allocation5 + $0x20] sm:$0xff] %vm2211_vm12, %v5318_v48  ;;  %v5345_v49 = vadd.f32 (%p4030_p6), %v6460_v22, %v5333_v50 }
 0xeac   : > { %vm5353_vm2 = vcmp.gt.f32.partialorder (%p4030_p6), %v5345_v49, 0.0  ;;  %v5361_v32 = vmul.f32 (%p4030_p6), 0.01, %v5345_v49 }
 0xeae   : > { %v5369_v30 = vsel (%p4030_p6), %vm5353_vm2, %v5345_v49, %v5361_v32 }
 0xeaf   : >> { %v5305_v24 = vpop.xlane.xlu1 %5304  ;;  %5377 = vst.msk [vmem:[%s6579_s16 + $0x18] sm:$0xff] (%p4030_p6), %vm2211_vm12, %v5369_v30 }
 0xeb0   : >> { %v5319_v15 = vadd.f32 %v5305_v24, %v5257_v35 }
 0xeb1   : > { %v5334_v58 = vld [vmem:[#allocation5 + $0x20] sm:$0xff] (%p4030_p6) }
 0xeb2   : >> { %5327 = vst.msk [vmem:[#allocation5 + $0x28] sm:$0xff] %vm2211_vm12, %v5319_v15  ;;  %v5346_v53 = vadd.f32 (%p4030_p6), %v6460_v22, %v5334_v58 }
 0xeb4   : > { %vm5354_vm5 = vcmp.gt.f32.partialorder (%p4030_p6), %v5346_v53, 0.0  ;;  %v5362_v57 = vmul.f32 (%p4030_p6), 0.01, %v5346_v53 }
 0xeb6   : > { %v5370_v47 = vsel (%p4030_p6), %vm5354_vm5, %v5346_v53, %v5362_v57 }
 0xeb7   : >> { %v5309_v21 = vpop.xlane.xlu2 %5308  ;;  %5378 = vst.msk [vmem:[%s6579_s16 + $0x20] sm:$0xff] (%p4030_p6), %vm2211_vm12, %v5370_v47 }
 0xeb8   : >> { %v5320_v39 = vadd.f32 %v5309_v21, %v5258_v5 }
 0xeb9   : > { %v5335_v12 = vld [vmem:[#allocation5 + $0x28] sm:$0xff] (%p4030_p6) }
 0xeba   : >> { %5328 = vst.msk [vmem:[#allocation5 + $0x30] sm:$0xff] %vm2211_vm12, %v5320_v39  ;;  %v5347_v54 = vadd.f32 (%p4030_p6), %v6460_v22, %v5335_v12 }
 0xebc   : > { %vm5355_vm6 = vcmp.gt.f32.partialorder (%p4030_p6), %v5347_v54, 0.0  ;;  %v5363_v34 = vmul.f32 (%p4030_p6), 0.01, %v5347_v54 }
 0xebe   : > { %4032 = sbr.rel (!%p4030_p6) target bundleno = 3040 (0xbe0), region = 154  ;;  %v5371_v38 = vsel (%p4030_p6), %vm5355_vm6, %v5347_v54, %v5363_v34 }
 0xebf   : >> { %v5313_v2 = vpop.xlane.xlu0 %5312  ;;  %5379 = vst.msk [vmem:[%s6579_s16 + $0x28] sm:$0xff] (%p4030_p6), %vm2211_vm12, %v5371_v38 }
 0xec0   : >> { %v5321_v36 = vadd.f32 %v5313_v2, %v5259_v43 }
 0xec1   : > { %v5336_v41 = vld [vmem:[#allocation5 + $0x30] sm:$0xff] (%p4030_p6) }
 0xec2   : >> { %5329 = vst.msk [vmem:[#allocation5 + $0x38] sm:$0xff] %vm2211_vm12, %v5321_v36  ;;  %v5348_v13 = vadd.f32 (%p4030_p6), %v6460_v22, %v5336_v41 }
 0xec4   : > { %vm5356_vm8 = vcmp.gt.f32.partialorder %v5348_v13, 0.0  ;;  %v5364_v40 = vmul.f32 0.01, %v5348_v13 }
 0xec6   : > { %v5372_v46 = vsel %vm5356_vm8, %v5348_v13, %v5364_v40 }
 0xec7   : > { %5380 = vst.msk [vmem:[%s6579_s16 + $0x30] sm:$0xff] %vm2211_vm12, %v5372_v46 }
 0xec9   : > { %v5337_v63 = vld [vmem:[#allocation5 + $0x38] sm:$0xff] }
 0xeca   : > { %v5349_v42 = vadd.f32 %v6460_v22, %v5337_v63 }
 0xecc   : > { %vm5357_vm7 = vcmp.gt.f32.partialorder %v5349_v42, 0.0  ;;  %v5365_v17 = vmul.f32 0.01, %v5349_v42 }
 0xece   : > { %v5373_v55 = vsel %vm5357_vm7, %v5349_v42, %v5365_v17 }
 0xecf   : > { %5381 = vst.msk [vmem:[%s6579_s16 + $0x38] sm:$0xff] %vm2211_vm12, %v5373_v55 }
 0xed0 PF: > { %s21_s11 = sadd.s32 1, %s6479_s11  }
 0xed1   : > { %p18_p7 = scmp.ge.s32.totalorder %s21_s11, 4  }
 0xed3   :  { %20 = sbr.rel (!%p18_p7) target bundleno = 3 (0x3), region = 165 }

</bundles_post_ra>
